<compile_context>
chip_gen: v6e
topology: v6e:2x2x1
jax: 0.10.0
libtpu: 0.0.40
codegen_flags: <defaults>
</compile_context>

<pallas_src>
import numpy as np
import jax
import jax.numpy as jnp
from jax.experimental import pallas as pl
from jax.experimental.pallas import tpu as pltpu


# ----------------------------- Pallas kernel ---------------------------------
def _elu(v):
    return jnp.where(v > 0, v, jnp.exp(jnp.minimum(v, 0.0)) - 1.0)


def upsample_kernel(x_ref, awt_ref, repq_ref, ah_ref, lq_ref,
                    cs_ref, w1_ref, b2_ref, o_ref):
    # x_ref   : (1, Cin*H, W)       input image, rows=(c,h), lanes=w
    # awt_ref : (W, Wo)             bilinear W-interp matrix (transposed)
    # repq_ref: (4, W, Wo)          0/1 column phase-placement matrices
    # ah_ref  : (Ho, H)             bilinear H-interp matrix
    # lq_ref  : (4, Cin*Ho, Cin*H)  fused convT channel-mix + row-phase placement
    # cs_ref  : (4, Cin)     SMEM   rows: s1a, sh1a, s1b, sh1b (folded BN1)
    # w1_ref  : (Cout, 2Cin) SMEM   1x1-conv weights with BN2 scale folded in
    # b2_ref  : (1, Cout)    SMEM   folded BN2 shift
    # o_ref   : (1, Cout, Ho, Wo)   output (NCHW)
    cinh, W = x_ref.shape[1], x_ref.shape[2]
    Ho, H = ah_ref.shape
    Wo = awt_ref.shape[1]
    Cin = cinh // H
    Cout = o_ref.shape[1]

    x2 = x_ref[0]                                                        # (Cin*H, W)

    # --- bilinear branch, W direction (shared by all channels) ---------------
    xw = jnp.dot(x2, awt_ref[...], preferred_element_type=jnp.float32)   # (Cin*H, Wo)

    # --- transposed-conv branch: 4 column phases ------------------------------
    up2 = jnp.zeros((Cin * Ho, Wo), jnp.float32)
    for q in range(4):
        mix = jnp.dot(lq_ref[q], x2, preferred_element_type=jnp.float32)      # (Cin*Ho, W)
        up2 = up2 + jnp.dot(mix, repq_ref[q], preferred_element_type=jnp.float32)

    # --- BN1 + ELU per channel (bilinear H direction done here too) -----------
    z1 = []
    z2 = []
    for c in range(Cin):
        b_c = jnp.dot(ah_ref[...], xw[c * H:(c + 1) * H, :],
                      preferred_element_type=jnp.float32)                # (Ho, Wo)
        z1.append(_elu(cs_ref[0, c] * b_c + cs_ref[1, c]))
        u_c = up2[c * Ho:(c + 1) * Ho, :]
        z2.append(_elu(cs_ref[2, c] * u_c + cs_ref[3, c]))

    # --- 1x1 conv (BN2 scale pre-folded) + BN2 shift + ELU ---------------------
    for o in range(Cout):
        acc = jnp.zeros((Ho, Wo), jnp.float32) + b2_ref[0, o]
        for c in range(Cin):
            acc = acc + w1_ref[o, c] * z1[c] + w1_ref[o, Cin + c] * z2[c]
        o_ref[0, o] = _elu(acc)


# ------------------------------ glue helpers ---------------------------------
def interp_matrix(n_out, n_in):
    """1-D bilinear interpolation matrix, align_corners=True."""
    A = np.zeros((n_out, n_in), np.float32)
    for o in range(n_out):
        s = 0.0 if n_out == 1 else o * (n_in - 1) / (n_out - 1)
        i0 = int(np.floor(s))
        i1 = min(i0 + 1, n_in - 1)
        w = s - i0
        A[o, i0] += 1.0 - w
        A[o, i1] += w
    return A


def _const_spec(a):
    nd = a.ndim
    return pl.BlockSpec(a.shape, lambda n, _nd=nd: (0,) * _nd)


_SMEM_SPEC = pl.BlockSpec(memory_space=pltpu.MemorySpace.SMEM)


def upsample_forward(x_nchw, params):
    """UpSample forward. x_nchw: (N, Cin, H, W) -> (N, Cout, 4H, 4W) (NCHW)."""
    N, Cin, H, W = x_nchw.shape
    Ho, Wo = 4 * H, 4 * W
    Cout = params["w1"].shape[0]
    eps = 1e-5
    f32 = jnp.float32

    # input: NCHW -> (N, Cin*H, W) — a free (contiguous) reshape, no transpose
    xr = x_nchw.astype(f32).reshape(N, Cin * H, W)

    # static interpolation / placement matrices (shape-only, numpy)
    ah = jnp.asarray(interp_matrix(Ho, H))                        # (Ho, H)
    awt = jnp.asarray(interp_matrix(Wo, W).T)                     # (W, Wo)
    repq_np = np.zeros((4, W, Wo), np.float32)                    # repq[q, j, 4j+q] = 1
    for q in range(4):
        repq_np[q, np.arange(W), 4 * np.arange(W) + q] = 1.0
    repq = jnp.asarray(repq_np)
    rowph_np = np.zeros((4, Ho, H), np.float32)                   # rowph[p, 4i+p, i] = 1
    for p in range(4):
        rowph_np[p, 4 * np.arange(H) + p, np.arange(H)] = 1.0
    rowph = jnp.asarray(rowph_np)

    # fused convT "channel-mix + row-phase placement", one matrix per column phase q:
    #   lq[q, d*Ho + 4i+p, c*H + i] = wt[c, d, p, q]
    wt = params["wt"].astype(f32)                                 # (Cin, Cin, 4, 4)
    lq = jnp.einsum("cdpq,pIi->qdIci", wt, rowph).reshape(4, Cin * Ho, Cin * H)

    # folded BN1 (convT bias folded into the shift of its half)
    s1 = params["g1"] / jnp.sqrt(params["v1"] + eps)
    sh1 = params["b1"] - params["m1"] * s1
    s1a, sh1a = s1[:Cin], sh1[:Cin]
    s1b = s1[Cin:]
    sh1b = sh1[Cin:] + params["bt"] * s1b
    cs = jnp.stack([s1a, sh1a, s1b, sh1b]).astype(f32)            # (4, Cin)

    # 1x1 conv with BN2 scale folded in; BN2 shift kept separate
    s2 = params["g2"] / jnp.sqrt(params["v2"] + eps)
    sh2 = params["b2"] - params["m2"] * s2
    w1s = (params["w1"] * s2[:, None]).astype(f32)                # (Cout, 2*Cin)
    b2s = sh2.reshape(1, Cout).astype(f32)

    in_specs = [
        pl.BlockSpec((1, Cin * H, W), lambda n: (n, 0, 0)),
        _const_spec(awt), _const_spec(repq), _const_spec(ah), _const_spec(lq),
        _SMEM_SPEC, _SMEM_SPEC, _SMEM_SPEC,
    ]

    out = pl.pallas_call(
        upsample_kernel,
        out_shape=jax.ShapeDtypeStruct((N, Cout, Ho, Wo), f32),
        grid=(N,),
        in_specs=in_specs,
        out_specs=pl.BlockSpec((1, Cout, Ho, Wo), lambda n: (n, 0, 0, 0)),
        compiler_params=pltpu.CompilerParams(
            dimension_semantics=("parallel",),
        ),
    )(xr, awt, repq, ah, lq, cs, w1s, b2s)
    return out


# --------------------------- numpy reference ----------------------------------
def reference_forward(x, params):
    x = np.asarray(x, np.float64)
    N, Cin, H, W = x.shape
    Ho, Wo = 4 * H, 4 * W
    eps = 1e-5

    # bilinear, align_corners=True
    up1 = np.zeros((N, Cin, Ho, Wo))
    for oh in range(Ho):
        sh = oh * (H - 1) / (Ho - 1)
        i0, wh = int(np.floor(sh)), sh - int(np.floor(sh))
        i1 = min(i0 + 1, H - 1)
        for ow in range(Wo):
            sw = ow * (W - 1) / (Wo - 1)
            j0, ww = int(np.floor(sw)), sw - int(np.floor(sw))
            j1 = min(j0 + 1, W - 1)
            up1[:, :, oh, ow] = ((1 - wh) * (1 - ww) * x[:, :, i0, j0]
                                 + (1 - wh) * ww * x[:, :, i0, j1]
                                 + wh * (1 - ww) * x[:, :, i1, j0]
                                 + wh * ww * x[:, :, i1, j1])

    # conv transpose k=4 s=4
    wt = np.asarray(params["wt"], np.float64)
    bt = np.asarray(params["bt"], np.float64)
    up2 = np.zeros((N, Cin, Ho, Wo))
    for i in range(H):
        for j in range(W):
            up2[:, :, 4 * i:4 * i + 4, 4 * j:4 * j + 4] += np.einsum(
                "nc,cdpq->ndpq", x[:, :, i, j], wt)
    up2 += bt[None, :, None, None]

    h = np.concatenate([up1, up2], axis=1)

    def bn(t, g, b, m, v):
        g, b, m, v = (np.asarray(a, np.float64) for a in (g, b, m, v))
        return (t - m[None, :, None, None]) / np.sqrt(v[None, :, None, None] + eps) \
            * g[None, :, None, None] + b[None, :, None, None]

    elu = lambda t: np.where(t > 0, t, np.exp(t) - 1.0)

    z = elu(bn(h, params["g1"], params["b1"], params["m1"], params["v1"]))
    y = np.einsum("nchw,dc->ndhw", z, np.asarray(params["w1"], np.float64))
    return elu(bn(y, params["g2"], params["b2"], params["m2"], params["v2"]))


# --------------------------------- main ----------------------------------------
if __name__ == "__main__":
    N, Cin, Cout, H, W = 2, 4, 8, 16, 16

    key = jax.random.PRNGKey(0)
    ks = jax.random.split(key, 13)
    x = jax.random.normal(ks[0], (N, Cin, H, W), jnp.float32)

    params = {
        "wt": 0.2 * jax.random.normal(ks[1], (Cin, Cin, 4, 4), jnp.float32),
        "bt": 0.1 * jax.random.normal(ks[2], (Cin,), jnp.float32),
        "g1": 1.0 + 0.1 * jax.random.normal(ks[3], (2 * Cin,), jnp.float32),
        "b1": 0.1 * jax.random.normal(ks[4], (2 * Cin,), jnp.float32),
        "m1": 0.1 * jax.random.normal(ks[5], (2 * Cin,), jnp.float32),
        "v1": 0.5 + jax.random.uniform(ks[6], (2 * Cin,), jnp.float32),
        "w1": 0.2 * jax.random.normal(ks[7], (Cout, 2 * Cin), jnp.float32),
        "g2": 1.0 + 0.1 * jax.random.normal(ks[8], (Cout,), jnp.float32),
        "b2": 0.1 * jax.random.normal(ks[9], (Cout,), jnp.float32),
        "m2": 0.1 * jax.random.normal(ks[10], (Cout,), jnp.float32),
        "v2": 0.5 + jax.random.uniform(ks[11], (Cout,), jnp.float32),
    }

    fwd = jax.jit(upsample_forward)
    out = fwd(x, params)
    out = jax.block_until_ready(out)

    ref = reference_forward(np.asarray(x), params)
    np.testing.assert_allclose(np.asarray(out), ref, rtol=2e-3, atol=2e-3)

    print("KERNEL_OK")
</pallas_src>

<mosaic_0001>
module attributes {stable_mosaic.version = 11 : i64} {
  func.func @upsample_kernel(%arg0: i32, %arg1: memref<1x64x16xf32, #tpu.memory_space<vmem>>, %arg2: memref<16x64xf32, #tpu.memory_space<vmem>>, %arg3: memref<4x16x64xf32, #tpu.memory_space<vmem>>, %arg4: memref<64x16xf32, #tpu.memory_space<vmem>>, %arg5: memref<4x256x64xf32, #tpu.memory_space<vmem>>, %arg6: memref<4x4xf32, #tpu.memory_space<smem>>, %arg7: memref<8x8xf32, #tpu.memory_space<smem>>, %arg8: memref<1x8xf32, #tpu.memory_space<smem>>, %arg9: memref<1x8x64x64xf32, #tpu.memory_space<vmem>>) attributes {dimension_semantics = [#tpu.dimension_semantics<parallel>], iteration_bounds = array<i64: 2>, scalar_prefetch = 0 : i64, scratch_operands = 0 : i64, tpu.core_type = #tpu.core_type<tc>, window_params = [{transform_indices = @transform_0, window_bounds = array<i64: 1, 64, 16>}, {pipeline_mode = #tpu.pipeline_mode<synchronous>, transform_indices = @transform_1, window_bounds = array<i64: 16, 64>}, {pipeline_mode = #tpu.pipeline_mode<synchronous>, transform_indices = @transform_2, window_bounds = array<i64: 4, 16, 64>}, {pipeline_mode = #tpu.pipeline_mode<synchronous>, transform_indices = @transform_3, window_bounds = array<i64: 64, 16>}, {pipeline_mode = #tpu.pipeline_mode<synchronous>, transform_indices = @transform_4, window_bounds = array<i64: 4, 256, 64>}, {transform_indices = @transform_5, window_bounds = array<i64: 4, 4>}, {transform_indices = @transform_6, window_bounds = array<i64: 8, 8>}, {transform_indices = @transform_7, window_bounds = array<i64: 1, 8>}, {transform_indices = @transform_8, window_bounds = array<i64: 1, 8, 64, 64>}]} {
    %c0 = arith.constant 0 : index
    %c0_0 = arith.constant 0 : index
    %c0_1 = arith.constant 0 : index
    %0 = vector.load %arg1[%c0, %c0_0, %c0_1] : memref<1x64x16xf32, #tpu.memory_space<vmem>>, vector<1x64x16xf32>
    %1 = vector.shape_cast %0 : vector<1x64x16xf32> to vector<64x16xf32>
    %c0_2 = arith.constant 0 : index
    %c0_3 = arith.constant 0 : index
    %2 = vector.load %arg2[%c0_2, %c0_3] : memref<16x64xf32, #tpu.memory_space<vmem>>, vector<16x64xf32>
    %cst = arith.constant dense<0.000000e+00> : vector<64x64xf32>
    %3 = tpu.matmul %1, %2, %cst {dimension_numbers = #tpu.dot_dimension_numbers<[1], [0], [0], [1], [0, 0, 1, 1], [], []>} : vector<64x16xf32>, vector<16x64xf32>, vector<64x64xf32> -> vector<64x64xf32>
    %cst_4 = arith.constant 0.000000e+00 : f32
    %4 = vector.broadcast %cst_4 : f32 to vector<256x64xf32>
    %c0_5 = arith.constant 0 : index
    %c0_6 = arith.constant 0 : index
    %c0_7 = arith.constant 0 : index
    %5 = vector.load %arg5[%c0_5, %c0_6, %c0_7] : memref<4x256x64xf32, #tpu.memory_space<vmem>>, vector<1x256x64xf32>
    %6 = vector.shape_cast %5 : vector<1x256x64xf32> to vector<256x64xf32>
    %cst_8 = arith.constant dense<0.000000e+00> : vector<256x16xf32>
    %7 = tpu.matmul %6, %1, %cst_8 {dimension_numbers = #tpu.dot_dimension_numbers<[1], [0], [0], [1], [0, 0, 1, 1], [], []>} : vector<256x64xf32>, vector<64x16xf32>, vector<256x16xf32> -> vector<256x16xf32>
    %c0_9 = arith.constant 0 : index
    %c0_10 = arith.constant 0 : index
    %c0_11 = arith.constant 0 : index
    %8 = vector.load %arg3[%c0_9, %c0_10, %c0_11] : memref<4x16x64xf32, #tpu.memory_space<vmem>>, vector<1x16x64xf32>
    %9 = vector.shape_cast %8 : vector<1x16x64xf32> to vector<16x64xf32>
    %cst_12 = arith.constant dense<0.000000e+00> : vector<256x64xf32>
    %10 = tpu.matmul %7, %9, %cst_12 {dimension_numbers = #tpu.dot_dimension_numbers<[1], [0], [0], [1], [0, 0, 1, 1], [], []>} : vector<256x16xf32>, vector<16x64xf32>, vector<256x64xf32> -> vector<256x64xf32>
    %11 = arith.addf %4, %10 : vector<256x64xf32>
    %c1 = arith.constant 1 : index
    %c0_13 = arith.constant 0 : index
    %c0_14 = arith.constant 0 : index
    %12 = vector.load %arg5[%c1, %c0_13, %c0_14] : memref<4x256x64xf32, #tpu.memory_space<vmem>>, vector<1x256x64xf32>
    %13 = vector.shape_cast %12 : vector<1x256x64xf32> to vector<256x64xf32>
    %cst_15 = arith.constant dense<0.000000e+00> : vector<256x16xf32>
    %14 = tpu.matmul %13, %1, %cst_15 {dimension_numbers = #tpu.dot_dimension_numbers<[1], [0], [0], [1], [0, 0, 1, 1], [], []>} : vector<256x64xf32>, vector<64x16xf32>, vector<256x16xf32> -> vector<256x16xf32>
    %c1_16 = arith.constant 1 : index
    %c0_17 = arith.constant 0 : index
    %c0_18 = arith.constant 0 : index
    %15 = vector.load %arg3[%c1_16, %c0_17, %c0_18] : memref<4x16x64xf32, #tpu.memory_space<vmem>>, vector<1x16x64xf32>
    %16 = vector.shape_cast %15 : vector<1x16x64xf32> to vector<16x64xf32>
    %cst_19 = arith.constant dense<0.000000e+00> : vector<256x64xf32>
    %17 = tpu.matmul %14, %16, %cst_19 {dimension_numbers = #tpu.dot_dimension_numbers<[1], [0], [0], [1], [0, 0, 1, 1], [], []>} : vector<256x16xf32>, vector<16x64xf32>, vector<256x64xf32> -> vector<256x64xf32>
    %18 = arith.addf %11, %17 : vector<256x64xf32>
    %c2 = arith.constant 2 : index
    %c0_20 = arith.constant 0 : index
    %c0_21 = arith.constant 0 : index
    %19 = vector.load %arg5[%c2, %c0_20, %c0_21] : memref<4x256x64xf32, #tpu.memory_space<vmem>>, vector<1x256x64xf32>
    %20 = vector.shape_cast %19 : vector<1x256x64xf32> to vector<256x64xf32>
    %cst_22 = arith.constant dense<0.000000e+00> : vector<256x16xf32>
    %21 = tpu.matmul %20, %1, %cst_22 {dimension_numbers = #tpu.dot_dimension_numbers<[1], [0], [0], [1], [0, 0, 1, 1], [], []>} : vector<256x64xf32>, vector<64x16xf32>, vector<256x16xf32> -> vector<256x16xf32>
    %c2_23 = arith.constant 2 : index
    %c0_24 = arith.constant 0 : index
    %c0_25 = arith.constant 0 : index
    %22 = vector.load %arg3[%c2_23, %c0_24, %c0_25] : memref<4x16x64xf32, #tpu.memory_space<vmem>>, vector<1x16x64xf32>
    %23 = vector.shape_cast %22 : vector<1x16x64xf32> to vector<16x64xf32>
    %cst_26 = arith.constant dense<0.000000e+00> : vector<256x64xf32>
    %24 = tpu.matmul %21, %23, %cst_26 {dimension_numbers = #tpu.dot_dimension_numbers<[1], [0], [0], [1], [0, 0, 1, 1], [], []>} : vector<256x16xf32>, vector<16x64xf32>, vector<256x64xf32> -> vector<256x64xf32>
    %25 = arith.addf %18, %24 : vector<256x64xf32>
    %c3 = arith.constant 3 : index
    %c0_27 = arith.constant 0 : index
    %c0_28 = arith.constant 0 : index
    %26 = vector.load %arg5[%c3, %c0_27, %c0_28] : memref<4x256x64xf32, #tpu.memory_space<vmem>>, vector<1x256x64xf32>
    %27 = vector.shape_cast %26 : vector<1x256x64xf32> to vector<256x64xf32>
    %cst_29 = arith.constant dense<0.000000e+00> : vector<256x16xf32>
    %28 = tpu.matmul %27, %1, %cst_29 {dimension_numbers = #tpu.dot_dimension_numbers<[1], [0], [0], [1], [0, 0, 1, 1], [], []>} : vector<256x64xf32>, vector<64x16xf32>, vector<256x16xf32> -> vector<256x16xf32>
    %c3_30 = arith.constant 3 : index
    %c0_31 = arith.constant 0 : index
    %c0_32 = arith.constant 0 : index
    %29 = vector.load %arg3[%c3_30, %c0_31, %c0_32] : memref<4x16x64xf32, #tpu.memory_space<vmem>>, vector<1x16x64xf32>
    %30 = vector.shape_cast %29 : vector<1x16x64xf32> to vector<16x64xf32>
    %cst_33 = arith.constant dense<0.000000e+00> : vector<256x64xf32>
    %31 = tpu.matmul %28, %30, %cst_33 {dimension_numbers = #tpu.dot_dimension_numbers<[1], [0], [0], [1], [0, 0, 1, 1], [], []>} : vector<256x16xf32>, vector<16x64xf32>, vector<256x64xf32> -> vector<256x64xf32>
    %32 = arith.addf %25, %31 : vector<256x64xf32>
    %c0_34 = arith.constant 0 : index
    %c0_35 = arith.constant 0 : index
    %33 = vector.load %arg4[%c0_34, %c0_35] : memref<64x16xf32, #tpu.memory_space<vmem>>, vector<64x16xf32>
    %34 = vector.extract_strided_slice %3 {offsets = [0, 0], sizes = [16, 64], strides = [1, 1]} : vector<64x64xf32> to vector<16x64xf32>
    %cst_36 = arith.constant dense<0.000000e+00> : vector<64x64xf32>
    %35 = tpu.matmul %33, %34, %cst_36 {dimension_numbers = #tpu.dot_dimension_numbers<[1], [0], [0], [1], [0, 0, 1, 1], [], []>} : vector<64x16xf32>, vector<16x64xf32>, vector<64x64xf32> -> vector<64x64xf32>
    %c0_37 = arith.constant 0 : index
    %c0_38 = arith.constant 0 : index
    %36 = memref.load %arg6[%c0_37, %c0_38] : memref<4x4xf32, #tpu.memory_space<smem>>
    %37 = vector.broadcast %36 : f32 to vector<64x64xf32>
    %38 = arith.mulf %37, %35 : vector<64x64xf32>
    %c1_39 = arith.constant 1 : index
    %c0_40 = arith.constant 0 : index
    %39 = memref.load %arg6[%c1_39, %c0_40] : memref<4x4xf32, #tpu.memory_space<smem>>
    %40 = vector.broadcast %39 : f32 to vector<64x64xf32>
    %41 = arith.addf %38, %40 : vector<64x64xf32>
    %cst_41 = arith.constant 0.000000e+00 : f32
    %42 = vector.broadcast %cst_41 : f32 to vector<64x64xf32>
    %43 = arith.cmpf ogt, %41, %42 : vector<64x64xf32>
    %cst_42 = arith.constant 0.000000e+00 : f32
    %44 = vector.broadcast %cst_42 : f32 to vector<64x64xf32>
    %45 = arith.minimumf %41, %44 : vector<64x64xf32>
    %46 = math.exp %45 : vector<64x64xf32>
    %cst_43 = arith.constant 1.000000e+00 : f32
    %47 = vector.broadcast %cst_43 : f32 to vector<64x64xf32>
    %48 = arith.subf %46, %47 : vector<64x64xf32>
    %49 = arith.select %43, %41, %48 : vector<64x64xi1>, vector<64x64xf32>
    %50 = vector.extract_strided_slice %32 {offsets = [0, 0], sizes = [64, 64], strides = [1, 1]} : vector<256x64xf32> to vector<64x64xf32>
    %c2_44 = arith.constant 2 : index
    %c0_45 = arith.constant 0 : index
    %51 = memref.load %arg6[%c2_44, %c0_45] : memref<4x4xf32, #tpu.memory_space<smem>>
    %52 = vector.broadcast %51 : f32 to vector<64x64xf32>
    %53 = arith.mulf %52, %50 : vector<64x64xf32>
    %c3_46 = arith.constant 3 : index
    %c0_47 = arith.constant 0 : index
    %54 = memref.load %arg6[%c3_46, %c0_47] : memref<4x4xf32, #tpu.memory_space<smem>>
    %55 = vector.broadcast %54 : f32 to vector<64x64xf32>
    %56 = arith.addf %53, %55 : vector<64x64xf32>
    %cst_48 = arith.constant 0.000000e+00 : f32
    %57 = vector.broadcast %cst_48 : f32 to vector<64x64xf32>
    %58 = arith.cmpf ogt, %56, %57 : vector<64x64xf32>
    %cst_49 = arith.constant 0.000000e+00 : f32
    %59 = vector.broadcast %cst_49 : f32 to vector<64x64xf32>
    %60 = arith.minimumf %56, %59 : vector<64x64xf32>
    %61 = math.exp %60 : vector<64x64xf32>
    %cst_50 = arith.constant 1.000000e+00 : f32
    %62 = vector.broadcast %cst_50 : f32 to vector<64x64xf32>
    %63 = arith.subf %61, %62 : vector<64x64xf32>
    %64 = arith.select %58, %56, %63 : vector<64x64xi1>, vector<64x64xf32>
    %c0_51 = arith.constant 0 : index
    %c0_52 = arith.constant 0 : index
    %65 = vector.load %arg4[%c0_51, %c0_52] : memref<64x16xf32, #tpu.memory_space<vmem>>, vector<64x16xf32>
    %66 = vector.extract_strided_slice %3 {offsets = [16, 0], sizes = [16, 64], strides = [1, 1]} : vector<64x64xf32> to vector<16x64xf32>
    %cst_53 = arith.constant dense<0.000000e+00> : vector<64x64xf32>
    %67 = tpu.matmul %65, %66, %cst_53 {dimension_numbers = #tpu.dot_dimension_numbers<[1], [0], [0], [1], [0, 0, 1, 1], [], []>} : vector<64x16xf32>, vector<16x64xf32>, vector<64x64xf32> -> vector<64x64xf32>
    %c0_54 = arith.constant 0 : index
    %c1_55 = arith.constant 1 : index
    %68 = memref.load %arg6[%c0_54, %c1_55] : memref<4x4xf32, #tpu.memory_space<smem>>
    %69 = vector.broadcast %68 : f32 to vector<64x64xf32>
    %70 = arith.mulf %69, %67 : vector<64x64xf32>
    %c1_56 = arith.constant 1 : index
    %c1_57 = arith.constant 1 : index
    %71 = memref.load %arg6[%c1_56, %c1_57] : memref<4x4xf32, #tpu.memory_space<smem>>
    %72 = vector.broadcast %71 : f32 to vector<64x64xf32>
    %73 = arith.addf %70, %72 : vector<64x64xf32>
    %cst_58 = arith.constant 0.000000e+00 : f32
    %74 = vector.broadcast %cst_58 : f32 to vector<64x64xf32>
    %75 = arith.cmpf ogt, %73, %74 : vector<64x64xf32>
    %cst_59 = arith.constant 0.000000e+00 : f32
    %76 = vector.broadcast %cst_59 : f32 to vector<64x64xf32>
    %77 = arith.minimumf %73, %76 : vector<64x64xf32>
    %78 = math.exp %77 : vector<64x64xf32>
    %cst_60 = arith.constant 1.000000e+00 : f32
    %79 = vector.broadcast %cst_60 : f32 to vector<64x64xf32>
    %80 = arith.subf %78, %79 : vector<64x64xf32>
    %81 = arith.select %75, %73, %80 : vector<64x64xi1>, vector<64x64xf32>
    %82 = vector.extract_strided_slice %32 {offsets = [64, 0], sizes = [64, 64], strides = [1, 1]} : vector<256x64xf32> to vector<64x64xf32>
    %c2_61 = arith.constant 2 : index
    %c1_62 = arith.constant 1 : index
    %83 = memref.load %arg6[%c2_61, %c1_62] : memref<4x4xf32, #tpu.memory_space<smem>>
    %84 = vector.broadcast %83 : f32 to vector<64x64xf32>
    %85 = arith.mulf %84, %82 : vector<64x64xf32>
    %c3_63 = arith.constant 3 : index
    %c1_64 = arith.constant 1 : index
    %86 = memref.load %arg6[%c3_63, %c1_64] : memref<4x4xf32, #tpu.memory_space<smem>>
    %87 = vector.broadcast %86 : f32 to vector<64x64xf32>
    %88 = arith.addf %85, %87 : vector<64x64xf32>
    %cst_65 = arith.constant 0.000000e+00 : f32
    %89 = vector.broadcast %cst_65 : f32 to vector<64x64xf32>
    %90 = arith.cmpf ogt, %88, %89 : vector<64x64xf32>
    %cst_66 = arith.constant 0.000000e+00 : f32
    %91 = vector.broadcast %cst_66 : f32 to vector<64x64xf32>
    %92 = arith.minimumf %88, %91 : vector<64x64xf32>
    %93 = math.exp %92 : vector<64x64xf32>
    %cst_67 = arith.constant 1.000000e+00 : f32
    %94 = vector.broadcast %cst_67 : f32 to vector<64x64xf32>
    %95 = arith.subf %93, %94 : vector<64x64xf32>
    %96 = arith.select %90, %88, %95 : vector<64x64xi1>, vector<64x64xf32>
    %c0_68 = arith.constant 0 : index
    %c0_69 = arith.constant 0 : index
    %97 = vector.load %arg4[%c0_68, %c0_69] : memref<64x16xf32, #tpu.memory_space<vmem>>, vector<64x16xf32>
    %98 = vector.extract_strided_slice %3 {offsets = [32, 0], sizes = [16, 64], strides = [1, 1]} : vector<64x64xf32> to vector<16x64xf32>
    %cst_70 = arith.constant dense<0.000000e+00> : vector<64x64xf32>
    %99 = tpu.matmul %97, %98, %cst_70 {dimension_numbers = #tpu.dot_dimension_numbers<[1], [0], [0], [1], [0, 0, 1, 1], [], []>} : vector<64x16xf32>, vector<16x64xf32>, vector<64x64xf32> -> vector<64x64xf32>
    %c0_71 = arith.constant 0 : index
    %c2_72 = arith.constant 2 : index
    %100 = memref.load %arg6[%c0_71, %c2_72] : memref<4x4xf32, #tpu.memory_space<smem>>
    %101 = vector.broadcast %100 : f32 to vector<64x64xf32>
    %102 = arith.mulf %101, %99 : vector<64x64xf32>
    %c1_73 = arith.constant 1 : index
    %c2_74 = arith.constant 2 : index
    %103 = memref.load %arg6[%c1_73, %c2_74] : memref<4x4xf32, #tpu.memory_space<smem>>
    %104 = vector.broadcast %103 : f32 to vector<64x64xf32>
    %105 = arith.addf %102, %104 : vector<64x64xf32>
    %cst_75 = arith.constant 0.000000e+00 : f32
    %106 = vector.broadcast %cst_75 : f32 to vector<64x64xf32>
    %107 = arith.cmpf ogt, %105, %106 : vector<64x64xf32>
    %cst_76 = arith.constant 0.000000e+00 : f32
    %108 = vector.broadcast %cst_76 : f32 to vector<64x64xf32>
    %109 = arith.minimumf %105, %108 : vector<64x64xf32>
    %110 = math.exp %109 : vector<64x64xf32>
    %cst_77 = arith.constant 1.000000e+00 : f32
    %111 = vector.broadcast %cst_77 : f32 to vector<64x64xf32>
    %112 = arith.subf %110, %111 : vector<64x64xf32>
    %113 = arith.select %107, %105, %112 : vector<64x64xi1>, vector<64x64xf32>
    %114 = vector.extract_strided_slice %32 {offsets = [128, 0], sizes = [64, 64], strides = [1, 1]} : vector<256x64xf32> to vector<64x64xf32>
    %c2_78 = arith.constant 2 : index
    %c2_79 = arith.constant 2 : index
    %115 = memref.load %arg6[%c2_78, %c2_79] : memref<4x4xf32, #tpu.memory_space<smem>>
    %116 = vector.broadcast %115 : f32 to vector<64x64xf32>
    %117 = arith.mulf %116, %114 : vector<64x64xf32>
    %c3_80 = arith.constant 3 : index
    %c2_81 = arith.constant 2 : index
    %118 = memref.load %arg6[%c3_80, %c2_81] : memref<4x4xf32, #tpu.memory_space<smem>>
    %119 = vector.broadcast %118 : f32 to vector<64x64xf32>
    %120 = arith.addf %117, %119 : vector<64x64xf32>
    %cst_82 = arith.constant 0.000000e+00 : f32
    %121 = vector.broadcast %cst_82 : f32 to vector<64x64xf32>
    %122 = arith.cmpf ogt, %120, %121 : vector<64x64xf32>
    %cst_83 = arith.constant 0.000000e+00 : f32
    %123 = vector.broadcast %cst_83 : f32 to vector<64x64xf32>
    %124 = arith.minimumf %120, %123 : vector<64x64xf32>
    %125 = math.exp %124 : vector<64x64xf32>
    %cst_84 = arith.constant 1.000000e+00 : f32
    %126 = vector.broadcast %cst_84 : f32 to vector<64x64xf32>
    %127 = arith.subf %125, %126 : vector<64x64xf32>
    %128 = arith.select %122, %120, %127 : vector<64x64xi1>, vector<64x64xf32>
    %c0_85 = arith.constant 0 : index
    %c0_86 = arith.constant 0 : index
    %129 = vector.load %arg4[%c0_85, %c0_86] : memref<64x16xf32, #tpu.memory_space<vmem>>, vector<64x16xf32>
    %130 = vector.extract_strided_slice %3 {offsets = [48, 0], sizes = [16, 64], strides = [1, 1]} : vector<64x64xf32> to vector<16x64xf32>
    %cst_87 = arith.constant dense<0.000000e+00> : vector<64x64xf32>
    %131 = tpu.matmul %129, %130, %cst_87 {dimension_numbers = #tpu.dot_dimension_numbers<[1], [0], [0], [1], [0, 0, 1, 1], [], []>} : vector<64x16xf32>, vector<16x64xf32>, vector<64x64xf32> -> vector<64x64xf32>
    %c0_88 = arith.constant 0 : index
    %c3_89 = arith.constant 3 : index
    %132 = memref.load %arg6[%c0_88, %c3_89] : memref<4x4xf32, #tpu.memory_space<smem>>
    %133 = vector.broadcast %132 : f32 to vector<64x64xf32>
    %134 = arith.mulf %133, %131 : vector<64x64xf32>
    %c1_90 = arith.constant 1 : index
    %c3_91 = arith.constant 3 : index
    %135 = memref.load %arg6[%c1_90, %c3_91] : memref<4x4xf32, #tpu.memory_space<smem>>
    %136 = vector.broadcast %135 : f32 to vector<64x64xf32>
    %137 = arith.addf %134, %136 : vector<64x64xf32>
    %cst_92 = arith.constant 0.000000e+00 : f32
    %138 = vector.broadcast %cst_92 : f32 to vector<64x64xf32>
    %139 = arith.cmpf ogt, %137, %138 : vector<64x64xf32>
    %cst_93 = arith.constant 0.000000e+00 : f32
    %140 = vector.broadcast %cst_93 : f32 to vector<64x64xf32>
    %141 = arith.minimumf %137, %140 : vector<64x64xf32>
    %142 = math.exp %141 : vector<64x64xf32>
    %cst_94 = arith.constant 1.000000e+00 : f32
    %143 = vector.broadcast %cst_94 : f32 to vector<64x64xf32>
    %144 = arith.subf %142, %143 : vector<64x64xf32>
    %145 = arith.select %139, %137, %144 : vector<64x64xi1>, vector<64x64xf32>
    %146 = vector.extract_strided_slice %32 {offsets = [192, 0], sizes = [64, 64], strides = [1, 1]} : vector<256x64xf32> to vector<64x64xf32>
    %c2_95 = arith.constant 2 : index
    %c3_96 = arith.constant 3 : index
    %147 = memref.load %arg6[%c2_95, %c3_96] : memref<4x4xf32, #tpu.memory_space<smem>>
    %148 = vector.broadcast %147 : f32 to vector<64x64xf32>
    %149 = arith.mulf %148, %146 : vector<64x64xf32>
    %c3_97 = arith.constant 3 : index
    %c3_98 = arith.constant 3 : index
    %150 = memref.load %arg6[%c3_97, %c3_98] : memref<4x4xf32, #tpu.memory_space<smem>>
    %151 = vector.broadcast %150 : f32 to vector<64x64xf32>
    %152 = arith.addf %149, %151 : vector<64x64xf32>
    %cst_99 = arith.constant 0.000000e+00 : f32
    %153 = vector.broadcast %cst_99 : f32 to vector<64x64xf32>
    %154 = arith.cmpf ogt, %152, %153 : vector<64x64xf32>
    %cst_100 = arith.constant 0.000000e+00 : f32
    %155 = vector.broadcast %cst_100 : f32 to vector<64x64xf32>
    %156 = arith.minimumf %152, %155 : vector<64x64xf32>
    %157 = math.exp %156 : vector<64x64xf32>
    %cst_101 = arith.constant 1.000000e+00 : f32
    %158 = vector.broadcast %cst_101 : f32 to vector<64x64xf32>
    %159 = arith.subf %157, %158 : vector<64x64xf32>
    %160 = arith.select %154, %152, %159 : vector<64x64xi1>, vector<64x64xf32>
    %cst_102 = arith.constant 0.000000e+00 : f32
    %161 = vector.broadcast %cst_102 : f32 to vector<64x64xf32>
    %c0_103 = arith.constant 0 : index
    %c0_104 = arith.constant 0 : index
    %162 = memref.load %arg8[%c0_103, %c0_104] : memref<1x8xf32, #tpu.memory_space<smem>>
    %163 = vector.broadcast %162 : f32 to vector<64x64xf32>
    %164 = arith.addf %161, %163 : vector<64x64xf32>
    %c0_105 = arith.constant 0 : index
    %c0_106 = arith.constant 0 : index
    %165 = memref.load %arg7[%c0_105, %c0_106] : memref<8x8xf32, #tpu.memory_space<smem>>
    %166 = vector.broadcast %165 : f32 to vector<64x64xf32>
    %167 = arith.mulf %166, %49 : vector<64x64xf32>
    %168 = arith.addf %164, %167 : vector<64x64xf32>
    %c0_107 = arith.constant 0 : index
    %c4 = arith.constant 4 : index
    %169 = memref.load %arg7[%c0_107, %c4] : memref<8x8xf32, #tpu.memory_space<smem>>
    %170 = vector.broadcast %169 : f32 to vector<64x64xf32>
    %171 = arith.mulf %170, %64 : vector<64x64xf32>
    %172 = arith.addf %168, %171 : vector<64x64xf32>
    %c0_108 = arith.constant 0 : index
    %c1_109 = arith.constant 1 : index
    %173 = memref.load %arg7[%c0_108, %c1_109] : memref<8x8xf32, #tpu.memory_space<smem>>
    %174 = vector.broadcast %173 : f32 to vector<64x64xf32>
    %175 = arith.mulf %174, %81 : vector<64x64xf32>
    %176 = arith.addf %172, %175 : vector<64x64xf32>
    %c0_110 = arith.constant 0 : index
    %c5 = arith.constant 5 : index
    %177 = memref.load %arg7[%c0_110, %c5] : memref<8x8xf32, #tpu.memory_space<smem>>
    %178 = vector.broadcast %177 : f32 to vector<64x64xf32>
    %179 = arith.mulf %178, %96 : vector<64x64xf32>
    %180 = arith.addf %176, %179 : vector<64x64xf32>
    %c0_111 = arith.constant 0 : index
    %c2_112 = arith.constant 2 : index
    %181 = memref.load %arg7[%c0_111, %c2_112] : memref<8x8xf32, #tpu.memory_space<smem>>
    %182 = vector.broadcast %181 : f32 to vector<64x64xf32>
    %183 = arith.mulf %182, %113 : vector<64x64xf32>
    %184 = arith.addf %180, %183 : vector<64x64xf32>
    %c0_113 = arith.constant 0 : index
    %c6 = arith.constant 6 : index
    %185 = memref.load %arg7[%c0_113, %c6] : memref<8x8xf32, #tpu.memory_space<smem>>
    %186 = vector.broadcast %185 : f32 to vector<64x64xf32>
    %187 = arith.mulf %186, %128 : vector<64x64xf32>
    %188 = arith.addf %184, %187 : vector<64x64xf32>
    %c0_114 = arith.constant 0 : index
    %c3_115 = arith.constant 3 : index
    %189 = memref.load %arg7[%c0_114, %c3_115] : memref<8x8xf32, #tpu.memory_space<smem>>
    %190 = vector.broadcast %189 : f32 to vector<64x64xf32>
    %191 = arith.mulf %190, %145 : vector<64x64xf32>
    %192 = arith.addf %188, %191 : vector<64x64xf32>
    %c0_116 = arith.constant 0 : index
    %c7 = arith.constant 7 : index
    %193 = memref.load %arg7[%c0_116, %c7] : memref<8x8xf32, #tpu.memory_space<smem>>
    %194 = vector.broadcast %193 : f32 to vector<64x64xf32>
    %195 = arith.mulf %194, %160 : vector<64x64xf32>
    %196 = arith.addf %192, %195 : vector<64x64xf32>
    %cst_117 = arith.constant 0.000000e+00 : f32
    %197 = vector.broadcast %cst_117 : f32 to vector<64x64xf32>
    %198 = arith.cmpf ogt, %196, %197 : vector<64x64xf32>
    %cst_118 = arith.constant 0.000000e+00 : f32
    %199 = vector.broadcast %cst_118 : f32 to vector<64x64xf32>
    %200 = arith.minimumf %196, %199 : vector<64x64xf32>
    %201 = math.exp %200 : vector<64x64xf32>
    %cst_119 = arith.constant 1.000000e+00 : f32
    %202 = vector.broadcast %cst_119 : f32 to vector<64x64xf32>
    %203 = arith.subf %201, %202 : vector<64x64xf32>
    %204 = arith.select %198, %196, %203 : vector<64x64xi1>, vector<64x64xf32>
    %c0_120 = arith.constant 0 : index
    %c0_121 = arith.constant 0 : index
    %c0_122 = arith.constant 0 : index
    %c0_123 = arith.constant 0 : index
    %205 = vector.load %arg9[%c0_120, %c0_121, %c0_122, %c0_123] : memref<1x8x64x64xf32, #tpu.memory_space<vmem>>, vector<1x1x64x64xf32>
    %206 = vector.shape_cast %205 : vector<1x1x64x64xf32> to vector<64x64xf32>
    %207 = vector.shape_cast %204 : vector<64x64xf32> to vector<1x1x64x64xf32>
    tpu.vector_store %arg9[%c0_120, %c0_121, %c0_122, %c0_123], %207 {strides = array<i32>} : memref<1x8x64x64xf32, #tpu.memory_space<vmem>>, vector<1x1x64x64xf32>,
    %cst_124 = arith.constant 0.000000e+00 : f32
    %208 = vector.broadcast %cst_124 : f32 to vector<64x64xf32>
    %c0_125 = arith.constant 0 : index
    %c1_126 = arith.constant 1 : index
    %209 = memref.load %arg8[%c0_125, %c1_126] : memref<1x8xf32, #tpu.memory_space<smem>>
    %210 = vector.broadcast %209 : f32 to vector<64x64xf32>
    %211 = arith.addf %208, %210 : vector<64x64xf32>
    %c1_127 = arith.constant 1 : index
    %c0_128 = arith.constant 0 : index
    %212 = memref.load %arg7[%c1_127, %c0_128] : memref<8x8xf32, #tpu.memory_space<smem>>
    %213 = vector.broadcast %212 : f32 to vector<64x64xf32>
    %214 = arith.mulf %213, %49 : vector<64x64xf32>
    %215 = arith.addf %211, %214 : vector<64x64xf32>
    %c1_129 = arith.constant 1 : index
    %c4_130 = arith.constant 4 : index
    %216 = memref.load %arg7[%c1_129, %c4_130] : memref<8x8xf32, #tpu.memory_space<smem>>
    %217 = vector.broadcast %216 : f32 to vector<64x64xf32>
    %218 = arith.mulf %217, %64 : vector<64x64xf32>
    %219 = arith.addf %215, %218 : vector<64x64xf32>
    %c1_131 = arith.constant 1 : index
    %c1_132 = arith.constant 1 : index
    %220 = memref.load %arg7[%c1_131, %c1_132] : memref<8x8xf32, #tpu.memory_space<smem>>
    %221 = vector.broadcast %220 : f32 to vector<64x64xf32>
    %222 = arith.mulf %221, %81 : vector<64x64xf32>
    %223 = arith.addf %219, %222 : vector<64x64xf32>
    %c1_133 = arith.constant 1 : index
    %c5_134 = arith.constant 5 : index
    %224 = memref.load %arg7[%c1_133, %c5_134] : memref<8x8xf32, #tpu.memory_space<smem>>
    %225 = vector.broadcast %224 : f32 to vector<64x64xf32>
    %226 = arith.mulf %225, %96 : vector<64x64xf32>
    %227 = arith.addf %223, %226 : vector<64x64xf32>
    %c1_135 = arith.constant 1 : index
    %c2_136 = arith.constant 2 : index
    %228 = memref.load %arg7[%c1_135, %c2_136] : memref<8x8xf32, #tpu.memory_space<smem>>
    %229 = vector.broadcast %228 : f32 to vector<64x64xf32>
    %230 = arith.mulf %229, %113 : vector<64x64xf32>
    %231 = arith.addf %227, %230 : vector<64x64xf32>
    %c1_137 = arith.constant 1 : index
    %c6_138 = arith.constant 6 : index
    %232 = memref.load %arg7[%c1_137, %c6_138] : memref<8x8xf32, #tpu.memory_space<smem>>
    %233 = vector.broadcast %232 : f32 to vector<64x64xf32>
    %234 = arith.mulf %233, %128 : vector<64x64xf32>
    %235 = arith.addf %231, %234 : vector<64x64xf32>
    %c1_139 = arith.constant 1 : index
    %c3_140 = arith.constant 3 : index
    %236 = memref.load %arg7[%c1_139, %c3_140] : memref<8x8xf32, #tpu.memory_space<smem>>
    %237 = vector.broadcast %236 : f32 to vector<64x64xf32>
    %238 = arith.mulf %237, %145 : vector<64x64xf32>
    %239 = arith.addf %235, %238 : vector<64x64xf32>
    %c1_141 = arith.constant 1 : index
    %c7_142 = arith.constant 7 : index
    %240 = memref.load %arg7[%c1_141, %c7_142] : memref<8x8xf32, #tpu.memory_space<smem>>
    %241 = vector.broadcast %240 : f32 to vector<64x64xf32>
    %242 = arith.mulf %241, %160 : vector<64x64xf32>
    %243 = arith.addf %239, %242 : vector<64x64xf32>
    %cst_143 = arith.constant 0.000000e+00 : f32
    %244 = vector.broadcast %cst_143 : f32 to vector<64x64xf32>
    %245 = arith.cmpf ogt, %243, %244 : vector<64x64xf32>
    %cst_144 = arith.constant 0.000000e+00 : f32
    %246 = vector.broadcast %cst_144 : f32 to vector<64x64xf32>
    %247 = arith.minimumf %243, %246 : vector<64x64xf32>
    %248 = math.exp %247 : vector<64x64xf32>
    %cst_145 = arith.constant 1.000000e+00 : f32
    %249 = vector.broadcast %cst_145 : f32 to vector<64x64xf32>
    %250 = arith.subf %248, %249 : vector<64x64xf32>
    %251 = arith.select %245, %243, %250 : vector<64x64xi1>, vector<64x64xf32>
    %c0_146 = arith.constant 0 : index
    %c1_147 = arith.constant 1 : index
    %c0_148 = arith.constant 0 : index
    %c0_149 = arith.constant 0 : index
    %252 = vector.load %arg9[%c0_146, %c1_147, %c0_148, %c0_149] : memref<1x8x64x64xf32, #tpu.memory_space<vmem>>, vector<1x1x64x64xf32>
    %253 = vector.shape_cast %252 : vector<1x1x64x64xf32> to vector<64x64xf32>
    %254 = vector.shape_cast %251 : vector<64x64xf32> to vector<1x1x64x64xf32>
    tpu.vector_store %arg9[%c0_146, %c1_147, %c0_148, %c0_149], %254 {strides = array<i32>} : memref<1x8x64x64xf32, #tpu.memory_space<vmem>>, vector<1x1x64x64xf32>,
    %cst_150 = arith.constant 0.000000e+00 : f32
    %255 = vector.broadcast %cst_150 : f32 to vector<64x64xf32>
    %c0_151 = arith.constant 0 : index
    %c2_152 = arith.constant 2 : index
    %256 = memref.load %arg8[%c0_151, %c2_152] : memref<1x8xf32, #tpu.memory_space<smem>>
    %257 = vector.broadcast %256 : f32 to vector<64x64xf32>
    %258 = arith.addf %255, %257 : vector<64x64xf32>
    %c2_153 = arith.constant 2 : index
    %c0_154 = arith.constant 0 : index
    %259 = memref.load %arg7[%c2_153, %c0_154] : memref<8x8xf32, #tpu.memory_space<smem>>
    %260 = vector.broadcast %259 : f32 to vector<64x64xf32>
    %261 = arith.mulf %260, %49 : vector<64x64xf32>
    %262 = arith.addf %258, %261 : vector<64x64xf32>
    %c2_155 = arith.constant 2 : index
    %c4_156 = arith.constant 4 : index
    %263 = memref.load %arg7[%c2_155, %c4_156] : memref<8x8xf32, #tpu.memory_space<smem>>
    %264 = vector.broadcast %263 : f32 to vector<64x64xf32>
    %265 = arith.mulf %264, %64 : vector<64x64xf32>
    %266 = arith.addf %262, %265 : vector<64x64xf32>
    %c2_157 = arith.constant 2 : index
    %c1_158 = arith.constant 1 : index
    %267 = memref.load %arg7[%c2_157, %c1_158] : memref<8x8xf32, #tpu.memory_space<smem>>
    %268 = vector.broadcast %267 : f32 to vector<64x64xf32>
    %269 = arith.mulf %268, %81 : vector<64x64xf32>
    %270 = arith.addf %266, %269 : vector<64x64xf32>
    %c2_159 = arith.constant 2 : index
    %c5_160 = arith.constant 5 : index
    %271 = memref.load %arg7[%c2_159, %c5_160] : memref<8x8xf32, #tpu.memory_space<smem>>
    %272 = vector.broadcast %271 : f32 to vector<64x64xf32>
    %273 = arith.mulf %272, %96 : vector<64x64xf32>
    %274 = arith.addf %270, %273 : vector<64x64xf32>
    %c2_161 = arith.constant 2 : index
    %c2_162 = arith.constant 2 : index
    %275 = memref.load %arg7[%c2_161, %c2_162] : memref<8x8xf32, #tpu.memory_space<smem>>
    %276 = vector.broadcast %275 : f32 to vector<64x64xf32>
    %277 = arith.mulf %276, %113 : vector<64x64xf32>
    %278 = arith.addf %274, %277 : vector<64x64xf32>
    %c2_163 = arith.constant 2 : index
    %c6_164 = arith.constant 6 : index
    %279 = memref.load %arg7[%c2_163, %c6_164] : memref<8x8xf32, #tpu.memory_space<smem>>
    %280 = vector.broadcast %279 : f32 to vector<64x64xf32>
    %281 = arith.mulf %280, %128 : vector<64x64xf32>
    %282 = arith.addf %278, %281 : vector<64x64xf32>
    %c2_165 = arith.constant 2 : index
    %c3_166 = arith.constant 3 : index
    %283 = memref.load %arg7[%c2_165, %c3_166] : memref<8x8xf32, #tpu.memory_space<smem>>
    %284 = vector.broadcast %283 : f32 to vector<64x64xf32>
    %285 = arith.mulf %284, %145 : vector<64x64xf32>
    %286 = arith.addf %282, %285 : vector<64x64xf32>
    %c2_167 = arith.constant 2 : index
    %c7_168 = arith.constant 7 : index
    %287 = memref.load %arg7[%c2_167, %c7_168] : memref<8x8xf32, #tpu.memory_space<smem>>
    %288 = vector.broadcast %287 : f32 to vector<64x64xf32>
    %289 = arith.mulf %288, %160 : vector<64x64xf32>
    %290 = arith.addf %286, %289 : vector<64x64xf32>
    %cst_169 = arith.constant 0.000000e+00 : f32
    %291 = vector.broadcast %cst_169 : f32 to vector<64x64xf32>
    %292 = arith.cmpf ogt, %290, %291 : vector<64x64xf32>
    %cst_170 = arith.constant 0.000000e+00 : f32
    %293 = vector.broadcast %cst_170 : f32 to vector<64x64xf32>
    %294 = arith.minimumf %290, %293 : vector<64x64xf32>
    %295 = math.exp %294 : vector<64x64xf32>
    %cst_171 = arith.constant 1.000000e+00 : f32
    %296 = vector.broadcast %cst_171 : f32 to vector<64x64xf32>
    %297 = arith.subf %295, %296 : vector<64x64xf32>
    %298 = arith.select %292, %290, %297 : vector<64x64xi1>, vector<64x64xf32>
    %c0_172 = arith.constant 0 : index
    %c2_173 = arith.constant 2 : index
    %c0_174 = arith.constant 0 : index
    %c0_175 = arith.constant 0 : index
    %299 = vector.load %arg9[%c0_172, %c2_173, %c0_174, %c0_175] : memref<1x8x64x64xf32, #tpu.memory_space<vmem>>, vector<1x1x64x64xf32>
    %300 = vector.shape_cast %299 : vector<1x1x64x64xf32> to vector<64x64xf32>
    %301 = vector.shape_cast %298 : vector<64x64xf32> to vector<1x1x64x64xf32>
    tpu.vector_store %arg9[%c0_172, %c2_173, %c0_174, %c0_175], %301 {strides = array<i32>} : memref<1x8x64x64xf32, #tpu.memory_space<vmem>>, vector<1x1x64x64xf32>,
    %cst_176 = arith.constant 0.000000e+00 : f32
    %302 = vector.broadcast %cst_176 : f32 to vector<64x64xf32>
    %c0_177 = arith.constant 0 : index
    %c3_178 = arith.constant 3 : index
    %303 = memref.load %arg8[%c0_177, %c3_178] : memref<1x8xf32, #tpu.memory_space<smem>>
    %304 = vector.broadcast %303 : f32 to vector<64x64xf32>
    %305 = arith.addf %302, %304 : vector<64x64xf32>
    %c3_179 = arith.constant 3 : index
    %c0_180 = arith.constant 0 : index
    %306 = memref.load %arg7[%c3_179, %c0_180] : memref<8x8xf32, #tpu.memory_space<smem>>
    %307 = vector.broadcast %306 : f32 to vector<64x64xf32>
    %308 = arith.mulf %307, %49 : vector<64x64xf32>
    %309 = arith.addf %305, %308 : vector<64x64xf32>
    %c3_181 = arith.constant 3 : index
    %c4_182 = arith.constant 4 : index
    %310 = memref.load %arg7[%c3_181, %c4_182] : memref<8x8xf32, #tpu.memory_space<smem>>
    %311 = vector.broadcast %310 : f32 to vector<64x64xf32>
    %312 = arith.mulf %311, %64 : vector<64x64xf32>
    %313 = arith.addf %309, %312 : vector<64x64xf32>
    %c3_183 = arith.constant 3 : index
    %c1_184 = arith.constant 1 : index
    %314 = memref.load %arg7[%c3_183, %c1_184] : memref<8x8xf32, #tpu.memory_space<smem>>
    %315 = vector.broadcast %314 : f32 to vector<64x64xf32>
    %316 = arith.mulf %315, %81 : vector<64x64xf32>
    %317 = arith.addf %313, %316 : vector<64x64xf32>
    %c3_185 = arith.constant 3 : index
    %c5_186 = arith.constant 5 : index
    %318 = memref.load %arg7[%c3_185, %c5_186] : memref<8x8xf32, #tpu.memory_space<smem>>
    %319 = vector.broadcast %318 : f32 to vector<64x64xf32>
    %320 = arith.mulf %319, %96 : vector<64x64xf32>
    %321 = arith.addf %317, %320 : vector<64x64xf32>
    %c3_187 = arith.constant 3 : index
    %c2_188 = arith.constant 2 : index
    %322 = memref.load %arg7[%c3_187, %c2_188] : memref<8x8xf32, #tpu.memory_space<smem>>
    %323 = vector.broadcast %322 : f32 to vector<64x64xf32>
    %324 = arith.mulf %323, %113 : vector<64x64xf32>
    %325 = arith.addf %321, %324 : vector<64x64xf32>
    %c3_189 = arith.constant 3 : index
    %c6_190 = arith.constant 6 : index
    %326 = memref.load %arg7[%c3_189, %c6_190] : memref<8x8xf32, #tpu.memory_space<smem>>
    %327 = vector.broadcast %326 : f32 to vector<64x64xf32>
    %328 = arith.mulf %327, %128 : vector<64x64xf32>
    %329 = arith.addf %325, %328 : vector<64x64xf32>
    %c3_191 = arith.constant 3 : index
    %c3_192 = arith.constant 3 : index
    %330 = memref.load %arg7[%c3_191, %c3_192] : memref<8x8xf32, #tpu.memory_space<smem>>
    %331 = vector.broadcast %330 : f32 to vector<64x64xf32>
    %332 = arith.mulf %331, %145 : vector<64x64xf32>
    %333 = arith.addf %329, %332 : vector<64x64xf32>
    %c3_193 = arith.constant 3 : index
    %c7_194 = arith.constant 7 : index
    %334 = memref.load %arg7[%c3_193, %c7_194] : memref<8x8xf32, #tpu.memory_space<smem>>
    %335 = vector.broadcast %334 : f32 to vector<64x64xf32>
    %336 = arith.mulf %335, %160 : vector<64x64xf32>
    %337 = arith.addf %333, %336 : vector<64x64xf32>
    %cst_195 = arith.constant 0.000000e+00 : f32
    %338 = vector.broadcast %cst_195 : f32 to vector<64x64xf32>
    %339 = arith.cmpf ogt, %337, %338 : vector<64x64xf32>
    %cst_196 = arith.constant 0.000000e+00 : f32
    %340 = vector.broadcast %cst_196 : f32 to vector<64x64xf32>
    %341 = arith.minimumf %337, %340 : vector<64x64xf32>
    %342 = math.exp %341 : vector<64x64xf32>
    %cst_197 = arith.constant 1.000000e+00 : f32
    %343 = vector.broadcast %cst_197 : f32 to vector<64x64xf32>
    %344 = arith.subf %342, %343 : vector<64x64xf32>
    %345 = arith.select %339, %337, %344 : vector<64x64xi1>, vector<64x64xf32>
    %c0_198 = arith.constant 0 : index
    %c3_199 = arith.constant 3 : index
    %c0_200 = arith.constant 0 : index
    %c0_201 = arith.constant 0 : index
    %346 = vector.load %arg9[%c0_198, %c3_199, %c0_200, %c0_201] : memref<1x8x64x64xf32, #tpu.memory_space<vmem>>, vector<1x1x64x64xf32>
    %347 = vector.shape_cast %346 : vector<1x1x64x64xf32> to vector<64x64xf32>
    %348 = vector.shape_cast %345 : vector<64x64xf32> to vector<1x1x64x64xf32>
    tpu.vector_store %arg9[%c0_198, %c3_199, %c0_200, %c0_201], %348 {strides = array<i32>} : memref<1x8x64x64xf32, #tpu.memory_space<vmem>>, vector<1x1x64x64xf32>,
    %cst_202 = arith.constant 0.000000e+00 : f32
    %349 = vector.broadcast %cst_202 : f32 to vector<64x64xf32>
    %c0_203 = arith.constant 0 : index
    %c4_204 = arith.constant 4 : index
    %350 = memref.load %arg8[%c0_203, %c4_204] : memref<1x8xf32, #tpu.memory_space<smem>>
    %351 = vector.broadcast %350 : f32 to vector<64x64xf32>
    %352 = arith.addf %349, %351 : vector<64x64xf32>
    %c4_205 = arith.constant 4 : index
    %c0_206 = arith.constant 0 : index
    %353 = memref.load %arg7[%c4_205, %c0_206] : memref<8x8xf32, #tpu.memory_space<smem>>
    %354 = vector.broadcast %353 : f32 to vector<64x64xf32>
    %355 = arith.mulf %354, %49 : vector<64x64xf32>
    %356 = arith.addf %352, %355 : vector<64x64xf32>
    %c4_207 = arith.constant 4 : index
    %c4_208 = arith.constant 4 : index
    %357 = memref.load %arg7[%c4_207, %c4_208] : memref<8x8xf32, #tpu.memory_space<smem>>
    %358 = vector.broadcast %357 : f32 to vector<64x64xf32>
    %359 = arith.mulf %358, %64 : vector<64x64xf32>
    %360 = arith.addf %356, %359 : vector<64x64xf32>
    %c4_209 = arith.constant 4 : index
    %c1_210 = arith.constant 1 : index
    %361 = memref.load %arg7[%c4_209, %c1_210] : memref<8x8xf32, #tpu.memory_space<smem>>
    %362 = vector.broadcast %361 : f32 to vector<64x64xf32>
    %363 = arith.mulf %362, %81 : vector<64x64xf32>
    %364 = arith.addf %360, %363 : vector<64x64xf32>
    %c4_211 = arith.constant 4 : index
    %c5_212 = arith.constant 5 : index
    %365 = memref.load %arg7[%c4_211, %c5_212] : memref<8x8xf32, #tpu.memory_space<smem>>
    %366 = vector.broadcast %365 : f32 to vector<64x64xf32>
    %367 = arith.mulf %366, %96 : vector<64x64xf32>
    %368 = arith.addf %364, %367 : vector<64x64xf32>
    %c4_213 = arith.constant 4 : index
    %c2_214 = arith.constant 2 : index
    %369 = memref.load %arg7[%c4_213, %c2_214] : memref<8x8xf32, #tpu.memory_space<smem>>
    %370 = vector.broadcast %369 : f32 to vector<64x64xf32>
    %371 = arith.mulf %370, %113 : vector<64x64xf32>
    %372 = arith.addf %368, %371 : vector<64x64xf32>
    %c4_215 = arith.constant 4 : index
    %c6_216 = arith.constant 6 : index
    %373 = memref.load %arg7[%c4_215, %c6_216] : memref<8x8xf32, #tpu.memory_space<smem>>
    %374 = vector.broadcast %373 : f32 to vector<64x64xf32>
    %375 = arith.mulf %374, %128 : vector<64x64xf32>
    %376 = arith.addf %372, %375 : vector<64x64xf32>
    %c4_217 = arith.constant 4 : index
    %c3_218 = arith.constant 3 : index
    %377 = memref.load %arg7[%c4_217, %c3_218] : memref<8x8xf32, #tpu.memory_space<smem>>
    %378 = vector.broadcast %377 : f32 to vector<64x64xf32>
    %379 = arith.mulf %378, %145 : vector<64x64xf32>
    %380 = arith.addf %376, %379 : vector<64x64xf32>
    %c4_219 = arith.constant 4 : index
    %c7_220 = arith.constant 7 : index
    %381 = memref.load %arg7[%c4_219, %c7_220] : memref<8x8xf32, #tpu.memory_space<smem>>
    %382 = vector.broadcast %381 : f32 to vector<64x64xf32>
    %383 = arith.mulf %382, %160 : vector<64x64xf32>
    %384 = arith.addf %380, %383 : vector<64x64xf32>
    %cst_221 = arith.constant 0.000000e+00 : f32
    %385 = vector.broadcast %cst_221 : f32 to vector<64x64xf32>
    %386 = arith.cmpf ogt, %384, %385 : vector<64x64xf32>
    %cst_222 = arith.constant 0.000000e+00 : f32
    %387 = vector.broadcast %cst_222 : f32 to vector<64x64xf32>
    %388 = arith.minimumf %384, %387 : vector<64x64xf32>
    %389 = math.exp %388 : vector<64x64xf32>
    %cst_223 = arith.constant 1.000000e+00 : f32
    %390 = vector.broadcast %cst_223 : f32 to vector<64x64xf32>
    %391 = arith.subf %389, %390 : vector<64x64xf32>
    %392 = arith.select %386, %384, %391 : vector<64x64xi1>, vector<64x64xf32>
    %c0_224 = arith.constant 0 : index
    %c4_225 = arith.constant 4 : index
    %c0_226 = arith.constant 0 : index
    %c0_227 = arith.constant 0 : index
    %393 = vector.load %arg9[%c0_224, %c4_225, %c0_226, %c0_227] : memref<1x8x64x64xf32, #tpu.memory_space<vmem>>, vector<1x1x64x64xf32>
    %394 = vector.shape_cast %393 : vector<1x1x64x64xf32> to vector<64x64xf32>
    %395 = vector.shape_cast %392 : vector<64x64xf32> to vector<1x1x64x64xf32>
    tpu.vector_store %arg9[%c0_224, %c4_225, %c0_226, %c0_227], %395 {strides = array<i32>} : memref<1x8x64x64xf32, #tpu.memory_space<vmem>>, vector<1x1x64x64xf32>,
    %cst_228 = arith.constant 0.000000e+00 : f32
    %396 = vector.broadcast %cst_228 : f32 to vector<64x64xf32>
    %c0_229 = arith.constant 0 : index
    %c5_230 = arith.constant 5 : index
    %397 = memref.load %arg8[%c0_229, %c5_230] : memref<1x8xf32, #tpu.memory_space<smem>>
    %398 = vector.broadcast %397 : f32 to vector<64x64xf32>
    %399 = arith.addf %396, %398 : vector<64x64xf32>
    %c5_231 = arith.constant 5 : index
    %c0_232 = arith.constant 0 : index
    %400 = memref.load %arg7[%c5_231, %c0_232] : memref<8x8xf32, #tpu.memory_space<smem>>
    %401 = vector.broadcast %400 : f32 to vector<64x64xf32>
    %402 = arith.mulf %401, %49 : vector<64x64xf32>
    %403 = arith.addf %399, %402 : vector<64x64xf32>
    %c5_233 = arith.constant 5 : index
    %c4_234 = arith.constant 4 : index
    %404 = memref.load %arg7[%c5_233, %c4_234] : memref<8x8xf32, #tpu.memory_space<smem>>
    %405 = vector.broadcast %404 : f32 to vector<64x64xf32>
    %406 = arith.mulf %405, %64 : vector<64x64xf32>
    %407 = arith.addf %403, %406 : vector<64x64xf32>
    %c5_235 = arith.constant 5 : index
    %c1_236 = arith.constant 1 : index
    %408 = memref.load %arg7[%c5_235, %c1_236] : memref<8x8xf32, #tpu.memory_space<smem>>
    %409 = vector.broadcast %408 : f32 to vector<64x64xf32>
    %410 = arith.mulf %409, %81 : vector<64x64xf32>
    %411 = arith.addf %407, %410 : vector<64x64xf32>
    %c5_237 = arith.constant 5 : index
    %c5_238 = arith.constant 5 : index
    %412 = memref.load %arg7[%c5_237, %c5_238] : memref<8x8xf32, #tpu.memory_space<smem>>
    %413 = vector.broadcast %412 : f32 to vector<64x64xf32>
    %414 = arith.mulf %413, %96 : vector<64x64xf32>
    %415 = arith.addf %411, %414 : vector<64x64xf32>
    %c5_239 = arith.constant 5 : index
    %c2_240 = arith.constant 2 : index
    %416 = memref.load %arg7[%c5_239, %c2_240] : memref<8x8xf32, #tpu.memory_space<smem>>
    %417 = vector.broadcast %416 : f32 to vector<64x64xf32>
    %418 = arith.mulf %417, %113 : vector<64x64xf32>
    %419 = arith.addf %415, %418 : vector<64x64xf32>
    %c5_241 = arith.constant 5 : index
    %c6_242 = arith.constant 6 : index
    %420 = memref.load %arg7[%c5_241, %c6_242] : memref<8x8xf32, #tpu.memory_space<smem>>
    %421 = vector.broadcast %420 : f32 to vector<64x64xf32>
    %422 = arith.mulf %421, %128 : vector<64x64xf32>
    %423 = arith.addf %419, %422 : vector<64x64xf32>
    %c5_243 = arith.constant 5 : index
    %c3_244 = arith.constant 3 : index
    %424 = memref.load %arg7[%c5_243, %c3_244] : memref<8x8xf32, #tpu.memory_space<smem>>
    %425 = vector.broadcast %424 : f32 to vector<64x64xf32>
    %426 = arith.mulf %425, %145 : vector<64x64xf32>
    %427 = arith.addf %423, %426 : vector<64x64xf32>
    %c5_245 = arith.constant 5 : index
    %c7_246 = arith.constant 7 : index
    %428 = memref.load %arg7[%c5_245, %c7_246] : memref<8x8xf32, #tpu.memory_space<smem>>
    %429 = vector.broadcast %428 : f32 to vector<64x64xf32>
    %430 = arith.mulf %429, %160 : vector<64x64xf32>
    %431 = arith.addf %427, %430 : vector<64x64xf32>
    %cst_247 = arith.constant 0.000000e+00 : f32
    %432 = vector.broadcast %cst_247 : f32 to vector<64x64xf32>
    %433 = arith.cmpf ogt, %431, %432 : vector<64x64xf32>
    %cst_248 = arith.constant 0.000000e+00 : f32
    %434 = vector.broadcast %cst_248 : f32 to vector<64x64xf32>
    %435 = arith.minimumf %431, %434 : vector<64x64xf32>
    %436 = math.exp %435 : vector<64x64xf32>
    %cst_249 = arith.constant 1.000000e+00 : f32
    %437 = vector.broadcast %cst_249 : f32 to vector<64x64xf32>
    %438 = arith.subf %436, %437 : vector<64x64xf32>
    %439 = arith.select %433, %431, %438 : vector<64x64xi1>, vector<64x64xf32>
    %c0_250 = arith.constant 0 : index
    %c5_251 = arith.constant 5 : index
    %c0_252 = arith.constant 0 : index
    %c0_253 = arith.constant 0 : index
    %440 = vector.load %arg9[%c0_250, %c5_251, %c0_252, %c0_253] : memref<1x8x64x64xf32, #tpu.memory_space<vmem>>, vector<1x1x64x64xf32>
    %441 = vector.shape_cast %440 : vector<1x1x64x64xf32> to vector<64x64xf32>
    %442 = vector.shape_cast %439 : vector<64x64xf32> to vector<1x1x64x64xf32>
    tpu.vector_store %arg9[%c0_250, %c5_251, %c0_252, %c0_253], %442 {strides = array<i32>} : memref<1x8x64x64xf32, #tpu.memory_space<vmem>>, vector<1x1x64x64xf32>,
    %cst_254 = arith.constant 0.000000e+00 : f32
    %443 = vector.broadcast %cst_254 : f32 to vector<64x64xf32>
    %c0_255 = arith.constant 0 : index
    %c6_256 = arith.constant 6 : index
    %444 = memref.load %arg8[%c0_255, %c6_256] : memref<1x8xf32, #tpu.memory_space<smem>>
    %445 = vector.broadcast %444 : f32 to vector<64x64xf32>
    %446 = arith.addf %443, %445 : vector<64x64xf32>
    %c6_257 = arith.constant 6 : index
    %c0_258 = arith.constant 0 : index
    %447 = memref.load %arg7[%c6_257, %c0_258] : memref<8x8xf32, #tpu.memory_space<smem>>
    %448 = vector.broadcast %447 : f32 to vector<64x64xf32>
    %449 = arith.mulf %448, %49 : vector<64x64xf32>
    %450 = arith.addf %446, %449 : vector<64x64xf32>
    %c6_259 = arith.constant 6 : index
    %c4_260 = arith.constant 4 : index
    %451 = memref.load %arg7[%c6_259, %c4_260] : memref<8x8xf32, #tpu.memory_space<smem>>
    %452 = vector.broadcast %451 : f32 to vector<64x64xf32>
    %453 = arith.mulf %452, %64 : vector<64x64xf32>
    %454 = arith.addf %450, %453 : vector<64x64xf32>
    %c6_261 = arith.constant 6 : index
    %c1_262 = arith.constant 1 : index
    %455 = memref.load %arg7[%c6_261, %c1_262] : memref<8x8xf32, #tpu.memory_space<smem>>
    %456 = vector.broadcast %455 : f32 to vector<64x64xf32>
    %457 = arith.mulf %456, %81 : vector<64x64xf32>
    %458 = arith.addf %454, %457 : vector<64x64xf32>
    %c6_263 = arith.constant 6 : index
    %c5_264 = arith.constant 5 : index
    %459 = memref.load %arg7[%c6_263, %c5_264] : memref<8x8xf32, #tpu.memory_space<smem>>
    %460 = vector.broadcast %459 : f32 to vector<64x64xf32>
    %461 = arith.mulf %460, %96 : vector<64x64xf32>
    %462 = arith.addf %458, %461 : vector<64x64xf32>
    %c6_265 = arith.constant 6 : index
    %c2_266 = arith.constant 2 : index
    %463 = memref.load %arg7[%c6_265, %c2_266] : memref<8x8xf32, #tpu.memory_space<smem>>
    %464 = vector.broadcast %463 : f32 to vector<64x64xf32>
    %465 = arith.mulf %464, %113 : vector<64x64xf32>
    %466 = arith.addf %462, %465 : vector<64x64xf32>
    %c6_267 = arith.constant 6 : index
    %c6_268 = arith.constant 6 : index
    %467 = memref.load %arg7[%c6_267, %c6_268] : memref<8x8xf32, #tpu.memory_space<smem>>
    %468 = vector.broadcast %467 : f32 to vector<64x64xf32>
    %469 = arith.mulf %468, %128 : vector<64x64xf32>
    %470 = arith.addf %466, %469 : vector<64x64xf32>
    %c6_269 = arith.constant 6 : index
    %c3_270 = arith.constant 3 : index
    %471 = memref.load %arg7[%c6_269, %c3_270] : memref<8x8xf32, #tpu.memory_space<smem>>
    %472 = vector.broadcast %471 : f32 to vector<64x64xf32>
    %473 = arith.mulf %472, %145 : vector<64x64xf32>
    %474 = arith.addf %470, %473 : vector<64x64xf32>
    %c6_271 = arith.constant 6 : index
    %c7_272 = arith.constant 7 : index
    %475 = memref.load %arg7[%c6_271, %c7_272] : memref<8x8xf32, #tpu.memory_space<smem>>
    %476 = vector.broadcast %475 : f32 to vector<64x64xf32>
    %477 = arith.mulf %476, %160 : vector<64x64xf32>
    %478 = arith.addf %474, %477 : vector<64x64xf32>
    %cst_273 = arith.constant 0.000000e+00 : f32
    %479 = vector.broadcast %cst_273 : f32 to vector<64x64xf32>
    %480 = arith.cmpf ogt, %478, %479 : vector<64x64xf32>
    %cst_274 = arith.constant 0.000000e+00 : f32
    %481 = vector.broadcast %cst_274 : f32 to vector<64x64xf32>
    %482 = arith.minimumf %478, %481 : vector<64x64xf32>
    %483 = math.exp %482 : vector<64x64xf32>
    %cst_275 = arith.constant 1.000000e+00 : f32
    %484 = vector.broadcast %cst_275 : f32 to vector<64x64xf32>
    %485 = arith.subf %483, %484 : vector<64x64xf32>
    %486 = arith.select %480, %478, %485 : vector<64x64xi1>, vector<64x64xf32>
    %c0_276 = arith.constant 0 : index
    %c6_277 = arith.constant 6 : index
    %c0_278 = arith.constant 0 : index
    %c0_279 = arith.constant 0 : index
    %487 = vector.load %arg9[%c0_276, %c6_277, %c0_278, %c0_279] : memref<1x8x64x64xf32, #tpu.memory_space<vmem>>, vector<1x1x64x64xf32>
    %488 = vector.shape_cast %487 : vector<1x1x64x64xf32> to vector<64x64xf32>
    %489 = vector.shape_cast %486 : vector<64x64xf32> to vector<1x1x64x64xf32>
    tpu.vector_store %arg9[%c0_276, %c6_277, %c0_278, %c0_279], %489 {strides = array<i32>} : memref<1x8x64x64xf32, #tpu.memory_space<vmem>>, vector<1x1x64x64xf32>,
    %cst_280 = arith.constant 0.000000e+00 : f32
    %490 = vector.broadcast %cst_280 : f32 to vector<64x64xf32>
    %c0_281 = arith.constant 0 : index
    %c7_282 = arith.constant 7 : index
    %491 = memref.load %arg8[%c0_281, %c7_282] : memref<1x8xf32, #tpu.memory_space<smem>>
    %492 = vector.broadcast %491 : f32 to vector<64x64xf32>
    %493 = arith.addf %490, %492 : vector<64x64xf32>
    %c7_283 = arith.constant 7 : index
    %c0_284 = arith.constant 0 : index
    %494 = memref.load %arg7[%c7_283, %c0_284] : memref<8x8xf32, #tpu.memory_space<smem>>
    %495 = vector.broadcast %494 : f32 to vector<64x64xf32>
    %496 = arith.mulf %495, %49 : vector<64x64xf32>
    %497 = arith.addf %493, %496 : vector<64x64xf32>
    %c7_285 = arith.constant 7 : index
    %c4_286 = arith.constant 4 : index
    %498 = memref.load %arg7[%c7_285, %c4_286] : memref<8x8xf32, #tpu.memory_space<smem>>
    %499 = vector.broadcast %498 : f32 to vector<64x64xf32>
    %500 = arith.mulf %499, %64 : vector<64x64xf32>
    %501 = arith.addf %497, %500 : vector<64x64xf32>
    %c7_287 = arith.constant 7 : index
    %c1_288 = arith.constant 1 : index
    %502 = memref.load %arg7[%c7_287, %c1_288] : memref<8x8xf32, #tpu.memory_space<smem>>
    %503 = vector.broadcast %502 : f32 to vector<64x64xf32>
    %504 = arith.mulf %503, %81 : vector<64x64xf32>
    %505 = arith.addf %501, %504 : vector<64x64xf32>
    %c7_289 = arith.constant 7 : index
    %c5_290 = arith.constant 5 : index
    %506 = memref.load %arg7[%c7_289, %c5_290] : memref<8x8xf32, #tpu.memory_space<smem>>
    %507 = vector.broadcast %506 : f32 to vector<64x64xf32>
    %508 = arith.mulf %507, %96 : vector<64x64xf32>
    %509 = arith.addf %505, %508 : vector<64x64xf32>
    %c7_291 = arith.constant 7 : index
    %c2_292 = arith.constant 2 : index
    %510 = memref.load %arg7[%c7_291, %c2_292] : memref<8x8xf32, #tpu.memory_space<smem>>
    %511 = vector.broadcast %510 : f32 to vector<64x64xf32>
    %512 = arith.mulf %511, %113 : vector<64x64xf32>
    %513 = arith.addf %509, %512 : vector<64x64xf32>
    %c7_293 = arith.constant 7 : index
    %c6_294 = arith.constant 6 : index
    %514 = memref.load %arg7[%c7_293, %c6_294] : memref<8x8xf32, #tpu.memory_space<smem>>
    %515 = vector.broadcast %514 : f32 to vector<64x64xf32>
    %516 = arith.mulf %515, %128 : vector<64x64xf32>
    %517 = arith.addf %513, %516 : vector<64x64xf32>
    %c7_295 = arith.constant 7 : index
    %c3_296 = arith.constant 3 : index
    %518 = memref.load %arg7[%c7_295, %c3_296] : memref<8x8xf32, #tpu.memory_space<smem>>
    %519 = vector.broadcast %518 : f32 to vector<64x64xf32>
    %520 = arith.mulf %519, %145 : vector<64x64xf32>
    %521 = arith.addf %517, %520 : vector<64x64xf32>
    %c7_297 = arith.constant 7 : index
    %c7_298 = arith.constant 7 : index
    %522 = memref.load %arg7[%c7_297, %c7_298] : memref<8x8xf32, #tpu.memory_space<smem>>
    %523 = vector.broadcast %522 : f32 to vector<64x64xf32>
    %524 = arith.mulf %523, %160 : vector<64x64xf32>
    %525 = arith.addf %521, %524 : vector<64x64xf32>
    %cst_299 = arith.constant 0.000000e+00 : f32
    %526 = vector.broadcast %cst_299 : f32 to vector<64x64xf32>
    %527 = arith.cmpf ogt, %525, %526 : vector<64x64xf32>
    %cst_300 = arith.constant 0.000000e+00 : f32
    %528 = vector.broadcast %cst_300 : f32 to vector<64x64xf32>
    %529 = arith.minimumf %525, %528 : vector<64x64xf32>
    %530 = math.exp %529 : vector<64x64xf32>
    %cst_301 = arith.constant 1.000000e+00 : f32
    %531 = vector.broadcast %cst_301 : f32 to vector<64x64xf32>
    %532 = arith.subf %530, %531 : vector<64x64xf32>
    %533 = arith.select %527, %525, %532 : vector<64x64xi1>, vector<64x64xf32>
    %c0_302 = arith.constant 0 : index
    %c7_303 = arith.constant 7 : index
    %c0_304 = arith.constant 0 : index
    %c0_305 = arith.constant 0 : index
    %534 = vector.load %arg9[%c0_302, %c7_303, %c0_304, %c0_305] : memref<1x8x64x64xf32, #tpu.memory_space<vmem>>, vector<1x1x64x64xf32>
    %535 = vector.shape_cast %534 : vector<1x1x64x64xf32> to vector<64x64xf32>
    %536 = vector.shape_cast %533 : vector<64x64xf32> to vector<1x1x64x64xf32>
    tpu.vector_store %arg9[%c0_302, %c7_303, %c0_304, %c0_305], %536 {strides = array<i32>} : memref<1x8x64x64xf32, #tpu.memory_space<vmem>>, vector<1x1x64x64xf32>,
    return
  }
  func.func @transform_0(%arg0: i32) -> (i32, i32, i32) {
    %c0_i32 = arith.constant 0 : i32
    %c0_i32_0 = arith.constant 0 : i32
    %c0_i32_1 = arith.constant 0 : i32
    return %arg0, %c0_i32, %c0_i32_0 : i32, i32, i32
  }
  func.func @transform_1(%arg0: i32) -> (i32, i32) {
    %c0_i32 = arith.constant 0 : i32
    %c0_i32_0 = arith.constant 0 : i32
    %c0_i32_1 = arith.constant 0 : i32
    return %c0_i32, %c0_i32_0 : i32, i32
  }
  func.func @transform_2(%arg0: i32) -> (i32, i32, i32) {
    %c0_i32 = arith.constant 0 : i32
    %c0_i32_0 = arith.constant 0 : i32
    %c0_i32_1 = arith.constant 0 : i32
    %c0_i32_2 = arith.constant 0 : i32
    return %c0_i32, %c0_i32_0, %c0_i32_1 : i32, i32, i32
  }
  func.func @transform_3(%arg0: i32) -> (i32, i32) {
    %c0_i32 = arith.constant 0 : i32
    %c0_i32_0 = arith.constant 0 : i32
    %c0_i32_1 = arith.constant 0 : i32
    return %c0_i32, %c0_i32_0 : i32, i32
  }
  func.func @transform_4(%arg0: i32) -> (i32, i32, i32) {
    %c0_i32 = arith.constant 0 : i32
    %c0_i32_0 = arith.constant 0 : i32
    %c0_i32_1 = arith.constant 0 : i32
    %c0_i32_2 = arith.constant 0 : i32
    return %c0_i32, %c0_i32_0, %c0_i32_1 : i32, i32, i32
  }
  func.func @transform_5(%arg0: i32) -> (i32, i32) {
    %c0_i32 = arith.constant 0 : i32
    %c0_i32_0 = arith.constant 0 : i32
    %c0_i32_1 = arith.constant 0 : i32
    return %c0_i32, %c0_i32_0 : i32, i32
  }
  func.func @transform_6(%arg0: i32) -> (i32, i32) {
    %c0_i32 = arith.constant 0 : i32
    %c0_i32_0 = arith.constant 0 : i32
    %c0_i32_1 = arith.constant 0 : i32
    return %c0_i32, %c0_i32_0 : i32, i32
  }
  func.func @transform_7(%arg0: i32) -> (i32, i32) {
    %c0_i32 = arith.constant 0 : i32
    %c0_i32_0 = arith.constant 0 : i32
    %c0_i32_1 = arith.constant 0 : i32
    return %c0_i32, %c0_i32_0 : i32, i32
  }
  func.func @transform_8(%arg0: i32) -> (i32, i32, i32, i32) {
    %c0_i32 = arith.constant 0 : i32
    %c0_i32_0 = arith.constant 0 : i32
    %c0_i32_1 = arith.constant 0 : i32
    %c0_i32_2 = arith.constant 0 : i32
    return %arg0, %c0_i32, %c0_i32_0, %c0_i32_1 : i32, i32, i32, i32
  }
}

</mosaic_0001>

<bundles_post_ra>
// kernel: upsample_forward.1
= control target key start
LH: loop header
LB: loop body
LE: loop exit
PB: predicated region body
PF: predicated region fallthrough
CT: control target
= control target key end

     0   :  { %s13256_s0 = inlined_call_operand.vmem [shape: f32[2,64,16], index: 0, kind: input, shape index: {}]   ;;  %s13257_s1 = inlined_call_operand.vmem [shape: f32[16,64], index: 1, kind: input, shape index: {}]   ;;  %s13258_s2 = inlined_call_operand.vmem [shape: f32[4,16,64], index: 2, kind: input, shape index: {}]   ;;  %s13259_s3 = inlined_call_operand.vmem [shape: f32[64,16], index: 3, kind: input, shape index: {}]   ;;  %s13260_s4 = inlined_call_operand.vmem [shape: f32[4,256,64], index: 4, kind: input, shape index: {}]   ;;  %s13261_s5 = inlined_call_operand.vmem [shape: f32[4,4], index: 5, kind: input, shape index: {}]   ;;  %s13262_s6 = inlined_call_operand.vmem [shape: f32[8,8], index: 6, kind: input, shape index: {}]   ;;  %s13263_s7 = inlined_call_operand.vmem [shape: f32[1,8], index: 7, kind: input, shape index: {}]   ;;  %s13264_s8 = inlined_call_operand.hbm [shape: f32[2,8,64,64], index: 8, kind: output, shape index: {}]  }
   0x1   :  { %13322 = sst [smem:[#allocation342_spill]] %s13256_s0 }
   0x2   :  { %13323 = sst [smem:[#allocation343_spill]] %s13257_s1 }
   0x3   :  { %13324 = sst [smem:[#allocation344_spill]] %s13258_s2 }
   0x4   :  { %13 = vsyncpa [#allocation4], 0 }
   0x5   :  { %14 = vsyncpa [#allocation6], 0 }
   0x6   :  { %15 = vsyncpa [#allocation3], 0 }
   0x7   :  { %17 = vsyncpa [#allocation3 + $0x1], 0  ;;  %s8063_s27 = smov 0   ;;  %s8065_s28 = smov 0  }
   0x8   :  { %s8067_s29 = smov 0   ;;  %s8069_s30 = smov 0  }
   0x9 LB: > { %s8084_s9 = sadd.s32 4294967295, %s8010_s30   ;;  %s5992_s10 = sadd.s32 4294967294, %s8010_s30   ;;  %s8010_s30 = sphi %s8069_s30, %s14340_s30   ;;  %s8006_s29 = sphi %s8067_s29, %s14339_s29   ;;  %s8002_s28 = sphi %s8065_s28, %s14338_s28   ;;  %s7998_s27 = sphi %s8063_s27, %s14337_s27  }
   0xa   : > { %s8088_s11 = sadd.s32 1, %s8010_s30   ;;  %s203_s12 = sadd.s32 1, %s8006_s29 }
   0xb   : > { %s200_s13 = ssub.s32 %s8010_s30, %s8088_s11  ;;  %p213_p0 = scmp.ne.s32.totalorder %s8006_s29, %s8002_s28 }
   0xc   : > { %p201_p1 = scmp.eq.s32.totalorder %s200_s13, 0  ;;  %p214_p2 = scmp.eq.s32.totalorder %s8084_s9, 1 }
   0xd   : > { %p219_p3 = scmp.ne.s32.totalorder %s8002_s28, %s7998_s27  ;;  %p220_p4 = scmp.eq.s32.totalorder %s5992_s10, 1 }
   0xe   : > { %s8099_s14 = scalar_select %p201_p1, %s8006_s29, %s203_s12  }
   0xf   : > { %p8101_p5 = por %p214_p2, %p213_p0  ;;  %p8105_p6 = por %p220_p4, %p219_p3 }
  0x10   : > { %p5993_p7 = scmp.ge.s32.totalorder %s8010_s30, 1  ;;  %p227_p8 = scmp.lt.s32.totalorder %s8010_s30, 3 }
  0x11   : > { %s13325_s15 = scalar_select %p8101_p5, 1, 0 }
  0x12   : > { %s13326_s16 = scalar_select %p8105_p6, 1, 0 }
  0x13   : > { %p13265_p9 = scmp.eq.s32.totalorder %s8084_s9, 0  ;;  %p8112_p10 = pnand %p5993_p7, %p227_p8 }
  0x14   : > { %s263_s20 = sshll.u32 %s13262_s6, 4  ;;  %s252_s23 = sshll.u32 %s13261_s5, 4  ;;  %s264_s20 = int_to_ptr.vmem [resolvable:$true] %s263_s20  ;;  %s253_s23 = int_to_ptr.vmem [resolvable:$true] %s252_s23 }
  0x15   : > { %s13327_s17 = scalar_select %p8112_p10, 1, 0 }
  0x16   : > { %p7583_p11 = pneg %p8112_p10  ;;  %s274_s10 = sshll.u32 %s13263_s7, 4  ;;  %s8133_s10 = int_to_ptr.vmem [resolvable:$true] %s274_s10 }
  0x17   : > { %s7897_s12 = scalar_lea.vmem %s264_s20, 128  ;;  %p7905_p3 = scmp.lt.s32.totalorder %s264_s20, %s264_s20 }
  0x18   : > { %p8126_p12 = pnand %p13265_p9, %p7583_p11  ;;  %p7898_p13 = scmp.ne.s32.totalorder %s264_s20, %s7897_s12 }
  0x19   : > { %p7906_p4 = scmp.lt.s32.totalorder %s7897_s12, %s7897_s12 }
  0x1a   : > { %p7899_p0 = pneg %p8126_p12 }
  0x1b   : > { %p7907_p7 = por %p7906_p4, %p7905_p3 }
  0x1c   : > { %p7900_p1 = pnand %p7899_p0, %p7898_p13 }
  0x1e   : > { %p7901_p2 = pneg %p7900_p1 }
  0x20   : > { %p7908_p8 = pnand %p7907_p7, %p7901_p2 }
  0x22   : > { %7911 = shalt.err (!%p7908_p8)
}
  0x23   : > { %s8012_s13 = smov [#allocation5]   ;;  %s7912_s18 = scalar_lea.vmem %s253_s23, 64 }
  0x24   : > { %7589 = dma.vmem_to_smem (!%p8126_p12), %s264_s20, 128, %s8012_s13, [#allocation6]  }
  0x25   : > { %p7913_p11 = scmp.ne.s32.totalorder %s253_s23, %s7912_s18  ;;  %p7920_p5 = scmp.lt.s32.totalorder %s253_s23, %s253_s23 }
  0x26   : > { %p7921_p10 = scmp.lt.s32.totalorder %s7912_s18, %s7912_s18 }
  0x27   : > { %p7915_p9 = pnand %p7913_p11, %p7899_p0 }
  0x28   : > { %p7922_p13 = por %p7921_p10, %p7920_p5 }
  0x29   : > { %p7916_p6 = pneg %p7915_p9 }
  0x2b   : > { %p7923_p1 = pnand %p7922_p13, %p7916_p6 }
  0x2d   : > { %7926 = shalt.err (!%p7923_p1)
}
  0x2e   : > { %s8013_s19 = smov [#allocation2]   ;;  %s7927_s20 = scalar_lea.vmem %s8133_s10, 16 }
  0x2f   : > { %7586 = dma.vmem_to_smem (!%p8126_p12), %s253_s23, 64, %s8013_s19, [#allocation4]  }
  0x30   : > { %p7928_p2 = scmp.ne.s32.totalorder %s8133_s10, %s7927_s20  ;;  %p7935_p9 = scmp.lt.s32.totalorder %s8133_s10, %s8133_s10 }
  0x31   : > { %p7936_p7 = scmp.lt.s32.totalorder %s7927_s20, %s7927_s20 }
  0x32   : > { %p7930_p3 = pnand %p7928_p2, %p7899_p0 }
  0x33   : > { %p7937_p5 = por %p7936_p7, %p7935_p9 }
  0x34   : > { %p7931_p4 = pneg %p7930_p3 }
  0x36   : > { %p7938_p6 = pnand %p7937_p5, %p7931_p4 }
  0x38   : > { %7941 = shalt.err (!%p7938_p6)
}
  0x39   : > { %s8014_s21 = smov [#allocation7]   ;;  %p13329_p10 = scmp.ne.s32.totalorder %s13327_s17, 0 }
  0x3a   : > { %7592 = dma.vmem_to_smem (!%p8126_p12), %s8133_s10, 16, %s8014_s21, [#allocation6]  }
  0x3b   : > { %295 = sbr.rel (%p13329_p10) target bundleno = 1342 (0x53e), region = 52 }
  0x40   : > { %p13330_p8 = scmp.eq.s32.totalorder %s8084_s9, 0 }
  0x42   : > { %7985 = dma.done.wait (%p13330_p8), [#allocation4], 64   ;;  %p13331_p0 = pmov %p13330_p8 }
  0x44   : > { %7987 = vsyncadd (%p13331_p0), [#allocation4], 4294967232  ;;  %p13332_p11 = pmov %p13331_p0 }
  0x45   : > { %p13333_p13 = pmov %p13331_p0 }
  0x46   : > { %7989 = dma.done.wait (%p13332_p11), [#allocation6], 144  }
  0x47   : > { %7991 = vsyncadd (%p13333_p13), [#allocation6], 4294967152 }
  0x48   : > { %309 = sfence }
  0x49   : > { %s13334_s1 = sld [smem:[#allocation343_spill]]  ;;  %p338_p12 = scmp.lt.s32.totalorder %s8084_s9, 1  ;;  %v483_v2 = vld [vmem:[%s13260_s4] sm:$0xff]  ;;  %vm515_vm0 = vcmask 523264   ;;  %vm353_vm1 = vcmask 130048   ;;  %v484_v12 = vld [vmem:[%s13260_s4 + $0x8] sm:$0xff] }
  0x4a   : > { %7057 = vmatprep.mubr.msk.f32.mxu1 %vm515_vm0, %v483_v2  ;;  %s13335_s0 = sld [smem:[#allocation342_spill]]  ;;  %v6045_v11 = vld [vmem:[%s13260_s4 + $0x100] sm:$0xff]  ;;  %v6046_v13 = vld [vmem:[%s13260_s4 + $0x108] sm:$0xff]  ;;  %v485_v14 = vld [vmem:[%s13260_s4 + $0x10] sm:$0xff]  ;;  %p14335_p2 = scmp.ne.s32.totalorder %s13325_s15, 0 }
  0x4b   : > { %s339_s10 = scalar_select %p338_p12, %s8084_s9, 1  ;;  %v6047_v15 = vld [vmem:[%s13260_s4 + $0x110] sm:$0xff]  ;;  %v486_v17 = vld [vmem:[%s13260_s4 + $0x18] sm:$0xff]  ;;  %v487_v20 = vld [vmem:[%s13260_s4 + $0x20] sm:$0xff] }
  0x4c   : > { %s13336_s2 = sld [smem:[#allocation344_spill]]  ;;  %v6048_v19 = vld [vmem:[%s13260_s4 + $0x118] sm:$0xff]  ;;  %v6049_v21 = vld [vmem:[%s13260_s4 + $0x120] sm:$0xff]  ;;  %v488_v22 = vld [vmem:[%s13260_s4 + $0x28] sm:$0xff] }
  0x4d   : > { %s6677_s12 = sshll.u32 %s339_s10, 6  ;;  %v6050_v23 = vld [vmem:[%s13260_s4 + $0x128] sm:$0xff]  ;;  %v489_v24 = vld [vmem:[%s13260_s4 + $0x30] sm:$0xff]  ;;  %v490_v26 = vld [vmem:[%s13260_s4 + $0x38] sm:$0xff]  ;;  %s3395_s20 = sld [smem:[#allocation2]] }
  0x4e   : > { %v6051_v25 = vld [vmem:[%s13260_s4 + $0x130] sm:$0xff]  ;;  %v6052_v27 = vld [vmem:[%s13260_s4 + $0x138] sm:$0xff]  ;;  %v491_v28 = vld [vmem:[%s13260_s4 + $0x40] sm:$0xff]  ;;  %s6379_s21 = sld [smem:[#allocation2 + $0x80]] }
  0x4f   : > { %v352_v0 = vld [vmem:[%s13334_s1 + $0x8] sm:$0xff]  ;;  %v351_v1 = vld [vmem:[%s13334_s1] sm:$0xff]  ;;  %v493_v32 = vld [vmem:[%s13260_s4 + $0x50] sm:$0xff]  ;;  %s4257_s22 = sld [smem:[#allocation5]] }
  0x50   : > { %7025 = vmatprep.subr.mxu0 %v352_v0  ;;  %s342_s19 = scalar_lea.vmem %s13335_s0, %s6677_s12  ;;  %v6053_v29 = vld [vmem:[%s13260_s4 + $0x140] sm:$0xff]  ;;  %v492_v30 = vld [vmem:[%s13260_s4 + $0x48] sm:$0xff]  ;;  %v6055_v33 = vld [vmem:[%s13260_s4 + $0x150] sm:$0xff]  ;;  %s6498_s23 = sld [smem:[#allocation5 + $0x80]] }
  0x51   : > { %7026 = vmatpush3.msra.mxu0 %v352_v0  ;;  %v8182_v3 = vld [vmem:[%s342_s19] sm:$0xff]  ;;  %v8184_v4 = vld [vmem:[%s342_s19 + $0x38] sm:$0xff]  ;;  %v8186_v5 = vld [vmem:[%s342_s19 + $0x8] sm:$0xff]  ;;  %s4254_s17 = sld [smem:[#allocation7]] }
  0x52   : > { %7027 = vmatprep.subr.mxu0 %v351_v1  ;;  %7029 = vmatprep.mubr.msk.f32.mxu0 %vm353_vm1, %v8182_v3  ;;  %v8191_v6 = vld [vmem:[%s342_s19 + $0x30] sm:$0xff]  ;;  %v8200_v8 = vld [vmem:[%s342_s19 + $0x28] sm:$0xff]  ;;  %v8204_v9 = vld [vmem:[%s342_s19 + $0x18] sm:$0xff]  ;;  %s6497_s24 = sld [smem:[#allocation7 + $0x1]] }
  0x53   : > { %7028 = vmatpush3.msra.mxu0 %v351_v1  ;;  %7041 = vmatprep.subr.mxu1 %v8184_v4  ;;  %v8196_v7 = vld [vmem:[%s342_s19 + $0x10] sm:$0xff]  ;;  %v8211_v10 = vld [vmem:[%s342_s19 + $0x20] sm:$0xff]  ;;  %v6110_v16 = vld [vmem:[%s13336_s2 + $0x18] sm:$0xff]  ;;  %s6523_s25 = sld [smem:[#allocation5 + $0x100]] }
  0x54   : > { %7105 = vmatprep.subr.mxu0 %v8184_v4  ;;  %7030 = vmatmul.mubr.msk.f32.vlgmr.msra.gmra.mxu0 %vm353_vm1, %v8186_v5  ;;  %v6109_v18 = vld [vmem:[%s13336_s2 + $0x10] sm:$0xff]  ;;  %v6054_v31 = vld [vmem:[%s13260_s4 + $0x148] sm:$0xff]  ;;  %v494_v34 = vld [vmem:[%s13260_s4 + $0x58] sm:$0xff]  ;;  %s9176_s26 = sld [smem:[#allocation7 + $0x2]] }
  0x55   : > { %7106 = vmatpush3.msra.mxu0 %v8184_v4  ;;  %7042 = vmatpush3.msra.mxu1 %v8184_v4  ;;  %v6056_v35 = vld [vmem:[%s13260_s4 + $0x158] sm:$0xff]  ;;  %v495_v36 = vld [vmem:[%s13260_s4 + $0x60] sm:$0xff]  ;;  %v496_v38 = vld [vmem:[%s13260_s4 + $0x68] sm:$0xff]  ;;  %s6547_s10 = sld [smem:[#allocation7 + $0x3]] }
  0x56   : > { %7107 = vmatprep.subr.mxu0 %v8191_v6  ;;  %7043 = vmatprep.subr.mxu1 %v8191_v6  ;;  %v6057_v37 = vld [vmem:[%s13260_s4 + $0x160] sm:$0xff]  ;;  %v6058_v39 = vld [vmem:[%s13260_s4 + $0x168] sm:$0xff]  ;;  %v497_v40 = vld [vmem:[%s13260_s4 + $0x70] sm:$0xff]  ;;  %s6548_s12 = sld [smem:[#allocation5 + $0x180]] }
  0x57   : > { %7108 = vmatpush3.msra.mxu0 %v8191_v6  ;;  %7032 = vmatprep.mubr.msk.f32.mxu0 %vm353_vm1, %v8196_v7  ;;  %v6059_v41 = vld [vmem:[%s13260_s4 + $0x170] sm:$0xff]  ;;  %v498_v42 = vld [vmem:[%s13260_s4 + $0x78] sm:$0xff]  ;;  %v499_v44 = vld [vmem:[%s13260_s4 + $0x80] sm:$0xff]  ;;  %s6572_s13 = sld [smem:[#allocation7 + $0x4]] }
  0x58   : > { %7044 = vmatpush3.msra.mxu1 %v8191_v6  ;;  %7109 = vmatprep.subr.mxu0 %v8200_v8  ;;  %v6060_v43 = vld [vmem:[%s13260_s4 + $0x178] sm:$0xff]  ;;  %v6061_v45 = vld [vmem:[%s13260_s4 + $0x180] sm:$0xff]  ;;  %v500_v46 = vld [vmem:[%s13260_s4 + $0x88] sm:$0xff]  ;;  %s6573_s18 = sld [smem:[#allocation5 + $0x200]] }
  0x59   : > { %7033 = vmatmul.mubr.msk.f32.gmra.mxu0 %vm353_vm1, %v8204_v9  ;;  %7045 = vmatprep.subr.mxu1 %v8200_v8  ;;  %v6062_v47 = vld [vmem:[%s13260_s4 + $0x188] sm:$0xff]  ;;  %v501_v48 = vld [vmem:[%s13260_s4 + $0x90] sm:$0xff]  ;;  %v502_v50 = vld [vmem:[%s13260_s4 + $0x98] sm:$0xff]  ;;  %s6597_s19 = sld [smem:[#allocation7 + $0x5]] }
  0x5a   : > { %7110 = vmatpush3.msra.mxu0 %v8200_v8  ;;  %7046 = vmatpush3.msra.mxu1 %v8200_v8  ;;  %v6063_v49 = vld [vmem:[%s13260_s4 + $0x190] sm:$0xff]  ;;  %v6064_v51 = vld [vmem:[%s13260_s4 + $0x198] sm:$0xff]  ;;  %v503_v52 = vld [vmem:[%s13260_s4 + $0xa0] sm:$0xff]  ;;  %s9758_s0 = sld [smem:[#allocation5 + $0x106]] }
  0x5b   : > { %7111 = vmatprep.subr.mxu0 %v8211_v10  ;;  %7047 = vmatprep.subr.mxu1 %v8211_v10  ;;  %v6065_v53 = vld [vmem:[%s13260_s4 + $0x1a0] sm:$0xff]  ;;  %v504_v54 = vld [vmem:[%s13260_s4 + $0xa8] sm:$0xff]  ;;  %v505_v56 = vld [vmem:[%s13260_s4 + $0xb0] sm:$0xff]  ;;  %s9850_s1 = sld [smem:[#allocation5 + $0x207]] }
  0x5c   : > { %7112 = vmatpush3.msra.mxu0 %v8211_v10  ;;  %7035 = vmatprep.mubr.msk.f32.mxu0 %vm353_vm1, %v8211_v10  ;;  %v6066_v55 = vld [vmem:[%s13260_s4 + $0x1a8] sm:$0xff]  ;;  %v6067_v57 = vld [vmem:[%s13260_s4 + $0x1b0] sm:$0xff]  ;;  %v506_v58 = vld [vmem:[%s13260_s4 + $0xb8] sm:$0xff] }
  0x5d   : > { %7048 = vmatpush3.msra.mxu1 %v8211_v10  ;;  %7113 = vmatprep.subr.mxu0 %v8204_v9  ;;  %v6068_v59 = vld [vmem:[%s13260_s4 + $0x1b8] sm:$0xff]  ;;  %v507_v60 = vld [vmem:[%s13260_s4 + $0xc0] sm:$0xff]  ;;  %v508_v62 = vld [vmem:[%s13260_s4 + $0xc8] sm:$0xff] }
  0x5e   : > { %7036 = vmatmul.mubr.msk.f32.gmra.mxu0 %vm353_vm1, %v8200_v8  ;;  %7049 = vmatprep.subr.mxu1 %v8204_v9  ;;  %v6069_v61 = vld [vmem:[%s13260_s4 + $0x1c0] sm:$0xff]  ;;  %v6070_v63 = vld [vmem:[%s13260_s4 + $0x1c8] sm:$0xff]  ;;  %v509_v0 = vld [vmem:[%s13260_s4 + $0xd0] sm:$0xff] }
  0x5f   : > { %7114 = vmatpush3.msra.mxu0 %v8204_v9  ;;  %7050 = vmatpush3.msra.mxu1 %v8204_v9  ;;  %v6071_v1 = vld [vmem:[%s13260_s4 + $0x1d0] sm:$0xff]  ;;  %v510_v2 = vld [vmem:[%s13260_s4 + $0xd8] sm:$0xff] }
  0x60   : > { %7115 = vmatprep.subr.mxu0 %v8196_v7  ;;  %7051 = vmatprep.subr.mxu1 %v8196_v7 }
  0x61   : > { %7116 = vmatpush3.msra.mxu0 %v8196_v7  ;;  %7038 = vmatprep.mubr.msk.f32.mxu0 %vm353_vm1, %v8191_v6 }
  0x62   : > { %7052 = vmatpush3.msra.mxu1 %v8196_v7  ;;  %7117 = vmatprep.subr.mxu0 %v8186_v5 }
  0x63   : > { %7039 = vmatmul.mubr.msk.f32.gmra.mxu0 %vm353_vm1, %v8184_v4  ;;  %7053 = vmatprep.subr.mxu1 %v8186_v5 }
  0x64   : > { %7118 = vmatpush3.msra.mxu0 %v8186_v5  ;;  %7054 = vmatpush3.msra.mxu1 %v8186_v5 }
  0x65   : > { %7119 = vmatprep.subr.mxu0 %v8182_v3  ;;  %7055 = vmatprep.subr.mxu1 %v8182_v3 }
  0x66   : > { %7120 = vmatpush3.msra.mxu0 %v8182_v3  ;;  %7056 = vmatpush3.msra.mxu1 %v8182_v3 }
  0x67   : > { %7121 = vmatprep.mubr.msk.f32.mxu0 %vm515_vm0, %v6045_v11  ;;  %7058 = vmatmul.mubr.msk.f32.vlgmr.msra.gmra.mxu1 %vm515_vm0, %v484_v12  ;;  %v6072_v11 = vld [vmem:[%s13260_s4 + $0x1d8] sm:$0xff]  ;;  %v511_v12 = vld [vmem:[%s13260_s4 + $0xe0] sm:$0xff] }
  0x68   : > { %7122 = vmatmul.mubr.msk.f32.vlgmr.msra.gmra.mxu0 %vm515_vm0, %v6046_v13  ;;  %7060 = vmatprep.mubr.msk.f32.mxu1 %vm515_vm0, %v485_v14  ;;  %v6073_v13 = vld [vmem:[%s13260_s4 + $0x1e0] sm:$0xff]  ;;  %v512_v14 = vld [vmem:[%s13260_s4 + $0xe8] sm:$0xff] }
  0x69   : > { %7124 = vmatprep.mubr.msk.f32.mxu0 %vm515_vm0, %v6047_v15  ;;  %7169 = vmatprep.subr.mxu1 %v6110_v16  ;;  %v6074_v15 = vld [vmem:[%s13260_s4 + $0x1e8] sm:$0xff] }
  0x6a   : > { %7170 = vmatpush3.msra.mxu1 %v6110_v16  ;;  %v513_v16 = vld [vmem:[%s13260_s4 + $0xf0] sm:$0xff] }
  0x6b   : > { %7061 = vmatmul.mubr.msk.f32.gmra.mxu1 %vm515_vm0, %v486_v17  ;;  %7171 = vmatprep.subr.mxu1 %v6109_v18  ;;  %v6075_v17 = vld [vmem:[%s13260_s4 + $0x1f0] sm:$0xff] }
  0x6c   : > { %7125 = vmatmul.mubr.msk.f32.gmra.mxu0 %vm515_vm0, %v6048_v19  ;;  %7063 = vmatprep.mubr.msk.f32.mxu1 %vm515_vm0, %v487_v20  ;;  %v6076_v19 = vld [vmem:[%s13260_s4 + $0x1f8] sm:$0xff]  ;;  %v838_v20 = vld [vmem:[%s13336_s2 + $0x8] sm:$0xff] }
  0x6d   : > { %7127 = vmatprep.mubr.msk.f32.mxu0 %vm515_vm0, %v6049_v21  ;;  %7172 = vmatpush3.msra.mxu1 %v6109_v18  ;;  %v514_v18 = vld [vmem:[%s13260_s4 + $0xf8] sm:$0xff]  ;;  %v837_v21 = vld [vmem:[%s13336_s2] sm:$0xff] }
  0x6e   : > { %7273 = vmatprep.subr.mxu1 %v8184_v4  ;;  %7221 = vmatprep.subr.mxu0 %v838_v20 }
  0x6f   : > { %7064 = vmatmul.mubr.msk.f32.gmra.mxu1 %vm515_vm0, %v488_v22  ;;  %7222 = vmatpush3.msra.mxu0 %v838_v20 }
  0x70   : > { %7128 = vmatmul.mubr.msk.f32.gmra.mxu0 %vm515_vm0, %v6050_v23  ;;  %7066 = vmatprep.mubr.msk.f32.mxu1 %vm515_vm0, %v489_v24 }
  0x71   : > { %7130 = vmatprep.mubr.msk.f32.mxu0 %vm515_vm0, %v6051_v25  ;;  %7223 = vmatprep.subr.mxu0 %v837_v21 }
  0x72   : > { %7224 = vmatpush3.msra.mxu0 %v837_v21 }
  0x73   : > { %7067 = vmatmul.mubr.msk.f32.gmra.mxu1 %vm515_vm0, %v490_v26 }
  0x74   : > { %7131 = vmatmul.mubr.msk.f32.gmra.mxu0 %vm515_vm0, %v6052_v27  ;;  %7069 = vmatprep.mubr.msk.f32.mxu1 %vm515_vm0, %v491_v28 }
  0x75   : > { %7133 = vmatprep.mubr.msk.f32.mxu0 %vm515_vm0, %v6053_v29 }
  0x77   : > { %7070 = vmatmul.mubr.msk.f32.gmra.mxu1 %vm515_vm0, %v492_v30 }
  0x78   : > { %7134 = vmatmul.mubr.msk.f32.gmra.mxu0 %vm515_vm0, %v6054_v31  ;;  %7072 = vmatprep.mubr.msk.f32.mxu1 %vm515_vm0, %v493_v32 }
  0x79   : > { %7136 = vmatprep.mubr.msk.f32.mxu0 %vm515_vm0, %v6055_v33 }
  0x7b   : > { %7073 = vmatmul.mubr.msk.f32.gmra.mxu1 %vm515_vm0, %v494_v34 }
  0x7c   : > { %7137 = vmatmul.mubr.msk.f32.gmra.mxu0 %vm515_vm0, %v6056_v35  ;;  %7075 = vmatprep.mubr.msk.f32.mxu1 %vm515_vm0, %v495_v36 }
  0x7d   : > { %7139 = vmatprep.mubr.msk.f32.mxu0 %vm515_vm0, %v6057_v37 }
  0x7f   : > { %7076 = vmatmul.mubr.msk.f32.gmra.mxu1 %vm515_vm0, %v496_v38 }
  0x80   : > { %7140 = vmatmul.mubr.msk.f32.gmra.mxu0 %vm515_vm0, %v6058_v39  ;;  %7078 = vmatprep.mubr.msk.f32.mxu1 %vm515_vm0, %v497_v40 }
  0x81   : > { %7142 = vmatprep.mubr.msk.f32.mxu0 %vm515_vm0, %v6059_v41 }
  0x83   : > { %7079 = vmatmul.mubr.msk.f32.gmra.mxu1 %vm515_vm0, %v498_v42 }
  0x84   : > { %7143 = vmatmul.mubr.msk.f32.gmra.mxu0 %vm515_vm0, %v6060_v43  ;;  %7081 = vmatprep.mubr.msk.f32.mxu1 %vm515_vm0, %v499_v44 }
  0x85   : > { %7145 = vmatprep.mubr.msk.f32.mxu0 %vm515_vm0, %v6061_v45 }
  0x87   : > { %7082 = vmatmul.mubr.msk.f32.gmra.mxu1 %vm515_vm0, %v500_v46 }
  0x88   : > { %7146 = vmatmul.mubr.msk.f32.gmra.mxu0 %vm515_vm0, %v6062_v47  ;;  %7084 = vmatprep.mubr.msk.f32.mxu1 %vm515_vm0, %v501_v48 }
  0x89   : > { %7148 = vmatprep.mubr.msk.f32.mxu0 %vm515_vm0, %v6063_v49 }
  0x8b   : > { %7085 = vmatmul.mubr.msk.f32.gmra.mxu1 %vm515_vm0, %v502_v50 }
  0x8c   : > { %7149 = vmatmul.mubr.msk.f32.gmra.mxu0 %vm515_vm0, %v6064_v51  ;;  %7087 = vmatprep.mubr.msk.f32.mxu1 %vm515_vm0, %v503_v52 }
  0x8d   : > { %7151 = vmatprep.mubr.msk.f32.mxu0 %vm515_vm0, %v6065_v53 }
  0x8f   : > { %7088 = vmatmul.mubr.msk.f32.gmra.mxu1 %vm515_vm0, %v504_v54 }
  0x90   : > { %7152 = vmatmul.mubr.msk.f32.gmra.mxu0 %vm515_vm0, %v6066_v55  ;;  %7090 = vmatprep.mubr.msk.f32.mxu1 %vm515_vm0, %v505_v56 }
  0x91   : > { %7154 = vmatprep.mubr.msk.f32.mxu0 %vm515_vm0, %v6067_v57 }
  0x93   : > { %7091 = vmatmul.mubr.msk.f32.gmra.mxu1 %vm515_vm0, %v506_v58 }
  0x94   : > { %7155 = vmatmul.mubr.msk.f32.gmra.mxu0 %vm515_vm0, %v6068_v59  ;;  %7093 = vmatprep.mubr.msk.f32.mxu1 %vm515_vm0, %v507_v60 }
  0x95   : > { %7157 = vmatprep.mubr.msk.f32.mxu0 %vm515_vm0, %v6069_v61 }
  0x97   : > { %7094 = vmatmul.mubr.msk.f32.gmra.mxu1 %vm515_vm0, %v508_v62 }
  0x98   : > { %7158 = vmatmul.mubr.msk.f32.gmra.mxu0 %vm515_vm0, %v6070_v63  ;;  %7096 = vmatprep.mubr.msk.f32.mxu1 %vm515_vm0, %v509_v0 }
  0x99   : > { %7160 = vmatprep.mubr.msk.f32.mxu0 %vm515_vm0, %v6071_v1 }
  0x9b   : > { %7097 = vmatmul.mubr.msk.f32.gmra.mxu1 %vm515_vm0, %v510_v2 }
  0x9c   : > { %7161 = vmatmul.mubr.msk.f32.gmra.mxu0 %vm515_vm0, %v6072_v11  ;;  %7099 = vmatprep.mubr.msk.f32.mxu1 %vm515_vm0, %v511_v12 }
  0x9d   : > { %7163 = vmatprep.mubr.msk.f32.mxu0 %vm515_vm0, %v6073_v13 }
  0x9f   : > { %7100 = vmatmul.mubr.msk.f32.gmra.mxu1 %vm515_vm0, %v512_v14 }
  0xa0   : > { %7164 = vmatmul.mubr.msk.f32.gmra.mxu0 %vm515_vm0, %v6074_v15  ;;  %7102 = vmatprep.mubr.msk.f32.mxu1 %vm515_vm0, %v513_v16 }
  0xa1   : > { %7166 = vmatprep.mubr.msk.f32.mxu0 %vm515_vm0, %v6075_v17 }
  0xa3   : > { %7103 = vmatmul.mubr.msk.f32.gmra.mxu1 %vm515_vm0, %v514_v18 }
  0xa4   : > { %7167 = vmatmul.mubr.msk.f32.gmra.mxu0 %vm515_vm0, %v6076_v19 }
 0x114   : > { %v8511_v22 = vpop.f32.mrf.mxu0 }
 0x116   : > { %v8513_v23 = vpop.f32.mrf.mxu0 }
 0x119   : > { %v8515_v24 = vpop.f32.mrf.mxu0 }
 0x11b   : > { %v8517_v25 = vpop.f32.mrf.mxu0 }
 0x11e   : > { %v8519_v26 = vpop.f32.mrf.mxu0 }
 0x120   : > { %v8521_v27 = vpop.f32.mrf.mxu0 }
 0x123   : > { %v8523_v28 = vpop.f32.mrf.mxu0 }
 0x125   : > { %v8525_v29 = vpop.f32.mrf.mxu0 }
 0x127   : > { %v7059_v30 = vpop.f32.mrf.mxu1 }
 0x128   : > { %v7123_v31 = vpop.f32.mrf.mxu0 }
 0x129   : > { %v678_v32 = vpop.f32.mrf.mxu1 }
 0x12a   : > { %v1034_v33 = vpop.f32.mrf.mxu0  ;;  %7225 = vmatprep.mubr.msk.f32.mxu0 %vm353_vm1, %v678_v32 }
 0x12b   : > { %7173 = vmatprep.mubr.msk.f32.mxu1 %vm353_vm1, %v1034_v33  ;;  %v7062_v34 = vpop.f32.mrf.mxu1  ;;  %7226 = vmatmul.mubr.msk.f32.vlgmr.msra.gmra.mxu0 %vm353_vm1, %v7059_v30 }
 0x12c   : > { %v7126_v35 = vpop.f32.mrf.mxu0  ;;  %7174 = vmatmul.mubr.msk.f32.vlgmr.msra.gmra.mxu1 %vm353_vm1, %v7123_v31 }
 0x12d   : > { %7274 = vmatpush3.msra.mxu1 %v8184_v4  ;;  %v688_v36 = vpop.f32.mrf.mxu1 }
 0x12e   : > { %v1044_v37 = vpop.f32.mrf.mxu0  ;;  %7228 = vmatprep.mubr.msk.f32.mxu0 %vm353_vm1, %v688_v36  ;;  %7275 = vmatprep.subr.mxu1 %v8191_v6 }
 0x12f   : > { %7176 = vmatprep.mubr.msk.f32.mxu1 %vm353_vm1, %v1044_v37  ;;  %v7065_v38 = vpop.f32.mrf.mxu1  ;;  %7229 = vmatmul.mubr.msk.f32.gmra.mxu0 %vm353_vm1, %v7062_v34 }
 0x130   : > { %v7129_v39 = vpop.f32.mrf.mxu0  ;;  %7177 = vmatmul.mubr.msk.f32.gmra.mxu1 %vm353_vm1, %v7126_v35 }
 0x131   : > { %v698_v40 = vpop.f32.mrf.mxu1  ;;  %7276 = vmatpush3.msra.mxu1 %v8191_v6 }
 0x132   : > { %v1054_v41 = vpop.f32.mrf.mxu0  ;;  %7231 = vmatprep.mubr.msk.f32.mxu0 %vm353_vm1, %v698_v40  ;;  %7277 = vmatprep.subr.mxu1 %v8200_v8 }
 0x133   : > { %7179 = vmatprep.mubr.msk.f32.mxu1 %vm353_vm1, %v1054_v41  ;;  %v7068_v42 = vpop.f32.mrf.mxu1  ;;  %7232 = vmatmul.mubr.msk.f32.gmra.mxu0 %vm353_vm1, %v7065_v38 }
 0x134   : > { %v7132_v43 = vpop.f32.mrf.mxu0  ;;  %7180 = vmatmul.mubr.msk.f32.gmra.mxu1 %vm353_vm1, %v7129_v39 }
 0x135   : > { %v708_v44 = vpop.f32.mrf.mxu1  ;;  %7278 = vmatpush3.msra.mxu1 %v8200_v8 }
 0x136   : > { %v1064_v45 = vpop.f32.mrf.mxu0  ;;  %7234 = vmatprep.mubr.msk.f32.mxu0 %vm353_vm1, %v708_v44  ;;  %7279 = vmatprep.subr.mxu1 %v8211_v10 }
 0x137   : > { %7182 = vmatprep.mubr.msk.f32.mxu1 %vm353_vm1, %v1064_v45  ;;  %v7071_v46 = vpop.f32.mrf.mxu1  ;;  %7235 = vmatmul.mubr.msk.f32.gmra.mxu0 %vm353_vm1, %v7068_v42 }
 0x138   : > { %v7135_v47 = vpop.f32.mrf.mxu0  ;;  %7183 = vmatmul.mubr.msk.f32.gmra.mxu1 %vm353_vm1, %v7132_v43 }
 0x139   : > { %v718_v48 = vpop.f32.mrf.mxu1  ;;  %7280 = vmatpush3.msra.mxu1 %v8211_v10 }
 0x13a   : > { %v1074_v49 = vpop.f32.mrf.mxu0  ;;  %7237 = vmatprep.mubr.msk.f32.mxu0 %vm353_vm1, %v718_v48  ;;  %7281 = vmatprep.subr.mxu1 %v8204_v9  ;;  %v6177_v48 = vld [vmem:[%s13260_s4 + $0x210] sm:$0xff] }
 0x13b   : > { %7185 = vmatprep.mubr.msk.f32.mxu1 %vm353_vm1, %v1074_v49  ;;  %v7074_v50 = vpop.f32.mrf.mxu1  ;;  %7238 = vmatmul.mubr.msk.f32.gmra.mxu0 %vm353_vm1, %v7071_v46  ;;  %v6175_v46 = vld [vmem:[%s13260_s4 + $0x200] sm:$0xff]  ;;  %v6178_v49 = vld [vmem:[%s13260_s4 + $0x218] sm:$0xff] }
 0x13c   : > { %v7138_v51 = vpop.f32.mrf.mxu0  ;;  %7186 = vmatmul.mubr.msk.f32.gmra.mxu1 %vm353_vm1, %v7135_v47  ;;  %v6176_v47 = vld [vmem:[%s13260_s4 + $0x208] sm:$0xff] }
 0x13d   : > { %v728_v52 = vpop.f32.mrf.mxu1  ;;  %7282 = vmatpush3.msra.mxu1 %v8204_v9 }
 0x13e   : > { %v1084_v53 = vpop.f32.mrf.mxu0  ;;  %7240 = vmatprep.mubr.msk.f32.mxu0 %vm353_vm1, %v728_v52  ;;  %7283 = vmatprep.subr.mxu1 %v8196_v7  ;;  %v6183_v52 = vld [vmem:[%s13260_s4 + $0x240] sm:$0xff] }
 0x13f   : > { %7188 = vmatprep.mubr.msk.f32.mxu1 %vm353_vm1, %v1084_v53  ;;  %v7077_v54 = vpop.f32.mrf.mxu1  ;;  %7241 = vmatmul.mubr.msk.f32.gmra.mxu0 %vm353_vm1, %v7074_v50  ;;  %v6179_v50 = vld [vmem:[%s13260_s4 + $0x220] sm:$0xff]  ;;  %v6189_v53 = vld [vmem:[%s13260_s4 + $0x270] sm:$0xff] }
 0x140   : > { %v7141_v55 = vpop.f32.mrf.mxu0  ;;  %7189 = vmatmul.mubr.msk.f32.gmra.mxu1 %vm353_vm1, %v7138_v51  ;;  %v6240_v51 = vld [vmem:[%s13336_s2 + $0x28] sm:$0xff] }
 0x141   : > { %v738_v56 = vpop.f32.mrf.mxu1  ;;  %7284 = vmatpush3.msra.mxu1 %v8196_v7  ;;  %7337 = vmatprep.subr.mxu0 %v6240_v51 }
 0x142   : > { %v1094_v57 = vpop.f32.mrf.mxu0  ;;  %7243 = vmatprep.mubr.msk.f32.mxu0 %vm353_vm1, %v738_v56  ;;  %7285 = vmatprep.subr.mxu1 %v8186_v5  ;;  %v6192_v56 = vld [vmem:[%s13260_s4 + $0x288] sm:$0xff] }
 0x143   : > { %7191 = vmatprep.mubr.msk.f32.mxu1 %vm353_vm1, %v1094_v57  ;;  %v7080_v58 = vpop.f32.mrf.mxu1  ;;  %7244 = vmatmul.mubr.msk.f32.gmra.mxu0 %vm353_vm1, %v7077_v54  ;;  %v6190_v54 = vld [vmem:[%s13260_s4 + $0x278] sm:$0xff]  ;;  %v6193_v57 = vld [vmem:[%s13260_s4 + $0x290] sm:$0xff] }
 0x144   : > { %v7144_v59 = vpop.f32.mrf.mxu0  ;;  %7192 = vmatmul.mubr.msk.f32.gmra.mxu1 %vm353_vm1, %v7141_v55  ;;  %7338 = vmatpush3.msra.mxu0 %v6240_v51  ;;  %v6191_v55 = vld [vmem:[%s13260_s4 + $0x280] sm:$0xff] }
 0x145   : > { %v748_v60 = vpop.f32.mrf.mxu1  ;;  %7286 = vmatpush3.msra.mxu1 %v8186_v5  ;;  %v6301_v51 = vld [vmem:[%s13260_s4 + $0x3e0] sm:$0xff] }
 0x146   : > { %v1104_v61 = vpop.f32.mrf.mxu0  ;;  %7246 = vmatprep.mubr.msk.f32.mxu0 %vm353_vm1, %v748_v60  ;;  %7287 = vmatprep.subr.mxu1 %v8182_v3  ;;  %v6239_v60 = vld [vmem:[%s13336_s2 + $0x20] sm:$0xff] }
 0x147   : > { %7194 = vmatprep.mubr.msk.f32.mxu1 %vm353_vm1, %v1104_v61  ;;  %v7083_v62 = vpop.f32.mrf.mxu1  ;;  %7247 = vmatmul.mubr.msk.f32.gmra.mxu0 %vm353_vm1, %v7080_v58  ;;  %v6194_v58 = vld [vmem:[%s13260_s4 + $0x298] sm:$0xff]  ;;  %v6196_v61 = vld [vmem:[%s13260_s4 + $0x2a8] sm:$0xff] }
 0x148   : > { %v7147_v63 = vpop.f32.mrf.mxu0  ;;  %7195 = vmatmul.mubr.msk.f32.gmra.mxu1 %vm353_vm1, %v7144_v59  ;;  %v6195_v59 = vld [vmem:[%s13260_s4 + $0x2a0] sm:$0xff]  ;;  %7339 = vmatprep.subr.mxu0 %v6239_v60 }
 0x149   : > { %v758_v0 = vpop.f32.mrf.mxu1  ;;  %7288 = vmatpush3.msra.mxu1 %v8182_v3  ;;  %7340 = vmatpush3.msra.mxu0 %v6239_v60 }
 0x14a   : > { %v1114_v1 = vpop.f32.mrf.mxu0  ;;  %7249 = vmatprep.mubr.msk.f32.mxu0 %vm353_vm1, %v758_v0  ;;  %7389 = vmatprep.subr.mxu1 %v8184_v4  ;;  %v6199_v0 = vld [vmem:[%s13260_s4 + $0x2c0] sm:$0xff] }
 0x14b   : > { %7197 = vmatprep.mubr.msk.f32.mxu1 %vm353_vm1, %v1114_v1  ;;  %v7086_v2 = vpop.f32.mrf.mxu1  ;;  %7250 = vmatmul.mubr.msk.f32.gmra.mxu0 %vm353_vm1, %v7083_v62  ;;  %v6197_v62 = vld [vmem:[%s13260_s4 + $0x2b0] sm:$0xff]  ;;  %v6200_v1 = vld [vmem:[%s13260_s4 + $0x2c8] sm:$0xff] }
 0x14c   : > { %v7150_v11 = vpop.f32.mrf.mxu0  ;;  %7198 = vmatmul.mubr.msk.f32.gmra.mxu1 %vm353_vm1, %v7147_v63  ;;  %v6198_v63 = vld [vmem:[%s13260_s4 + $0x2b8] sm:$0xff] }
 0x14d   : > { %v768_v12 = vpop.f32.mrf.mxu1 }
 0x14e   : > { %v1124_v13 = vpop.f32.mrf.mxu0  ;;  %7252 = vmatprep.mubr.msk.f32.mxu0 %vm353_vm1, %v768_v12  ;;  %v6203_v12 = vld [vmem:[%s13260_s4 + $0x2e0] sm:$0xff] }
 0x14f   : > { %7200 = vmatprep.mubr.msk.f32.mxu1 %vm353_vm1, %v1124_v13  ;;  %v7089_v14 = vpop.f32.mrf.mxu1  ;;  %7253 = vmatmul.mubr.msk.f32.gmra.mxu0 %vm353_vm1, %v7086_v2  ;;  %v6201_v2 = vld [vmem:[%s13260_s4 + $0x2d0] sm:$0xff]  ;;  %v6204_v13 = vld [vmem:[%s13260_s4 + $0x2e8] sm:$0xff] }
 0x150   : > { %v7153_v15 = vpop.f32.mrf.mxu0  ;;  %7201 = vmatmul.mubr.msk.f32.gmra.mxu1 %vm353_vm1, %v7150_v11  ;;  %v6202_v11 = vld [vmem:[%s13260_s4 + $0x2d8] sm:$0xff] }
 0x151   : > { %v778_v16 = vpop.f32.mrf.mxu1 }
 0x152   : > { %v1134_v17 = vpop.f32.mrf.mxu0  ;;  %7255 = vmatprep.mubr.msk.f32.mxu0 %vm353_vm1, %v778_v16  ;;  %v6273_v16 = vld [vmem:[%s13260_s4 + $0x300] sm:$0xff] }
 0x153   : > { %7203 = vmatprep.mubr.msk.f32.mxu1 %vm353_vm1, %v1134_v17  ;;  %v7092_v18 = vpop.f32.mrf.mxu1  ;;  %7256 = vmatmul.mubr.msk.f32.gmra.mxu0 %vm353_vm1, %v7089_v14  ;;  %v6205_v14 = vld [vmem:[%s13260_s4 + $0x2f0] sm:$0xff]  ;;  %v6274_v17 = vld [vmem:[%s13260_s4 + $0x308] sm:$0xff] }
 0x154   : > { %v7156_v19 = vpop.f32.mrf.mxu0  ;;  %7204 = vmatmul.mubr.msk.f32.gmra.mxu1 %vm353_vm1, %v7153_v15  ;;  %v6206_v15 = vld [vmem:[%s13260_s4 + $0x2f8] sm:$0xff] }
 0x155   : > { %v788_v20 = vpop.f32.mrf.mxu1 }
 0x156   : > { %v1144_v21 = vpop.f32.mrf.mxu0  ;;  %7258 = vmatprep.mubr.msk.f32.mxu0 %vm353_vm1, %v788_v20  ;;  %v6277_v20 = vld [vmem:[%s13260_s4 + $0x320] sm:$0xff] }
 0x157   : > { %7206 = vmatprep.mubr.msk.f32.mxu1 %vm353_vm1, %v1144_v21  ;;  %v7095_v30 = vpop.f32.mrf.mxu1  ;;  %7259 = vmatmul.mubr.msk.f32.gmra.mxu0 %vm353_vm1, %v7092_v18  ;;  %v6275_v18 = vld [vmem:[%s13260_s4 + $0x310] sm:$0xff]  ;;  %v8781_v21 = vld [vmem:[%s13336_s2 + $0x38] sm:$0xff] }
 0x158   : > { %v7159_v31 = vpop.f32.mrf.mxu0  ;;  %7207 = vmatmul.mubr.msk.f32.gmra.mxu1 %vm353_vm1, %v7156_v19  ;;  %v6276_v19 = vld [vmem:[%s13260_s4 + $0x318] sm:$0xff]  ;;  %7453 = vmatprep.subr.mxu0 %v8781_v21 }
 0x159   : > { %v798_v32 = vpop.f32.mrf.mxu1 }
 0x15a   : > { %v1154_v33 = vpop.f32.mrf.mxu0  ;;  %7261 = vmatprep.mubr.msk.f32.mxu0 %vm353_vm1, %v798_v32  ;;  %v6282_v32 = vld [vmem:[%s13260_s4 + $0x348] sm:$0xff] }
 0x15b   : > { %7209 = vmatprep.mubr.msk.f32.mxu1 %vm353_vm1, %v1154_v33  ;;  %v7098_v34 = vpop.f32.mrf.mxu1  ;;  %7262 = vmatmul.mubr.msk.f32.gmra.mxu0 %vm353_vm1, %v7095_v30  ;;  %v6280_v30 = vld [vmem:[%s13260_s4 + $0x338] sm:$0xff]  ;;  %v6283_v33 = vld [vmem:[%s13260_s4 + $0x350] sm:$0xff] }
 0x15c   : > { %v7162_v35 = vpop.f32.mrf.mxu0  ;;  %7210 = vmatmul.mubr.msk.f32.gmra.mxu1 %vm353_vm1, %v7159_v31  ;;  %v6281_v31 = vld [vmem:[%s13260_s4 + $0x340] sm:$0xff] }
 0x15d   : > { %v808_v36 = vpop.f32.mrf.mxu1 }
 0x15e   : > { %v1164_v37 = vpop.f32.mrf.mxu0  ;;  %7264 = vmatprep.mubr.msk.f32.mxu0 %vm353_vm1, %v808_v36  ;;  %v6286_v36 = vld [vmem:[%s13260_s4 + $0x368] sm:$0xff] }
 0x15f   : > { %7212 = vmatprep.mubr.msk.f32.mxu1 %vm353_vm1, %v1164_v37  ;;  %v7101_v38 = vpop.f32.mrf.mxu1  ;;  %7265 = vmatmul.mubr.msk.f32.gmra.mxu0 %vm353_vm1, %v7098_v34  ;;  %v6284_v34 = vld [vmem:[%s13260_s4 + $0x358] sm:$0xff]  ;;  %v6287_v37 = vld [vmem:[%s13260_s4 + $0x370] sm:$0xff] }
 0x160   : > { %v7165_v39 = vpop.f32.mrf.mxu0  ;;  %7213 = vmatmul.mubr.msk.f32.gmra.mxu1 %vm353_vm1, %v7162_v35  ;;  %v6285_v35 = vld [vmem:[%s13260_s4 + $0x360] sm:$0xff] }
 0x161   : > { %v818_v40 = vpop.f32.mrf.mxu1 }
 0x162   : > { %v1174_v41 = vpop.f32.mrf.mxu0  ;;  %7267 = vmatprep.mubr.msk.f32.mxu0 %vm353_vm1, %v818_v40  ;;  %v6290_v40 = vld [vmem:[%s13260_s4 + $0x388] sm:$0xff] }
 0x163   : > { %7215 = vmatprep.mubr.msk.f32.mxu1 %vm353_vm1, %v1174_v41  ;;  %v7104_v42 = vpop.f32.mrf.mxu1  ;;  %7268 = vmatmul.mubr.msk.f32.gmra.mxu0 %vm353_vm1, %v7101_v38  ;;  %v6288_v38 = vld [vmem:[%s13260_s4 + $0x378] sm:$0xff]  ;;  %v6291_v41 = vld [vmem:[%s13260_s4 + $0x390] sm:$0xff] }
 0x164   : > { %v7168_v43 = vpop.f32.mrf.mxu0  ;;  %7216 = vmatmul.mubr.msk.f32.gmra.mxu1 %vm353_vm1, %v7165_v39  ;;  %v6289_v39 = vld [vmem:[%s13260_s4 + $0x380] sm:$0xff] }
 0x165   : > { %v828_v44 = vpop.f32.mrf.mxu1 }
 0x166   : > { %v1184_v45 = vpop.f32.mrf.mxu0  ;;  %7270 = vmatprep.mubr.msk.f32.mxu0 %vm353_vm1, %v828_v44  ;;  %v6294_v44 = vld [vmem:[%s13260_s4 + $0x3a8] sm:$0xff] }
 0x167   : > { %7218 = vmatprep.mubr.msk.f32.mxu1 %vm353_vm1, %v1184_v45  ;;  %7271 = vmatmul.mubr.msk.f32.gmra.mxu0 %vm353_vm1, %v7104_v42  ;;  %v6292_v42 = vld [vmem:[%s13260_s4 + $0x398] sm:$0xff]  ;;  %v6295_v45 = vld [vmem:[%s13260_s4 + $0x3b0] sm:$0xff] }
 0x168   : > { %7219 = vmatmul.mubr.msk.f32.gmra.mxu1 %vm353_vm1, %v7168_v43  ;;  %v6293_v43 = vld [vmem:[%s13260_s4 + $0x3a0] sm:$0xff] }
 0x169   : > { %7289 = vmatprep.mubr.msk.f32.mxu1 %vm515_vm0, %v6175_v46  ;;  %v6296_v46 = vld [vmem:[%s13260_s4 + $0x3b8] sm:$0xff] }
 0x16c   : > { %7290 = vmatmul.mubr.msk.f32.vlgmr.msra.gmra.mxu1 %vm515_vm0, %v6176_v47  ;;  %v6297_v47 = vld [vmem:[%s13260_s4 + $0x3c0] sm:$0xff] }
 0x16d   : > { %7390 = vmatpush3.msra.mxu1 %v8184_v4  ;;  %7292 = vmatprep.mubr.msk.f32.mxu1 %vm515_vm0, %v6177_v48  ;;  %v6180_v4 = vld [vmem:[%s13260_s4 + $0x228] sm:$0xff] }
 0x16e   : > { %7391 = vmatprep.subr.mxu1 %v8191_v6  ;;  %v6298_v48 = vld [vmem:[%s13260_s4 + $0x3c8] sm:$0xff] }
 0x16f   : > { %7392 = vmatpush3.msra.mxu1 %v8191_v6  ;;  %v6181_v6 = vld [vmem:[%s13260_s4 + $0x230] sm:$0xff] }
 0x170   : > { %7393 = vmatprep.subr.mxu1 %v8200_v8  ;;  %7293 = vmatmul.mubr.msk.f32.gmra.mxu1 %vm515_vm0, %v6178_v49  ;;  %v6299_v49 = vld [vmem:[%s13260_s4 + $0x3d0] sm:$0xff] }
 0x171   : > { %7394 = vmatpush3.msra.mxu1 %v8200_v8  ;;  %7295 = vmatprep.mubr.msk.f32.mxu1 %vm515_vm0, %v6179_v50  ;;  %v6182_v8 = vld [vmem:[%s13260_s4 + $0x238] sm:$0xff] }
 0x172   : > { %7395 = vmatprep.subr.mxu1 %v8211_v10  ;;  %v6300_v50 = vld [vmem:[%s13260_s4 + $0x3d8] sm:$0xff] }
 0x173   : > { %7396 = vmatpush3.msra.mxu1 %v8211_v10  ;;  %v6185_v10 = vld [vmem:[%s13260_s4 + $0x250] sm:$0xff] }
 0x174   : > { %7397 = vmatprep.subr.mxu1 %v8204_v9  ;;  %7296 = vmatmul.mubr.msk.f32.gmra.mxu1 %vm515_vm0, %v6180_v4  ;;  %v6302_v4 = vld [vmem:[%s13260_s4 + $0x3e8] sm:$0xff] }
 0x175   : > { %7398 = vmatpush3.msra.mxu1 %v8204_v9  ;;  %7298 = vmatprep.mubr.msk.f32.mxu1 %vm515_vm0, %v6181_v6  ;;  %v6184_v9 = vld [vmem:[%s13260_s4 + $0x248] sm:$0xff]  ;;  %v6303_v6 = vld [vmem:[%s13260_s4 + $0x3f0] sm:$0xff] }
 0x176   : > { %7399 = vmatprep.subr.mxu1 %v8196_v7 }
 0x177   : > { %7400 = vmatpush3.msra.mxu1 %v8196_v7  ;;  %v6187_v7 = vld [vmem:[%s13260_s4 + $0x260] sm:$0xff] }
 0x178   : > { %7401 = vmatprep.subr.mxu1 %v8186_v5  ;;  %7299 = vmatmul.mubr.msk.f32.gmra.mxu1 %vm515_vm0, %v6182_v8  ;;  %v6304_v8 = vld [vmem:[%s13260_s4 + $0x3f8] sm:$0xff] }
 0x179   : > { %7402 = vmatpush3.msra.mxu1 %v8186_v5  ;;  %7301 = vmatprep.mubr.msk.f32.mxu1 %vm515_vm0, %v6183_v52  ;;  %v6186_v5 = vld [vmem:[%s13260_s4 + $0x258] sm:$0xff]  ;;  %v8897_v52 = vld [vmem:[%s13259_s3] sm:$0xff] }
 0x17a   : > { %7403 = vmatprep.subr.mxu1 %v8182_v3 }
 0x17b   : > { %7404 = vmatpush3.msra.mxu1 %v8182_v3  ;;  %v6188_v3 = vld [vmem:[%s13260_s4 + $0x268] sm:$0xff] }
 0x17c   : > { %7505 = vmatprep.subr.mxu1 %v8511_v22  ;;  %7302 = vmatmul.mubr.msk.f32.gmra.mxu1 %vm515_vm0, %v6184_v9  ;;  %v8905_v9 = vld [vmem:[%s13259_s3 + $0x8] sm:$0xff] }
 0x17d   : > { %7304 = vmatprep.mubr.msk.f32.mxu1 %vm515_vm0, %v6185_v10 }
 0x180   : > { %7305 = vmatmul.mubr.msk.f32.gmra.mxu1 %vm515_vm0, %v6186_v5 }
 0x181   : > { %7307 = vmatprep.mubr.msk.f32.mxu1 %vm515_vm0, %v6187_v7 }
 0x184   : > { %7308 = vmatmul.mubr.msk.f32.gmra.mxu1 %vm515_vm0, %v6188_v3 }
 0x185   : > { %7310 = vmatprep.mubr.msk.f32.mxu1 %vm515_vm0, %v6189_v53 }
 0x188   : > { %7311 = vmatmul.mubr.msk.f32.gmra.mxu1 %vm515_vm0, %v6190_v54 }
 0x189   : > { %7313 = vmatprep.mubr.msk.f32.mxu1 %vm515_vm0, %v6191_v55 }
 0x18c   : > { %7314 = vmatmul.mubr.msk.f32.gmra.mxu1 %vm515_vm0, %v6192_v56 }
 0x18d   : > { %7316 = vmatprep.mubr.msk.f32.mxu1 %vm515_vm0, %v6193_v57 }
 0x190   : > { %7317 = vmatmul.mubr.msk.f32.gmra.mxu1 %vm515_vm0, %v6194_v58 }
 0x191   : > { %7319 = vmatprep.mubr.msk.f32.mxu1 %vm515_vm0, %v6195_v59 }
 0x194   : > { %7320 = vmatmul.mubr.msk.f32.gmra.mxu1 %vm515_vm0, %v6196_v61 }
 0x195   : > { %7322 = vmatprep.mubr.msk.f32.mxu1 %vm515_vm0, %v6197_v62 }
 0x198   : > { %7323 = vmatmul.mubr.msk.f32.gmra.mxu1 %vm515_vm0, %v6198_v63 }
 0x199   : > { %7325 = vmatprep.mubr.msk.f32.mxu1 %vm515_vm0, %v6199_v0 }
 0x19c   : > { %7326 = vmatmul.mubr.msk.f32.gmra.mxu1 %vm515_vm0, %v6200_v1 }
 0x19d   : > { %7328 = vmatprep.mubr.msk.f32.mxu1 %vm515_vm0, %v6201_v2 }
 0x1a0   : > { %7329 = vmatmul.mubr.msk.f32.gmra.mxu1 %vm515_vm0, %v6202_v11 }
 0x1a1   : > { %7331 = vmatprep.mubr.msk.f32.mxu1 %vm515_vm0, %v6203_v12  ;;  %v8941_v12 = vld [vmem:[%s13259_s3 + $0x20] sm:$0xff] }
 0x1a4   : > { %7332 = vmatmul.mubr.msk.f32.gmra.mxu1 %vm515_vm0, %v6204_v13 }
 0x1a5   : > { %7334 = vmatprep.mubr.msk.f32.mxu1 %vm515_vm0, %v6205_v14  ;;  %v8948_v14 = vld [vmem:[%s13259_s3 + $0x28] sm:$0xff] }
 0x1a8   : > { %7335 = vmatmul.mubr.msk.f32.gmra.mxu1 %vm515_vm0, %v6206_v15 }
 0x1a9   : > { %7405 = vmatprep.mubr.msk.f32.mxu1 %vm515_vm0, %v6273_v16 }
 0x1ac   : > { %7406 = vmatmul.mubr.msk.f32.vlgmr.msra.gmra.mxu1 %vm515_vm0, %v6274_v17 }
 0x1ad   : > { %7506 = vmatpush3.msra.mxu1 %v8511_v22  ;;  %7408 = vmatprep.mubr.msk.f32.mxu1 %vm515_vm0, %v6275_v18  ;;  %v6278_v22 = vld [vmem:[%s13260_s4 + $0x328] sm:$0xff] }
 0x1ae   : > { %7507 = vmatprep.subr.mxu1 %v8513_v23 }
 0x1af   : > { %7508 = vmatpush3.msra.mxu1 %v8513_v23  ;;  %v6279_v23 = vld [vmem:[%s13260_s4 + $0x330] sm:$0xff] }
 0x1b0   : > { %7537 = vmatprep.subr.mxu1 %v8519_v26  ;;  %7409 = vmatmul.mubr.msk.f32.gmra.mxu1 %vm515_vm0, %v6276_v19 }
 0x1b1   : > { %7411 = vmatprep.mubr.msk.f32.mxu1 %vm515_vm0, %v6277_v20  ;;  %v8959_v20 = vld [vmem:[%s13259_s3 + $0x30] sm:$0xff] }
 0x1b4   : > { %7412 = vmatmul.mubr.msk.f32.gmra.mxu1 %vm515_vm0, %v6278_v22 }
 0x1b5   : > { %7414 = vmatprep.mubr.msk.f32.mxu1 %vm515_vm0, %v6279_v23  ;;  %v8966_v23 = vld [vmem:[%s13259_s3 + $0x38] sm:$0xff] }
 0x1b8   : > { %7415 = vmatmul.mubr.msk.f32.gmra.mxu1 %vm515_vm0, %v6280_v30 }
 0x1b9   : > { %7417 = vmatprep.mubr.msk.f32.mxu1 %vm515_vm0, %v6281_v31 }
 0x1bc   : > { %7418 = vmatmul.mubr.msk.f32.gmra.mxu1 %vm515_vm0, %v6282_v32 }
 0x1bd   : > { %7420 = vmatprep.mubr.msk.f32.mxu1 %vm515_vm0, %v6283_v33 }
 0x1c0   : > { %7421 = vmatmul.mubr.msk.f32.gmra.mxu1 %vm515_vm0, %v6284_v34 }
 0x1c1   : > { %7423 = vmatprep.mubr.msk.f32.mxu1 %vm515_vm0, %v6285_v35 }
 0x1c4   : > { %7424 = vmatmul.mubr.msk.f32.gmra.mxu1 %vm515_vm0, %v6286_v36 }
 0x1c5   : > { %7426 = vmatprep.mubr.msk.f32.mxu1 %vm515_vm0, %v6287_v37 }
 0x1c8   : > { %7427 = vmatmul.mubr.msk.f32.gmra.mxu1 %vm515_vm0, %v6288_v38 }
 0x1c9   : > { %7429 = vmatprep.mubr.msk.f32.mxu1 %vm515_vm0, %v6289_v39 }
 0x1cc   : > { %7430 = vmatmul.mubr.msk.f32.gmra.mxu1 %vm515_vm0, %v6290_v40 }
 0x1cd   : > { %7432 = vmatprep.mubr.msk.f32.mxu1 %vm515_vm0, %v6291_v41 }
 0x1d0   : > { %7433 = vmatmul.mubr.msk.f32.gmra.mxu1 %vm515_vm0, %v6292_v42 }
 0x1d1   : > { %7435 = vmatprep.mubr.msk.f32.mxu1 %vm515_vm0, %v6293_v43 }
 0x1d4   : > { %7436 = vmatmul.mubr.msk.f32.gmra.mxu1 %vm515_vm0, %v6294_v44 }
 0x1d5   : > { %7438 = vmatprep.mubr.msk.f32.mxu1 %vm515_vm0, %v6295_v45 }
 0x1d8   : > { %7439 = vmatmul.mubr.msk.f32.gmra.mxu1 %vm515_vm0, %v6296_v46 }
 0x1d9   : > { %7441 = vmatprep.mubr.msk.f32.mxu1 %vm515_vm0, %v6297_v47 }
 0x1dc   : > { %7442 = vmatmul.mubr.msk.f32.gmra.mxu1 %vm515_vm0, %v6298_v48 }
 0x1dd   : > { %7444 = vmatprep.mubr.msk.f32.mxu1 %vm515_vm0, %v6299_v49 }
 0x1e0   : > { %7445 = vmatmul.mubr.msk.f32.gmra.mxu1 %vm515_vm0, %v6300_v50 }
 0x1e1   : > { %7447 = vmatprep.mubr.msk.f32.mxu1 %vm515_vm0, %v6301_v51 }
 0x1e4   : > { %7448 = vmatmul.mubr.msk.f32.gmra.mxu1 %vm515_vm0, %v6302_v4 }
 0x1e5   : > { %7450 = vmatprep.mubr.msk.f32.mxu1 %vm515_vm0, %v6303_v6 }
 0x1e8   : > { %7451 = vmatmul.mubr.msk.f32.gmra.mxu1 %vm515_vm0, %v6304_v8 }
 0x1e9   : > { %7509 = vmatprep.mubr.msk.f32.mxu1 %vm353_vm1, %v8897_v52 }
 0x1eb   : > { %v7227_v10 = vpop.f32.mrf.mxu0 }
 0x1ec   : > { %v7175_v5 = vpop.f32.mrf.mxu1  ;;  %7510 = vmatmul.mubr.msk.f32.vlgmr.msra.gmra.mxu1 %vm353_vm1, %v8905_v9 }
 0x1ed   : > { %v8909_v7 = vadd.f32 %v7227_v10, %v7175_v5  ;;  %7538 = vmatpush3.msra.mxu1 %v8519_v26  ;;  %v1679_v3 = vpop.f32.mrf.mxu0  ;;  %v8923_v26 = vld [vmem:[%s13259_s3 + $0x10] sm:$0xff] }
 0x1ee   : > { %7539 = vmatprep.subr.mxu1 %v8521_v27  ;;  %v1358_v53 = vpop.f32.mrf.mxu1  ;;  %7512 = vmatprep.mubr.msk.f32.mxu1 %vm353_vm1, %v8923_v26 }
 0x1ef   : > { %v8913_v54 = vadd.f32 %v1679_v3, %v1358_v53  ;;  %7540 = vmatpush3.msra.mxu1 %v8521_v27  ;;  %v7230_v55 = vpop.f32.mrf.mxu0  ;;  %v8930_v27 = vld [vmem:[%s13259_s3 + $0x18] sm:$0xff] }
 0x1f0   : > { %v7178_v56 = vpop.f32.mrf.mxu1  ;;  %7513 = vmatmul.mubr.msk.f32.gmra.mxu1 %vm353_vm1, %v8930_v27 }
 0x1f1   : > { %v8916_v57 = vadd.f32 %v7230_v55, %v7178_v56  ;;  %v1689_v58 = vpop.f32.mrf.mxu0  ;;  %7515 = vmatprep.mubr.msk.f32.mxu1 %vm353_vm1, %v8941_v12 }
 0x1f2   : > { %v1368_v59 = vpop.f32.mrf.mxu1 }
 0x1f3   : > { %v8918_v60 = vadd.f32 %v1689_v58, %v1368_v59  ;;  %v7233_v61 = vpop.f32.mrf.mxu0 }
 0x1f4   : > { %v7181_v62 = vpop.f32.mrf.mxu1  ;;  %7516 = vmatmul.mubr.msk.f32.gmra.mxu1 %vm353_vm1, %v8948_v14 }
 0x1f5   : > { %v8932_v63 = vadd.f32 %v7233_v61, %v7181_v62  ;;  %v1699_v0 = vpop.f32.mrf.mxu0  ;;  %7518 = vmatprep.mubr.msk.f32.mxu1 %vm353_vm1, %v8959_v20 }
 0x1f6   : > { %v1378_v1 = vpop.f32.mrf.mxu1 }
 0x1f7   : > { %v8936_v2 = vadd.f32 %v1699_v0, %v1378_v1  ;;  %v7236_v11 = vpop.f32.mrf.mxu0 }
 0x1f8   : > { %v7184_v13 = vpop.f32.mrf.mxu1  ;;  %7519 = vmatmul.mubr.msk.f32.gmra.mxu1 %vm353_vm1, %v8966_v23 }
 0x1f9   : > { %v8950_v15 = vadd.f32 %v7236_v11, %v7184_v13  ;;  %v1709_v16 = vpop.f32.mrf.mxu0  ;;  %7541 = vmatprep.mubr.msk.f32.mxu1 %vm353_vm1, %v8897_v52 }
 0x1fa   : > { %v1388_v17 = vpop.f32.mrf.mxu1 }
 0x1fb   : > { %v8954_v18 = vadd.f32 %v1709_v16, %v1388_v17  ;;  %v7239_v19 = vpop.f32.mrf.mxu0 }
 0x1fc   : > { %v7187_v22 = vpop.f32.mrf.mxu1  ;;  %7542 = vmatmul.mubr.msk.f32.vlgmr.msra.gmra.mxu1 %vm353_vm1, %v8905_v9 }
 0x1fd   : > { %v8968_v30 = vadd.f32 %v7239_v19, %v7187_v22  ;;  %v1719_v31 = vpop.f32.mrf.mxu0  ;;  %7544 = vmatprep.mubr.msk.f32.mxu1 %vm353_vm1, %v8923_v26 }
 0x1fe   : > { %v1398_v32 = vpop.f32.mrf.mxu1 }
 0x1ff   : > { %v8974_v33 = vadd.f32 %v1719_v31, %v1398_v32  ;;  %v7242_v34 = vpop.f32.mrf.mxu0 }
 0x200   : > { %v7190_v35 = vpop.f32.mrf.mxu1  ;;  %7545 = vmatmul.mubr.msk.f32.gmra.mxu1 %vm353_vm1, %v8930_v27 }
 0x201   : > { %v8976_v36 = vadd.f32 %v7242_v34, %v7190_v35  ;;  %v1729_v37 = vpop.f32.mrf.mxu0  ;;  %7547 = vmatprep.mubr.msk.f32.mxu1 %vm353_vm1, %v8941_v12 }
 0x202   : > { %v1408_v38 = vpop.f32.mrf.mxu1 }
 0x203   : > { %v8982_v39 = vadd.f32 %v1729_v37, %v1408_v38  ;;  %v7245_v40 = vpop.f32.mrf.mxu0 }
 0x204   : > { %v7193_v41 = vpop.f32.mrf.mxu1  ;;  %7548 = vmatmul.mubr.msk.f32.gmra.mxu1 %vm353_vm1, %v8948_v14 }
 0x205   : > { %v8984_v42 = vadd.f32 %v7245_v40, %v7193_v41  ;;  %v1739_v43 = vpop.f32.mrf.mxu0  ;;  %7550 = vmatprep.mubr.msk.f32.mxu1 %vm353_vm1, %v8959_v20 }
 0x206   : > { %v1418_v44 = vpop.f32.mrf.mxu1 }
 0x207   : > { %v8990_v45 = vadd.f32 %v1739_v43, %v1418_v44  ;;  %v7248_v46 = vpop.f32.mrf.mxu0 }
 0x208   : > { %v7196_v47 = vpop.f32.mrf.mxu1  ;;  %7551 = vmatmul.mubr.msk.f32.gmra.mxu1 %vm353_vm1, %v8966_v23 }
 0x209   : > { %v8992_v48 = vadd.f32 %v7248_v46, %v7196_v47  ;;  %v1749_v49 = vpop.f32.mrf.mxu0 }
 0x20a   : > { %v1428_v50 = vpop.f32.mrf.mxu1 }
 0x20b   : > { %v8998_v51 = vadd.f32 %v1749_v49, %v1428_v50  ;;  %v7251_v4 = vpop.f32.mrf.mxu0 }
 0x20c   : > { %v7199_v6 = vpop.f32.mrf.mxu1 }
 0x20d   : > { %v9000_v8 = vadd.f32 %v7251_v4, %v7199_v6  ;;  %v1759_v10 = vpop.f32.mrf.mxu0 }
 0x20e   : > { %v1438_v5 = vpop.f32.mrf.mxu1 }
 0x20f   : > { %v9004_v3 = vadd.f32 %v1759_v10, %v1438_v5  ;;  %v7254_v53 = vpop.f32.mrf.mxu0 }
 0x210   : > { %v7202_v55 = vpop.f32.mrf.mxu1 }
 0x211   : > { %v9006_v56 = vadd.f32 %v7254_v53, %v7202_v55  ;;  %v1769_v58 = vpop.f32.mrf.mxu0 }
 0x212   : > { %v1448_v59 = vpop.f32.mrf.mxu1 }
 0x213   : > { %v9008_v61 = vadd.f32 %v1769_v58, %v1448_v59  ;;  %v7257_v62 = vpop.f32.mrf.mxu0 }
 0x214   : > { %v7205_v0 = vpop.f32.mrf.mxu1 }
 0x215   : > { %v9010_v1 = vadd.f32 %v7257_v62, %v7205_v0  ;;  %v1779_v11 = vpop.f32.mrf.mxu0 }
 0x216   : > { %v1458_v13 = vpop.f32.mrf.mxu1 }
 0x217   : > { %v9012_v16 = vadd.f32 %v1779_v11, %v1458_v13  ;;  %v7260_v17 = vpop.f32.mrf.mxu0 }
 0x218   : > { %v7208_v19 = vpop.f32.mrf.mxu1 }
 0x219   : > { %v9014_v22 = vadd.f32 %v7260_v17, %v7208_v19  ;;  %v1789_v31 = vpop.f32.mrf.mxu0  ;;  %v6337_v19 = vld [vmem:[%s13336_s2 + $0x30] sm:$0xff]  ;;  %s9859_s2 = sld [smem:[#allocation5 + $0x287]] }
 0x21a   : > { %v1468_v32 = vpop.f32.mrf.mxu1 }
 0x21b   : > { %v9016_v34 = vadd.f32 %v1789_v31, %v1468_v32  ;;  %v7263_v35 = vpop.f32.mrf.mxu0 }
 0x21c   : > { %v7211_v37 = vpop.f32.mrf.mxu1 }
 0x21d   : > { %13337 = vst [vmem:[#allocation12_spill] sm:$0xff] %v9016_v34  ;;  %v9018_v38 = vadd.f32 %v7263_v35, %v7211_v37  ;;  %v1799_v40 = vpop.f32.mrf.mxu0 }
 0x21e   : > { %v1478_v41 = vpop.f32.mrf.mxu1 }
 0x21f   : > { %13338 = vst [vmem:[#allocation13_spill] sm:$0xff] %v9018_v38  ;;  %v9020_v43 = vadd.f32 %v1799_v40, %v1478_v41  ;;  %v7266_v44 = vpop.f32.mrf.mxu0 }
 0x220   : > { %v7214_v46 = vpop.f32.mrf.mxu1 }
 0x221   : > { %13339 = vst [vmem:[#allocation14_spill] sm:$0xff] %v9020_v43  ;;  %v9022_v47 = vadd.f32 %v7266_v44, %v7214_v46  ;;  %v1809_v49 = vpop.f32.mrf.mxu0 }
 0x222   : > { %v1488_v50 = vpop.f32.mrf.mxu1 }
 0x223   : > { %13340 = vst [vmem:[#allocation15_spill] sm:$0xff] %v9022_v47  ;;  %v9024_v4 = vadd.f32 %v1809_v49, %v1488_v50  ;;  %v7269_v6 = vpop.f32.mrf.mxu0 }
 0x224   : > { %v7217_v10 = vpop.f32.mrf.mxu1 }
 0x225   : > { %13341 = vst [vmem:[#allocation16_spill] sm:$0xff] %v9024_v4  ;;  %v9026_v5 = vadd.f32 %v7269_v6, %v7217_v10  ;;  %v1819_v53 = vpop.f32.mrf.mxu0 }
 0x226   : > { %v1498_v55 = vpop.f32.mrf.mxu1 }
 0x227   : > { %13342 = vst [vmem:[#allocation17_spill] sm:$0xff] %v9026_v5  ;;  %v9028_v58 = vadd.f32 %v1819_v53, %v1498_v55  ;;  %v7272_v59 = vpop.f32.mrf.mxu0 }
 0x228   : > { %v7220_v62 = vpop.f32.mrf.mxu1 }
 0x229   : > { %13343 = vst [vmem:[#allocation18_spill] sm:$0xff] %v9028_v58  ;;  %v9030_v0 = vadd.f32 %v7272_v59, %v7220_v62 }
 0x22a   : > { %v9032_v11 = vpop.f32.mrf.mxu1 }
 0x22b   : > { %13344 = vst [vmem:[#allocation19_spill] sm:$0xff] %v9030_v0  ;;  %13345 = vst [vmem:[#allocation20_spill] sm:$0xff] %v9032_v11 }
 0x22c   : > { %v7291_v13 = vpop.f32.mrf.mxu1 }
 0x22e   : > { %v2033_v17 = vpop.f32.mrf.mxu1 }
 0x22f   : > { %7341 = vmatprep.mubr.msk.f32.mxu0 %vm353_vm1, %v2033_v17 }
 0x230   : > { %v7294_v31 = vpop.f32.mrf.mxu1  ;;  %7342 = vmatmul.mubr.msk.f32.vlgmr.msra.gmra.mxu0 %vm353_vm1, %v7291_v13 }
 0x231   : > { %7454 = vmatpush3.msra.mxu0 %v8781_v21 }
 0x232   : > { %7455 = vmatprep.subr.mxu0 %v6337_v19  ;;  %v2043_v32 = vpop.f32.mrf.mxu1 }
 0x233   : > { %7456 = vmatpush3.msra.mxu0 %v6337_v19  ;;  %7344 = vmatprep.mubr.msk.f32.mxu0 %vm353_vm1, %v2043_v32 }
 0x234   : > { %7521 = vmatprep.subr.mxu0 %v8515_v24  ;;  %v7297_v35 = vpop.f32.mrf.mxu1  ;;  %7345 = vmatmul.mubr.msk.f32.gmra.mxu0 %vm353_vm1, %v7294_v31 }
 0x236   : > { %v2053_v37 = vpop.f32.mrf.mxu1 }
 0x237   : > { %7347 = vmatprep.mubr.msk.f32.mxu0 %vm353_vm1, %v2053_v37 }
 0x238   : > { %v7300_v40 = vpop.f32.mrf.mxu1  ;;  %7348 = vmatmul.mubr.msk.f32.gmra.mxu0 %vm353_vm1, %v7297_v35 }
 0x23a   : > { %v2063_v41 = vpop.f32.mrf.mxu1 }
 0x23b   : > { %7350 = vmatprep.mubr.msk.f32.mxu0 %vm353_vm1, %v2063_v41 }
 0x23c   : > { %v7303_v21 = vpop.f32.mrf.mxu1  ;;  %7351 = vmatmul.mubr.msk.f32.gmra.mxu0 %vm353_vm1, %v7300_v40 }
 0x23e   : > { %v2073_v44 = vpop.f32.mrf.mxu1 }
 0x23f   : > { %7353 = vmatprep.mubr.msk.f32.mxu0 %vm353_vm1, %v2073_v44 }
 0x240   : > { %v7306_v46 = vpop.f32.mrf.mxu1  ;;  %7354 = vmatmul.mubr.msk.f32.gmra.mxu0 %vm353_vm1, %v7303_v21 }
 0x242   : > { %v2083_v49 = vpop.f32.mrf.mxu1 }
 0x243   : > { %7356 = vmatprep.mubr.msk.f32.mxu0 %vm353_vm1, %v2083_v49 }
 0x244   : > { %v7309_v50 = vpop.f32.mrf.mxu1  ;;  %7357 = vmatmul.mubr.msk.f32.gmra.mxu0 %vm353_vm1, %v7306_v46 }
 0x246   : > { %v2093_v6 = vpop.f32.mrf.mxu1 }
 0x247   : > { %7359 = vmatprep.mubr.msk.f32.mxu0 %vm353_vm1, %v2093_v6 }
 0x248   : > { %v7312_v10 = vpop.f32.mrf.mxu1  ;;  %7360 = vmatmul.mubr.msk.f32.gmra.mxu0 %vm353_vm1, %v7309_v50 }
 0x24a   : > { %v2103_v53 = vpop.f32.mrf.mxu1 }
 0x24b   : > { %7362 = vmatprep.mubr.msk.f32.mxu0 %vm353_vm1, %v2103_v53 }
 0x24c   : > { %v7315_v55 = vpop.f32.mrf.mxu1  ;;  %7363 = vmatmul.mubr.msk.f32.gmra.mxu0 %vm353_vm1, %v7312_v10 }
 0x24e   : > { %v2113_v59 = vpop.f32.mrf.mxu1 }
 0x24f   : > { %7365 = vmatprep.mubr.msk.f32.mxu0 %vm353_vm1, %v2113_v59 }
 0x250   : > { %v7318_v62 = vpop.f32.mrf.mxu1  ;;  %7366 = vmatmul.mubr.msk.f32.gmra.mxu0 %vm353_vm1, %v7315_v55 }
 0x252   : > { %v2123_v13 = vpop.f32.mrf.mxu1 }
 0x253   : > { %7368 = vmatprep.mubr.msk.f32.mxu0 %vm353_vm1, %v2123_v13 }
 0x254   : > { %v7321_v17 = vpop.f32.mrf.mxu1  ;;  %7369 = vmatmul.mubr.msk.f32.gmra.mxu0 %vm353_vm1, %v7318_v62 }
 0x256   : > { %v2133_v19 = vpop.f32.mrf.mxu1 }
 0x257   : > { %7371 = vmatprep.mubr.msk.f32.mxu0 %vm353_vm1, %v2133_v19 }
 0x258   : > { %v7324_v31 = vpop.f32.mrf.mxu1  ;;  %7372 = vmatmul.mubr.msk.f32.gmra.mxu0 %vm353_vm1, %v7321_v17 }
 0x25a   : > { %v2143_v32 = vpop.f32.mrf.mxu1 }
 0x25b   : > { %7374 = vmatprep.mubr.msk.f32.mxu0 %vm353_vm1, %v2143_v32 }
 0x25c   : > { %v7327_v35 = vpop.f32.mrf.mxu1  ;;  %7375 = vmatmul.mubr.msk.f32.gmra.mxu0 %vm353_vm1, %v7324_v31 }
 0x25e   : > { %v2153_v37 = vpop.f32.mrf.mxu1 }
 0x25f   : > { %7377 = vmatprep.mubr.msk.f32.mxu0 %vm353_vm1, %v2153_v37 }
 0x260   : > { %v7330_v40 = vpop.f32.mrf.mxu1  ;;  %7378 = vmatmul.mubr.msk.f32.gmra.mxu0 %vm353_vm1, %v7327_v35 }
 0x262   : > { %v2163_v41 = vpop.f32.mrf.mxu1 }
 0x263   : > { %7380 = vmatprep.mubr.msk.f32.mxu0 %vm353_vm1, %v2163_v41 }
 0x264   : > { %v7333_v21 = vpop.f32.mrf.mxu1  ;;  %7381 = vmatmul.mubr.msk.f32.gmra.mxu0 %vm353_vm1, %v7330_v40 }
 0x266   : > { %v2173_v44 = vpop.f32.mrf.mxu1 }
 0x267   : > { %7383 = vmatprep.mubr.msk.f32.mxu0 %vm353_vm1, %v2173_v44 }
 0x268   : > { %v7336_v46 = vpop.f32.mrf.mxu1  ;;  %7384 = vmatmul.mubr.msk.f32.gmra.mxu0 %vm353_vm1, %v7333_v21 }
 0x26a   : > { %v2183_v49 = vpop.f32.mrf.mxu1 }
 0x26b   : > { %7386 = vmatprep.mubr.msk.f32.mxu0 %vm353_vm1, %v2183_v49 }
 0x26c   : > { %7387 = vmatmul.mubr.msk.f32.gmra.mxu0 %vm353_vm1, %v7336_v46  ;;  %v7407_v50 = vpop.f32.mrf.mxu1 }
 0x26e   : > { %v2743_v6 = vpop.f32.mrf.mxu1 }
 0x26f   : > { %7457 = vmatprep.mubr.msk.f32.mxu0 %vm353_vm1, %v2743_v6 }
 0x270   : > { %v7410_v10 = vpop.f32.mrf.mxu1  ;;  %7458 = vmatmul.mubr.msk.f32.vlgmr.msra.gmra.mxu0 %vm353_vm1, %v7407_v50 }
 0x271   : > { %7522 = vmatpush3.msra.mxu0 %v8515_v24 }
 0x272   : > { %7523 = vmatprep.subr.mxu0 %v8517_v25  ;;  %v2753_v53 = vpop.f32.mrf.mxu1 }
 0x273   : > { %7524 = vmatpush3.msra.mxu0 %v8517_v25  ;;  %7460 = vmatprep.mubr.msk.f32.mxu0 %vm353_vm1, %v2753_v53 }
 0x274   : > { %7553 = vmatprep.subr.mxu0 %v8523_v28  ;;  %v7413_v55 = vpop.f32.mrf.mxu1  ;;  %7461 = vmatmul.mubr.msk.f32.gmra.mxu0 %vm353_vm1, %v7410_v10 }
 0x276   : > { %v2763_v59 = vpop.f32.mrf.mxu1 }
 0x277   : > { %7463 = vmatprep.mubr.msk.f32.mxu0 %vm353_vm1, %v2763_v59 }
 0x278   : > { %v7416_v62 = vpop.f32.mrf.mxu1  ;;  %7464 = vmatmul.mubr.msk.f32.gmra.mxu0 %vm353_vm1, %v7413_v55 }
 0x27a   : > { %v2773_v13 = vpop.f32.mrf.mxu1 }
 0x27b   : > { %7466 = vmatprep.mubr.msk.f32.mxu0 %vm353_vm1, %v2773_v13 }
 0x27c   : > { %v7419_v24 = vpop.f32.mrf.mxu1  ;;  %7467 = vmatmul.mubr.msk.f32.gmra.mxu0 %vm353_vm1, %v7416_v62 }
 0x27e   : > { %v2783_v25 = vpop.f32.mrf.mxu1 }
 0x27f   : > { %7469 = vmatprep.mubr.msk.f32.mxu0 %vm353_vm1, %v2783_v25 }
 0x280   : > { %v7422_v17 = vpop.f32.mrf.mxu1  ;;  %7470 = vmatmul.mubr.msk.f32.gmra.mxu0 %vm353_vm1, %v7419_v24 }
 0x282   : > { %v2793_v19 = vpop.f32.mrf.mxu1 }
 0x283   : > { %7472 = vmatprep.mubr.msk.f32.mxu0 %vm353_vm1, %v2793_v19 }
 0x284   : > { %v7425_v31 = vpop.f32.mrf.mxu1  ;;  %7473 = vmatmul.mubr.msk.f32.gmra.mxu0 %vm353_vm1, %v7422_v17 }
 0x286   : > { %v2803_v32 = vpop.f32.mrf.mxu1 }
 0x287   : > { %7475 = vmatprep.mubr.msk.f32.mxu0 %vm353_vm1, %v2803_v32 }
 0x288   : > { %v7428_v35 = vpop.f32.mrf.mxu1  ;;  %7476 = vmatmul.mubr.msk.f32.gmra.mxu0 %vm353_vm1, %v7425_v31  ;;  %v9130_v31 = vstv %s3395_s20  ;;  %s6598_s20 = sld [smem:[#allocation5 + $0x280]] }
 0x28a   : > { %v2813_v37 = vpop.f32.mrf.mxu1 }
 0x28b   : > { %7478 = vmatprep.mubr.msk.f32.mxu0 %vm353_vm1, %v2813_v37 }
 0x28c   : > { %v7431_v40 = vpop.f32.mrf.mxu1  ;;  %7479 = vmatmul.mubr.msk.f32.gmra.mxu0 %vm353_vm1, %v7428_v35  ;;  %v9135_v35 = vstv %s6379_s21  ;;  %s6622_s21 = sld [smem:[#allocation7 + $0x6]] }
 0x28e   : > { %v2823_v41 = vpop.f32.mrf.mxu1 }
 0x28f   : > { %7481 = vmatprep.mubr.msk.f32.mxu0 %vm353_vm1, %v2823_v41 }
 0x290   : > { %v7434_v21 = vpop.f32.mrf.mxu1  ;;  %7482 = vmatmul.mubr.msk.f32.gmra.mxu0 %vm353_vm1, %v7431_v40 }
 0x292   : > { %v2833_v44 = vpop.f32.mrf.mxu1 }
 0x293   : > { %7484 = vmatprep.mubr.msk.f32.mxu0 %vm353_vm1, %v2833_v44 }
 0x294   : > { %v7437_v46 = vpop.f32.mrf.mxu1  ;;  %7485 = vmatmul.mubr.msk.f32.gmra.mxu0 %vm353_vm1, %v7434_v21 }
 0x296   : > { %v2843_v49 = vpop.f32.mrf.mxu1 }
 0x297   : > { %7487 = vmatprep.mubr.msk.f32.mxu0 %vm353_vm1, %v2843_v49 }
 0x298   : > { %v7440_v50 = vpop.f32.mrf.mxu1  ;;  %7488 = vmatmul.mubr.msk.f32.gmra.mxu0 %vm353_vm1, %v7437_v46 }
 0x29a   : > { %v2853_v6 = vpop.f32.mrf.mxu1 }
 0x29b   : > { %7490 = vmatprep.mubr.msk.f32.mxu0 %vm353_vm1, %v2853_v6 }
 0x29c   : > { %v7443_v10 = vpop.f32.mrf.mxu1  ;;  %7491 = vmatmul.mubr.msk.f32.gmra.mxu0 %vm353_vm1, %v7440_v50 }
 0x29e   : > { %v2863_v53 = vpop.f32.mrf.mxu1 }
 0x29f   : > { %7493 = vmatprep.mubr.msk.f32.mxu0 %vm353_vm1, %v2863_v53 }
 0x2a0   : > { %v7446_v55 = vpop.f32.mrf.mxu1  ;;  %7494 = vmatmul.mubr.msk.f32.gmra.mxu0 %vm353_vm1, %v7443_v10 }
 0x2a2   : > { %v2873_v59 = vpop.f32.mrf.mxu1 }
 0x2a3   : > { %7496 = vmatprep.mubr.msk.f32.mxu0 %vm353_vm1, %v2873_v59 }
 0x2a4   : > { %v7449_v62 = vpop.f32.mrf.mxu1  ;;  %7497 = vmatmul.mubr.msk.f32.gmra.mxu0 %vm353_vm1, %v7446_v55 }
 0x2a6   : > { %v2883_v13 = vpop.f32.mrf.mxu1 }
 0x2a7   : > { %7499 = vmatprep.mubr.msk.f32.mxu0 %vm353_vm1, %v2883_v13 }
 0x2a8   : > { %v7452_v24 = vpop.f32.mrf.mxu1  ;;  %7500 = vmatmul.mubr.msk.f32.gmra.mxu0 %vm353_vm1, %v7449_v62 }
 0x2aa   : > { %v2893_v25 = vpop.f32.mrf.mxu1 }
 0x2ab   : > { %7502 = vmatprep.mubr.msk.f32.mxu0 %vm353_vm1, %v2893_v25 }
 0x2ac   : > { %7503 = vmatmul.mubr.msk.f32.gmra.mxu0 %vm353_vm1, %v7452_v24  ;;  %v9114_v17 = vpop.f32.mrf.mxu1  ;;  %v9172_v24 = vstv %s4257_s22  ;;  %s6623_s22 = sld [smem:[#allocation5 + $0x300]] }
 0x2ad   : > { %7525 = vmatprep.mubr.msk.f32.mxu0 %vm353_vm1, %v8897_v52 }
 0x2ae   : > { %v9120_v19 = vpop.f32.mrf.mxu1 }
 0x2b0   : > { %7526 = vmatmul.mubr.msk.f32.vlgmr.msra.gmra.mxu0 %vm353_vm1, %v8905_v9 }
 0x2b1   : > { %7554 = vmatpush3.msra.mxu0 %v8523_v28  ;;  %7528 = vmatprep.mubr.msk.f32.mxu0 %vm353_vm1, %v8923_v26  ;;  %v9124_v28 = vpop.f32.mrf.mxu1 }
 0x2b2   : > { %7555 = vmatprep.subr.mxu0 %v8525_v29 }
 0x2b3   : > { %7556 = vmatpush3.msra.mxu0 %v8525_v29  ;;  %v3366_v29 = vpop.f32.mrf.mxu1 }
 0x2b4   : > { %7529 = vmatmul.mubr.msk.f32.gmra.mxu0 %vm353_vm1, %v8930_v27  ;;  %v3399_v32 = vmul.f32 %v9130_v31, %v3366_v29 }
 0x2b5   : > { %7531 = vmatprep.mubr.msk.f32.mxu0 %vm353_vm1, %v8941_v12  ;;  %v7517_v40 = vpop.f32.mrf.mxu1 }
 0x2b6   : > { %v3409_v37 = vadd.f32 %v9135_v35, %v3399_v32  ;;  %v3402_v41 = vmul.f32 %v7517_v40, %v9130_v31  ;;  %v9182_v40 = vstv %s4254_s17  ;;  %s6647_s17 = sld [smem:[#allocation7 + $0x7]] }
 0x2b7   : > { %v3376_v44 = vpop.f32.mrf.mxu1 }
 0x2b8   : > { %7532 = vmatmul.mubr.msk.f32.gmra.mxu0 %vm353_vm1, %v8948_v14  ;;  %v3425_v21 = vmin.f32 %v3409_v37, 0.0  ;;  %v9144_v46 = vadd.f32 %v9135_v35, %v3402_v41  ;;  %v3401_v49 = vmul.f32 %v9130_v31, %v3376_v44  ;;  %vm3417_vm2 = vcmp.gt.f32.partialorder %v3409_v37, 0.0 }
 0x2b9   : > { %7534 = vmatprep.mubr.msk.f32.mxu0 %vm353_vm1, %v8959_v20  ;;  %v7520_v6 = vpop.f32.mrf.mxu1  ;;  %v9184_v41 = vstv %s6497_s24  ;;  %s9460_s24 = sld [smem:[#allocation2 + $0x100]] }
 0x2ba   : > { %v3435_v50 = vmul.f32 1.442695, %v3425_v21  ;;  %v3404_v10 = vmul.f32 %v7520_v6, %v9130_v31  ;;  %v3428_v53 = vmin.f32 %v9144_v46, 0.0  ;;  %vm3420_vm3 = vcmp.gt.f32.partialorder %v9144_v46, 0.0 }
 0x2bc   : > { %7535 = vmatmul.mubr.msk.f32.gmra.mxu0 %vm353_vm1, %v8966_v23  ;;  %7641 = vpow2.f32 %v3435_v50  ;;  %v9159_v55 = vadd.f32 %v9135_v35, %v3404_v10  ;;  %v9192_v50 = vstv %s6523_s25  ;;  %s9465_s25 = sld [smem:[#allocation2 + $0x180]] }
 0x2bd   : > { %7557 = vmatprep.mubr.msk.f32.mxu0 %vm353_vm1, %v8897_v52  ;;  %v9150_v52 = vadd.f32 %v9135_v35, %v3401_v49 }
 0x2be   : > { %v3430_v25 = vmin.f32 %v9159_v55, 0.0  ;;  %vm3422_vm5 = vcmp.gt.f32.partialorder %v9159_v55, 0.0 }
 0x2bf   : > { %v3427_v13 = vmin.f32 %v9150_v52, 0.0  ;;  %vm3419_vm4 = vcmp.gt.f32.partialorder %v9150_v52, 0.0 }
 0x2c0   : > { %7558 = vmatmul.mubr.msk.f32.vlgmr.msra.gmra.mxu0 %vm353_vm1, %v8905_v9  ;;  %v3386_v9 = vpop.f32.mrf.mxu1  ;;  %v3445_v49 = vmul.f32 1.442695, %v3430_v25  ;;  %v9206_v25 = vstv %s6573_s18  ;;  %s9481_s18 = sld [smem:[#allocation5 + $0x184]] }
 0x2c1   : > { %7560 = vmatprep.mubr.msk.f32.mxu0 %vm353_vm1, %v8923_v26  ;;  %v3403_v26 = vmul.f32 %v9130_v31, %v3386_v9  ;;  %v3439_v21 = vmul.f32 1.442695, %v3427_v13  ;;  %v9204_v13 = vstv %s6572_s13  ;;  %s9479_s13 = sld [smem:[#allocation5 + $0x104]] }
 0x2c3   : > { %v9163_v59 = vadd.f32 %v9135_v35, %v3403_v26  ;;  %v9197_v26 = vstv %s9176_s26  ;;  %s9467_s26 = sld [smem:[#allocation2 + $0x101]] }
 0x2c4   : > { %7561 = vmatmul.mubr.msk.f32.gmra.mxu0 %vm353_vm1, %v8930_v27  ;;  %v3441_v27 = vmul.f32 1.442695, %v3428_v53 }
 0x2c5   : > { %7563 = vmatprep.mubr.msk.f32.mxu0 %vm353_vm1, %v8941_v12  ;;  %v3429_v32 = vmin.f32 %v9163_v59, 0.0  ;;  %vm3421_vm6 = vcmp.gt.f32.partialorder %v9163_v59, 0.0 }
 0x2c6   : > { %7643 = vpow2.f32 %v3441_v27  ;;  %v9199_v27 = vstv %s6547_s10  ;;  %s9472_s10 = sld [smem:[#allocation5 + $0x4]] }
 0x2c7   : > { %v3443_v6 = vmul.f32 1.442695, %v3429_v32  ;;  %7645 = vpow2.f32 %v3439_v21  ;;  %v9213_v32 = vstv %s6622_s21  ;;  %s9493_s21 = sld [smem:[#allocation5 + $0x304]] }
 0x2c8   : > { %7564 = vmatmul.mubr.msk.f32.gmra.mxu0 %vm353_vm1, %v8948_v14  ;;  %v9174_v14 = vstv %s6498_s23  ;;  %7647 = vpow2.f32 %v3445_v49  ;;  %s6648_s23 = sld [smem:[#allocation5 + $0x380]] }
 0x2c9   : > { %7566 = vmatprep.mubr.msk.f32.mxu0 %vm353_vm1, %v8959_v20  ;;  %v7642_v12 = vpop.eup %7641  ;;  %7649 = vpow2.f32 %v3443_v6  ;;  %v9219_v6 = vstv %s6623_s22  ;;  %s9495_s22 = sld [smem:[#allocation5 + $0x384]] }
 0x2ca   : > { %v6382_v62 = vadd.f32 -1.0, %v7642_v12  ;;  %v9201_v12 = vstv %s6548_s12  ;;  %s9474_s12 = sld [smem:[#allocation5 + $0x84]] }
 0x2cc   : > { %7567 = vmatmul.mubr.msk.f32.gmra.mxu0 %vm353_vm1, %v8966_v23  ;;  %v3457_v20 = vsel %vm3417_vm2, %v3409_v37, %v6382_v62 }
 0x2cd   : > { %v4261_v23 = vmul.f32 %v9172_v24, %v3457_v20  ;;  %v4464_v29 = vmul.f32 %v9174_v14, %v3457_v20  ;;  %v4668_v10 = vmul.f32 %v9192_v50, %v3457_v20  ;;  %v4872_v49 = vmul.f32 %v9201_v12, %v3457_v20 }
 0x2ce   : > { %v5484_v0 = vmul.f32 %v9219_v6, %v3457_v20 }
 0x2cf   : > { %v9187_v44 = vadd.f32 %v4261_v23, %v9182_v40  ;;  %v9190_v37 = vadd.f32 %v4464_v29, %v9184_v41  ;;  %v9208_v23 = vstv %s6597_s19  ;;  %v9211_v29 = vstv %s6598_s20  ;;  %s9486_s19 = sld [smem:[#allocation5 + $0x204]] }
 0x2d0   : > { %v9216_v21 = vadd.f32 %v4668_v10, %v9197_v26  ;;  %v9241_v11 = vadd.f32 %v5484_v0, %v9213_v32  ;;  %s9488_s20 = sld [smem:[#allocation5 + $0x284]] }
 0x2d1   : > { %13346 = vst [vmem:[#allocation21_spill] sm:$0xff] %v9187_v44  ;;  %13347 = vst [vmem:[#allocation22_spill] sm:$0xff] %v9190_v37  ;;  %v9225_v37 = vstv %s6647_s17  ;;  %v9228_v44 = vadd.f32 %v4872_v49, %v9199_v27  ;;  %s9534_s17 = sld [smem:[#allocation2 + $0x82]] }
 0x2d2   : > { %13348 = vst [vmem:[#allocation23_spill] sm:$0xff] %v9216_v21  ;;  %13352 = vst [vmem:[#allocation27_spill] sm:$0xff] %v9241_v11 }
 0x2d3   : > { %v7644_v9 = vpop.eup %7643  ;;  %13349 = vst [vmem:[#allocation24_spill] sm:$0xff] %v9228_v44 }
 0x2d4   : > { %v6385_v53 = vadd.f32 -1.0, %v7644_v9  ;;  %v5076_v9 = vmul.f32 %v9206_v25, %v3457_v20  ;;  %v7646_v47 = vpop.eup %7645 }
 0x2d6   : > { %v3460_v62 = vsel %vm3420_vm3, %v9144_v46, %v6385_v53  ;;  %v9221_v46 = vstv %s6648_s23  ;;  %v5280_v53 = vmul.f32 %v9211_v29, %v3457_v20  ;;  %v9233_v21 = vadd.f32 %v5076_v9, %v9204_v13  ;;  %v7648_v9 = vpop.eup %7647  ;;  %s9502_s23 = sld [smem:[#allocation2 + $0x2]] }
 0x2d7   : > { %v5688_v10 = vmul.f32 %v9221_v46, %v3457_v20  ;;  %v4264_v5 = vmul.f32 %v9172_v24, %v3460_v62  ;;  %v4467_v4 = vmul.f32 %v9174_v14, %v3460_v62  ;;  %v4671_v44 = vmul.f32 %v9192_v50, %v3460_v62  ;;  %v7650_v0 = vpop.eup %7649 }
 0x2d8   : > { %13350 = vst [vmem:[#allocation25_spill] sm:$0xff] %v9233_v21  ;;  %v9236_v58 = vadd.f32 %v5280_v53, %v9208_v23  ;;  %v4875_v20 = vmul.f32 %v9201_v12, %v3460_v62  ;;  %v5283_v43 = vmul.f32 %v9211_v29, %v3460_v62  ;;  %v5691_v38 = vmul.f32 %v9221_v46, %v3460_v62 }
 0x2d9   : > { %v9244_v49 = vadd.f32 %v5688_v10, %v9225_v37  ;;  %v9249_v21 = vadd.f32 %v4264_v5, %v9182_v40  ;;  %v9252_v53 = vadd.f32 %v4467_v4, %v9184_v41  ;;  %v9257_v11 = vadd.f32 %v4671_v44, %v9197_v26 }
 0x2da   : > { %13351 = vst [vmem:[#allocation26_spill] sm:$0xff] %v9236_v58  ;;  %v5079_v58 = vmul.f32 %v9206_v25, %v3460_v62  ;;  %v9260_v10 = vadd.f32 %v4875_v20, %v9199_v27  ;;  %v9268_v4 = vadd.f32 %v5283_v43, %v9208_v23  ;;  %v9274_v44 = vadd.f32 %v5691_v38, %v9225_v37  ;;  %v9285_v38 = vpop.f32.mrf.mxu0 }
 0x2db   : > { %13353 = vst [vmem:[#allocation28_spill] sm:$0xff] %v9244_v49  ;;  %13354 = vst [vmem:[#allocation29_spill] sm:$0xff] %v9249_v21  ;;  %v5487_v49 = vmul.f32 %v9219_v6, %v3460_v62  ;;  %v6387_v62 = vadd.f32 -1.0, %v7648_v9 }
 0x2dc   : > { %13355 = vst [vmem:[#allocation30_spill] sm:$0xff] %v9252_v53  ;;  %13356 = vst [vmem:[#allocation31_spill] sm:$0xff] %v9257_v11  ;;  %v9265_v5 = vadd.f32 %v5079_v58, %v9204_v13  ;;  %v6384_v53 = vadd.f32 -1.0, %v7646_v47  ;;  %v6386_v58 = vadd.f32 -1.0, %v7650_v0 }
 0x2dd   : > { %13357 = vst [vmem:[#allocation32_spill] sm:$0xff] %v9260_v10  ;;  %13359 = vst [vmem:[#allocation34_spill] sm:$0xff] %v9268_v4  ;;  %v9271_v21 = vadd.f32 %v5487_v49, %v9213_v32 }
 0x2de   : > { %13358 = vst [vmem:[#allocation33_spill] sm:$0xff] %v9265_v5  ;;  %13361 = vst [vmem:[#allocation36_spill] sm:$0xff] %v9274_v44  ;;  %v3459_v20 = vsel %vm3419_vm4, %v9150_v52, %v6384_v53 }
 0x2df   : > { %13360 = vst [vmem:[#allocation35_spill] sm:$0xff] %v9271_v21  ;;  %v4263_v43 = vmul.f32 %v9172_v24, %v3459_v20  ;;  %v4466_v47 = vmul.f32 %v9174_v14, %v3459_v20  ;;  %v4670_v49 = vmul.f32 %v9192_v50, %v3459_v20  ;;  %v4874_v21 = vmul.f32 %v9201_v12, %v3459_v20 }
 0x2e0   : > { %13362 = vst [vmem:[#allocation37_spill] sm:$0xff] %v9285_v38  ;;  %v5078_v44 = vmul.f32 %v9206_v25, %v3459_v20  ;;  %v5282_v4 = vmul.f32 %v9211_v29, %v3459_v20  ;;  %v5486_v52 = vmul.f32 %v9219_v6, %v3459_v20  ;;  %v5690_v9 = vmul.f32 %v9221_v46, %v3459_v20 }
 0x2e1   : > { %v9292_v53 = vadd.f32 %v4263_v43, %v9182_v40  ;;  %v9295_v0 = vadd.f32 %v4466_v47, %v9184_v41  ;;  %v9298_v5 = vadd.f32 %v4670_v49, %v9197_v26  ;;  %v9301_v10 = vadd.f32 %v4874_v21, %v9199_v27 }
 0x2e2   : > { %v9304_v38 = vadd.f32 %v5078_v44, %v9204_v13  ;;  %v9307_v34 = vadd.f32 %v5282_v4, %v9208_v23  ;;  %v9310_v20 = vadd.f32 %v5486_v52, %v9213_v32  ;;  %v9313_v43 = vadd.f32 %v5690_v9, %v9225_v37 }
 0x2e3   : > { %13363 = vst [vmem:[#allocation38_spill] sm:$0xff] %v9292_v53  ;;  %13364 = vst [vmem:[#allocation39_spill] sm:$0xff] %v9295_v0  ;;  %v3462_v21 = vsel %vm3422_vm5, %v9159_v55, %v6387_v62  ;;  %v3461_v44 = vsel %vm3421_vm6, %v9163_v59, %v6386_v58  ;;  %v9557_v0 = vstv %s9486_s19  ;;  %v9560_v53 = vstv %s9488_s20  ;;  %s9680_s19 = sld [smem:[#allocation5 + $0x305]] }
 0x2e4   : > { %13365 = vst [vmem:[#allocation40_spill] sm:$0xff] %v9298_v5  ;;  %13366 = vst [vmem:[#allocation41_spill] sm:$0xff] %v9301_v10  ;;  %v4266_v4 = vmul.f32 %v9172_v24, %v3462_v21  ;;  %v4469_v52 = vmul.f32 %v9174_v14, %v3462_v21  ;;  %v4877_v9 = vmul.f32 %v9201_v12, %v3462_v21  ;;  %s9688_s20 = sld [smem:[#allocation5 + $0x385]] }
 0x2e5   : > { %13367 = vst [vmem:[#allocation42_spill] sm:$0xff] %v9304_v38  ;;  %13368 = vst [vmem:[#allocation43_spill] sm:$0xff] %v9307_v34  ;;  %v5285_v55 = vmul.f32 %v9211_v29, %v3462_v21  ;;  %v5489_v62 = vmul.f32 %v9219_v6, %v3462_v21 }
 0x2e6   : > { %13369 = vst [vmem:[#allocation44_spill] sm:$0xff] %v9310_v20  ;;  %13370 = vst [vmem:[#allocation45_spill] sm:$0xff] %v9313_v43  ;;  %v4673_v20 = vmul.f32 %v9192_v50, %v3462_v21  ;;  %v9335_v59 = vadd.f32 %v4266_v4, %v9182_v40  ;;  %v9338_v58 = vadd.f32 %v4469_v52, %v9184_v41 }
 0x2e7   : > { %v9344_v38 = vadd.f32 %v4877_v9, %v9199_v27  ;;  %v9353_v10 = vadd.f32 %v5285_v55, %v9208_v23  ;;  %v9356_v4 = vadd.f32 %v5489_v62, %v9213_v32  ;;  %v4468_v9 = vmul.f32 %v9174_v14, %v3461_v44 }
 0x2e8   : > { %13371 = vst [vmem:[#allocation46_spill] sm:$0xff] %v9335_v59  ;;  %13372 = vst [vmem:[#allocation47_spill] sm:$0xff] %v9338_v58  ;;  %v9341_v34 = vadd.f32 %v4673_v20, %v9197_v26  ;;  %v5693_v58 = vmul.f32 %v9221_v46, %v3462_v21  ;;  %v4265_v20 = vmul.f32 %v9172_v24, %v3461_v44 }
 0x2e9   : > { %13374 = vst [vmem:[#allocation49_spill] sm:$0xff] %v9344_v38  ;;  %13376 = vst [vmem:[#allocation51_spill] sm:$0xff] %v9353_v10  ;;  %v4672_v38 = vmul.f32 %v9192_v50, %v3461_v44  ;;  %v5284_v55 = vmul.f32 %v9211_v29, %v3461_v44  ;;  %v9375_v10 = vadd.f32 %v4468_v9, %v9184_v41 }
 0x2ea   : > { %13373 = vst [vmem:[#allocation48_spill] sm:$0xff] %v9341_v34  ;;  %13377 = vst [vmem:[#allocation52_spill] sm:$0xff] %v9356_v4  ;;  %v9369_v4 = vadd.f32 %v5693_v58, %v9225_v37  ;;  %v5692_v9 = vmul.f32 %v9221_v46, %v3461_v44 }
 0x2eb   : > { %13380 = vst [vmem:[#allocation55_spill] sm:$0xff] %v9375_v10  ;;  %v9390_v58 = vadd.f32 %v5284_v55, %v9208_v23  ;;  %v13401_v10 = vld [vmem:[#allocation15_spill] sm:$0xff] }
 0x2ec   : > { %13378 = vst [vmem:[#allocation53_spill] sm:$0xff] %v9369_v4  ;;  %v9552_v4 = vstv %s9481_s18  ;;  %s9670_s18 = sld [smem:[#allocation5 + $0x285]] }
 0x2ed   : > { %13384 = vst [vmem:[#allocation59_spill] sm:$0xff] %v9390_v58 }
 0x2f0   : > { %v7343_v11 = vpop.f32.mrf.mxu0 }
 0x2f1   : > { %v9316_v47 = vadd.f32 %v7343_v11, %v8909_v7  ;;  %v5081_v11 = vmul.f32 %v9206_v25, %v3462_v21  ;;  %v9372_v21 = vadd.f32 %v4265_v20, %v9182_v40 }
 0x2f2   : > { %v2357_v49 = vpop.f32.mrf.mxu0 }
 0x2f3   : > { %v9329_v7 = vadd.f32 %v2357_v49, %v8913_v54  ;;  %v9350_v49 = vadd.f32 %v5081_v11, %v9204_v13  ;;  %v5080_v11 = vmul.f32 %v9206_v25, %v3461_v44  ;;  %13379 = vst [vmem:[#allocation54_spill] sm:$0xff] %v9372_v21  ;;  %v5488_v21 = vmul.f32 %v9219_v6, %v3461_v44 }
 0x2f4   : > { %v7346_v43 = vpop.f32.mrf.mxu0 }
 0x2f5   : > { %v9347_v54 = vadd.f32 %v7346_v43, %v8916_v57  ;;  %13375 = vst [vmem:[#allocation50_spill] sm:$0xff] %v9350_v49  ;;  %v4876_v43 = vmul.f32 %v9201_v12, %v3461_v44  ;;  %v9378_v49 = vadd.f32 %v4672_v38, %v9197_v26  ;;  %v9387_v34 = vadd.f32 %v5080_v11, %v9204_v13 }
 0x2f6   : > { %v2367_v52 = vpop.f32.mrf.mxu0 }
 0x2f7   : > { %v9363_v57 = vadd.f32 %v2367_v52, %v8918_v60  ;;  %13381 = vst [vmem:[#allocation56_spill] sm:$0xff] %v9378_v49  ;;  %v9384_v52 = vadd.f32 %v4876_v43, %v9199_v27  ;;  %13383 = vst [vmem:[#allocation58_spill] sm:$0xff] %v9387_v34  ;;  %v9401_v43 = vadd.f32 %v5692_v9, %v9225_v37  ;;  %v13400_v34 = vld [vmem:[#allocation37_spill] sm:$0xff] }
 0x2f8   : > { %v7349_v62 = vpop.f32.mrf.mxu0 }
 0x2f9   : > { %v9381_v60 = vadd.f32 %v7349_v62, %v8932_v63  ;;  %13382 = vst [vmem:[#allocation57_spill] sm:$0xff] %v9384_v52  ;;  %v9398_v63 = vadd.f32 %v5488_v21, %v9213_v32  ;;  %13386 = vst [vmem:[#allocation61_spill] sm:$0xff] %v9401_v43  ;;  %v3398_v62 = vmul.f32 %v9114_v17, %v9130_v31  ;;  %v9520_v52 = vstv %s9465_s25  ;;  %s9607_s25 = sld [smem:[#allocation5 + $0x5]] }
 0x2fa   : > { %v2377_v20 = vpop.f32.mrf.mxu0 }
 0x2fb   : > { %v9395_v38 = vadd.f32 %v2377_v20, %v8936_v2  ;;  %13385 = vst [vmem:[#allocation60_spill] sm:$0xff] %v9398_v63  ;;  %v3397_v2 = vmul.f32 %v9130_v31, %v9120_v19  ;;  %v3400_v20 = vmul.f32 %v9124_v28, %v9130_v31 }
 0x2fc   : > { %v7352_v49 = vpop.f32.mrf.mxu0 }
 0x2fd   : > { %v9404_v11 = vadd.f32 %v7352_v49, %v8950_v15  ;;  %v9419_v15 = vadd.f32 %v9135_v35, %v3398_v62 }
 0x2fe   : > { %v2387_v55 = vpop.f32.mrf.mxu0 }
 0x2ff   : > { %v9409_v58 = vadd.f32 %v2387_v55, %v8954_v18  ;;  %v9425_v18 = vadd.f32 %v9135_v35, %v3397_v2  ;;  %v3424_v28 = vmin.f32 %v9419_v15, 0.0  ;;  %vm3416_vm7 = vcmp.gt.f32.partialorder %v9419_v15, 0.0 }
 0x300   : > { %v7355_v44 = vpop.f32.mrf.mxu0 }
 0x301   : > { %v9414_v21 = vadd.f32 %v7355_v44, %v8968_v30  ;;  %v9431_v30 = vadd.f32 %v9135_v35, %v3400_v20  ;;  %v3423_v62 = vmin.f32 %v9425_v18, 0.0  ;;  %vm3415_vm8 = vcmp.gt.f32.partialorder %v9425_v18, 0.0 }
 0x302   : > { %v2397_v9 = vpop.f32.mrf.mxu0 }
 0x303   : > { %v9422_v49 = vadd.f32 %v2397_v9, %v8974_v33  ;;  %v3426_v2 = vmin.f32 %v9431_v30, 0.0  ;;  %v3431_v35 = vmul.f32 1.442695, %v3423_v62  ;;  %vm3418_vm9 = vcmp.gt.f32.partialorder %v9431_v30, 0.0 }
 0x304   : > { %v7358_v17 = vpop.f32.mrf.mxu0 }
 0x305   : > { %v9428_v19 = vadd.f32 %v7358_v17, %v8976_v36  ;;  %v3433_v36 = vmul.f32 1.442695, %v3424_v28 }
 0x306   : > { %v2407_v55 = vpop.f32.mrf.mxu0 }
 0x307   : > { %v9435_v31 = vadd.f32 %v2407_v55, %v8982_v39  ;;  %v3437_v39 = vmul.f32 1.442695, %v3426_v2  ;;  %7651 = vpow2.f32 %v3433_v36 }
 0x308   : > { %v7361_v33 = vpop.f32.mrf.mxu0  ;;  %7653 = vpow2.f32 %v3431_v35 }
 0x309   : > { %v9439_v44 = vadd.f32 %v7361_v33, %v8984_v42  ;;  %7655 = vpow2.f32 %v3437_v39 }
 0x30a   : > { %v2417_v9 = vpop.f32.mrf.mxu0 }
 0x30b   : > { %v9443_v17 = vadd.f32 %v2417_v9, %v8990_v45 }
 0x30c   : > { %v7364_v20 = vpop.f32.mrf.mxu0 }
 0x30d   : > { %v9446_v43 = vadd.f32 %v7364_v20, %v8992_v48 }
 0x30e   : > { %v2427_v55 = vpop.f32.mrf.mxu0 }
 0x30f   : > { %v9449_v63 = vadd.f32 %v2427_v55, %v8998_v51  ;;  %v13393_v55 = vld [vmem:[#allocation12_spill] sm:$0xff] }
 0x310   : > { %v7367_v42 = vpop.f32.mrf.mxu0 }
 0x311   : > { %v9452_v33 = vadd.f32 %v7367_v42, %v9000_v8 }
 0x312   : > { %v2437_v28 = vpop.f32.mrf.mxu0 }
 0x313   : > { %13387 = vst [vmem:[#allocation62_spill] sm:$0xff] %v9452_v33  ;;  %v9455_v45 = vadd.f32 %v2437_v28, %v9004_v3  ;;  %v13414_v33 = vld [vmem:[#allocation19_spill] sm:$0xff] }
 0x314   : > { %v7370_v62 = vpop.f32.mrf.mxu0 }
 0x315   : > { %v9458_v48 = vadd.f32 %v7370_v62, %v9006_v56  ;;  %v7652_v56 = vpop.eup %7651 }
 0x316   : > { %v2447_v2 = vpop.f32.mrf.mxu0 }
 0x317   : > { %13388 = vst [vmem:[#allocation63_spill] sm:$0xff] %v9458_v48  ;;  %v9463_v51 = vadd.f32 %v2447_v2, %v9008_v61  ;;  %v7654_v61 = vpop.eup %7653 }
 0x318   : > { %v7373_v9 = vpop.f32.mrf.mxu0  ;;  %v6380_v28 = vadd.f32 -1.0, %v7654_v61 }
 0x319   : > { %13389 = vst [vmem:[#allocation64_spill] sm:$0xff] %v9463_v51  ;;  %v9470_v8 = vadd.f32 %v7373_v9, %v9010_v1  ;;  %v7656_v1 = vpop.eup %7655 }
 0x31a   : > { %v2457_v3 = vpop.f32.mrf.mxu0  ;;  %v6383_v9 = vadd.f32 -1.0, %v7656_v1 }
 0x31b   : > { %13390 = vst [vmem:[#allocation65_spill] sm:$0xff] %v9470_v8  ;;  %v9477_v36 = vadd.f32 %v2457_v3, %v9012_v16  ;;  %v6381_v16 = vadd.f32 -1.0, %v7652_v56  ;;  %v13397_v56 = vld [vmem:[#allocation14_spill] sm:$0xff] }
 0x31c   : > { %v7376_v35 = vpop.f32.mrf.mxu0 }
 0x31d   : > { %13391 = vst [vmem:[#allocation66_spill] sm:$0xff] %v9477_v36  ;;  %v9484_v20 = vadd.f32 %v7376_v35, %v9014_v22  ;;  %v13395_v22 = vld [vmem:[#allocation13_spill] sm:$0xff]  ;;  %v9509_v35 = vsel %vm3416_vm7, %v9419_v15, %v6381_v16  ;;  %v9526_v15 = vstv %s9472_s10  ;;  %v9532_v16 = vstv %s9467_s26  ;;  %s9617_s26 = sld [smem:[#allocation5 + $0x85]] }
 0x31e   : > { %v2467_v39 = vpop.f32.mrf.mxu0  ;;  %v4667_v8 = vmul.f32 %v9192_v50, %v9509_v35  ;;  %s9634_s10 = sld [smem:[#allocation5 + $0x105]] }
 0x31f   : > { %13392 = vst [vmem:[#allocation67_spill] sm:$0xff] %v9484_v20  ;;  %v9491_v42 = vadd.f32 %v2467_v39, %v13393_v55  ;;  %v9512_v39 = vsel %vm3415_vm8, %v9425_v18, %v6380_v28  ;;  %v13399_v55 = vld [vmem:[#allocation20_spill] sm:$0xff]  ;;  %v9529_v18 = vsel %vm3418_vm9, %v9431_v30, %v6383_v9  ;;  %v9537_v28 = vstv %s9474_s12  ;;  %s9647_s12 = sld [smem:[#allocation5 + $0x185]] }
 0x320   : > { %v7379_v62 = vpop.f32.mrf.mxu0  ;;  %v4259_v30 = vmul.f32 %v9172_v24, %v9512_v39  ;;  %v13403_v9 = vld [vmem:[#allocation16_spill] sm:$0xff]  ;;  %v4462_v59 = vmul.f32 %v9174_v14, %v9512_v39 }
 0x321   : > { %13394 = vst [vmem:[#allocation12_spill] sm:$0xff] %v9491_v42  ;;  %v9500_v2 = vadd.f32 %v7379_v62, %v13395_v22  ;;  %v1830_v62 = vadd.f32 %v13400_v34, %v13399_v55  ;;  %v9517_v22 = vstv %s9460_s24  ;;  %v9576_v42 = vstv %s9502_s23  ;;  %s9597_s24 = sld [smem:[#allocation2 + $0x181]] }
 0x322   : > { %v2477_v3 = vpop.f32.mrf.mxu0  ;;  %13407 = vst [vmem:[#allocation16_spill] sm:$0xff] %v9576_v42  ;;  %s9735_s23 = sld [smem:[#allocation5 + $0x6]] }
 0x323   : > { %13396 = vst [vmem:[#allocation13_spill] sm:$0xff] %v9500_v2  ;;  %v9506_v61 = vadd.f32 %v2477_v3, %v13397_v56  ;;  %v4463_v56 = vmul.f32 %v9174_v14, %v9509_v35  ;;  %v4262_v2 = vmul.f32 %v9172_v24, %v9529_v18 }
 0x324   : > { %v7382_v1 = vpop.f32.mrf.mxu0 }
 0x325   : > { %13398 = vst [vmem:[#allocation14_spill] sm:$0xff] %v9506_v61  ;;  %v9523_v3 = vadd.f32 %v7382_v1, %v13401_v10  ;;  %v4260_v10 = vmul.f32 %v9172_v24, %v9509_v35  ;;  %v9549_v1 = vstv %s9479_s13  ;;  %v9573_v61 = vstv %s9495_s22  ;;  %s9656_s13 = sld [smem:[#allocation5 + $0x205]] }
 0x326   : > { %v2487_v34 = vpop.f32.mrf.mxu0  ;;  %v9584_v24 = vadd.f32 %v4259_v30, %v9182_v40  ;;  %v7543_v30 = vpop.f32.mrf.mxu1  ;;  %v9600_v51 = vadd.f32 %v4463_v56, %v9184_v41  ;;  %v5074_v56 = vmul.f32 %v9206_v25, %v9512_v39  ;;  %s9711_s22 = sld [smem:[#allocation2 + $0x182]] }
 0x327   : > { %13402 = vst [vmem:[#allocation20_spill] sm:$0xff] %v9523_v3  ;;  %v9546_v55 = vadd.f32 %v2487_v34, %v13403_v9  ;;  %v4465_v3 = vmul.f32 %v9174_v14, %v9529_v18  ;;  %v13405_v34 = vld [vmem:[#allocation17_spill] sm:$0xff]  ;;  %v9579_v36 = vadd.f32 %v4260_v10, %v9182_v40  ;;  %v4666_v14 = vmul.f32 %v9192_v50, %v9512_v39 }
 0x328   : > { %v7385_v5 = vpop.f32.mrf.mxu0  ;;  %13409 = vst [vmem:[#allocation68_spill] sm:$0xff] %v9584_v24  ;;  %v4870_v10 = vmul.f32 %v9201_v12, %v9512_v39  ;;  %13412 = vst [vmem:[#allocation69_spill] sm:$0xff] %v9600_v51 }
 0x329   : > { %13404 = vst [vmem:[#allocation37_spill] sm:$0xff] %v9546_v55  ;;  %v9567_v9 = vadd.f32 %v7385_v5, %v13405_v34  ;;  %v9570_v55 = vstv %s9493_s21  ;;  %13408 = vst [vmem:[#allocation17_spill] sm:$0xff] %v9579_v36  ;;  %v13410_v5 = vld [vmem:[#allocation18_spill] sm:$0xff]  ;;  %v4669_v36 = vmul.f32 %v9192_v50, %v9529_v18  ;;  %v5075_v50 = vmul.f32 %v9206_v25, %v9509_v35  ;;  %s9698_s21 = sld [smem:[#allocation2 + $0x102]] }
 0x32a   : > { %v2497_v20 = vpop.f32.mrf.mxu0 }
 0x32b   : > { %13406 = vst [vmem:[#allocation15_spill] sm:$0xff] %v9567_v9  ;;  %v9589_v34 = vadd.f32 %v2497_v20, %v13410_v5  ;;  %v4871_v9 = vmul.f32 %v9201_v12, %v9509_v35  ;;  %v9603_v20 = vadd.f32 %v4262_v2, %v9182_v40  ;;  %v4873_v5 = vmul.f32 %v9201_v12, %v9529_v18 }
 0x32c   : > { %v7388_v24 = vpop.f32.mrf.mxu0  ;;  %v9620_v40 = vstv %s9534_s17  ;;  %v9623_v12 = vadd.f32 %v4667_v8, %v9197_v26  ;;  %v9645_v8 = vadd.f32 %v4669_v36, %v9197_v26  ;;  %v9663_v36 = vadd.f32 %v5075_v50, %v9204_v13  ;;  %s9744_s17 = sld [smem:[#allocation5 + $0x86]] }
 0x32d   : > { %13411 = vst [vmem:[#allocation18_spill] sm:$0xff] %v9589_v34  ;;  %13413 = vst [vmem:[#allocation70_spill] sm:$0xff] %v9603_v20  ;;  %v3880_v34 = vmul.f32 %v7543_v30, %v9576_v42  ;;  %v9611_v48 = vadd.f32 %v7388_v24, %v13414_v33  ;;  %v9626_v20 = vadd.f32 %v4462_v59, %v9184_v41 }
 0x32e   : > { %13416 = vst [vmem:[#allocation71_spill] sm:$0xff] %v9620_v40  ;;  %v2507_v2 = vpop.f32.mrf.mxu0  ;;  %13417 = vst [vmem:[#allocation72_spill] sm:$0xff] %v9623_v12  ;;  %v9629_v33 = vadd.f32 %v4666_v14, %v9197_v26  ;;  %v9632_v24 = vadd.f32 %v4465_v3, %v9184_v41  ;;  %v9639_v51 = vadd.f32 %v4871_v9, %v9199_v27 }
 0x32f   : > { %13415 = vst [vmem:[#allocation19_spill] sm:$0xff] %v9611_v48  ;;  %13418 = vst [vmem:[#allocation73_spill] sm:$0xff] %v9626_v20  ;;  %v9636_v30 = vadd.f32 %v2507_v2, %v1830_v62  ;;  %v9642_v48 = vadd.f32 %v4870_v10, %v9199_v27  ;;  %v5279_v41 = vmul.f32 %v9211_v29, %v9509_v35 }
 0x330   : > { %13419 = vst [vmem:[#allocation74_spill] sm:$0xff] %v9629_v33  ;;  %13420 = vst [vmem:[#allocation75_spill] sm:$0xff] %v9632_v24  ;;  %v7459_v59 = vpop.f32.mrf.mxu0  ;;  %v9652_v3 = vadd.f32 %v4873_v5, %v9199_v27  ;;  %v5077_v62 = vmul.f32 %v9206_v25, %v9529_v18  ;;  %v9659_v9 = vadd.f32 %v9620_v40, %v3880_v34 }
 0x331   : > { %13421 = vst [vmem:[#allocation76_spill] sm:$0xff] %v9636_v30  ;;  %13422 = vst [vmem:[#allocation77_spill] sm:$0xff] %v9639_v51  ;;  %v3227_v26 = vadd.f32 %v7459_v59, %v9316_v47  ;;  %v9666_v14 = vadd.f32 %v5074_v56, %v9204_v13  ;;  %v5278_v27 = vmul.f32 %v9211_v29, %v9512_v39 }
 0x332   : > { %13423 = vst [vmem:[#allocation78_spill] sm:$0xff] %v9642_v48  ;;  %13424 = vst [vmem:[#allocation79_spill] sm:$0xff] %v9645_v8  ;;  %v5483_v25 = vmul.f32 %v9219_v6, %v9509_v35  ;;  %v3067_v10 = vpop.f32.mrf.mxu0  ;;  %v5482_v34 = vmul.f32 %v9219_v6, %v9512_v39  ;;  %v5281_v47 = vmul.f32 %v9211_v29, %v9529_v18  ;;  %v9773_v8 = vstv %s9680_s19  ;;  %s9824_s19 = sld [smem:[#allocation5 + $0x7]] }
 0x333   : > { %13425 = vst [vmem:[#allocation80_spill] sm:$0xff] %v9652_v3  ;;  %13426 = vst [vmem:[#allocation81_spill] sm:$0xff] %v9663_v36  ;;  %v5485_v5 = vmul.f32 %v9219_v6, %v9529_v18  ;;  %v3466_v50 = vmul.f32 %v9517_v22, %v3227_v26  ;;  %v5687_v56 = vmul.f32 %v9221_v46, %v9509_v35  ;;  %v3906_v35 = vmin.f32 %v9659_v9, 0.0 }
 0x334   : > { %13427 = vst [vmem:[#allocation82_spill] sm:$0xff] %v9666_v14  ;;  %v3226_v2 = vadd.f32 %v3067_v10, %v9329_v7  ;;  %v5686_v59 = vmul.f32 %v9221_v46, %v9512_v39  ;;  %v9691_v3 = vadd.f32 %v5279_v41, %v9208_v23  ;;  %v7462_v29 = vpop.f32.mrf.mxu0  ;;  %v9694_v6 = vadd.f32 %v5077_v62, %v9204_v13 }
 0x335   : > { %v5689_v26 = vmul.f32 %v9221_v46, %v9529_v18  ;;  %v9702_v7 = vadd.f32 %v9520_v52, %v3466_v50  ;;  %v9706_v10 = vadd.f32 %v5278_v27, %v9208_v23  ;;  %v9709_v41 = vadd.f32 %v7462_v29, %v9347_v54 }
 0x336   : > { %13428 = vst [vmem:[#allocation83_spill] sm:$0xff] %v9691_v3  ;;  %13429 = vst [vmem:[#allocation84_spill] sm:$0xff] %v9694_v6  ;;  %v3465_v39 = vmul.f32 %v9517_v22, %v3226_v2  ;;  %v9714_v13 = vadd.f32 %v5483_v25, %v9213_v32  ;;  %v9717_v46 = vadd.f32 %v5482_v34, %v9213_v32  ;;  %v3077_v54 = vpop.f32.mrf.mxu0  ;;  %v9742_v2 = vstv %s9597_s24  ;;  %s9765_s24 = sld [smem:[#allocation5 + $0x186]] }
 0x337   : > { %13430 = vst [vmem:[#allocation85_spill] sm:$0xff] %v9706_v10  ;;  %v9720_v18 = vadd.f32 %v5281_v47, %v9208_v23  ;;  %v9723_v62 = vadd.f32 %v5485_v5, %v9213_v32  ;;  %v3492_v27 = vmin.f32 %v9702_v7, 0.0  ;;  %v9727_v50 = vadd.f32 %v5687_v56, %v9225_v37  ;;  %v3838_v23 = vpop.f32.mrf.mxu1 }
 0x338   : > { %13431 = vst [vmem:[#allocation86_spill] sm:$0xff] %v9714_v13  ;;  %13432 = vst [vmem:[#allocation87_spill] sm:$0xff] %v9717_v46  ;;  %v9730_v25 = vadd.f32 %v9520_v52, %v3465_v39  ;;  %v9733_v34 = vadd.f32 %v5686_v59, %v9225_v37  ;;  %v9738_v32 = vadd.f32 %v5689_v26, %v9225_v37  ;;  %v7465_v5 = vpop.f32.mrf.mxu0  ;;  %v3915_v56 = vmul.f32 1.442695, %v3906_v35 }
 0x339   : > { %13433 = vst [vmem:[#allocation88_spill] sm:$0xff] %v9720_v18  ;;  %13434 = vst [vmem:[#allocation89_spill] sm:$0xff] %v9723_v62  ;;  %v3228_v47 = vadd.f32 %v3077_v54, %v9363_v57  ;;  %v9747_v29 = vstv %s9607_s25  ;;  %v9750_v59 = vstv %s9617_s26  ;;  %v9753_v39 = vstv %s9634_s10  ;;  %s9775_s25 = sld [smem:[#allocation5 + $0x206]]  ;;  %v7546_v14 = vpop.f32.mrf.mxu1 }
 0x33a   : > { %13435 = vst [vmem:[#allocation90_spill] sm:$0xff] %v9727_v50  ;;  %13436 = vst [vmem:[#allocation91_spill] sm:$0xff] %v9733_v34  ;;  %v9756_v62 = vstv %s9647_s12  ;;  %v3231_v57 = vadd.f32 %v7465_v5, %v9381_v60  ;;  %v3087_v26 = vpop.f32.mrf.mxu0  ;;  %v9763_v54 = vstv %s9656_s13  ;;  %v3879_v35 = vmul.f32 %v9576_v42, %v3838_v23  ;;  %s9782_s26 = sld [smem:[#allocation5 + $0x286]] }
 0x33b   : > { %13437 = vst [vmem:[#allocation92_spill] sm:$0xff] %v9738_v32  ;;  %v3467_v37 = vmul.f32 %v9517_v22, %v3228_v47  ;;  %v3501_v32 = vmul.f32 1.442695, %v3492_v27  ;;  %v3491_v18 = vmin.f32 %v9730_v25, 0.0  ;;  %v9770_v6 = vstv %s9670_s18  ;;  %s9794_s10 = sld [smem:[#allocation5 + $0x306]] }
 0x33c   : > { %v3470_v47 = vmul.f32 %v9517_v22, %v3231_v57  ;;  %v3230_v5 = vadd.f32 %v3087_v26, %v9395_v38  ;;  %v7468_v24 = vpop.f32.mrf.mxu0  ;;  %7657 = vpow2.f32 %v3915_v56  ;;  %v9786_v23 = vstv %s9688_s20  ;;  %s9801_s12 = sld [smem:[#allocation5 + $0x386]] }
 0x33d   : > { %v9778_v60 = vadd.f32 %v9520_v52, %v3467_v37  ;;  %v3233_v27 = vadd.f32 %v7468_v24, %v9404_v11  ;;  %v9789_v34 = vstv %s9698_s21  ;;  %v9792_v46 = vstv %s9711_s22  ;;  %s9808_s13 = sld [smem:[#allocation2 + $0x103]] }
 0x33e   : > { %v9798_v57 = vadd.f32 %v9520_v52, %v3470_v47  ;;  %v3469_v38 = vmul.f32 %v9517_v22, %v3230_v5  ;;  %v3097_v26 = vpop.f32.mrf.mxu0  ;;  %v9804_v11 = vadd.f32 %v9620_v40, %v3879_v35  ;;  %7659 = vpow2.f32 %v3501_v32  ;;  %s9814_s18 = sld [smem:[#allocation2 + $0x183]] }
 0x33f   : > { %v3493_v37 = vmin.f32 %v9778_v60, 0.0  ;;  %v3499_v24 = vmul.f32 1.442695, %v3491_v18  ;;  %v3472_v56 = vmul.f32 %v9517_v22, %v3233_v27  ;;  %v3232_v10 = vadd.f32 %v3097_v26, %v9409_v58  ;;  %s9827_s20 = sld [smem:[#allocation5 + $0x87]] }
 0x340   : > { %13438 = vst [vmem:[#allocation93_spill] sm:$0xff] %v9804_v11  ;;  %v3496_v47 = vmin.f32 %v9798_v57, 0.0  ;;  %v9812_v5 = vadd.f32 %v9520_v52, %v3469_v38  ;;  %v7471_v33 = vpop.f32.mrf.mxu0  ;;  %v3882_v35 = vmul.f32 %v7546_v14, %v9576_v42  ;;  %v3468_v18 = vmul.f32 %v9517_v22, %v9709_v41  ;;  %s9835_s21 = sld [smem:[#allocation5 + $0x107]] }
 0x341   : > { %v3503_v48 = vmul.f32 1.442695, %v3493_v37  ;;  %v9820_v32 = vadd.f32 %v9520_v52, %v3472_v56  ;;  %v3471_v58 = vmul.f32 %v9517_v22, %v3232_v10  ;;  %v3235_v27 = vadd.f32 %v7471_v33, %v9414_v21  ;;  %s9838_s22 = sld [smem:[#allocation5 + $0x187]] }
 0x342   : > { %v3509_v37 = vmul.f32 1.442695, %v3496_v47  ;;  %v3495_v38 = vmin.f32 %v9812_v5, 0.0  ;;  %v3107_v26 = vpop.f32.mrf.mxu0  ;;  %v3905_v14 = vmin.f32 %v9804_v11, 0.0  ;;  %v9841_v10 = vadd.f32 %v9620_v40, %v3882_v35 }
 0x343   : > { %7661 = vpow2.f32 %v3503_v48  ;;  %v3498_v41 = vmin.f32 %v9820_v32, 0.0  ;;  %v9832_v56 = vadd.f32 %v9520_v52, %v3471_v58  ;;  %v3707_v21 = vmul.f32 %v9532_v16, %v3235_v27 }
 0x344   : > { %7663 = vpow2.f32 %v3499_v24  ;;  %v3507_v48 = vmul.f32 1.442695, %v3495_v38  ;;  %v3234_v22 = vadd.f32 %v3107_v26, %v9422_v49  ;;  %v7474_v33 = vpop.f32.mrf.mxu0  ;;  %13439 = vst [vmem:[#allocation94_spill] sm:$0xff] %v9841_v10  ;;  %v9844_v24 = vadd.f32 %v9520_v52, %v3468_v18 }
 0x345   : > { %7665 = vpow2.f32 %v3509_v37  ;;  %v3513_v47 = vmul.f32 1.442695, %v3498_v41  ;;  %v3497_v58 = vmin.f32 %v9832_v56, 0.0  ;;  %v9848_v27 = vstv %s9735_s23  ;;  %s9867_s23 = sld [smem:[#allocation5 + $0x307]] }
 0x346   : > { %7667 = vpow2.f32 %v3507_v48  ;;  %v3237_v49 = vadd.f32 %v7474_v33, %v9428_v19  ;;  %v3117_v37 = vpop.f32.mrf.mxu0  ;;  %v9854_v38 = vstv %s9744_s17  ;;  %v9857_v26 = vstv %s9758_s0  ;;  %s9871_s0 = sld [smem:[#allocation5 + $0x2]] }
 0x347   : > { %7669 = vpow2.f32 %v3513_v47  ;;  %v3511_v52 = vmul.f32 1.442695, %v3497_v58  ;;  %v9862_v35 = vadd.f32 %v9742_v2, %v3707_v21  ;;  %v9865_v18 = vstv %s9765_s24  ;;  %s9879_s17 = sld [smem:[#allocation5 + $0x82]] }
 0x348   : > { %13440 = vst [vmem:[#allocation95_spill] sm:$0xff] %v9865_v18  ;;  %v3706_v19 = vmul.f32 %v9532_v16, %v3234_v22  ;;  %v3236_v41 = vadd.f32 %v3117_v37, %v9435_v31  ;;  %v7477_v48 = vpop.f32.mrf.mxu0  ;;  %v3913_v33 = vmul.f32 1.442695, %v3905_v14  ;;  %v3908_v47 = vmin.f32 %v9841_v10, 0.0  ;;  %s9895_s24 = sld [smem:[#allocation5 + $0x102]] }
 0x349   : > { %v7658_v21 = vpop.eup %7657  ;;  %v3494_v58 = vmin.f32 %v9844_v24, 0.0  ;;  %7671 = vpow2.f32 %v3511_v52  ;;  %v3239_v20 = vadd.f32 %v7477_v48, %v9439_v44  ;;  %v9877_v50 = vstv %s9775_s25  ;;  %s10733_s25 = sld [smem:[#allocation5 + $0x202]] }
 0x34a   : > { %13441 = vst [vmem:[#allocation96_spill] sm:$0xff] %v9877_v50  ;;  %v9882_v31 = vmul.f32 %v9532_v16, %v3236_v41  ;;  %v9884_v22 = vpop.f32.mrf.mxu0  ;;  %v9887_v14 = vstv %s9782_s26  ;;  %v9890_v37 = vstv %s9794_s10  ;;  %v9893_v13 = vstv %s9801_s12  ;;  %s10738_s26 = sld [smem:[#allocation5 + $0x282]] }
 0x34b   : > { %13442 = vst [vmem:[#allocation97_spill] sm:$0xff] %v9887_v14  ;;  %13443 = vst [vmem:[#allocation98_spill] sm:$0xff] %v9890_v37  ;;  %v3733_v44 = vmin.f32 %v9862_v35, 0.0  ;;  %v9899_v52 = vmul.f32 %v9532_v16, %v3239_v20  ;;  %v9902_v41 = vstv %s9808_s13  ;;  %v9905_v48 = vstv %s9814_s18  ;;  %v7660_v3 = vpop.eup %7659  ;;  %s10756_s10 = sld [smem:[#allocation5 + $0x302]] }
 0x34c   : > { %13444 = vst [vmem:[#allocation99_spill] sm:$0xff] %v9893_v13  ;;  %13445 = vst [vmem:[#allocation100_spill] sm:$0xff] %v9905_v48  ;;  %v9908_v36 = vadd.f32 %v9742_v2, %v3706_v19  ;;  %v6437_v51 = vadd.f32 -1.0, %v7658_v21  ;;  %7673 = vpow2.f32 %v3913_v33  ;;  %v3919_v12 = vmul.f32 1.442695, %v3908_v47  ;;  %v9910_v30 = vpop.f32.mrf.mxu0  ;;  %s10759_s12 = sld [smem:[#allocation5 + $0x382]] }
 0x34d   : > { %v3505_v40 = vmul.f32 1.442695, %v3494_v58  ;;  %v9913_v42 = vstv %s9824_s19  ;;  %v9916_v20 = vstv %s9827_s20  ;;  %vm3898_vm10 = vcmp.gt.f32.partialorder %v9659_v9, 0.0  ;;  %s10841_s13 = sld [smem:[#allocation2 + $0x1]] }
 0x34e   : > { %13446 = vst [vmem:[#allocation101_spill] sm:$0xff] %v9913_v42  ;;  %13447 = vst [vmem:[#allocation102_spill] sm:$0xff] %v9916_v20  ;;  %v9920_v10 = vstv %s9835_s21  ;;  %v9923_v11 = vstv %s9838_s22  ;;  %v9926_v48 = vstv %s9850_s1  ;;  %v9929_v19 = vstv %s9859_s2  ;;  %s10027_s1 = sld [smem:[#allocation5 + $0x387]] }
 0x34f   : > { %13448 = vst [vmem:[#allocation103_spill] sm:$0xff] %v9920_v10  ;;  %13449 = vst [vmem:[#allocation104_spill] sm:$0xff] %v9923_v11  ;;  %v6391_v47 = vadd.f32 -1.0, %v7660_v3  ;;  %v3742_v21 = vmul.f32 1.442695, %v3733_v44  ;;  %v3709_v58 = vmul.f32 %v9532_v16, %v3237_v49  ;;  %v9933_v42 = vstv %s9867_s23  ;;  %v9941_v44 = vpop.f32.mrf.mxu0  ;;  %s10720_s2 = sld [smem:[#allocation5 + $0x182]] }
 0x350   : > { %13450 = vst [vmem:[#allocation105_spill] sm:$0xff] %v9926_v48  ;;  %13451 = vst [vmem:[#allocation106_spill] sm:$0xff] %v9929_v19  ;;  %v7662_v33 = vpop.eup %7661  ;;  %vm3484_vm11 = vcmp.gt.f32.partialorder %v9702_v7, 0.0  ;;  %v3732_v10 = vmin.f32 %v9908_v36, 0.0  ;;  %v9938_v11 = vsel %vm3898_vm10, %v9659_v9, %v6437_v51  ;;  %7675 = vpow2.f32 %v3919_v12  ;;  %s10895_s18 = sld [smem:[#allocation2 + $0x81]] }
 0x351   : > { %13452 = vst [vmem:[#allocation107_spill] sm:$0xff] %v9933_v42  ;;  %v7664_v20 = vpop.eup %7663  ;;  %7677 = vpow2.f32 %v3505_v40  ;;  %vm3485_vm12 = vcmp.gt.f32.partialorder %v9778_v60, 0.0  ;;  %v6392_v3 = vadd.f32 -1.0, %v7662_v33  ;;  %v9944_v49 = vstv %s9871_s0  ;;  %s11071_s19 = sld [smem:[#allocation5 + $0x1]] }
 0x352   : > { %v7666_v19 = vpop.eup %7665  ;;  %13453 = vst [vmem:[#allocation108_spill] sm:$0xff] %v9944_v49  ;;  %vm3488_vm13 = vcmp.gt.f32.partialorder %v9798_v57, 0.0  ;;  %vm3487_vm14 = vcmp.gt.f32.partialorder %v9812_v5, 0.0  ;;  %v9949_v42 = vstv %s9879_s17  ;;  %v9952_v48 = vstv %s9895_s24  ;;  %s11080_s20 = sld [smem:[#allocation5 + $0x81]] }
 0x353   : > { %13454 = vst [vmem:[#allocation109_spill] sm:$0xff] %v9949_v42  ;;  %13455 = vst [vmem:[#allocation110_spill] sm:$0xff] %v9952_v48  ;;  %v7668_v51 = vpop.eup %7667  ;;  %v9955_v12 = vsel %vm3484_vm11, %v9702_v7, %v6391_v47  ;;  %v9957_v40 = vadd.f32 -1.0, %v7664_v20  ;;  %vm3490_vm15 = vcmp.gt.f32.partialorder %v9820_v32, 0.0  ;;  %vm3489_vm1 = vcmp.gt.f32.partialorder %v9832_v56, 0.0  ;;  %s11094_s21 = sld [smem:[#allocation5 + $0x101]] }
 0x354   : > { %7679 = vpow2.f32 %v3742_v21  ;;  %v9962_v9 = vadd.f32 %v9742_v2, %v3709_v58  ;;  %v7670_v33 = vpop.eup %7669  ;;  %v3525_v13 = vsel %vm3485_vm12, %v9778_v60, %v6392_v3  ;;  %v6395_v37 = vadd.f32 -1.0, %v7666_v19  ;;  %v9979_v58 = vpop.f32.mrf.mxu0  ;;  %s11108_s22 = sld [smem:[#allocation5 + $0x181]] }
 0x355   : > { %v6394_v14 = vadd.f32 -1.0, %v7668_v51  ;;  %v3740_v50 = vmul.f32 1.442695, %v3732_v10  ;;  %v9968_v7 = vmul.f32 %v9526_v15, %v3525_v13  ;;  %v9971_v20 = vmul.f32 %v9537_v28, %v3525_v13  ;;  %s11125_s23 = sld [smem:[#allocation5 + $0x201]] }
 0x356   : > { %v9974_v47 = vmul.f32 %v9549_v1, %v3525_v13  ;;  %v9977_v21 = vmul.f32 %v9552_v4, %v3525_v13  ;;  %v7672_v18 = vpop.eup %7671  ;;  %v9982_v60 = vmul.f32 %v9557_v0, %v3525_v13  ;;  %v9985_v10 = vmul.f32 %v9560_v53, %v3525_v13  ;;  %s11133_s0 = sld [smem:[#allocation5 + $0x281]] }
 0x357   : > { %13456 = vst [vmem:[#allocation111_spill] sm:$0xff] %v9968_v7  ;;  %13457 = vst [vmem:[#allocation112_spill] sm:$0xff] %v9971_v20  ;;  %v9988_v19 = vmul.f32 %v9570_v55, %v3525_v13  ;;  %v9991_v3 = vmul.f32 %v9573_v61, %v3525_v13  ;;  %v3528_v51 = vsel %vm3488_vm13, %v9798_v57, %v6395_v37  ;;  %v6396_v20 = vadd.f32 -1.0, %v7672_v18  ;;  %v10025_v37 = vpop.f32.mrf.mxu0  ;;  %s11150_s17 = sld [smem:[#allocation5 + $0x301]] }
 0x358   : > { %13458 = vst [vmem:[#allocation113_spill] sm:$0xff] %v9974_v47  ;;  %13459 = vst [vmem:[#allocation114_spill] sm:$0xff] %v9977_v21  ;;  %v3527_v21 = vsel %vm3487_vm14, %v9812_v5, %v6394_v14  ;;  %v6397_v47 = vadd.f32 -1.0, %v7670_v33  ;;  %v10009_v13 = vmul.f32 %v9552_v4, %v3528_v51  ;;  %v10014_v57 = vmul.f32 %v9557_v0, %v3528_v51  ;;  %s11160_s24 = sld [smem:[#allocation5 + $0x381]] }
 0x359   : > { %13460 = vst [vmem:[#allocation115_spill] sm:$0xff] %v9982_v60  ;;  %13461 = vst [vmem:[#allocation116_spill] sm:$0xff] %v9985_v10  ;;  %v10000_v60 = vmul.f32 %v9526_v15, %v3528_v51  ;;  %v10003_v10 = vmul.f32 %v9537_v28, %v3528_v51  ;;  %v10017_v5 = vmul.f32 %v9560_v53, %v3528_v51  ;;  %7681 = vpow2.f32 %v3740_v50 }
 0x35a   : > { %13462 = vst [vmem:[#allocation117_spill] sm:$0xff] %v9988_v19  ;;  %13463 = vst [vmem:[#allocation118_spill] sm:$0xff] %v9991_v3  ;;  %v10006_v19 = vmul.f32 %v9549_v1, %v3528_v51  ;;  %v10011_v3 = vpop.eup %7673  ;;  %v10020_v18 = vmul.f32 %v9570_v55, %v3528_v51  ;;  %v10023_v14 = vmul.f32 %v9573_v61, %v3528_v51  ;;  %vm3483_vm2 = vcmp.gt.f32.partialorder %v9730_v25, 0.0 }
 0x35b   : > { %13464 = vst [vmem:[#allocation119_spill] sm:$0xff] %v10000_v60  ;;  %13465 = vst [vmem:[#allocation120_spill] sm:$0xff] %v10003_v10  ;;  %v10030_v33 = vmul.f32 %v9526_v15, %v3527_v21  ;;  %v10045_v51 = vmul.f32 %v9560_v53, %v3527_v21  ;;  %vm3486_vm3 = vcmp.gt.f32.partialorder %v9844_v24, 0.0  ;;  %vm3725_vm4 = vcmp.gt.f32.partialorder %v9862_v35, 0.0 }
 0x35c   : > { %13466 = vst [vmem:[#allocation121_spill] sm:$0xff] %v10006_v19  ;;  %13467 = vst [vmem:[#allocation122_spill] sm:$0xff] %v10009_v13  ;;  %v10033_v13 = vmul.f32 %v9537_v28, %v3527_v21  ;;  %v10171_v10 = vmul.f32 %v9573_v61, %v9955_v12  ;;  %vm3724_vm5 = vcmp.gt.f32.partialorder %v9908_v36, 0.0  ;;  %vm3727_vm11 = vcmp.gt.f32.partialorder %v9962_v9, 0.0 }
 0x35d   : > { %13468 = vst [vmem:[#allocation123_spill] sm:$0xff] %v10014_v57  ;;  %13469 = vst [vmem:[#allocation124_spill] sm:$0xff] %v10017_v5  ;;  %v10036_v57 = vmul.f32 %v9549_v1, %v3527_v21  ;;  %v10039_v5 = vmul.f32 %v9552_v4, %v3527_v21 }
 0x35e   : > { %13470 = vst [vmem:[#allocation125_spill] sm:$0xff] %v10020_v18  ;;  %13471 = vst [vmem:[#allocation126_spill] sm:$0xff] %v10023_v14  ;;  %v10042_v18 = vmul.f32 %v9557_v0, %v3527_v21  ;;  %v10048_v14 = vmul.f32 %v9570_v55, %v3527_v21 }
 0x35f   : > { %13472 = vst [vmem:[#allocation127_spill] sm:$0xff] %v10030_v33  ;;  %13473 = vst [vmem:[#allocation128_spill] sm:$0xff] %v10033_v13  ;;  %v10051_v33 = vmul.f32 %v9573_v61, %v3527_v21  ;;  %v3530_v13 = vsel %vm3490_vm15, %v9820_v32, %v6397_v47  ;;  %v7486_v47 = vpop.f32.mrf.mxu0 }
 0x360   : > { %13474 = vst [vmem:[#allocation129_spill] sm:$0xff] %v10036_v57  ;;  %13475 = vst [vmem:[#allocation130_spill] sm:$0xff] %v10039_v5  ;;  %v3529_v5 = vsel %vm3489_vm1, %v9832_v56, %v6396_v20  ;;  %v10060_v57 = vpop.eup %7675  ;;  %v10069_v21 = vmul.f32 %v9549_v1, %v3530_v13  ;;  %v10072_v32 = vmul.f32 %v9552_v4, %v3530_v13 }
 0x361   : > { %13476 = vst [vmem:[#allocation131_spill] sm:$0xff] %v10042_v18  ;;  %13477 = vst [vmem:[#allocation132_spill] sm:$0xff] %v10045_v51  ;;  %v3735_v18 = vmin.f32 %v9962_v9, 0.0  ;;  %v10063_v51 = vmul.f32 %v9526_v15, %v3530_v13  ;;  %v10075_v50 = vmul.f32 %v9557_v0, %v3530_v13  ;;  %v10078_v56 = vmul.f32 %v9560_v53, %v3530_v13 }
 0x362   : > { %13478 = vst [vmem:[#allocation133_spill] sm:$0xff] %v10048_v14  ;;  %13479 = vst [vmem:[#allocation134_spill] sm:$0xff] %v10051_v33  ;;  %v10066_v14 = vmul.f32 %v9537_v28, %v3530_v13  ;;  %v7678_v33 = vpop.eup %7677  ;;  %v10081_v20 = vmul.f32 %v9570_v55, %v3530_v13  ;;  %v10099_v19 = vmul.f32 %v9557_v0, %v3529_v5 }
 0x363   : > { %13480 = vst [vmem:[#allocation135_spill] sm:$0xff] %v10063_v51  ;;  %13482 = vst [vmem:[#allocation137_spill] sm:$0xff] %v10069_v21  ;;  %v10087_v21 = vmul.f32 %v9526_v15, %v3529_v5  ;;  %v10093_v51 = vmul.f32 %v9549_v1, %v3529_v5  ;;  %v6393_v60 = vadd.f32 -1.0, %v7678_v33 }
 0x364   : > { %13481 = vst [vmem:[#allocation136_spill] sm:$0xff] %v10066_v14  ;;  %13483 = vst [vmem:[#allocation138_spill] sm:$0xff] %v10072_v32  ;;  %v10084_v14 = vmul.f32 %v9573_v61, %v3530_v13  ;;  %v10090_v32 = vmul.f32 %v9537_v28, %v3529_v5  ;;  %v10105_v13 = vmul.f32 %v9570_v55, %v3529_v5 }
 0x365   : > { %13484 = vst [vmem:[#allocation139_spill] sm:$0xff] %v10075_v50  ;;  %13485 = vst [vmem:[#allocation140_spill] sm:$0xff] %v10078_v56  ;;  %v10096_v50 = vmul.f32 %v9552_v4, %v3529_v5  ;;  %v7680_v56 = vpop.eup %7679 }
 0x366   : > { %13486 = vst [vmem:[#allocation141_spill] sm:$0xff] %v10081_v20  ;;  %13487 = vst [vmem:[#allocation142_spill] sm:$0xff] %v10084_v14  ;;  %v10102_v20 = vmul.f32 %v9560_v53, %v3529_v5  ;;  %v10157_v14 = vmul.f32 %v9557_v0, %v9955_v12  ;;  %v6419_v33 = vadd.f32 -1.0, %v7680_v56 }
 0x367   : > { %13488 = vst [vmem:[#allocation143_spill] sm:$0xff] %v10087_v21  ;;  %13489 = vst [vmem:[#allocation144_spill] sm:$0xff] %v10090_v32  ;;  %v10108_v21 = vmul.f32 %v9573_v61, %v3529_v5  ;;  %v10122_v32 = vstv %s10027_s1  ;;  %v10127_v5 = vmul.f32 %v9944_v49, %v9938_v11  ;;  %s11648_s1 = sld [smem:[#allocation2 + $0x3]] }
 0x368   : > { %13490 = vst [vmem:[#allocation145_spill] sm:$0xff] %v10093_v51  ;;  %13491 = vst [vmem:[#allocation146_spill] sm:$0xff] %v10096_v50  ;;  %v10113_v51 = vadd.f32 %v9742_v2, %v9882_v31  ;;  %v10117_v50 = vadd.f32 %v9742_v2, %v9899_v52  ;;  %v10135_v31 = vmul.f32 %v9526_v15, %v9955_v12 }
 0x369   : > { %13492 = vst [vmem:[#allocation147_spill] sm:$0xff] %v10099_v19  ;;  %13493 = vst [vmem:[#allocation148_spill] sm:$0xff] %v10102_v20  ;;  %v10119_v19 = vpop.f32.mrf.mxu0  ;;  %v10139_v52 = vmul.f32 %v9537_v28, %v9955_v12  ;;  %v3523_v20 = vsel %vm3483_vm2, %v9730_v25, %v9957_v40  ;;  %v10163_v40 = vmul.f32 %v9560_v53, %v9955_v12 }
 0x36a   : > { %13494 = vst [vmem:[#allocation149_spill] sm:$0xff] %v10105_v13  ;;  %13495 = vst [vmem:[#allocation150_spill] sm:$0xff] %v10108_v21  ;;  %v3746_v13 = vmul.f32 1.442695, %v3735_v18  ;;  %v10131_v21 = vmul.f32 %v9949_v42, %v9938_v11  ;;  %v10145_v18 = vmul.f32 %v9952_v48, %v9938_v11  ;;  %v3734_v25 = vmin.f32 %v10113_v51, 0.0 }
 0x36b   : > { %13496 = vst [vmem:[#allocation151_spill] sm:$0xff] %v10127_v5  ;;  %13498 = vst [vmem:[#allocation153_spill] sm:$0xff] %v10135_v31  ;;  %v10149_v5 = vmul.f32 %v9549_v1, %v9955_v12  ;;  %v7489_v7 = vpop.f32.mrf.mxu0  ;;  %v10220_v56 = vmul.f32 %v9573_v61, %v3523_v20  ;;  %vm3726_vm6 = vcmp.gt.f32.partialorder %v10113_v51, 0.0  ;;  %vm3729_vm7 = vcmp.gt.f32.partialorder %v10117_v50, 0.0 }
 0x36c   : > { %13497 = vst [vmem:[#allocation152_spill] sm:$0xff] %v10131_v21  ;;  %13499 = vst [vmem:[#allocation154_spill] sm:$0xff] %v10139_v52  ;;  %v10153_v21 = vmul.f32 %v9552_v4, %v9955_v12  ;;  %7683 = vpow2.f32 %v3746_v13  ;;  %v3737_v52 = vmin.f32 %v10117_v50, 0.0  ;;  %v7682_v13 = vpop.eup %7681 }
 0x36d   : > { %13500 = vst [vmem:[#allocation155_spill] sm:$0xff] %v10145_v18  ;;  %13501 = vst [vmem:[#allocation156_spill] sm:$0xff] %v10149_v5  ;;  %v10167_v18 = vmul.f32 %v9570_v55, %v9955_v12  ;;  %v10180_v5 = vmul.f32 %v9549_v1, %v3523_v20  ;;  %v3241_v12 = vadd.f32 %v9910_v30, %v9446_v43 }
 0x36e   : > { %13502 = vst [vmem:[#allocation157_spill] sm:$0xff] %v10153_v21  ;;  %13503 = vst [vmem:[#allocation158_spill] sm:$0xff] %v10157_v14  ;;  %v10174_v14 = vmul.f32 %v9526_v15, %v3523_v20  ;;  %v10177_v21 = vmul.f32 %v9537_v28, %v3523_v20  ;;  %v10197_v43 = vmul.f32 %v9552_v4, %v3523_v20 }
 0x36f   : > { %13504 = vst [vmem:[#allocation159_spill] sm:$0xff] %v10163_v40  ;;  %13505 = vst [vmem:[#allocation160_spill] sm:$0xff] %v10167_v18  ;;  %v3744_v40 = vmul.f32 1.442695, %v3734_v25  ;;  %v3238_v18 = vadd.f32 %v9884_v22, %v9443_v17  ;;  %v3750_v25 = vmul.f32 1.442695, %v3737_v52  ;;  %v3713_v17 = vmul.f32 %v9532_v16, %v3241_v12  ;;  %v3167_v22 = vpop.f32.mrf.mxu0 }
 0x370   : > { %13506 = vst [vmem:[#allocation161_spill] sm:$0xff] %v10171_v10  ;;  %13507 = vst [vmem:[#allocation162_spill] sm:$0xff] %v10174_v14  ;;  %v3240_v14 = vadd.f32 %v9941_v44, %v9449_v63  ;;  %v13510_v10 = vld [vmem:[#allocation63_spill] sm:$0xff]  ;;  %v10200_v30 = vmul.f32 %v9557_v0, %v3523_v20  ;;  %v3526_v63 = vsel %vm3486_vm3, %v9844_v24, %v6393_v60 }
 0x371   : > { %13508 = vst [vmem:[#allocation163_spill] sm:$0xff] %v10177_v21  ;;  %13509 = vst [vmem:[#allocation164_spill] sm:$0xff] %v10180_v5  ;;  %v3242_v21 = vadd.f32 %v10025_v37, %v9455_v45  ;;  %v10192_v31 = vadd.f32 %v7486_v47, %v13510_v10  ;;  %7685 = vpow2.f32 %v3744_v40  ;;  %v3710_v5 = vmul.f32 %v9532_v16, %v3238_v18  ;;  %v7492_v18 = vpop.f32.mrf.mxu0 }
 0x372   : > { %v3712_v45 = vmul.f32 %v9532_v16, %v3240_v14  ;;  %v10208_v44 = vmul.f32 %v9560_v53, %v3523_v20  ;;  %7687 = vpow2.f32 %v3750_v25  ;;  %v10214_v37 = vadd.f32 %v9742_v2, %v3713_v17  ;;  %v13511_v16 = vld [vmem:[#allocation62_spill] sm:$0xff] }
 0x373   : > { %v10211_v10 = vadd.f32 %v9742_v2, %v3710_v5  ;;  %v10217_v47 = vmul.f32 %v9570_v55, %v3523_v20  ;;  %v3243_v60 = vadd.f32 %v9979_v58, %v13511_v16  ;;  %v10228_v14 = vmul.f32 %v9526_v15, %v3526_v63  ;;  %v3177_v17 = vpop.f32.mrf.mxu0  ;;  %v13522_v16 = vld [vmem:[#allocation64_spill] sm:$0xff] }
 0x374   : > { %v10223_v24 = vadd.f32 %v9742_v2, %v3712_v45  ;;  %v10231_v5 = vmul.f32 %v9537_v28, %v3526_v63  ;;  %v10234_v52 = vmul.f32 %v9549_v1, %v3526_v63  ;;  %v10239_v20 = vsel %vm3725_vm4, %v9862_v35, %v6419_v33 }
 0x375   : > { %v10242_v2 = vmul.f32 %v9552_v4, %v3526_v63  ;;  %v10245_v58 = vmul.f32 %v9557_v0, %v3526_v63  ;;  %v10248_v15 = vmul.f32 %v9560_v53, %v3526_v63  ;;  %v10251_v28 = vmul.f32 %v9570_v55, %v3526_v63 }
 0x376   : > { %13512 = vst [vmem:[#allocation63_spill] sm:$0xff] %v10234_v52  ;;  %v10254_v1 = vmul.f32 %v9573_v61, %v3526_v63  ;;  %v6418_v40 = vadd.f32 -1.0, %v7682_v13  ;;  %v3736_v35 = vmin.f32 %v10211_v10, 0.0  ;;  %v3739_v12 = vmin.f32 %v10214_v37, 0.0  ;;  %v10300_v52 = vpop.f32.mrf.mxu0 }
 0x377   : > { %13513 = vst [vmem:[#allocation62_spill] sm:$0xff] %v10242_v2  ;;  %13514 = vst [vmem:[#allocation165_spill] sm:$0xff] %v10245_v58  ;;  %v10260_v4 = vmul.f32 %v9747_v29, %v10239_v20  ;;  %v3738_v0 = vmin.f32 %v10223_v24, 0.0  ;;  %v3948_v53 = vmul.f32 %v9789_v34, %v3243_v60  ;;  %v3947_v33 = vmul.f32 %v9789_v34, %v3242_v21 }
 0x378   : > { %13515 = vst [vmem:[#allocation166_spill] sm:$0xff] %v10248_v15  ;;  %13516 = vst [vmem:[#allocation167_spill] sm:$0xff] %v10251_v28  ;;  %v10267_v55 = vmul.f32 %v9750_v59, %v10239_v20  ;;  %v10271_v61 = vmul.f32 %v9753_v39, %v10239_v20  ;;  %v3748_v13 = vmul.f32 1.442695, %v3736_v35  ;;  %v3754_v25 = vmul.f32 1.442695, %v3739_v12 }
 0x379   : > { %13517 = vst [vmem:[#allocation168_spill] sm:$0xff] %v10254_v1  ;;  %v10275_v63 = vmul.f32 %v9756_v62, %v10239_v20  ;;  %v10279_v45 = vmul.f32 %v9763_v54, %v10239_v20  ;;  %v3752_v21 = vmul.f32 1.442695, %v3738_v0  ;;  %v3244_v60 = vadd.f32 %v10119_v19, %v13522_v16  ;;  %v7684_v1 = vpop.eup %7683  ;;  %v13523_v35 = vld [vmem:[#allocation65_spill] sm:$0xff]  ;;  %v13524_v15 = vld [vmem:[#allocation66_spill] sm:$0xff] }
 0x37a   : > { %13518 = vst [vmem:[#allocation169_spill] sm:$0xff] %v10267_v55  ;;  %13519 = vst [vmem:[#allocation170_spill] sm:$0xff] %v10271_v61  ;;  %v10286_v28 = vsel %vm3724_vm5, %v9908_v36, %v6418_v40  ;;  %7689 = vpow2.f32 %v3748_v13  ;;  %v3247_v12 = vadd.f32 %v7489_v7, %v13523_v35  ;;  %v3246_v58 = vadd.f32 %v3167_v22, %v13524_v15  ;;  %v13525_v40 = vld [vmem:[#allocation67_spill] sm:$0xff]  ;;  %v13526_v15 = vld [vmem:[#allocation12_spill] sm:$0xff] }
 0x37b   : > { %13520 = vst [vmem:[#allocation171_spill] sm:$0xff] %v10275_v63  ;;  %13521 = vst [vmem:[#allocation172_spill] sm:$0xff] %v10279_v45  ;;  %7691 = vpow2.f32 %v3754_v25  ;;  %v10291_v2 = vadd.f32 %v9792_v46, %v3948_v53  ;;  %v10294_v0 = vadd.f32 %v9792_v46, %v3947_v33  ;;  %v3949_v19 = vmul.f32 %v9789_v34, %v3244_v60 }
 0x37c   : > { %7693 = vpow2.f32 %v3752_v21  ;;  %v3952_v16 = vmul.f32 %v9789_v34, %v3247_v12  ;;  %v3951_v36 = vmul.f32 %v9789_v34, %v3246_v58  ;;  %v3249_v13 = vadd.f32 %v7492_v18, %v13525_v40 }
 0x37d   : > { %v10305_v22 = vadd.f32 %v9792_v46, %v3949_v19  ;;  %v3248_v53 = vadd.f32 %v3177_v17, %v13526_v15  ;;  %v10308_v33 = vadd.f32 -1.0, %v7684_v1  ;;  %v3974_v60 = vmin.f32 %v10291_v2, 0.0 }
 0x37e   : > { %v7686_v7 = vpop.eup %7685  ;;  %v10311_v21 = vadd.f32 %v9792_v46, %v3952_v16  ;;  %v10314_v18 = vadd.f32 %v9792_v46, %v3951_v36  ;;  %v3950_v35 = vmul.f32 %v9789_v34, %v10192_v31  ;;  %v3954_v19 = vmul.f32 %v9789_v34, %v3249_v13 }
 0x37f   : > { %v6420_v25 = vadd.f32 -1.0, %v7686_v7  ;;  %v7688_v58 = vpop.eup %7687  ;;  %v3975_v12 = vmin.f32 %v10305_v22, 0.0  ;;  %v3973_v40 = vmin.f32 %v10294_v0, 0.0  ;;  %v3187_v7 = vpop.f32.mrf.mxu0  ;;  %vm3728_vm8 = vcmp.gt.f32.partialorder %v10211_v10, 0.0 }
 0x380   : > { %v6423_v17 = vadd.f32 -1.0, %v7688_v58  ;;  %v3978_v16 = vmin.f32 %v10311_v21, 0.0  ;;  %vm3731_vm9 = vcmp.gt.f32.partialorder %v10214_v37, 0.0  ;;  %vm3730_vm10 = vcmp.gt.f32.partialorder %v10223_v24, 0.0 }
 0x381   : > { %v3766_v1 = vsel %vm3726_vm6, %v10113_v51, %v6420_v25  ;;  %v3981_v55 = vmul.f32 1.442695, %v3973_v40  ;;  %vm3967_vm12 = vcmp.gt.f32.partialorder %v10305_v22, 0.0  ;;  %vm3970_vm13 = vcmp.gt.f32.partialorder %v10311_v21, 0.0 }
 0x382   : > { %v10325_v36 = vmul.f32 %v9747_v29, %v3766_v1  ;;  %v10328_v15 = vmul.f32 %v9750_v59, %v3766_v1  ;;  %v10331_v31 = vmul.f32 %v9753_v39, %v3766_v1  ;;  %v10334_v45 = vmul.f32 %v9756_v62, %v3766_v1 }
 0x383   : > { %v10338_v51 = vmul.f32 %v9763_v54, %v3766_v1  ;;  %v10341_v13 = vmul.f32 %v9770_v6, %v3766_v1  ;;  %v10344_v25 = vmul.f32 %v9773_v8, %v3766_v1  ;;  %v10347_v58 = vmul.f32 %v9786_v23, %v3766_v1 }
 0x384   : > { %13527 = vst [vmem:[#allocation64_spill] sm:$0xff] %v10325_v36  ;;  %13528 = vst [vmem:[#allocation65_spill] sm:$0xff] %v10328_v15  ;;  %v3985_v15 = vmul.f32 1.442695, %v3975_v12  ;;  %v3991_v36 = vmul.f32 1.442695, %v3978_v16 }
 0x385   : > { %13529 = vst [vmem:[#allocation66_spill] sm:$0xff] %v10331_v31  ;;  %13530 = vst [vmem:[#allocation67_spill] sm:$0xff] %v10334_v45  ;;  %v3769_v31 = vsel %vm3729_vm7, %v10117_v50, %v6423_v17  ;;  %v10353_v45 = vadd.f32 %v9792_v46, %v3950_v35  ;;  %v3977_v16 = vmin.f32 %v10314_v18, 0.0  ;;  %vm3969_vm14 = vcmp.gt.f32.partialorder %v10314_v18, 0.0 }
 0x386   : > { %13531 = vst [vmem:[#allocation12_spill] sm:$0xff] %v10338_v51  ;;  %13532 = vst [vmem:[#allocation173_spill] sm:$0xff] %v10341_v13  ;;  %v10356_v51 = vmul.f32 %v9747_v29, %v3769_v31  ;;  %v10359_v13 = vmul.f32 %v9750_v59, %v3769_v31  ;;  %v10365_v1 = vmul.f32 %v9756_v62, %v3769_v31  ;;  %7695 = vpow2.f32 %v3985_v15 }
 0x387   : > { %13533 = vst [vmem:[#allocation174_spill] sm:$0xff] %v10344_v25  ;;  %13534 = vst [vmem:[#allocation175_spill] sm:$0xff] %v10347_v58  ;;  %v10362_v25 = vmul.f32 %v9753_v39, %v3769_v31  ;;  %v7498_v58 = vpop.f32.mrf.mxu0  ;;  %v10368_v50 = vmul.f32 %v9763_v54, %v3769_v31  ;;  %v10371_v35 = vmul.f32 %v9770_v6, %v3769_v31  ;;  %7697 = vpow2.f32 %v3991_v36 }
 0x388   : > { %13535 = vst [vmem:[#allocation176_spill] sm:$0xff] %v10356_v51  ;;  %13536 = vst [vmem:[#allocation177_spill] sm:$0xff] %v10359_v13  ;;  %v10374_v12 = vmul.f32 %v9773_v8, %v3769_v31  ;;  %v10377_v17 = vmul.f32 %v9786_v23, %v3769_v31  ;;  %v7690_v13 = vpop.eup %7689  ;;  %v13544_v51 = vld [vmem:[#allocation20_spill] sm:$0xff]  ;;  %v3983_v15 = vmul.f32 1.442695, %v3974_v60  ;;  %vm3966_vm15 = vcmp.gt.f32.partialorder %v10291_v2, 0.0 }
 0x389   : > { %13537 = vst [vmem:[#allocation178_spill] sm:$0xff] %v10362_v25  ;;  %13538 = vst [vmem:[#allocation179_spill] sm:$0xff] %v10365_v1  ;;  %v10381_v25 = vadd.f32 %v9792_v46, %v3954_v19  ;;  %v3953_v1 = vmul.f32 %v9789_v34, %v3248_v53  ;;  %v7692_v31 = vpop.eup %7691  ;;  %v3989_v63 = vmul.f32 1.442695, %v3977_v16  ;;  %vm3965_vm1 = vcmp.gt.f32.partialorder %v10294_v0, 0.0 }
 0x38a   : > { %13539 = vst [vmem:[#allocation180_spill] sm:$0xff] %v10368_v50  ;;  %13540 = vst [vmem:[#allocation181_spill] sm:$0xff] %v10371_v35  ;;  %v13543_v50 = vld [vmem:[#allocation14_spill] sm:$0xff]  ;;  %v7694_v19 = vpop.eup %7693  ;;  %v6425_v61 = vadd.f32 -1.0, %v7692_v31  ;;  %vm3968_vm3 = vcmp.gt.f32.partialorder %v10353_v45, 0.0 }
 0x38b   : > { %13541 = vst [vmem:[#allocation182_spill] sm:$0xff] %v10374_v12  ;;  %13542 = vst [vmem:[#allocation183_spill] sm:$0xff] %v10377_v17  ;;  %v10386_v35 = vadd.f32 %v3187_v7, %v13543_v50  ;;  %v10389_v12 = vadd.f32 %v7498_v58, %v13544_v51  ;;  %v6422_v17 = vadd.f32 -1.0, %v7690_v13  ;;  %v3980_v34 = vmin.f32 %v10381_v25, 0.0 }
 0x38c   : > { %v10394_v53 = vadd.f32 %v9792_v46, %v3953_v1  ;;  %v6424_v36 = vadd.f32 -1.0, %v7694_v19  ;;  %v3976_v51 = vmin.f32 %v10353_v45, 0.0  ;;  %7699 = vpow2.f32 %v3989_v63 }
 0x38d   : > { %v3768_v7 = vsel %vm3728_vm8, %v10211_v10, %v6422_v17  ;;  %v3771_v50 = vsel %vm3731_vm9, %v10214_v37, %v6425_v61  ;;  %7701 = vpow2.f32 %v3983_v15  ;;  %v3995_v16 = vmul.f32 1.442695, %v3980_v34 }
 0x38e   : > { %v10402_v60 = vmul.f32 %v9747_v29, %v3768_v7  ;;  %v10405_v40 = vmul.f32 %v9750_v59, %v3768_v7  ;;  %v10408_v13 = vmul.f32 %v9753_v39, %v3768_v7  ;;  %v10411_v46 = vmul.f32 %v9756_v62, %v3768_v7 }
 0x38f   : > { %v10414_v58 = vmul.f32 %v9763_v54, %v3768_v7  ;;  %v10417_v10 = vmul.f32 %v9770_v6, %v3768_v7  ;;  %v10420_v63 = vmul.f32 %v9773_v8, %v3768_v7  ;;  %v10423_v1 = vmul.f32 %v9786_v23, %v3768_v7 }
 0x390   : > { %13545 = vst [vmem:[#allocation14_spill] sm:$0xff] %v10402_v60  ;;  %13546 = vst [vmem:[#allocation20_spill] sm:$0xff] %v10405_v40  ;;  %v3770_v17 = vsel %vm3730_vm10, %v10223_v24, %v6424_v36  ;;  %v10432_v31 = vmul.f32 %v9747_v29, %v3771_v50  ;;  %v10435_v19 = vmul.f32 %v9750_v59, %v3771_v50  ;;  %7703 = vpow2.f32 %v3995_v16 }
 0x391   : > { %13547 = vst [vmem:[#allocation184_spill] sm:$0xff] %v10408_v13  ;;  %13548 = vst [vmem:[#allocation185_spill] sm:$0xff] %v10411_v46  ;;  %v10441_v7 = vmul.f32 %v9756_v62, %v3771_v50  ;;  %v10444_v37 = vmul.f32 %v9763_v54, %v3771_v50  ;;  %v10447_v61 = vmul.f32 %v9770_v6, %v3771_v50  ;;  %7705 = vpow2.f32 %v3981_v55 }
 0x392   : > { %13549 = vst [vmem:[#allocation186_spill] sm:$0xff] %v10414_v58  ;;  %13550 = vst [vmem:[#allocation187_spill] sm:$0xff] %v10417_v10  ;;  %v10450_v24 = vmul.f32 %v9773_v8, %v3771_v50  ;;  %v10453_v15 = vmul.f32 %v9786_v23, %v3771_v50  ;;  %v10456_v34 = vmul.f32 %v9747_v29, %v3770_v17  ;;  %vm3972_vm2 = vcmp.gt.f32.partialorder %v10381_v25, 0.0 }
 0x393   : > { %13551 = vst [vmem:[#allocation188_spill] sm:$0xff] %v10420_v63  ;;  %13552 = vst [vmem:[#allocation189_spill] sm:$0xff] %v10423_v1  ;;  %v10438_v63 = vmul.f32 %v9753_v39, %v3771_v50  ;;  %v10459_v36 = vmul.f32 %v9750_v59, %v3770_v17  ;;  %v10474_v50 = vmul.f32 %v9773_v8, %v3770_v17  ;;  %vm3971_vm4 = vcmp.gt.f32.partialorder %v10394_v53, 0.0 }
 0x394   : > { %13553 = vst [vmem:[#allocation190_spill] sm:$0xff] %v10432_v31  ;;  %13554 = vst [vmem:[#allocation191_spill] sm:$0xff] %v10435_v19  ;;  %v10509_v16 = vmul.f32 %v9756_v62, %v10286_v28  ;;  %v10521_v55 = vmul.f32 %v9773_v8, %v10286_v28 }
 0x395   : > { %13555 = vst [vmem:[#allocation192_spill] sm:$0xff] %v10438_v63  ;;  %13556 = vst [vmem:[#allocation193_spill] sm:$0xff] %v10441_v7  ;;  %v10462_v7 = vmul.f32 %v9753_v39, %v3770_v17  ;;  %v10513_v63 = vmul.f32 %v9763_v54, %v10286_v28 }
 0x396   : > { %13557 = vst [vmem:[#allocation194_spill] sm:$0xff] %v10444_v37  ;;  %13558 = vst [vmem:[#allocation195_spill] sm:$0xff] %v10447_v61  ;;  %v10465_v37 = vmul.f32 %v9756_v62, %v3770_v17  ;;  %v10468_v61 = vmul.f32 %v9763_v54, %v3770_v17 }
 0x397   : > { %13559 = vst [vmem:[#allocation196_spill] sm:$0xff] %v10450_v24  ;;  %13560 = vst [vmem:[#allocation197_spill] sm:$0xff] %v10453_v15  ;;  %v10471_v24 = vmul.f32 %v9770_v6, %v3770_v17  ;;  %v10501_v15 = vmul.f32 %v9750_v59, %v10286_v28 }
 0x398   : > { %13561 = vst [vmem:[#allocation198_spill] sm:$0xff] %v10456_v34  ;;  %13562 = vst [vmem:[#allocation199_spill] sm:$0xff] %v10459_v36  ;;  %v10477_v34 = vmul.f32 %v9786_v23, %v3770_v17  ;;  %v10481_v36 = vmul.f32 %v9770_v6, %v10239_v20  ;;  %v3767_v17 = vsel %vm3727_vm11, %v9962_v9, %v10308_v33 }
 0x399   : > { %13563 = vst [vmem:[#allocation200_spill] sm:$0xff] %v10462_v7  ;;  %13564 = vst [vmem:[#allocation201_spill] sm:$0xff] %v10465_v37  ;;  %v10485_v7 = vmul.f32 %v9773_v8, %v10239_v20  ;;  %v10517_v9 = vmul.f32 %v9770_v6, %v10286_v28  ;;  %v10525_v33 = vmul.f32 %v9786_v23, %v10286_v28 }
 0x39a   : > { %13565 = vst [vmem:[#allocation202_spill] sm:$0xff] %v10468_v61  ;;  %13566 = vst [vmem:[#allocation203_spill] sm:$0xff] %v10471_v24  ;;  %v10489_v61 = vmul.f32 %v9786_v23, %v10239_v20  ;;  %v7696_v24 = vpop.eup %7695  ;;  %v10505_v20 = vmul.f32 %v9753_v39, %v10286_v28  ;;  %v10530_v31 = vmul.f32 %v9747_v29, %v3767_v17 }
 0x39b   : > { %13567 = vst [vmem:[#allocation204_spill] sm:$0xff] %v10474_v50  ;;  %13568 = vst [vmem:[#allocation205_spill] sm:$0xff] %v10477_v34  ;;  %v10493_v50 = vmul.f32 %v9747_v29, %v10286_v28  ;;  %v3987_v34 = vmul.f32 1.442695, %v3976_v51  ;;  %v7698_v37 = vpop.eup %7697  ;;  %v13577_v51 = vld [vmem:[#allocation13_spill] sm:$0xff]  ;;  %v10533_v1 = vmul.f32 %v9750_v59, %v3767_v17  ;;  %v10536_v10 = vmul.f32 %v9753_v39, %v3767_v17 }
 0x39c   : > { %13570 = vst [vmem:[#allocation207_spill] sm:$0xff] %v10501_v15  ;;  %13571 = vst [vmem:[#allocation208_spill] sm:$0xff] %v10505_v20  ;;  %v3251_v19 = vadd.f32 %v10300_v52, %v13577_v51  ;;  %v10539_v58 = vmul.f32 %v9756_v62, %v3767_v17  ;;  %v7700_v46 = vpop.eup %7699  ;;  %v10542_v13 = vmul.f32 %v9763_v54, %v3767_v17  ;;  %v6448_v28 = vadd.f32 -1.0, %v7696_v24  ;;  %v13770_v15 = vld [vmem:[#allocation160_spill] sm:$0xff] }
 0x39d   : > { %13569 = vst [vmem:[#allocation206_spill] sm:$0xff] %v10493_v50  ;;  %13572 = vst [vmem:[#allocation209_spill] sm:$0xff] %v10509_v16  ;;  %7707 = vpow2.f32 %v3987_v34  ;;  %v6451_v40 = vadd.f32 -1.0, %v7698_v37  ;;  %v10545_v52 = vmul.f32 %v9770_v6, %v3767_v17  ;;  %v10548_v29 = vmul.f32 %v9773_v8, %v3767_v17  ;;  %v7702_v54 = vpop.eup %7701 }
 0x39e   : > { %13573 = vst [vmem:[#allocation210_spill] sm:$0xff] %v10513_v63  ;;  %13574 = vst [vmem:[#allocation211_spill] sm:$0xff] %v10517_v9  ;;  %v10551_v59 = vmul.f32 %v9786_v23, %v3767_v17  ;;  %v4189_v62 = vmul.f32 %v9902_v41, %v3251_v19  ;;  %v4188_v39 = vmul.f32 %v9902_v41, %v10386_v35  ;;  %v6450_v37 = vadd.f32 -1.0, %v7700_v46  ;;  %v13589_v19 = vld [vmem:[#allocation95_spill] sm:$0xff]  ;;  %v13591_v35 = vld [vmem:[#allocation96_spill] sm:$0xff] }
 0x39f   : > { %13575 = vst [vmem:[#allocation212_spill] sm:$0xff] %v10521_v55  ;;  %13576 = vst [vmem:[#allocation213_spill] sm:$0xff] %v10525_v33  ;;  %v4007_v6 = vsel %vm3967_vm12, %v10305_v22, %v6448_v28  ;;  %v4010_v8 = vsel %vm3970_vm13, %v10311_v21, %v6451_v40  ;;  %v3979_v23 = vmin.f32 %v10394_v53, 0.0  ;;  %v13593_v22 = vld [vmem:[#allocation97_spill] sm:$0xff]  ;;  %v13595_v40 = vld [vmem:[#allocation98_spill] sm:$0xff] }
 0x3a0   : > { %13578 = vst [vmem:[#allocation13_spill] sm:$0xff] %v10530_v31  ;;  %13579 = vst [vmem:[#allocation214_spill] sm:$0xff] %v10533_v1  ;;  %v10563_v24 = vmul.f32 %v9848_v27, %v4007_v6  ;;  %v10566_v34 = vmul.f32 %v9854_v38, %v4007_v6  ;;  %v10569_v17 = vmul.f32 %v9857_v26, %v4007_v6  ;;  %v13597_v28 = vld [vmem:[#allocation99_spill] sm:$0xff]  ;;  %v13766_v33 = vld [vmem:[#allocation158_spill] sm:$0xff] }
 0x3a1   : > { %13580 = vst [vmem:[#allocation215_spill] sm:$0xff] %v10536_v10  ;;  %13581 = vst [vmem:[#allocation216_spill] sm:$0xff] %v10539_v58  ;;  %v10572_v51 = vmul.f32 %v13589_v19, %v4007_v6  ;;  %v10575_v60 = vmul.f32 %v13591_v35, %v4007_v6  ;;  %v10578_v21 = vmul.f32 %v13593_v22, %v4007_v6 }
 0x3a2   : > { %13582 = vst [vmem:[#allocation217_spill] sm:$0xff] %v10542_v13  ;;  %13583 = vst [vmem:[#allocation218_spill] sm:$0xff] %v10545_v52  ;;  %v10581_v46 = vmul.f32 %v13595_v40, %v4007_v6 }
 0x3a3   : > { %13584 = vst [vmem:[#allocation219_spill] sm:$0xff] %v10548_v29  ;;  %13585 = vst [vmem:[#allocation220_spill] sm:$0xff] %v10551_v59  ;;  %v3993_v59 = vmul.f32 1.442695, %v3979_v23 }
 0x3a4   : > { %13586 = vst [vmem:[#allocation221_spill] sm:$0xff] %v10563_v24  ;;  %13587 = vst [vmem:[#allocation222_spill] sm:$0xff] %v10566_v34  ;;  %v10584_v24 = vmul.f32 %v13597_v28, %v4007_v6  ;;  %v10587_v34 = vmul.f32 %v9848_v27, %v4010_v8  ;;  %v10605_v6 = vmul.f32 %v13595_v40, %v4010_v8 }
 0x3a5   : > { %13588 = vst [vmem:[#allocation223_spill] sm:$0xff] %v10569_v17  ;;  %13590 = vst [vmem:[#allocation95_spill] sm:$0xff] %v10572_v51  ;;  %v10590_v17 = vmul.f32 %v9854_v38, %v4010_v8  ;;  %v10593_v51 = vmul.f32 %v9857_v26, %v4010_v8  ;;  %7709 = vpow2.f32 %v3993_v59 }
 0x3a6   : > { %13592 = vst [vmem:[#allocation96_spill] sm:$0xff] %v10575_v60  ;;  %13594 = vst [vmem:[#allocation97_spill] sm:$0xff] %v10578_v21  ;;  %v10596_v60 = vmul.f32 %v13589_v19, %v4010_v8  ;;  %v10599_v21 = vmul.f32 %v13591_v35, %v4010_v8 }
 0x3a7   : > { %13596 = vst [vmem:[#allocation98_spill] sm:$0xff] %v10581_v46  ;;  %13598 = vst [vmem:[#allocation99_spill] sm:$0xff] %v10584_v24  ;;  %v10602_v46 = vmul.f32 %v13593_v22, %v4010_v8  ;;  %v7704_v24 = vpop.eup %7703 }
 0x3a8   : > { %13599 = vst [vmem:[#allocation224_spill] sm:$0xff] %v10587_v34  ;;  %13600 = vst [vmem:[#allocation225_spill] sm:$0xff] %v10590_v17  ;;  %v10608_v34 = vmul.f32 %v13597_v28, %v4010_v8  ;;  %v6447_v17 = vadd.f32 -1.0, %v7702_v54  ;;  %v7706_v52 = vpop.eup %7705 }
 0x3a9   : > { %13601 = vst [vmem:[#allocation226_spill] sm:$0xff] %v10593_v51  ;;  %13602 = vst [vmem:[#allocation227_spill] sm:$0xff] %v10596_v60  ;;  %v4009_v51 = vsel %vm3969_vm14, %v10314_v18, %v6450_v37  ;;  %v13607_v60 = vld [vmem:[#allocation100_spill] sm:$0xff] }
 0x3aa   : > { %13603 = vst [vmem:[#allocation228_spill] sm:$0xff] %v10599_v21  ;;  %13604 = vst [vmem:[#allocation229_spill] sm:$0xff] %v10602_v46  ;;  %v10614_v29 = vadd.f32 %v13607_v60, %v4189_v62  ;;  %v3197_v21 = vpop.f32.mrf.mxu0  ;;  %v10617_v46 = vmul.f32 %v9848_v27, %v4009_v51  ;;  %v10623_v8 = vmul.f32 %v9857_v26, %v4009_v51 }
 0x3ab   : > { %13605 = vst [vmem:[#allocation230_spill] sm:$0xff] %v10605_v6  ;;  %13606 = vst [vmem:[#allocation231_spill] sm:$0xff] %v10608_v34  ;;  %v10620_v6 = vmul.f32 %v9854_v38, %v4009_v51  ;;  %v10626_v54 = vmul.f32 %v13589_v19, %v4009_v51  ;;  %v10629_v18 = vmul.f32 %v13591_v35, %v4009_v51  ;;  %v7708_v34 = vpop.eup %7707 }
 0x3ac   : > { %13608 = vst [vmem:[#allocation100_spill] sm:$0xff] %v10617_v46  ;;  %13610 = vst [vmem:[#allocation233_spill] sm:$0xff] %v10623_v8  ;;  %v10632_v62 = vmul.f32 %v13593_v22, %v4009_v51  ;;  %v10635_v37 = vmul.f32 %v13595_v40, %v4009_v51  ;;  %v10638_v23 = vmul.f32 %v13597_v28, %v4009_v51  ;;  %v4215_v8 = vmin.f32 %v10614_v29, 0.0 }
 0x3ad   : > { %13609 = vst [vmem:[#allocation232_spill] sm:$0xff] %v10620_v6  ;;  %13611 = vst [vmem:[#allocation234_spill] sm:$0xff] %v10626_v54  ;;  %v6453_v6 = vadd.f32 -1.0, %v7704_v24  ;;  %v6446_v54 = vadd.f32 -1.0, %v7706_v52  ;;  %v10648_v13 = vadd.f32 %v13607_v60, %v4188_v39  ;;  %vm4207_vm6 = vcmp.gt.f32.partialorder %v10614_v29, 0.0 }
 0x3ae   : > { %13612 = vst [vmem:[#allocation235_spill] sm:$0xff] %v10629_v18  ;;  %13613 = vst [vmem:[#allocation236_spill] sm:$0xff] %v10632_v62  ;;  %v13616_v18 = vld [vmem:[#allocation37_spill] sm:$0xff]  ;;  %v7501_v62 = vpop.f32.mrf.mxu0 }
 0x3af   : > { %13614 = vst [vmem:[#allocation237_spill] sm:$0xff] %v10635_v37  ;;  %13615 = vst [vmem:[#allocation238_spill] sm:$0xff] %v10638_v23  ;;  %v3252_v46 = vadd.f32 %v3197_v21, %v13616_v18  ;;  %v4006_v37 = vsel %vm3966_vm15, %v10291_v2, %v6447_v17  ;;  %v4012_v51 = vsel %vm3972_vm2, %v10381_v25, %v6453_v6  ;;  %v4224_v23 = vmul.f32 1.442695, %v4215_v8 }
 0x3b0   : > { %v10651_v59 = vmul.f32 %v9848_v27, %v4012_v51  ;;  %v10654_v24 = vmul.f32 %v9854_v38, %v4012_v51  ;;  %v10657_v52 = vmul.f32 %v9857_v26, %v4012_v51  ;;  %v10660_v21 = vmul.f32 %v13589_v19, %v4012_v51 }
 0x3b1   : > { %v10663_v2 = vmul.f32 %v13591_v35, %v4012_v51  ;;  %v10666_v25 = vmul.f32 %v13593_v22, %v4012_v51  ;;  %v10669_v39 = vmul.f32 %v13595_v40, %v4012_v51  ;;  %v10672_v17 = vmul.f32 %v13597_v28, %v4012_v51 }
 0x3b2   : > { %13617 = vst [vmem:[#allocation37_spill] sm:$0xff] %v10651_v59  ;;  %13618 = vst [vmem:[#allocation239_spill] sm:$0xff] %v10654_v24  ;;  %v4005_v6 = vsel %vm3965_vm1, %v10294_v0, %v6446_v54  ;;  %v6449_v8 = vadd.f32 -1.0, %v7708_v34  ;;  %v4190_v18 = vmul.f32 %v9902_v41, %v3252_v46  ;;  %v4214_v51 = vmin.f32 %v10648_v13, 0.0  ;;  %v13632_v24 = vld [vmem:[#allocation15_spill] sm:$0xff] }
 0x3b3   : > { %13619 = vst [vmem:[#allocation240_spill] sm:$0xff] %v10657_v52  ;;  %13620 = vst [vmem:[#allocation241_spill] sm:$0xff] %v10660_v21  ;;  %v3207_v21 = vpop.f32.mrf.mxu0  ;;  %v10693_v0 = vmul.f32 %v13591_v35, %v4006_v37  ;;  %v10696_v34 = vmul.f32 %v13593_v22, %v4006_v37  ;;  %v10702_v54 = vmul.f32 %v13595_v40, %v4006_v37  ;;  %7711 = vpow2.f32 %v4224_v23 }
 0x3b4   : > { %13621 = vst [vmem:[#allocation242_spill] sm:$0xff] %v10663_v2  ;;  %13622 = vst [vmem:[#allocation243_spill] sm:$0xff] %v10666_v25  ;;  %v10680_v2 = vmul.f32 %v9848_v27, %v4006_v37  ;;  %v10683_v25 = vmul.f32 %v9854_v38, %v4006_v37  ;;  %v10699_v46 = vadd.f32 %v13607_v60, %v4190_v18  ;;  %v4222_v23 = vmul.f32 1.442695, %v4214_v51 }
 0x3b5   : > { %13623 = vst [vmem:[#allocation244_spill] sm:$0xff] %v10669_v39  ;;  %13624 = vst [vmem:[#allocation245_spill] sm:$0xff] %v10672_v17  ;;  %v10686_v39 = vmul.f32 %v9857_v26, %v4006_v37  ;;  %v10690_v17 = vmul.f32 %v13589_v19, %v4006_v37  ;;  %v4191_v52 = vmul.f32 %v9902_v41, %v10389_v12  ;;  %vm4206_vm10 = vcmp.gt.f32.partialorder %v10648_v13, 0.0 }
 0x3b6   : > { %13625 = vst [vmem:[#allocation246_spill] sm:$0xff] %v10680_v2  ;;  %13626 = vst [vmem:[#allocation247_spill] sm:$0xff] %v10683_v25  ;;  %v3255_v59 = vadd.f32 %v7501_v62, %v13632_v24  ;;  %v4216_v18 = vmin.f32 %v10699_v46, 0.0  ;;  %v13637_v62 = vld [vmem:[#allocation18_spill] sm:$0xff]  ;;  %v10725_v24 = vmul.f32 %v13589_v19, %v4005_v6  ;;  %vm4208_vm8 = vcmp.gt.f32.partialorder %v10699_v46, 0.0  ;;  %v13705_v2 = vld [vmem:[#allocation71_spill] sm:$0xff] }
 0x3b7   : > { %13627 = vst [vmem:[#allocation248_spill] sm:$0xff] %v10686_v39  ;;  %13628 = vst [vmem:[#allocation249_spill] sm:$0xff] %v10690_v17  ;;  %v10708_v17 = vmul.f32 %v13597_v28, %v4006_v37  ;;  %v7504_v39 = vpop.f32.mrf.mxu0  ;;  %v3254_v37 = vadd.f32 %v3207_v21, %v13637_v62  ;;  %v10736_v51 = vadd.f32 %v13607_v60, %v4191_v52  ;;  %v13640_v62 = vld [vmem:[#allocation19_spill] sm:$0xff] }
 0x3b8   : > { %13629 = vst [vmem:[#allocation250_spill] sm:$0xff] %v10693_v0  ;;  %13630 = vst [vmem:[#allocation251_spill] sm:$0xff] %v10696_v34  ;;  %v10711_v0 = vmul.f32 %v9848_v27, %v4005_v6  ;;  %v10714_v34 = vmul.f32 %v9854_v38, %v4005_v6  ;;  %v4193_v12 = vmul.f32 %v9902_v41, %v3255_v59 }
 0x3b9   : > { %13631 = vst [vmem:[#allocation252_spill] sm:$0xff] %v10702_v54  ;;  %13633 = vst [vmem:[#allocation15_spill] sm:$0xff] %v10708_v17  ;;  %v10718_v54 = vmul.f32 %v9857_v26, %v4005_v6  ;;  %v4226_v17 = vmul.f32 1.442695, %v4216_v18  ;;  %v4192_v21 = vmul.f32 %v9902_v41, %v3254_v37  ;;  %v10754_v52 = vmul.f32 %v13597_v28, %v4005_v6 }
 0x3ba   : > { %13634 = vst [vmem:[#allocation253_spill] sm:$0xff] %v10711_v0  ;;  %13635 = vst [vmem:[#allocation254_spill] sm:$0xff] %v10714_v34  ;;  %v10728_v0 = vmul.f32 %v13591_v35, %v4005_v6  ;;  %v4008_v34 = vsel %vm3968_vm3, %v10353_v45, %v6449_v8  ;;  %v10741_v59 = vadd.f32 %v13607_v60, %v4193_v12  ;;  %vm4209_vm12 = vcmp.gt.f32.partialorder %v10736_v51, 0.0 }
 0x3bb   : > { %13636 = vst [vmem:[#allocation255_spill] sm:$0xff] %v10718_v54  ;;  %13638 = vst [vmem:[#allocation18_spill] sm:$0xff] %v10725_v24  ;;  %v10745_v24 = vadd.f32 %v7504_v39, %v13640_v62  ;;  %v10748_v54 = vmul.f32 %v13593_v22, %v4005_v6  ;;  %v10751_v45 = vmul.f32 %v13595_v40, %v4005_v6  ;;  %7713 = vpow2.f32 %v4226_v17 }
 0x3bc   : > { %13639 = vst [vmem:[#allocation256_spill] sm:$0xff] %v10728_v0  ;;  %v7710_v0 = vpop.eup %7709  ;;  %13643 = vst [vmem:[#allocation258_spill] sm:$0xff] %v10754_v52  ;;  %7715 = vpow2.f32 %v4222_v23  ;;  %v4219_v39 = vmin.f32 %v10741_v59, 0.0  ;;  %v10763_v18 = vmul.f32 %v9848_v27, %v4008_v34  ;;  %v10766_v12 = vmul.f32 %v9854_v38, %v4008_v34 }
 0x3bd   : > { %13641 = vst [vmem:[#allocation19_spill] sm:$0xff] %v10748_v54  ;;  %13642 = vst [vmem:[#allocation257_spill] sm:$0xff] %v10751_v45  ;;  %v6452_v8 = vadd.f32 -1.0, %v7710_v0  ;;  %v10769_v6 = vmul.f32 %v9857_v26, %v4008_v34  ;;  %v10772_v17 = vmul.f32 %v13589_v19, %v4008_v34  ;;  %v4217_v0 = vmin.f32 %v10736_v51, 0.0  ;;  %v3848_v45 = vpop.f32.mrf.mxu1 }
 0x3be   : > { %13644 = vst [vmem:[#allocation259_spill] sm:$0xff] %v10763_v18  ;;  %13645 = vst [vmem:[#allocation260_spill] sm:$0xff] %v10766_v12  ;;  %v4232_v23 = vmul.f32 1.442695, %v4219_v39  ;;  %v10777_v62 = vadd.f32 %v13607_v60, %v4192_v21  ;;  %v10809_v39 = vmul.f32 %v13593_v22, %v4008_v34  ;;  %vm4211_vm9 = vcmp.gt.f32.partialorder %v10741_v59, 0.0 }
 0x3bf   : > { %13646 = vst [vmem:[#allocation261_spill] sm:$0xff] %v10769_v6  ;;  %13647 = vst [vmem:[#allocation262_spill] sm:$0xff] %v10772_v17  ;;  %v4011_v37 = vsel %vm3971_vm4, %v10394_v53, %v6452_v8  ;;  %v4195_v52 = vmul.f32 %v9902_v41, %v10745_v24 }
 0x3c0   : > { %v10780_v18 = vmul.f32 %v9848_v27, %v4011_v37  ;;  %v10783_v12 = vmul.f32 %v9854_v38, %v4011_v37  ;;  %v10786_v6 = vmul.f32 %v9857_v26, %v4011_v37  ;;  %v10789_v17 = vmul.f32 %v13589_v19, %v4011_v37  ;;  %13657 = vst [vmem:[#allocation272_spill] sm:$0xff] %v10809_v39 }
 0x3c1   : > { %v10792_v53 = vmul.f32 %v13591_v35, %v4011_v37  ;;  %v10795_v21 = vmul.f32 %v13593_v22, %v4011_v37  ;;  %v10798_v27 = vmul.f32 %v13595_v40, %v4011_v37  ;;  %v10801_v38 = vmul.f32 %v13597_v28, %v4011_v37  ;;  %v7712_v37 = vpop.eup %7711 }
 0x3c2   : > { %13648 = vst [vmem:[#allocation263_spill] sm:$0xff] %v10780_v18  ;;  %13649 = vst [vmem:[#allocation264_spill] sm:$0xff] %v10783_v12  ;;  %v10804_v26 = vmul.f32 %v13591_v35, %v4008_v34  ;;  %7717 = vpow2.f32 %v4232_v23  ;;  %v6436_v19 = vadd.f32 -1.0, %v10011_v3  ;;  %v4218_v8 = vmin.f32 %v10777_v62, 0.0  ;;  %v13667_v18 = vld [vmem:[#allocation94_spill] sm:$0xff] }
 0x3c3   : > { %13650 = vst [vmem:[#allocation265_spill] sm:$0xff] %v10786_v6  ;;  %13651 = vst [vmem:[#allocation266_spill] sm:$0xff] %v10789_v17  ;;  %v10819_v17 = vstv %s10733_s25  ;;  %v10822_v35 = vstv %s10738_s26  ;;  %v10825_v3 = vmul.f32 %v13597_v28, %v4008_v34  ;;  %v10828_v6 = vstv %s10756_s10  ;;  %s11843_s25 = sld [smem:[#allocation5 + $0x3]] }
 0x3c4   : > { %13652 = vst [vmem:[#allocation267_spill] sm:$0xff] %v10792_v53  ;;  %13653 = vst [vmem:[#allocation268_spill] sm:$0xff] %v10795_v21  ;;  %v10812_v21 = vmul.f32 %v13595_v40, %v4008_v34  ;;  %v13660_v53 = vld [vmem:[#allocation93_spill] sm:$0xff]  ;;  %v4230_v23 = vmul.f32 1.442695, %v4218_v8  ;;  %v10831_v22 = vstv %s10759_s12  ;;  %v6439_v40 = vadd.f32 -1.0, %v10060_v57 }
 0x3c5   : > { %13654 = vst [vmem:[#allocation269_spill] sm:$0xff] %v10798_v27  ;;  %13655 = vst [vmem:[#allocation270_spill] sm:$0xff] %v10801_v38  ;;  %v10815_v27 = vstv %s10720_s2  ;;  %vm3897_vm5 = vcmp.gt.f32.partialorder %v13660_v53, 0.0  ;;  %v4228_v38 = vmul.f32 1.442695, %v4217_v0  ;;  %vm3900_vm7 = vcmp.gt.f32.partialorder %v13667_v18, 0.0 }
 0x3c6   : > { %13656 = vst [vmem:[#allocation271_spill] sm:$0xff] %v10804_v26  ;;  %13658 = vst [vmem:[#allocation273_spill] sm:$0xff] %v10812_v21  ;;  %v10837_v12 = vmul.f32 %v10815_v27, %v9938_v11  ;;  %v3937_v0 = vsel %vm3897_vm5, %v13660_v53, %v6436_v19  ;;  %v6475_v28 = vadd.f32 -1.0, %v7712_v37  ;;  %v10845_v34 = vmul.f32 %v10819_v17, %v9938_v11  ;;  %s11658_s2 = sld [smem:[#allocation2 + $0x83]] }
 0x3c7   : > { %13659 = vst [vmem:[#allocation274_spill] sm:$0xff] %v10815_v27  ;;  %13661 = vst [vmem:[#allocation93_spill] sm:$0xff] %v10819_v17  ;;  %v10849_v57 = vmul.f32 %v10822_v35, %v9938_v11  ;;  %7719 = vpow2.f32 %v4230_v23  ;;  %v10854_v53 = vmul.f32 %v10828_v6, %v9938_v11  ;;  %v10858_v19 = vmul.f32 %v10831_v22, %v9938_v11  ;;  %s11859_s26 = sld [smem:[#allocation5 + $0x83]] }
 0x3c8   : > { %13662 = vst [vmem:[#allocation275_spill] sm:$0xff] %v10822_v35  ;;  %13663 = vst [vmem:[#allocation276_spill] sm:$0xff] %v10825_v3  ;;  %7721 = vpow2.f32 %v4228_v38  ;;  %v7714_v8 = vpop.eup %7713  ;;  %v10861_v37 = vmul.f32 %v9944_v49, %v3937_v0  ;;  %v10864_v3 = vmul.f32 %v9949_v42, %v3937_v0  ;;  %v10867_v23 = vmul.f32 %v9952_v48, %v3937_v0  ;;  %s11936_s10 = sld [smem:[#allocation5 + $0x103]] }
 0x3c9   : > { %13664 = vst [vmem:[#allocation277_spill] sm:$0xff] %v10828_v6  ;;  %13665 = vst [vmem:[#allocation278_spill] sm:$0xff] %v10831_v22  ;;  %v10870_v38 = vsel %vm3900_vm7, %v13667_v18, %v6439_v40  ;;  %v7716_v21 = vpop.eup %7715  ;;  %v6476_v39 = vadd.f32 -1.0, %v7714_v8  ;;  %v10874_v11 = vmul.f32 %v10815_v27, %v3937_v0  ;;  %v10877_v26 = vmul.f32 %v10819_v17, %v3937_v0  ;;  %s11942_s12 = sld [smem:[#allocation5 + $0x183]] }
 0x3ca   : > { %13666 = vst [vmem:[#allocation279_spill] sm:$0xff] %v10837_v12  ;;  %13668 = vst [vmem:[#allocation94_spill] sm:$0xff] %v10845_v34  ;;  %v10884_v54 = vsel %vm4207_vm6, %v10614_v29, %v6475_v28  ;;  %v10887_v18 = vmul.f32 %v10822_v35, %v3937_v0  ;;  %v10890_v40 = vmul.f32 %v10828_v6, %v3937_v0  ;;  %vm4210_vm11 = vcmp.gt.f32.partialorder %v10777_v62, 0.0 }
 0x3cb   : > { %13669 = vst [vmem:[#allocation280_spill] sm:$0xff] %v10849_v57  ;;  %13670 = vst [vmem:[#allocation281_spill] sm:$0xff] %v10854_v53  ;;  %v10893_v8 = vmul.f32 %v10831_v22, %v3937_v0  ;;  %v4248_v24 = vsel %vm4208_vm8, %v10699_v46, %v6476_v39  ;;  %v10902_v29 = vmul.f32 %v9944_v49, %v10870_v38  ;;  %v6474_v0 = vadd.f32 -1.0, %v7716_v21  ;;  %v13684_v46 = vld [vmem:[#allocation16_spill] sm:$0xff]  ;;  %v13697_v57 = vld [vmem:[#allocation105_spill] sm:$0xff] }
 0x3cc   : > { %13671 = vst [vmem:[#allocation282_spill] sm:$0xff] %v10858_v19  ;;  %13672 = vst [vmem:[#allocation283_spill] sm:$0xff] %v10861_v37  ;;  %v10906_v28 = vmul.f32 %v9949_v42, %v10870_v38  ;;  %v3881_v39 = vmul.f32 %v13684_v46, %v3848_v45  ;;  %v13688_v21 = vld [vmem:[#allocation76_spill] sm:$0xff]  ;;  %v13693_v37 = vld [vmem:[#allocation103_spill] sm:$0xff] }
 0x3cd   : > { %13673 = vst [vmem:[#allocation284_spill] sm:$0xff] %v10864_v3  ;;  %13674 = vst [vmem:[#allocation285_spill] sm:$0xff] %v10867_v23  ;;  %v10931_v23 = vstv %s10841_s13  ;;  %v10940_v19 = vmul.f32 %v13693_v37, %v4248_v24  ;;  %s11956_s13 = sld [smem:[#allocation5 + $0x203]] }
 0x3ce   : > { %13675 = vst [vmem:[#allocation286_spill] sm:$0xff] %v10874_v11  ;;  %13676 = vst [vmem:[#allocation287_spill] sm:$0xff] %v10877_v26  ;;  %v3217_v26 = vpop.f32.mrf.mxu0  ;;  %v10964_v58 = vadd.f32 %v13705_v2, %v3881_v39  ;;  %v10978_v39 = vstv %s10895_s18  ;;  %s11970_s18 = sld [smem:[#allocation5 + $0x283]] }
 0x3cf   : > { %13677 = vst [vmem:[#allocation288_spill] sm:$0xff] %v10887_v18  ;;  %13678 = vst [vmem:[#allocation289_spill] sm:$0xff] %v10890_v40  ;;  %v10909_v40 = vadd.f32 %v13607_v60, %v4195_v52  ;;  %v10917_v18 = vmul.f32 %v10815_v27, %v10870_v38  ;;  %v10927_v52 = vmul.f32 %v10819_v17, %v10870_v38  ;;  %v13776_v17 = vld [vmem:[#allocation163_spill] sm:$0xff] }
 0x3d0   : > { %13679 = vst [vmem:[#allocation290_spill] sm:$0xff] %v10893_v8  ;;  %13680 = vst [vmem:[#allocation291_spill] sm:$0xff] %v10902_v29  ;;  %v10913_v8 = vmul.f32 %v9952_v48, %v10870_v38  ;;  %v13685_v29 = vld [vmem:[#allocation101_spill] sm:$0xff]  ;;  %v3907_v10 = vmin.f32 %v10964_v58, 0.0  ;;  %vm3899_vm15 = vcmp.gt.f32.partialorder %v10964_v58, 0.0 }
 0x3d1   : > { %13681 = vst [vmem:[#allocation292_spill] sm:$0xff] %v10906_v28  ;;  %13683 = vst [vmem:[#allocation294_spill] sm:$0xff] %v10917_v18  ;;  %v10922_v11 = vmul.f32 %v13685_v29, %v10884_v54  ;;  %v3256_v28 = vadd.f32 %v3217_v26, %v13688_v21  ;;  %v10934_v3 = vmul.f32 %v13685_v29, %v4248_v24  ;;  %v13691_v18 = vld [vmem:[#allocation102_spill] sm:$0xff]  ;;  %v4221_v25 = vmin.f32 %v10909_v40, 0.0 }
 0x3d2   : > { %13682 = vst [vmem:[#allocation293_spill] sm:$0xff] %v10913_v8  ;;  %13687 = vst [vmem:[#allocation101_spill] sm:$0xff] %v10927_v52  ;;  %v7718_v8 = vpop.eup %7717  ;;  %v10937_v45 = vmul.f32 %v13691_v18, %v4248_v24  ;;  %v7527_v52 = vpop.f32.mrf.mxu0  ;;  %v10947_v26 = vmul.f32 %v13697_v57, %v4248_v24  ;;  %v13699_v21 = vld [vmem:[#allocation106_spill] sm:$0xff]  ;;  %vm4213_vm13 = vcmp.gt.f32.partialorder %v10909_v40, 0.0 }
 0x3d3   : > { %13686 = vst [vmem:[#allocation16_spill] sm:$0xff] %v10922_v11  ;;  %13689 = vst [vmem:[#allocation76_spill] sm:$0xff] %v10931_v23  ;;  %v13695_v11 = vld [vmem:[#allocation104_spill] sm:$0xff]  ;;  %v10950_v34 = vmul.f32 %v13699_v21, %v4248_v24 }
 0x3d4   : > { %13690 = vst [vmem:[#allocation295_spill] sm:$0xff] %v10934_v3  ;;  %13692 = vst [vmem:[#allocation102_spill] sm:$0xff] %v10937_v45  ;;  %v10943_v53 = vmul.f32 %v13695_v11, %v4248_v24  ;;  %v13701_v3 = vld [vmem:[#allocation107_spill] sm:$0xff]  ;;  %v10956_v45 = vmul.f32 %v10122_v32, %v4248_v24  ;;  %v7720_v1 = vpop.eup %7719 }
 0x3d5   : > { %13694 = vst [vmem:[#allocation103_spill] sm:$0xff] %v10940_v19  ;;  %13698 = vst [vmem:[#allocation105_spill] sm:$0xff] %v10947_v26  ;;  %v10953_v12 = vmul.f32 %v13701_v3, %v4248_v24  ;;  %v10960_v19 = vmul.f32 %v13691_v18, %v10884_v54  ;;  %v7549_v26 = vpop.f32.mrf.mxu1 }
 0x3d6   : > { %13696 = vst [vmem:[#allocation104_spill] sm:$0xff] %v10943_v53  ;;  %13700 = vst [vmem:[#allocation106_spill] sm:$0xff] %v10950_v34  ;;  %v6479_v53 = vadd.f32 -1.0, %v7718_v8  ;;  %v10968_v34 = vmul.f32 %v13693_v37, %v10884_v54  ;;  %v3884_v24 = vmul.f32 %v7549_v26, %v13684_v46 }
 0x3d7   : > { %13702 = vst [vmem:[#allocation107_spill] sm:$0xff] %v10953_v12  ;;  %13703 = vst [vmem:[#allocation296_spill] sm:$0xff] %v10956_v45  ;;  %v4194_v12 = vmul.f32 %v9902_v41, %v3256_v28  ;;  %v3639_v45 = vmul.f32 %v7527_v52, %v10931_v23  ;;  %v7722_v52 = vpop.eup %7721 }
 0x3d8   : > { %13704 = vst [vmem:[#allocation297_spill] sm:$0xff] %v10960_v19  ;;  %13706 = vst [vmem:[#allocation71_spill] sm:$0xff] %v10968_v34  ;;  %v4251_v8 = vsel %vm4211_vm9, %v10741_v59, %v6479_v53  ;;  %v4236_v19 = vmul.f32 1.442695, %v4221_v25 }
 0x3d9   : > { %13707 = vst [vmem:[#allocation298_spill] sm:$0xff] %v10978_v39  ;;  %v10981_v31 = vmul.f32 %v13685_v29, %v4251_v8  ;;  %v10984_v34 = vmul.f32 %v13691_v18, %v4251_v8  ;;  %v10987_v41 = vmul.f32 %v13693_v37, %v4251_v8  ;;  %v10990_v28 = vmul.f32 %v13695_v11, %v4251_v8 }
 0x3da   : > { %v10994_v25 = vmul.f32 %v13697_v57, %v4251_v8  ;;  %v10997_v59 = vmul.f32 %v13699_v21, %v4251_v8  ;;  %v11000_v53 = vmul.f32 %v13701_v3, %v4251_v8  ;;  %v11003_v26 = vmul.f32 %v10122_v32, %v4251_v8 }
 0x3db   : > { %13708 = vst [vmem:[#allocation299_spill] sm:$0xff] %v10981_v31  ;;  %13709 = vst [vmem:[#allocation300_spill] sm:$0xff] %v10984_v34  ;;  %7723 = vpow2.f32 %v4236_v19  ;;  %v11010_v34 = vadd.f32 %v13607_v60, %v4194_v12  ;;  %v11020_v8 = vadd.f32 %v13705_v2, %v3884_v24 }
 0x3dc   : > { %13710 = vst [vmem:[#allocation301_spill] sm:$0xff] %v10987_v41  ;;  %13711 = vst [vmem:[#allocation302_spill] sm:$0xff] %v10990_v28  ;;  %v11007_v41 = vmul.f32 %v13695_v11, %v10884_v54  ;;  %v6478_v28 = vadd.f32 -1.0, %v7720_v1  ;;  %v3917_v1 = vmul.f32 1.442695, %v3907_v10 }
 0x3dd   : > { %13712 = vst [vmem:[#allocation303_spill] sm:$0xff] %v10994_v25  ;;  %13713 = vst [vmem:[#allocation304_spill] sm:$0xff] %v10997_v59  ;;  %v11014_v25 = vmul.f32 %v13697_v57, %v10884_v54  ;;  %v6477_v59 = vadd.f32 -1.0, %v7722_v52  ;;  %v4220_v12 = vmin.f32 %v11010_v34, 0.0  ;;  %vm4212_vm14 = vcmp.gt.f32.partialorder %v11010_v34, 0.0 }
 0x3de   : > { %13714 = vst [vmem:[#allocation305_spill] sm:$0xff] %v11000_v53  ;;  %13715 = vst [vmem:[#allocation306_spill] sm:$0xff] %v11003_v26  ;;  %v4246_v53 = vsel %vm4206_vm10, %v10648_v13, %v6474_v0  ;;  %v11023_v26 = vadd.f32 %v10978_v39, %v3639_v45  ;;  %v4250_v60 = vsel %vm4210_vm11, %v10777_v62, %v6478_v28  ;;  %7725 = vpow2.f32 %v3917_v1 }
 0x3df   : > { %13716 = vst [vmem:[#allocation307_spill] sm:$0xff] %v11007_v41  ;;  %13717 = vst [vmem:[#allocation308_spill] sm:$0xff] %v11014_v25  ;;  %v11030_v19 = vmul.f32 %v13685_v29, %v4250_v60  ;;  %v11033_v31 = vmul.f32 %v13691_v18, %v4250_v60  ;;  %v11036_v13 = vmul.f32 %v13693_v37, %v4250_v60  ;;  %v4234_v52 = vmul.f32 1.442695, %v4220_v12  ;;  %v13764_v25 = vld [vmem:[#allocation157_spill] sm:$0xff] }
 0x3e0   : > { %v11039_v0 = vmul.f32 %v13695_v11, %v4250_v60  ;;  %v11042_v45 = vmul.f32 %v13697_v57, %v4250_v60  ;;  %v11045_v62 = vmul.f32 %v13699_v21, %v4250_v60  ;;  %v11048_v10 = vmul.f32 %v13701_v3, %v4250_v60 }
 0x3e1   : > { %13718 = vst [vmem:[#allocation309_spill] sm:$0xff] %v11030_v19  ;;  %13719 = vst [vmem:[#allocation310_spill] sm:$0xff] %v11033_v31  ;;  %v11051_v24 = vmul.f32 %v10122_v32, %v4250_v60  ;;  %v11055_v28 = vmul.f32 %v13699_v21, %v10884_v54  ;;  %v11069_v60 = vmul.f32 %v10822_v35, %v10870_v38  ;;  %7727 = vpow2.f32 %v4234_v52  ;;  %v3597_v31 = vpop.f32.mrf.mxu0  ;;  %v13775_v35 = vld [vmem:[#allocation73_spill] sm:$0xff] }
 0x3e2   : > { %13720 = vst [vmem:[#allocation311_spill] sm:$0xff] %v11036_v13  ;;  %13721 = vst [vmem:[#allocation312_spill] sm:$0xff] %v11039_v0  ;;  %v3910_v13 = vmin.f32 %v11020_v8, 0.0  ;;  %v3665_v0 = vmin.f32 %v11023_v26, 0.0  ;;  %v11074_v12 = vmul.f32 %v13685_v29, %v4246_v53  ;;  %v11083_v19 = vmul.f32 %v13691_v18, %v4246_v53 }
 0x3e3   : > { %13722 = vst [vmem:[#allocation313_spill] sm:$0xff] %v11042_v45  ;;  %13723 = vst [vmem:[#allocation314_spill] sm:$0xff] %v11045_v62  ;;  %v11061_v45 = vmul.f32 %v13701_v3, %v10884_v54  ;;  %v11065_v62 = vmul.f32 %v10122_v32, %v10884_v54  ;;  %v3858_v54 = vpop.f32.mrf.mxu1  ;;  %v11086_v1 = vmul.f32 %v13693_v37, %v4246_v53  ;;  %v11209_v41 = vstv %s11108_s22 }
 0x3e4   : > { %13724 = vst [vmem:[#allocation315_spill] sm:$0xff] %v11048_v10  ;;  %13725 = vst [vmem:[#allocation316_spill] sm:$0xff] %v11051_v24  ;;  %v11078_v24 = vmul.f32 %v10828_v6, %v10870_v38  ;;  %v3674_v10 = vmul.f32 1.442695, %v3665_v0  ;;  %v11097_v0 = vmul.f32 %v13697_v57, %v4246_v53  ;;  %v11100_v52 = vmul.f32 %v13699_v21, %v4246_v53 }
 0x3e5   : > { %13726 = vst [vmem:[#allocation317_spill] sm:$0xff] %v11055_v28  ;;  %13727 = vst [vmem:[#allocation318_spill] sm:$0xff] %v11061_v45  ;;  %vm3657_vm1 = vcmp.gt.f32.partialorder %v11023_v26, 0.0  ;;  %v11233_v6 = vstv %s11160_s24  ;;  %v11241_v27 = vadd.f32 %v13776_v17, %v13775_v35  ;;  %vm3902_vm2 = vcmp.gt.f32.partialorder %v11020_v8, 0.0 }
 0x3e6   : > { %13728 = vst [vmem:[#allocation319_spill] sm:$0xff] %v11065_v62  ;;  %13729 = vst [vmem:[#allocation320_spill] sm:$0xff] %v11069_v60  ;;  %v11089_v60 = vmul.f32 %v13695_v11, %v4246_v53  ;;  %7729 = vpow2.f32 %v3674_v10  ;;  %v11123_v10 = vmul.f32 %v10831_v22, %v10870_v38 }
 0x3e7   : > { %13730 = vst [vmem:[#allocation321_spill] sm:$0xff] %v11074_v12  ;;  %13731 = vst [vmem:[#allocation322_spill] sm:$0xff] %v11078_v24  ;;  %v4249_v12 = vsel %vm4209_vm12, %v10736_v51, %v6477_v59  ;;  %v3923_v24 = vmul.f32 1.442695, %v3910_v13  ;;  %v3883_v51 = vmul.f32 %v13684_v46, %v3858_v54  ;;  %v3638_v59 = vmul.f32 %v10931_v23, %v3597_v31 }
 0x3e8   : > { %13732 = vst [vmem:[#allocation323_spill] sm:$0xff] %v11083_v19  ;;  %13733 = vst [vmem:[#allocation324_spill] sm:$0xff] %v11086_v1  ;;  %v11103_v19 = vmul.f32 %v13701_v3, %v4246_v53  ;;  %v11106_v1 = vmul.f32 %v10122_v32, %v4246_v53  ;;  %v11119_v13 = vmul.f32 %v13693_v37, %v4249_v12  ;;  %v7724_v38 = vpop.eup %7723 }
 0x3e9   : > { %13734 = vst [vmem:[#allocation325_spill] sm:$0xff] %v11089_v60  ;;  %13735 = vst [vmem:[#allocation326_spill] sm:$0xff] %v11097_v0  ;;  %v11113_v60 = vmul.f32 %v13685_v29, %v4249_v12  ;;  %v11116_v0 = vmul.f32 %v13691_v18, %v4249_v12  ;;  %v11128_v53 = vmul.f32 %v13695_v11, %v4249_v12  ;;  %7731 = vpow2.f32 %v3923_v24 }
 0x3ea   : > { %13736 = vst [vmem:[#allocation327_spill] sm:$0xff] %v11100_v52  ;;  %13737 = vst [vmem:[#allocation328_spill] sm:$0xff] %v11103_v19  ;;  %v11131_v31 = vmul.f32 %v13697_v57, %v4249_v12  ;;  %v11136_v54 = vadd.f32 %v13705_v2, %v3883_v51  ;;  %v7530_v51 = vpop.f32.mrf.mxu0  ;;  %v11158_v52 = vstv %s11071_s19  ;;  %v11168_v24 = vstv %s11080_s20  ;;  %s11977_s19 = sld [smem:[#allocation5 + $0x303]] }
 0x3eb   : > { %13738 = vst [vmem:[#allocation329_spill] sm:$0xff] %v11106_v1  ;;  %13739 = vst [vmem:[#allocation330_spill] sm:$0xff] %v11113_v60  ;;  %v11145_v60 = vmul.f32 %v13701_v3, %v4249_v12  ;;  %v13750_v1 = vld [vmem:[#allocation153_spill] sm:$0xff]  ;;  %v3641_v28 = vmul.f32 %v7530_v51, %v10931_v23  ;;  %v11228_v23 = vstv %s11150_s17  ;;  %s11983_s20 = sld [smem:[#allocation5 + $0x383]] }
 0x3ec   : > { %13740 = vst [vmem:[#allocation331_spill] sm:$0xff] %v11116_v0  ;;  %13741 = vst [vmem:[#allocation332_spill] sm:$0xff] %v11119_v13  ;;  %v11139_v13 = vadd.f32 %v10978_v39, %v3638_v59  ;;  %v11142_v0 = vmul.f32 %v13699_v21, %v4249_v12  ;;  %v13749_v59 = vld [vmem:[#allocation17_spill] sm:$0xff]  ;;  %v3909_v45 = vmin.f32 %v11136_v54, 0.0 }
 0x3ed   : > { %13742 = vst [vmem:[#allocation333_spill] sm:$0xff] %v11123_v10  ;;  %13743 = vst [vmem:[#allocation334_spill] sm:$0xff] %v11128_v53  ;;  %v11148_v53 = vmul.f32 %v10122_v32, %v4249_v12  ;;  %v11155_v19 = vadd.f32 %v13750_v1, %v13749_v59  ;;  %v13752_v12 = vld [vmem:[#allocation154_spill] sm:$0xff]  ;;  %v13754_v10 = vld [vmem:[#allocation156_spill] sm:$0xff]  ;;  %v11177_v59 = vstv %s11094_s21  ;;  %v11220_v20 = vadd.f32 %v10978_v39, %v3641_v28  ;;  %v7552_v28 = vpop.f32.mrf.mxu1  ;;  %s335_s21 = sand.u32 1, %s8002_s28  }
 0x3ee   : > { %13744 = vst [vmem:[#allocation335_spill] sm:$0xff] %v11131_v31  ;;  %13745 = vst [vmem:[#allocation336_spill] sm:$0xff] %v11136_v54  ;;  %v6481_v31 = vadd.f32 -1.0, %v7724_v38  ;;  %v3664_v38 = vmin.f32 %v11139_v13, 0.0  ;;  %v3921_v16 = vmul.f32 1.442695, %v3909_v45 }
 0x3ef   : > { %13746 = vst [vmem:[#allocation337_spill] sm:$0xff] %v11142_v0  ;;  %13747 = vst [vmem:[#allocation338_spill] sm:$0xff] %v11145_v60  ;;  %v13751_v60 = vld [vmem:[#allocation69_spill] sm:$0xff]  ;;  %v13753_v0 = vld [vmem:[#allocation72_spill] sm:$0xff]  ;;  %vm3656_vm3 = vcmp.gt.f32.partialorder %v11139_v13, 0.0  ;;  %vm3659_vm5 = vcmp.gt.f32.partialorder %v11220_v20, 0.0 }
 0x3f0   : > { %13748 = vst [vmem:[#allocation339_spill] sm:$0xff] %v11148_v53  ;;  %v11165_v53 = vadd.f32 %v13752_v12, %v13751_v60  ;;  %v11172_v62 = vadd.f32 %v13754_v10, %v13753_v0  ;;  %v4253_v1 = vsel %vm4213_vm13, %v10909_v40, %v6481_v31  ;;  %v13774_v45 = vld [vmem:[#allocation162_spill] sm:$0xff]  ;;  %s12188_s22 = sshll.u32 %s335_s21, 9 }
 0x3f1   : > { %v11182_v60 = vmul.f32 %v13685_v29, %v4253_v1  ;;  %v11185_v12 = vmul.f32 %v13691_v18, %v4253_v1  ;;  %v11188_v0 = vmul.f32 %v13693_v37, %v4253_v1  ;;  %v11191_v10 = vmul.f32 %v13695_v11, %v4253_v1 }
 0x3f2   : > { %v11194_v40 = vmul.f32 %v13697_v57, %v4253_v1  ;;  %v11197_v31 = vmul.f32 %v13699_v21, %v4253_v1  ;;  %v11200_v51 = vmul.f32 %v13701_v3, %v4253_v1 }
 0x3f3   : > { %13755 = vst [vmem:[#allocation17_spill] sm:$0xff] %v11182_v60  ;;  %13756 = vst [vmem:[#allocation153_spill] sm:$0xff] %v11185_v12  ;;  %v11203_v60 = vmul.f32 %v10122_v32, %v4253_v1  ;;  %v13763_v12 = vld [vmem:[#allocation77_spill] sm:$0xff]  ;;  %v13767_v1 = vld [vmem:[#allocation83_spill] sm:$0xff] }
 0x3f4   : > { %13757 = vst [vmem:[#allocation69_spill] sm:$0xff] %v11188_v0  ;;  %13758 = vst [vmem:[#allocation154_spill] sm:$0xff] %v11191_v10  ;;  %v7726_v0 = vpop.eup %7725  ;;  %v4897_v10 = vadd.f32 %v13764_v25, %v13763_v12  ;;  %v11223_v25 = vstv %s11133_s0  ;;  %v13769_v12 = vld [vmem:[#allocation86_spill] sm:$0xff]  ;;  %s6678_s0 = sshll.u32 %s8084_s9, 13  ;;  %s13216_s9 = scalar_lea.sflag [#allocation3], %s335_s21 }
 0x3f5   : > { %13759 = vst [vmem:[#allocation72_spill] sm:$0xff] %v11194_v40  ;;  %13760 = vst [vmem:[#allocation156_spill] sm:$0xff] %v11197_v31  ;;  %v13765_v40 = vld [vmem:[#allocation81_spill] sm:$0xff]  ;;  %v3672_v31 = vmul.f32 1.442695, %v3664_v38  ;;  %v7728_v9 = vpop.eup %7727  ;;  %v5509_v50 = vadd.f32 %v13770_v15, %v13769_v12  ;;  %v6438_v39 = vadd.f32 -1.0, %v7726_v0 }
 0x3f6   : > { %13761 = vst [vmem:[#allocation340_spill] sm:$0xff] %v11200_v51  ;;  %13762 = vst [vmem:[#allocation341_spill] sm:$0xff] %v11203_v60  ;;  %v5101_v55 = vadd.f32 %v13766_v33, %v13765_v40  ;;  %v11215_v51 = vstv %s11125_s23  ;;  %v13768_v60 = vld [vmem:[#allocation159_spill] sm:$0xff]  ;;  %v13771_v33 = vld [vmem:[#allocation90_spill] sm:$0xff]  ;;  %v7730_v54 = vpop.eup %7729  ;;  %v6480_v22 = vadd.f32 -1.0, %v7728_v9  ;;  %s12240_s23 = scalar_lea.vmem [#allocation8], %s12188_s22 }
 0x3f7   : > { %v5305_v63 = vadd.f32 %v13768_v60, %v13767_v1  ;;  %v13772_v38 = vld [vmem:[#allocation161_spill] sm:$0xff]  ;;  %7733 = vpow2.f32 %v3672_v31  ;;  %v13773_v60 = vld [vmem:[#allocation68_spill] sm:$0xff]  ;;  %v13777_v15 = vld [vmem:[#allocation74_spill] sm:$0xff]  ;;  %v6409_v31 = vadd.f32 -1.0, %v7730_v54  ;;  %s5899_s17 = sshll.u32 %s12240_s23, 4  ;;  %s13210_s17 = int_to_ptr.vmem [resolvable:$true] %s5899_s17 }
 0x3f8   : > { %v5713_v40 = vadd.f32 %v13772_v38, %v13771_v33  ;;  %v11237_v1 = vadd.f32 %v13774_v45, %v13773_v60  ;;  %v13778_v12 = vld [vmem:[#allocation164_spill] sm:$0xff]  ;;  %v3886_v33 = vmul.f32 %v7552_v28, %v13684_v46  ;;  %v4252_v9 = vsel %vm4212_vm14, %v11010_v34, %v6480_v22  ;;  %v7732_v45 = vpop.eup %7731  ;;  %v13789_v54 = vld [vmem:[#allocation85_spill] sm:$0xff] }
 0x3f9   : > { %v11245_v48 = vadd.f32 %v13778_v12, %v13777_v15  ;;  %7735 = vpow2.f32 %v3921_v16  ;;  %v3667_v38 = vmin.f32 %v11220_v20, 0.0  ;;  %v11253_v0 = vmul.f32 %v13685_v29, %v4252_v9  ;;  %v13788_v29 = vld [vmem:[#allocation82_spill] sm:$0xff] }
 0x3fa   : > { %v11256_v17 = vmul.f32 %v13691_v18, %v4252_v9  ;;  %v11259_v35 = vmul.f32 %v13693_v37, %v4252_v9  ;;  %v11262_v60 = vmul.f32 %v13695_v11, %v4252_v9  ;;  %v11265_v28 = vmul.f32 %v13697_v57, %v4252_v9  ;;  %v13787_v18 = vld [vmem:[#allocation78_spill] sm:$0xff] }
 0x3fb   : > { %13779 = vst [vmem:[#allocation77_spill] sm:$0xff] %v11253_v0  ;;  %v11268_v16 = vmul.f32 %v13699_v21, %v4252_v9  ;;  %v11271_v22 = vmul.f32 %v13701_v3, %v4252_v9  ;;  %v11274_v34 = vmul.f32 %v10122_v32, %v4252_v9  ;;  %v11278_v37 = vadd.f32 %v10197_v43, %v13787_v18  ;;  %v13790_v21 = vld [vmem:[#allocation87_spill] sm:$0xff]  ;;  %v13792_v12 = vld [vmem:[#allocation70_spill] sm:$0xff] }
 0x3fc   : > { %13780 = vst [vmem:[#allocation157_spill] sm:$0xff] %v11256_v17  ;;  %13781 = vst [vmem:[#allocation81_spill] sm:$0xff] %v11259_v35  ;;  %v11282_v11 = vadd.f32 %v10200_v30, %v13788_v29  ;;  %v11286_v57 = vadd.f32 %v10208_v44, %v13789_v54  ;;  %v11290_v15 = vadd.f32 %v10217_v47, %v13790_v21  ;;  %v13791_v32 = vld [vmem:[#allocation91_spill] sm:$0xff]  ;;  %v6441_v18 = vadd.f32 -1.0, %v7732_v45  ;;  %v13796_v35 = vld [vmem:[#allocation170_spill] sm:$0xff] }
 0x3fd   : > { %13782 = vst [vmem:[#allocation158_spill] sm:$0xff] %v11262_v60  ;;  %13783 = vst [vmem:[#allocation83_spill] sm:$0xff] %v11265_v28  ;;  %v11295_v3 = vadd.f32 %v10220_v56, %v13791_v32  ;;  %v11298_v43 = vadd.f32 %v13705_v2, %v3886_v33  ;;  %v11302_v30 = vadd.f32 %v10228_v14, %v13792_v12  ;;  %v13793_v9 = vld [vmem:[#allocation75_spill] sm:$0xff]  ;;  %v3678_v33 = vmul.f32 1.442695, %v3667_v38  ;;  %v13794_v28 = vld [vmem:[#allocation169_spill] sm:$0xff] }
 0x3fe   : > { %13784 = vst [vmem:[#allocation159_spill] sm:$0xff] %v11268_v16  ;;  %13785 = vst [vmem:[#allocation86_spill] sm:$0xff] %v11271_v22  ;;  %v11306_v44 = vadd.f32 %v10231_v5, %v13793_v9  ;;  %v3939_v47 = vsel %vm3899_vm15, %v10964_v58, %v6438_v39  ;;  %v3697_v56 = vsel %vm3657_vm1, %v11023_v26, %v6409_v31 }
 0x3ff   : > { %13786 = vst [vmem:[#allocation160_spill] sm:$0xff] %v11274_v34  ;;  %v4296_v29 = vmul.f32 %v11158_v52, %v3697_v56  ;;  %v4499_v14 = vmul.f32 %v11168_v24, %v3697_v56  ;;  %v4703_v54 = vmul.f32 %v11177_v59, %v3697_v56  ;;  %v4907_v5 = vmul.f32 %v11209_v41, %v3697_v56 }
 0x400   : > { %v5111_v21 = vmul.f32 %v11215_v51, %v3697_v56  ;;  %v5315_v58 = vmul.f32 %v11223_v25, %v3697_v56  ;;  %v5519_v39 = vmul.f32 %v11228_v23, %v3697_v56  ;;  %v5723_v45 = vmul.f32 %v11233_v6, %v3697_v56  ;;  %v13798_v56 = vld [vmem:[#allocation171_spill] sm:$0xff] }
 0x401   : > { %v4304_v26 = vadd.f32 %v4296_v29, %v11155_v19  ;;  %v4507_v31 = vadd.f32 %v4499_v14, %v11165_v53  ;;  %v4711_v38 = vadd.f32 %v4703_v54, %v11172_v62  ;;  %v4915_v32 = vadd.f32 %v4907_v5, %v4897_v10  ;;  %v13800_v29 = vld [vmem:[#allocation172_spill] sm:$0xff]  ;;  %v13807_v14 = vld [vmem:[#allocation110_spill] sm:$0xff]  ;;  %v13813_v5 = vld [vmem:[#allocation275_spill] sm:$0xff] }
 0x402   : > { %v5119_v12 = vadd.f32 %v5111_v21, %v5101_v55  ;;  %v5323_v9 = vadd.f32 %v5315_v58, %v5305_v63  ;;  %v5527_v34 = vadd.f32 %v5519_v39, %v5509_v50  ;;  %v5731_v22 = vadd.f32 %v5723_v45, %v5713_v40  ;;  %v13809_v54 = vld [vmem:[#allocation274_spill] sm:$0xff]  ;;  %v13815_v58 = vld [vmem:[#allocation21_spill] sm:$0xff]  ;;  %v13816_v39 = vld [vmem:[#allocation111_spill] sm:$0xff] }
 0x403   : > { %v11327_v16 = vadd.f32 %v10260_v4, %v4304_v26  ;;  %v11330_v60 = vadd.f32 %v13794_v28, %v4507_v31  ;;  %v11333_v17 = vadd.f32 %v13796_v35, %v4711_v38  ;;  %v11336_v19 = vadd.f32 %v13798_v56, %v4915_v32  ;;  %v13817_v26 = vld [vmem:[#allocation22_spill] sm:$0xff]  ;;  %v13818_v31 = vld [vmem:[#allocation112_spill] sm:$0xff]  ;;  %v13819_v32 = vld [vmem:[#allocation277_spill] sm:$0xff] }
 0x404   : > { %v7734_v53 = vpop.eup %7733  ;;  %v11339_v62 = vadd.f32 %v13800_v29, %v5119_v12  ;;  %v11342_v63 = vadd.f32 %v10481_v36, %v5323_v9  ;;  %v11345_v50 = vadd.f32 %v10485_v7, %v5527_v34  ;;  %v11348_v4 = vadd.f32 %v10489_v61, %v5731_v22  ;;  %v13811_v34 = vld [vmem:[#allocation93_spill] sm:$0xff]  ;;  %v3607_v22 = vpop.f32.mrf.mxu0  ;;  %v13821_v9 = vld [vmem:[#allocation278_spill] sm:$0xff]  ;;  %v13823_v29 = vld [vmem:[#allocation336_spill] sm:$0xff] }
 0x405   : > { %13795 = vst [vmem:[#allocation90_spill] sm:$0xff] %v11330_v60  ;;  %13797 = vst [vmem:[#allocation161_spill] sm:$0xff] %v11333_v17  ;;  %v11351_v55 = vmul.f32 %v9944_v49, %v3939_v47  ;;  %v6408_v10 = vadd.f32 -1.0, %v7734_v53  ;;  %v3912_v40 = vmin.f32 %v11298_v43, 0.0  ;;  %7737 = vpow2.f32 %v3678_v33  ;;  %v13890_v17 = vld [vmem:[#allocation214_spill] sm:$0xff] }
 0x406   : > { %13799 = vst [vmem:[#allocation68_spill] sm:$0xff] %v11336_v19  ;;  %13801 = vst [vmem:[#allocation162_spill] sm:$0xff] %v11339_v62  ;;  %v7736_v35 = vpop.eup %7735  ;;  %v11355_v28 = vmul.f32 %v9949_v42, %v3939_v47  ;;  %v11358_v36 = vmul.f32 %v13807_v14, %v3939_v47  ;;  %v11361_v7 = vmul.f32 %v13809_v54, %v3939_v47  ;;  %vm3901_vm4 = vcmp.gt.f32.partialorder %v13823_v29, 0.0 }
 0x407   : > { %13802 = vst [vmem:[#allocation73_spill] sm:$0xff] %v11342_v63  ;;  %13803 = vst [vmem:[#allocation163_spill] sm:$0xff] %v11345_v50  ;;  %v11364_v61 = vmul.f32 %v13811_v34, %v3939_v47  ;;  %v11367_v21 = vmul.f32 %v13813_v5, %v3939_v47  ;;  %v3696_v33 = vsel %vm3656_vm3, %v11139_v13, %v6408_v10  ;;  %v13824_v13 = vld [vmem:[#allocation79_spill] sm:$0xff]  ;;  %v3927_v0 = vmul.f32 1.442695, %v3912_v40  ;;  %v13829_v50 = vld [vmem:[#allocation206_spill] sm:$0xff] }
 0x408   : > { %13804 = vst [vmem:[#allocation74_spill] sm:$0xff] %v11348_v4  ;;  %13805 = vst [vmem:[#allocation164_spill] sm:$0xff] %v11351_v55  ;;  %v11374_v45 = vadd.f32 %v13816_v39, %v13815_v58  ;;  %v11378_v38 = vadd.f32 %v13818_v31, %v13817_v26  ;;  %v11381_v12 = vmul.f32 %v13819_v32, %v3939_v47  ;;  %v13825_v10 = vld [vmem:[#allocation63_spill] sm:$0xff]  ;;  %v6440_v39 = vadd.f32 -1.0, %v7736_v35  ;;  %v13826_v26 = vld [vmem:[#allocation80_spill] sm:$0xff] }
 0x409   : > { %13806 = vst [vmem:[#allocation78_spill] sm:$0xff] %v11355_v28  ;;  %13808 = vst [vmem:[#allocation82_spill] sm:$0xff] %v11358_v36  ;;  %v11384_v56 = vmul.f32 %v13821_v9, %v3939_v47  ;;  %v3942_v53 = vsel %vm3902_vm2, %v11020_v8, %v6441_v18  ;;  %v11392_v58 = vadd.f32 %v13825_v10, %v13824_v13  ;;  %v13827_v31 = vld [vmem:[#allocation62_spill] sm:$0xff]  ;;  %7739 = vpow2.f32 %v3927_v0 }
 0x40a   : > { %13810 = vst [vmem:[#allocation85_spill] sm:$0xff] %v11361_v7  ;;  %13812 = vst [vmem:[#allocation87_spill] sm:$0xff] %v11364_v61  ;;  %v4295_v47 = vmul.f32 %v11158_v52, %v3696_v33  ;;  %v4702_v8 = vmul.f32 %v11177_v59, %v3696_v33  ;;  %v4906_v18 = vmul.f32 %v11209_v41, %v3696_v33  ;;  %v13873_v0 = vld [vmem:[#allocation118_spill] sm:$0xff]  ;;  %vm3904_vm6 = vcmp.gt.f32.partialorder %v11298_v43, 0.0 }
 0x40b   : > { %13814 = vst [vmem:[#allocation91_spill] sm:$0xff] %v11367_v21  ;;  %13820 = vst [vmem:[#allocation70_spill] sm:$0xff] %v11381_v12  ;;  %v11396_v21 = vadd.f32 %v13827_v31, %v13826_v26  ;;  %v13828_v12 = vld [vmem:[#allocation76_spill] sm:$0xff]  ;;  %v5110_v7 = vmul.f32 %v11215_v51, %v3696_v33  ;;  %v5314_v13 = vmul.f32 %v11223_v25, %v3696_v33 }
 0x40c   : > { %13822 = vst [vmem:[#allocation75_spill] sm:$0xff] %v11384_v56  ;;  %v3640_v61 = vmul.f32 %v13828_v12, %v3607_v22  ;;  %v4498_v56 = vmul.f32 %v11168_v24, %v3696_v33  ;;  %v5518_v40 = vmul.f32 %v11228_v23, %v3696_v33  ;;  %v5722_v35 = vmul.f32 %v11233_v6, %v3696_v33  ;;  %v13831_v33 = vld [vmem:[#allocation207_spill] sm:$0xff] }
 0x40d   : > { %v4303_v10 = vadd.f32 %v4295_v47, %v11237_v1  ;;  %v4710_v26 = vadd.f32 %v4702_v8, %v11245_v48  ;;  %v4914_v31 = vadd.f32 %v4906_v18, %v11278_v37  ;;  %v5118_v36 = vadd.f32 %v5110_v7, %v11282_v11  ;;  %v13833_v1 = vld [vmem:[#allocation208_spill] sm:$0xff]  ;;  %v13835_v48 = vld [vmem:[#allocation209_spill] sm:$0xff]  ;;  %v13837_v37 = vld [vmem:[#allocation210_spill] sm:$0xff] }
 0x40e   : > { %v4506_v22 = vadd.f32 %v4498_v56, %v11241_v27  ;;  %v5322_v28 = vadd.f32 %v5314_v13, %v11286_v57  ;;  %v5526_v55 = vadd.f32 %v5518_v40, %v11290_v15  ;;  %v5730_v4 = vadd.f32 %v5722_v35, %v11295_v3  ;;  %v13839_v57 = vld [vmem:[#allocation211_spill] sm:$0xff]  ;;  %v13841_v3 = vld [vmem:[#allocation212_spill] sm:$0xff]  ;;  %v13843_v7 = vld [vmem:[#allocation213_spill] sm:$0xff] }
 0x40f   : > { %v11416_v63 = vadd.f32 %v13829_v50, %v4303_v10  ;;  %v11422_v27 = vadd.f32 %v13833_v1, %v4710_v26  ;;  %v11425_v56 = vadd.f32 %v13835_v48, %v4914_v31  ;;  %v11429_v11 = vadd.f32 %v13837_v37, %v5118_v36  ;;  %v13847_v13 = vld [vmem:[#allocation298_spill] sm:$0xff]  ;;  %v13848_v36 = vld [vmem:[#allocation23_spill] sm:$0xff]  ;;  %v13849_v35 = vld [vmem:[#allocation113_spill] sm:$0xff] }
 0x410   : > { %v11419_v62 = vadd.f32 %v13831_v33, %v4506_v22  ;;  %v11432_v15 = vadd.f32 %v13839_v57, %v5322_v28  ;;  %v11435_v50 = vadd.f32 %v13841_v3, %v5526_v55  ;;  %v11438_v47 = vadd.f32 %v13843_v7, %v5730_v4  ;;  %v13850_v28 = vld [vmem:[#allocation24_spill] sm:$0xff]  ;;  %v13851_v22 = vld [vmem:[#allocation114_spill] sm:$0xff]  ;;  %v13852_v26 = vld [vmem:[#allocation25_spill] sm:$0xff] }
 0x411   : > { %13830 = vst [vmem:[#allocation169_spill] sm:$0xff] %v11416_v63  ;;  %13834 = vst [vmem:[#allocation171_spill] sm:$0xff] %v11422_v27  ;;  %v11441_v8 = vmul.f32 %v9944_v49, %v3942_v53  ;;  %v11444_v18 = vmul.f32 %v9949_v42, %v3942_v53  ;;  %v11447_v40 = vadd.f32 %v13847_v13, %v3640_v61  ;;  %v13853_v4 = vld [vmem:[#allocation115_spill] sm:$0xff]  ;;  %v13854_v33 = vld [vmem:[#allocation26_spill] sm:$0xff] }
 0x412   : > { %13832 = vst [vmem:[#allocation170_spill] sm:$0xff] %v11419_v62  ;;  %13836 = vst [vmem:[#allocation172_spill] sm:$0xff] %v11425_v56  ;;  %v11451_v10 = vadd.f32 %v13849_v35, %v13848_v36  ;;  %v11455_v55 = vadd.f32 %v13851_v22, %v13850_v28  ;;  %v11459_v31 = vadd.f32 %v13853_v4, %v13852_v26  ;;  %v13855_v1 = vld [vmem:[#allocation116_spill] sm:$0xff]  ;;  %v13856_v37 = vld [vmem:[#allocation27_spill] sm:$0xff]  ;;  %v7738_v3 = vpop.eup %7737  ;;  %v3868_v22 = vpop.f32.mrf.mxu1 }
 0x413   : > { %13838 = vst [vmem:[#allocation21_spill] sm:$0xff] %v11429_v11  ;;  %13840 = vst [vmem:[#allocation111_spill] sm:$0xff] %v11432_v15  ;;  %v11463_v48 = vadd.f32 %v13855_v1, %v13854_v33  ;;  %v13857_v57 = vld [vmem:[#allocation117_spill] sm:$0xff]  ;;  %v11470_v7 = vmul.f32 %v13807_v14, %v3942_v53  ;;  %v11473_v36 = vmul.f32 %v13809_v54, %v3942_v53  ;;  %v13864_v1 = vld [vmem:[#allocation84_spill] sm:$0xff]  ;;  %vm3658_vm7 = vcmp.gt.f32.partialorder %v11447_v40, 0.0 }
 0x414   : > { %13842 = vst [vmem:[#allocation22_spill] sm:$0xff] %v11435_v50  ;;  %13844 = vst [vmem:[#allocation112_spill] sm:$0xff] %v11438_v47  ;;  %v11467_v61 = vadd.f32 %v13857_v57, %v13856_v37  ;;  %v11476_v35 = vmul.f32 %v13811_v34, %v3942_v53  ;;  %v11479_v28 = vmul.f32 %v13813_v5, %v3942_v53  ;;  %v13865_v37 = vld [vmem:[#allocation165_spill] sm:$0xff]  ;;  %v13870_v47 = vld [vmem:[#allocation92_spill] sm:$0xff] }
 0x415   : > { %13845 = vst [vmem:[#allocation336_spill] sm:$0xff] %v11441_v8  ;;  %13846 = vst [vmem:[#allocation79_spill] sm:$0xff] %v11444_v18  ;;  %v11482_v26 = vmul.f32 %v13819_v32, %v3942_v53  ;;  %v11485_v4 = vmul.f32 %v13821_v9, %v3942_v53  ;;  %v11490_v33 = vsel %vm3901_vm4, %v13823_v29, %v6440_v39  ;;  %v13869_v18 = vld [vmem:[#allocation167_spill] sm:$0xff]  ;;  %v7533_v53 = vpop.f32.mrf.mxu0  ;;  %v3666_v29 = vmin.f32 %v11447_v40, 0.0  ;;  %v13872_v39 = vld [vmem:[#allocation28_spill] sm:$0xff] }
 0x416   : > { %13858 = vst [vmem:[#allocation63_spill] sm:$0xff] %v11470_v7  ;;  %13859 = vst [vmem:[#allocation80_spill] sm:$0xff] %v11473_v36  ;;  %v5103_v57 = vadd.f32 %v13865_v37, %v13864_v1  ;;  %v13867_v36 = vld [vmem:[#allocation166_spill] sm:$0xff]  ;;  %v3885_v15 = vmul.f32 %v13684_v46, %v3868_v22  ;;  %v11504_v11 = vadd.f32 %v13873_v0, %v13872_v39  ;;  %v13883_v46 = vld [vmem:[#allocation121_spill] sm:$0xff] }
 0x417   : > { %13860 = vst [vmem:[#allocation62_spill] sm:$0xff] %v11476_v35  ;;  %13861 = vst [vmem:[#allocation76_spill] sm:$0xff] %v11479_v28  ;;  %v13866_v35 = vld [vmem:[#allocation88_spill] sm:$0xff]  ;;  %v13868_v28 = vld [vmem:[#allocation89_spill] sm:$0xff]  ;;  %v11508_v1 = vmul.f32 %v9944_v49, %v11490_v33  ;;  %v3676_v39 = vmul.f32 1.442695, %v3666_v29  ;;  %v3643_v0 = vmul.f32 %v7533_v53, %v13828_v12 }
 0x418   : > { %13862 = vst [vmem:[#allocation206_spill] sm:$0xff] %v11482_v26  ;;  %13863 = vst [vmem:[#allocation207_spill] sm:$0xff] %v11485_v4  ;;  %v5307_v7 = vadd.f32 %v13867_v36, %v13866_v35  ;;  %v5511_v8 = vadd.f32 %v13869_v18, %v13868_v28  ;;  %v13871_v26 = vld [vmem:[#allocation168_spill] sm:$0xff]  ;;  %v6411_v4 = vadd.f32 -1.0, %v7738_v3  ;;  %v13876_v36 = vld [vmem:[#allocation29_spill] sm:$0xff] }
 0x419   : > { %v5715_v50 = vadd.f32 %v13871_v26, %v13870_v47  ;;  %13874 = vst [vmem:[#allocation208_spill] sm:$0xff] %v11504_v11  ;;  %13875 = vst [vmem:[#allocation209_spill] sm:$0xff] %v11508_v1  ;;  %v13877_v35 = vld [vmem:[#allocation119_spill] sm:$0xff]  ;;  %v13879_v28 = vld [vmem:[#allocation30_spill] sm:$0xff]  ;;  %7741 = vpow2.f32 %v3676_v39 }
 0x41a   : > { %v11512_v18 = vadd.f32 %v13877_v35, %v13876_v36  ;;  %v13880_v47 = vld [vmem:[#allocation120_spill] sm:$0xff]  ;;  %v13882_v3 = vld [vmem:[#allocation31_spill] sm:$0xff]  ;;  %v3699_v37 = vsel %vm3659_vm5, %v11220_v20, %v6411_v4  ;;  %v13886_v56 = vld [vmem:[#allocation122_spill] sm:$0xff] }
 0x41b   : > { %v11516_v26 = vadd.f32 %v13880_v47, %v13879_v28  ;;  %v11520_v22 = vadd.f32 %v13883_v46, %v13882_v3  ;;  %v13885_v1 = vld [vmem:[#allocation32_spill] sm:$0xff]  ;;  %v4298_v36 = vmul.f32 %v11158_v52, %v3699_v37  ;;  %v4501_v35 = vmul.f32 %v11168_v24, %v3699_v37 }
 0x41c   : > { %13878 = vst [vmem:[#allocation210_spill] sm:$0xff] %v11512_v18  ;;  %v11528_v27 = vadd.f32 %v13886_v56, %v13885_v1  ;;  %v4705_v28 = vmul.f32 %v11177_v59, %v3699_v37  ;;  %v4909_v47 = vmul.f32 %v11209_v41, %v3699_v37  ;;  %v5113_v3 = vmul.f32 %v11215_v51, %v3699_v37 }
 0x41d   : > { %13881 = vst [vmem:[#allocation211_spill] sm:$0xff] %v11516_v26  ;;  %13884 = vst [vmem:[#allocation212_spill] sm:$0xff] %v11520_v22  ;;  %v5317_v46 = vmul.f32 %v11223_v25, %v3699_v37  ;;  %v5521_v20 = vmul.f32 %v11228_v23, %v3699_v37  ;;  %v5725_v4 = vmul.f32 %v11233_v6, %v3699_v37  ;;  %v3617_v22 = vpop.f32.mrf.mxu0  ;;  %v13888_v26 = vld [vmem:[#allocation13_spill] sm:$0xff]  ;;  %v13892_v37 = vld [vmem:[#allocation215_spill] sm:$0xff] }
 0x41e   : > { %13887 = vst [vmem:[#allocation213_spill] sm:$0xff] %v11528_v27  ;;  %v4306_v53 = vadd.f32 %v4298_v36, %v11302_v30  ;;  %v4509_v56 = vadd.f32 %v4501_v35, %v11306_v44  ;;  %v4713_v29 = vadd.f32 %v4705_v28, %v11392_v58  ;;  %v4917_v1 = vadd.f32 %v4909_v47, %v11396_v21  ;;  %v13894_v30 = vld [vmem:[#allocation216_spill] sm:$0xff]  ;;  %v13896_v58 = vld [vmem:[#allocation217_spill] sm:$0xff]  ;;  %v13898_v21 = vld [vmem:[#allocation218_spill] sm:$0xff] }
 0x41f   : > { %v5121_v62 = vadd.f32 %v5113_v3, %v5103_v57  ;;  %v5325_v63 = vadd.f32 %v5317_v46, %v5307_v7  ;;  %v5529_v19 = vadd.f32 %v5521_v20, %v5511_v8  ;;  %v5733_v27 = vadd.f32 %v5725_v4, %v5715_v50  ;;  %v13900_v50 = vld [vmem:[#allocation219_spill] sm:$0xff]  ;;  %v13902_v57 = vld [vmem:[#allocation220_spill] sm:$0xff]  ;;  %v13904_v35 = vld [vmem:[#allocation33_spill] sm:$0xff] }
 0x420   : > { %v11543_v18 = vadd.f32 %v13888_v26, %v4306_v53  ;;  %v11546_v60 = vadd.f32 %v13890_v17, %v4509_v56  ;;  %v11549_v11 = vadd.f32 %v13892_v37, %v4713_v29  ;;  %v11552_v44 = vadd.f32 %v13894_v30, %v4917_v1  ;;  %v13905_v28 = vld [vmem:[#allocation123_spill] sm:$0xff]  ;;  %v13907_v3 = vld [vmem:[#allocation124_spill] sm:$0xff]  ;;  %v13911_v4 = vld [vmem:[#allocation126_spill] sm:$0xff]  ;;  %v7536_v1 = vpop.f32.mrf.mxu0  ;;  %v7740_v37 = vpop.eup %7739 }
 0x421   : > { %v11555_v36 = vadd.f32 %v13896_v58, %v5121_v62  ;;  %v11558_v7 = vadd.f32 %v13898_v21, %v5325_v63  ;;  %v11561_v8 = vadd.f32 %v13900_v50, %v5529_v19  ;;  %v11564_v26 = vadd.f32 %v13902_v57, %v5733_v27  ;;  %v13906_v62 = vld [vmem:[#allocation34_spill] sm:$0xff]  ;;  %v13908_v46 = vld [vmem:[#allocation35_spill] sm:$0xff]  ;;  %v13909_v19 = vld [vmem:[#allocation125_spill] sm:$0xff] }
 0x422   : > { %13889 = vst [vmem:[#allocation298_spill] sm:$0xff] %v11543_v18  ;;  %13891 = vst [vmem:[#allocation23_spill] sm:$0xff] %v11546_v60  ;;  %v11568_v17 = vadd.f32 %v13847_v13, %v3643_v0  ;;  %v11572_v47 = vadd.f32 %v13905_v28, %v13904_v35  ;;  %v11576_v63 = vadd.f32 %v13907_v3, %v13906_v62  ;;  %v13910_v27 = vld [vmem:[#allocation36_spill] sm:$0xff]  ;;  %v13912_v0 = vld [vmem:[#allocation38_spill] sm:$0xff]  ;;  %v3627_v60 = vpop.f32.mrf.mxu0 }
 0x423   : > { %13893 = vst [vmem:[#allocation113_spill] sm:$0xff] %v11549_v11  ;;  %13895 = vst [vmem:[#allocation24_spill] sm:$0xff] %v11552_v44  ;;  %v11580_v20 = vadd.f32 %v13909_v19, %v13908_v46  ;;  %v11584_v53 = vadd.f32 %v13911_v4, %v13910_v27  ;;  %v3642_v39 = vmul.f32 %v13828_v12, %v3617_v22  ;;  %v13913_v56 = vld [vmem:[#allocation127_spill] sm:$0xff]  ;;  %v13916_v50 = vld [vmem:[#allocation128_spill] sm:$0xff] }
 0x424   : > { %13897 = vst [vmem:[#allocation114_spill] sm:$0xff] %v11555_v36  ;;  %13899 = vst [vmem:[#allocation25_spill] sm:$0xff] %v11558_v7  ;;  %v11589_v29 = vadd.f32 %v13913_v56, %v13912_v0  ;;  %v11592_v30 = vadd.f32 %v13705_v2, %v3885_v15  ;;  %v3669_v58 = vmin.f32 %v11568_v17, 0.0  ;;  %v13915_v21 = vld [vmem:[#allocation39_spill] sm:$0xff]  ;;  %v13917_v35 = vld [vmem:[#allocation40_spill] sm:$0xff]  ;;  %vm3661_vm8 = vcmp.gt.f32.partialorder %v11568_v17, 0.0 }
 0x425   : > { %13901 = vst [vmem:[#allocation115_spill] sm:$0xff] %v11561_v8  ;;  %13903 = vst [vmem:[#allocation26_spill] sm:$0xff] %v11564_v26  ;;  %v11597_v57 = vadd.f32 %v13916_v50, %v13915_v21  ;;  %v13918_v28 = vld [vmem:[#allocation129_spill] sm:$0xff]  ;;  %v11604_v22 = vadd.f32 %v13847_v13, %v3642_v39  ;;  %v13920_v46 = vld [vmem:[#allocation130_spill] sm:$0xff] }
 0x426   : > { %13914 = vst [vmem:[#allocation116_spill] sm:$0xff] %v11592_v30  ;;  %v11601_v62 = vadd.f32 %v13918_v28, %v13917_v35  ;;  %v13919_v3 = vld [vmem:[#allocation41_spill] sm:$0xff]  ;;  %v13921_v27 = vld [vmem:[#allocation42_spill] sm:$0xff]  ;;  %v13922_v2 = vld [vmem:[#allocation131_spill] sm:$0xff]  ;;  %v3682_v21 = vmul.f32 1.442695, %v3669_v58 }
 0x427   : > { %v11608_v19 = vadd.f32 %v13920_v46, %v13919_v3  ;;  %v11612_v15 = vadd.f32 %v13922_v2, %v13921_v27  ;;  %v13923_v4 = vld [vmem:[#allocation43_spill] sm:$0xff]  ;;  %v13924_v0 = vld [vmem:[#allocation132_spill] sm:$0xff]  ;;  %v13926_v26 = vld [vmem:[#allocation133_spill] sm:$0xff]  ;;  %v3645_v3 = vmul.f32 %v7536_v1, %v13828_v12  ;;  %v6443_v46 = vadd.f32 -1.0, %v7740_v37 }
 0x428   : > { %v11616_v56 = vadd.f32 %v13924_v0, %v13923_v4  ;;  %v13925_v50 = vld [vmem:[#allocation44_spill] sm:$0xff]  ;;  %v13927_v28 = vld [vmem:[#allocation45_spill] sm:$0xff]  ;;  %v13928_v39 = vld [vmem:[#allocation134_spill] sm:$0xff]  ;;  %v3668_v7 = vmin.f32 %v11604_v22, 0.0  ;;  %7743 = vpow2.f32 %v3682_v21  ;;  %vm3660_vm9 = vcmp.gt.f32.partialorder %v11604_v22, 0.0 }
 0x429   : > { %v11620_v35 = vadd.f32 %v13926_v26, %v13925_v50  ;;  %v11624_v8 = vadd.f32 %v13928_v39, %v13927_v28  ;;  %v13929_v27 = vld [vmem:[#allocation46_spill] sm:$0xff]  ;;  %v13930_v2 = vld [vmem:[#allocation135_spill] sm:$0xff]  ;;  %v13932_v0 = vld [vmem:[#allocation136_spill] sm:$0xff]  ;;  %v3911_v26 = vmin.f32 %v11592_v30, 0.0  ;;  %v11638_v50 = vadd.f32 %v13847_v13, %v3645_v3 }
 0x42a   : > { %v11630_v36 = vadd.f32 %v13930_v2, %v13929_v27  ;;  %v13931_v4 = vld [vmem:[#allocation47_spill] sm:$0xff]  ;;  %v13933_v28 = vld [vmem:[#allocation48_spill] sm:$0xff]  ;;  %v13934_v39 = vld [vmem:[#allocation137_spill] sm:$0xff]  ;;  %v3680_v27 = vmul.f32 1.442695, %v3668_v7 }
 0x42b   : > { %v11634_v58 = vadd.f32 %v13932_v0, %v13931_v4  ;;  %v11642_v44 = vadd.f32 %v13934_v39, %v13933_v28  ;;  %v13935_v1 = vld [vmem:[#allocation49_spill] sm:$0xff]  ;;  %v13936_v37 = vld [vmem:[#allocation138_spill] sm:$0xff]  ;;  %v13939_v4 = vld [vmem:[#allocation139_spill] sm:$0xff]  ;;  %v11662_v28 = vmul.f32 %v9949_v42, %v11490_v33  ;;  %v3671_v39 = vmin.f32 %v11638_v50, 0.0 }
 0x42c   : > { %v11646_v11 = vadd.f32 %v13936_v37, %v13935_v1  ;;  %v13938_v2 = vld [vmem:[#allocation50_spill] sm:$0xff]  ;;  %v13940_v30 = vld [vmem:[#allocation51_spill] sm:$0xff]  ;;  %v13941_v3 = vld [vmem:[#allocation140_spill] sm:$0xff]  ;;  %7745 = vpow2.f32 %v3680_v27  ;;  %vm3663_vm10 = vcmp.gt.f32.partialorder %v11638_v50, 0.0 }
 0x42d   : > { %v11652_v0 = vadd.f32 %v13939_v4, %v13938_v2  ;;  %v11656_v18 = vadd.f32 %v13941_v3, %v13940_v30  ;;  %13943 = vst [vmem:[#allocation84_spill] sm:$0xff] %v11662_v28  ;;  %v13944_v1 = vld [vmem:[#allocation52_spill] sm:$0xff]  ;;  %v13945_v37 = vld [vmem:[#allocation141_spill] sm:$0xff]  ;;  %v11675_v30 = vmul.f32 %v13807_v14, %v11490_v33  ;;  %v3644_v4 = vmul.f32 %v13828_v12, %v3627_v60  ;;  %v13949_v3 = vld [vmem:[#allocation54_spill] sm:$0xff] }
 0x42e   : > { %13937 = vst [vmem:[#allocation27_spill] sm:$0xff] %v11646_v11  ;;  %v11667_v21 = vadd.f32 %v13945_v37, %v13944_v1  ;;  %v13946_v7 = vld [vmem:[#allocation53_spill] sm:$0xff]  ;;  %v13947_v11 = vld [vmem:[#allocation142_spill] sm:$0xff]  ;;  %v13950_v42 = vld [vmem:[#allocation143_spill] sm:$0xff]  ;;  %v11688_v1 = vmul.f32 %v13811_v34, %v11490_v33  ;;  %v3925_v37 = vmul.f32 1.442695, %v3911_v26  ;;  %v11696_v60 = vmul.f32 %v13819_v32, %v11490_v33  ;;  %v7559_v34 = vpop.f32.mrf.mxu0 }
 0x42f   : > { %13942 = vst [vmem:[#allocation117_spill] sm:$0xff] %v11656_v18  ;;  %v11671_v2 = vadd.f32 %v13947_v11, %v13946_v7  ;;  %13948 = vst [vmem:[#allocation165_spill] sm:$0xff] %v11675_v30  ;;  %v11680_v28 = vadd.f32 %v13950_v42, %v13949_v3  ;;  %v11684_v18 = vmul.f32 %v13809_v54, %v11490_v33  ;;  %v3686_v27 = vmul.f32 1.442695, %v3671_v39  ;;  %v13957_v26 = vld [vmem:[#allocation55_spill] sm:$0xff]  ;;  %v13958_v3 = vld [vmem:[#allocation144_spill] sm:$0xff] }
 0x430   : > { %13952 = vst [vmem:[#allocation166_spill] sm:$0xff] %v11688_v1  ;;  %v11692_v11 = vmul.f32 %v13813_v5, %v11490_v33  ;;  %13954 = vst [vmem:[#allocation167_spill] sm:$0xff] %v11696_v60  ;;  %v11700_v42 = vmul.f32 %v13821_v9, %v11490_v33  ;;  %v11705_v12 = vsel %vm3904_vm6, %v11298_v43, %v6443_v46  ;;  %v13960_v33 = vld [vmem:[#allocation145_spill] sm:$0xff]  ;;  %v7742_v1 = vpop.eup %7741  ;;  %v13963_v43 = vld [vmem:[#allocation146_spill] sm:$0xff]  ;;  %7747 = vpow2.f32 %v3925_v37 }
 0x431   : > { %13951 = vst [vmem:[#allocation88_spill] sm:$0xff] %v11684_v18  ;;  %13956 = vst [vmem:[#allocation168_spill] sm:$0xff] %v11705_v12  ;;  %v11709_v7 = vadd.f32 %v13847_v13, %v3644_v4  ;;  %v11713_v60 = vadd.f32 %v13958_v3, %v13957_v26  ;;  %v13962_v18 = vld [vmem:[#allocation57_spill] sm:$0xff]  ;;  %v13965_v30 = vld [vmem:[#allocation58_spill] sm:$0xff]  ;;  %7749 = vpow2.f32 %v3686_v27 }
 0x432   : > { %13953 = vst [vmem:[#allocation89_spill] sm:$0xff] %v11692_v11  ;;  %13955 = vst [vmem:[#allocation92_spill] sm:$0xff] %v11700_v42  ;;  %v13959_v11 = vld [vmem:[#allocation56_spill] sm:$0xff]  ;;  %v11721_v46 = vadd.f32 %v13963_v43, %v13962_v18  ;;  %v13966_v39 = vld [vmem:[#allocation147_spill] sm:$0xff]  ;;  %v6410_v18 = vadd.f32 -1.0, %v7742_v1 }
 0x433   : > { %v11717_v42 = vadd.f32 %v13960_v33, %v13959_v11  ;;  %v11725_v9 = vadd.f32 %v13966_v39, %v13965_v30  ;;  %v13968_v13 = vld [vmem:[#allocation59_spill] sm:$0xff]  ;;  %v13969_v4 = vld [vmem:[#allocation148_spill] sm:$0xff]  ;;  %v13972_v26 = vld [vmem:[#allocation149_spill] sm:$0xff]  ;;  %v11737_v11 = vmul.f32 %v9944_v49, %v11705_v12  ;;  %v3670_v33 = vmin.f32 %v11709_v7, 0.0 }
 0x434   : > { %13964 = vst [vmem:[#allocation118_spill] sm:$0xff] %v11721_v46  ;;  %v11729_v32 = vadd.f32 %v13969_v4, %v13968_v13  ;;  %v13971_v5 = vld [vmem:[#allocation60_spill] sm:$0xff]  ;;  %v13975_v30 = vld [vmem:[#allocation61_spill] sm:$0xff]  ;;  %v13976_v43 = vld [vmem:[#allocation150_spill] sm:$0xff]  ;;  %v11745_v13 = vstv %s11648_s1  ;;  %v11748_v4 = vstv %s11658_s2  ;;  %vm3662_vm11 = vcmp.gt.f32.partialorder %v11709_v7, 0.0  ;;  %s13208_s2 = scalar_lea.hbm %s13264_s8, %s6678_s0 }
 0x435   : > { %13961 = vst [vmem:[#allocation28_spill] sm:$0xff] %v11717_v42  ;;  %13967 = vst [vmem:[#allocation29_spill] sm:$0xff] %v11725_v9  ;;  %v11733_v3 = vadd.f32 %v13972_v26, %v13971_v5  ;;  %v11742_v39 = vadd.f32 %v13976_v43, %v13975_v30  ;;  %v3698_v5 = vsel %vm3658_vm7, %v11447_v40, %v6410_v18  ;;  %v3684_v26 = vmul.f32 1.442695, %v3670_v33  ;;  %v13979_v1 = vld [vmem:[#allocation151_spill] sm:$0xff]  ;;  %v13981_v46 = vld [vmem:[#allocation64_spill] sm:$0xff] }
 0x436   : > { %13970 = vst [vmem:[#allocation119_spill] sm:$0xff] %v11729_v32  ;;  %13974 = vst [vmem:[#allocation120_spill] sm:$0xff] %v11737_v11  ;;  %v4121_v11 = vmul.f32 %v7559_v34, %v11745_v13  ;;  %v4340_v37 = vadd.f32 %v13979_v1, %v11327_v16  ;;  %v4297_v27 = vmul.f32 %v11158_v52, %v3698_v5  ;;  %v13980_v32 = vld [vmem:[#allocation208_spill] sm:$0xff] }
 0x437   : > { %13973 = vst [vmem:[#allocation30_spill] sm:$0xff] %v11733_v3  ;;  %13977 = vst [vmem:[#allocation31_spill] sm:$0xff] %v11742_v39  ;;  %v4500_v49 = vmul.f32 %v11168_v24, %v3698_v5  ;;  %v4704_v30 = vmul.f32 %v11177_v59, %v3698_v5  ;;  %v4908_v43 = vmul.f32 %v11209_v41, %v3698_v5  ;;  %7751 = vpow2.f32 %v3684_v26 }
 0x438   : > { %13978 = vst [vmem:[#allocation121_spill] sm:$0xff] %v11745_v13  ;;  %v5112_v54 = vmul.f32 %v11215_v51, %v3698_v5  ;;  %v5316_v14 = vmul.f32 %v11223_v25, %v3698_v5  ;;  %v5520_v40 = vmul.f32 %v11228_v23, %v3698_v5  ;;  %v5724_v18 = vmul.f32 %v11233_v6, %v3698_v5  ;;  %v7744_v13 = vpop.eup %7743  ;;  %v13982_v5 = vld [vmem:[#allocation65_spill] sm:$0xff] }
 0x439   : > { %v4305_v34 = vadd.f32 %v4297_v27, %v11374_v45  ;;  %v4508_v16 = vadd.f32 %v4500_v49, %v11378_v38  ;;  %v4712_v33 = vadd.f32 %v4704_v30, %v11451_v10  ;;  %v4916_v1 = vadd.f32 %v4908_v43, %v11455_v55  ;;  %v13984_v49 = vld [vmem:[#allocation66_spill] sm:$0xff]  ;;  %v13986_v10 = vld [vmem:[#allocation67_spill] sm:$0xff]  ;;  %v7746_v27 = vpop.eup %7745 }
 0x43a   : > { %v5120_v12 = vadd.f32 %v5112_v54, %v11459_v31  ;;  %v5324_v39 = vadd.f32 %v5316_v14, %v11463_v48  ;;  %v5528_v3 = vadd.f32 %v5520_v40, %v11467_v61  ;;  %v5732_v9 = vadd.f32 %v5724_v18, %v13980_v32  ;;  %v13988_v54 = vld [vmem:[#allocation12_spill] sm:$0xff]  ;;  %v13990_v14 = vld [vmem:[#allocation173_spill] sm:$0xff]  ;;  %v13992_v32 = vld [vmem:[#allocation174_spill] sm:$0xff] }
 0x43b   : > { %v11773_v42 = vadd.f32 %v13981_v46, %v4305_v34  ;;  %v11776_v45 = vadd.f32 %v13982_v5, %v4508_v16  ;;  %v11779_v38 = vadd.f32 %v13984_v49, %v4712_v33  ;;  %v11782_v55 = vadd.f32 %v13986_v10, %v4916_v1  ;;  %v13994_v46 = vld [vmem:[#allocation175_spill] sm:$0xff]  ;;  %v13998_v16 = vld [vmem:[#allocation152_spill] sm:$0xff]  ;;  %v13999_v33 = vld [vmem:[#allocation161_spill] sm:$0xff] }
 0x43c   : > { %v11785_v31 = vadd.f32 %v13988_v54, %v5120_v12  ;;  %v11788_v48 = vadd.f32 %v13990_v14, %v5324_v39  ;;  %v11791_v61 = vadd.f32 %v13992_v32, %v5528_v3  ;;  %v11794_v30 = vadd.f32 %v13994_v46, %v5732_v9  ;;  %v13996_v12 = vld [vmem:[#allocation246_spill] sm:$0xff] }
 0x43d   : > { %13983 = vst [vmem:[#allocation32_spill] sm:$0xff] %v11776_v45  ;;  %13985 = vst [vmem:[#allocation122_spill] sm:$0xff] %v11779_v38  ;;  %v6413_v43 = vadd.f32 -1.0, %v7744_v13  ;;  %v6412_v40 = vadd.f32 -1.0, %v7746_v27  ;;  %v11797_v18 = vadd.f32 %v11748_v4, %v4121_v11  ;;  %v11802_v34 = vadd.f32 %v13996_v12, %v4340_v37  ;;  %v13997_v39 = vld [vmem:[#allocation90_spill] sm:$0xff]  ;;  %v14000_v11 = vld [vmem:[#allocation155_spill] sm:$0xff]  ;;  %v11817_v27 = vpop.eup %7747 }
 0x43e   : > { %13987 = vst [vmem:[#allocation13_spill] sm:$0xff] %v11782_v55  ;;  %13989 = vst [vmem:[#allocation214_spill] sm:$0xff] %v11785_v31  ;;  %v11806_v3 = vadd.f32 %v13998_v16, %v13997_v39  ;;  %v4747_v1 = vadd.f32 %v14000_v11, %v13999_v33  ;;  %v7750_v32 = vpop.eup %7749  ;;  %v14001_v46 = vld [vmem:[#allocation210_spill] sm:$0xff]  ;;  %v14003_v39 = vld [vmem:[#allocation212_spill] sm:$0xff] }
 0x43f   : > { %13991 = vst [vmem:[#allocation215_spill] sm:$0xff] %v11788_v48  ;;  %13993 = vst [vmem:[#allocation216_spill] sm:$0xff] %v11791_v61  ;;  %v3701_v9 = vsel %vm3661_vm8, %v11568_v17, %v6413_v43  ;;  %v3700_v13 = vsel %vm3660_vm9, %v11604_v22, %v6412_v40  ;;  %v4147_v26 = vmin.f32 %v11797_v18, 0.0  ;;  %v14002_v40 = vld [vmem:[#allocation211_spill] sm:$0xff]  ;;  %v14004_v33 = vld [vmem:[#allocation213_spill] sm:$0xff]  ;;  %vm4139_vm12 = vcmp.gt.f32.partialorder %v11797_v18, 0.0 }
 0x440   : > { %13995 = vst [vmem:[#allocation217_spill] sm:$0xff] %v11794_v30  ;;  %v4300_v5 = vmul.f32 %v11158_v52, %v3701_v9  ;;  %v4503_v49 = vmul.f32 %v11168_v24, %v3701_v9  ;;  %v4707_v37 = vmul.f32 %v11177_v59, %v3701_v9  ;;  %v4911_v10 = vmul.f32 %v11209_v41, %v3701_v9  ;;  %v14005_v55 = vld [vmem:[#allocation176_spill] sm:$0xff] }
 0x441   : > { %v5115_v54 = vmul.f32 %v11215_v51, %v3701_v9  ;;  %v5319_v17 = vmul.f32 %v11223_v25, %v3701_v9  ;;  %v5523_v22 = vmul.f32 %v11228_v23, %v3701_v9  ;;  %v5727_v14 = vmul.f32 %v11233_v6, %v3701_v9  ;;  %v14006_v9 = vld [vmem:[#allocation177_spill] sm:$0xff] }
 0x442   : > { %v4308_v43 = vadd.f32 %v4300_v5, %v14001_v46  ;;  %v4511_v12 = vadd.f32 %v4503_v49, %v14002_v40  ;;  %v4715_v16 = vadd.f32 %v4707_v37, %v14003_v39  ;;  %v4919_v11 = vadd.f32 %v4911_v10, %v14004_v33  ;;  %v14007_v5 = vld [vmem:[#allocation178_spill] sm:$0xff]  ;;  %v14009_v37 = vld [vmem:[#allocation179_spill] sm:$0xff] }
 0x443   : > { %v5123_v30 = vadd.f32 %v5115_v54, %v11572_v47  ;;  %v5327_v61 = vadd.f32 %v5319_v17, %v11576_v63  ;;  %v5531_v48 = vadd.f32 %v5523_v22, %v11580_v20  ;;  %v5735_v31 = vadd.f32 %v5727_v14, %v11584_v53  ;;  %v14011_v47 = vld [vmem:[#allocation180_spill] sm:$0xff]  ;;  %v14013_v20 = vld [vmem:[#allocation181_spill] sm:$0xff]  ;;  %v14015_v53 = vld [vmem:[#allocation182_spill] sm:$0xff] }
 0x444   : > { %v11832_v38 = vadd.f32 %v14005_v55, %v4308_v43  ;;  %v11835_v45 = vadd.f32 %v14006_v9, %v4511_v12  ;;  %v11838_v49 = vadd.f32 %v14007_v5, %v4715_v16  ;;  %v11841_v46 = vadd.f32 %v14009_v37, %v4919_v11  ;;  %v14017_v54 = vld [vmem:[#allocation183_spill] sm:$0xff] }
 0x445   : > { %v11846_v63 = vadd.f32 %v14011_v47, %v5123_v30  ;;  %v11849_v10 = vadd.f32 %v14013_v20, %v5327_v61  ;;  %v11852_v55 = vadd.f32 %v14015_v53, %v5531_v48  ;;  %v11855_v17 = vadd.f32 %v14017_v54, %v5735_v31  ;;  %v7752_v47 = vpop.eup %7751 }
 0x446   : > { %14008 = vst [vmem:[#allocation218_spill] sm:$0xff] %v11838_v49  ;;  %14010 = vst [vmem:[#allocation219_spill] sm:$0xff] %v11841_v46  ;;  %v4299_v22 = vmul.f32 %v11158_v52, %v3700_v13  ;;  %v4502_v30 = vmul.f32 %v11168_v24, %v3700_v13  ;;  %v4706_v14 = vmul.f32 %v11177_v59, %v3700_v13  ;;  %v14165_v49 = vld [vmem:[#allocation276_spill] sm:$0xff] }
 0x447   : > { %14012 = vst [vmem:[#allocation220_spill] sm:$0xff] %v11846_v63  ;;  %14014 = vst [vmem:[#allocation33_spill] sm:$0xff] %v11849_v10  ;;  %v4910_v61 = vmul.f32 %v11209_v41, %v3700_v13  ;;  %v5114_v48 = vmul.f32 %v11215_v51, %v3700_v13  ;;  %v5318_v43 = vmul.f32 %v11223_v25, %v3700_v13 }
 0x448   : > { %14016 = vst [vmem:[#allocation123_spill] sm:$0xff] %v11852_v55  ;;  %14018 = vst [vmem:[#allocation34_spill] sm:$0xff] %v11855_v17  ;;  %v5522_v31 = vmul.f32 %v11228_v23, %v3700_v13  ;;  %v5726_v40 = vmul.f32 %v11233_v6, %v3700_v13  ;;  %v4307_v12 = vadd.f32 %v4299_v22, %v11589_v29  ;;  %v14019_v13 = vld [vmem:[#allocation14_spill] sm:$0xff]  ;;  %v14021_v29 = vld [vmem:[#allocation20_spill] sm:$0xff] }
 0x449   : > { %v4510_v39 = vadd.f32 %v4502_v30, %v11597_v57  ;;  %v4714_v16 = vadd.f32 %v4706_v14, %v11601_v62  ;;  %v4918_v33 = vadd.f32 %v4910_v61, %v11608_v19  ;;  %v5122_v11 = vadd.f32 %v5114_v48, %v11612_v15  ;;  %v14023_v62 = vld [vmem:[#allocation184_spill] sm:$0xff]  ;;  %v14025_v19 = vld [vmem:[#allocation185_spill] sm:$0xff] }
 0x44a   : > { %v5326_v9 = vadd.f32 %v5318_v43, %v11616_v56  ;;  %v5530_v5 = vadd.f32 %v5522_v31, %v11620_v35  ;;  %v5734_v37 = vadd.f32 %v5726_v40, %v11624_v8  ;;  %v11878_v20 = vadd.f32 %v14019_v13, %v4307_v12  ;;  %v14027_v56 = vld [vmem:[#allocation186_spill] sm:$0xff]  ;;  %v14029_v35 = vld [vmem:[#allocation187_spill] sm:$0xff]  ;;  %v14031_v8 = vld [vmem:[#allocation188_spill] sm:$0xff] }
 0x44b   : > { %v11881_v57 = vadd.f32 %v14021_v29, %v4510_v39  ;;  %v11884_v53 = vadd.f32 %v14023_v62, %v4714_v16  ;;  %v11887_v15 = vadd.f32 %v14025_v19, %v4918_v33  ;;  %v11890_v54 = vadd.f32 %v14027_v56, %v5122_v11  ;;  %v14033_v14 = vld [vmem:[#allocation189_spill] sm:$0xff]  ;;  %v14035_v40 = vld [vmem:[#allocation247_spill] sm:$0xff]  ;;  %v14036_v33 = vld [vmem:[#allocation248_spill] sm:$0xff] }
 0x44c   : > { %14020 = vst [vmem:[#allocation124_spill] sm:$0xff] %v11878_v20  ;;  %v11893_v22 = vadd.f32 %v14029_v35, %v5326_v9  ;;  %v11896_v30 = vadd.f32 %v14031_v8, %v5530_v5  ;;  %v11899_v61 = vadd.f32 %v14033_v14, %v5734_v37  ;;  %v6415_v48 = vadd.f32 -1.0, %v7750_v32  ;;  %v14037_v9 = vld [vmem:[#allocation68_spill] sm:$0xff]  ;;  %v14038_v5 = vld [vmem:[#allocation279_spill] sm:$0xff]  ;;  %v14040_v37 = vld [vmem:[#allocation94_spill] sm:$0xff] }
 0x44d   : > { %14022 = vst [vmem:[#allocation35_spill] sm:$0xff] %v11881_v57  ;;  %14024 = vst [vmem:[#allocation125_spill] sm:$0xff] %v11884_v53  ;;  %v6414_v43 = vadd.f32 -1.0, %v7752_v47  ;;  %v4156_v31 = vmul.f32 1.442695, %v4147_v26  ;;  %v11903_v12 = vadd.f32 %v14035_v40, %v11806_v3  ;;  %v11906_v39 = vstv %s11843_s25  ;;  %v14039_v3 = vld [vmem:[#allocation162_spill] sm:$0xff] }
 0x44e   : > { %14026 = vst [vmem:[#allocation36_spill] sm:$0xff] %v11887_v15  ;;  %14028 = vst [vmem:[#allocation126_spill] sm:$0xff] %v11890_v54  ;;  %v11909_v16 = vstv %s11859_s26  ;;  %v11912_v11 = vadd.f32 %v14036_v33, %v4747_v1  ;;  %v4951_v13 = vadd.f32 %v14038_v5, %v14037_v9  ;;  %v3703_v32 = vsel %vm3663_vm10, %v11638_v50, %v6415_v48  ;;  %v14042_v33 = vld [vmem:[#allocation117_spill] sm:$0xff]  ;;  %v14153_v15 = vld [vmem:[#allocation320_spill] sm:$0xff]  ;;  %s7942_s25 = scalar_lea.vmem %s13210_s17, 8192  ;;  %s8015_s26 = smov [#allocation8]  }
 0x44f   : > { %14030 = vst [vmem:[#allocation38_spill] sm:$0xff] %v11893_v22  ;;  %14032 = vst [vmem:[#allocation127_spill] sm:$0xff] %v11896_v30  ;;  %v3702_v26 = vsel %vm3662_vm11, %v11709_v7, %v6414_v43  ;;  %7753 = vpow2.f32 %v4156_v31  ;;  %v5155_v47 = vadd.f32 %v14040_v37, %v14039_v3  ;;  %v4302_v29 = vmul.f32 %v11158_v52, %v3703_v32  ;;  %v14041_v43 = vld [vmem:[#allocation27_spill] sm:$0xff]  ;;  %v14129_v30 = vld [vmem:[#allocation18_spill] sm:$0xff]  ;;  %p7943_p1 = scmp.ne.s32.totalorder %s13210_s17, %s7942_s25 }
 0x450   : > { %14034 = vst [vmem:[#allocation39_spill] sm:$0xff] %v11899_v61  ;;  %v4505_v1 = vmul.f32 %v11168_v24, %v3703_v32  ;;  %v4709_v62 = vmul.f32 %v11177_v59, %v3703_v32  ;;  %v4913_v19 = vmul.f32 %v11209_v41, %v3703_v32  ;;  %v5117_v56 = vmul.f32 %v11215_v51, %v3703_v32  ;;  %v14144_v22 = vld [vmem:[#allocation294_spill] sm:$0xff] }
 0x451   : > { %v5321_v50 = vmul.f32 %v11223_v25, %v3703_v32  ;;  %v5525_v35 = vmul.f32 %v11228_v23, %v3703_v32  ;;  %v5729_v7 = vmul.f32 %v11233_v6, %v3703_v32  ;;  %v4310_v8 = vadd.f32 %v4302_v29, %v11630_v36  ;;  %v14043_v32 = vld [vmem:[#allocation190_spill] sm:$0xff]  ;;  %p7944_p3 = pnand %p7943_p1, %p14335_p2 }
 0x452   : > { %v4513_v14 = vadd.f32 %v4505_v1, %v11634_v58  ;;  %v4717_v48 = vadd.f32 %v4709_v62, %v11642_v44  ;;  %v4921_v31 = vadd.f32 %v4913_v19, %v14041_v43  ;;  %v5125_v40 = vadd.f32 %v5117_v56, %v11652_v0  ;;  %v14045_v58 = vld [vmem:[#allocation191_spill] sm:$0xff]  ;;  %v14047_v44 = vld [vmem:[#allocation192_spill] sm:$0xff]  ;;  %v14049_v1 = vld [vmem:[#allocation193_spill] sm:$0xff] }
 0x453   : > { %v5329_v9 = vadd.f32 %v5321_v50, %v14042_v33  ;;  %v5533_v5 = vadd.f32 %v5525_v35, %v11667_v21  ;;  %v5737_v3 = vadd.f32 %v5729_v7, %v11671_v2  ;;  %v11945_v36 = vadd.f32 %v14043_v32, %v4310_v8  ;;  %v14051_v0 = vld [vmem:[#allocation194_spill] sm:$0xff]  ;;  %v14053_v2 = vld [vmem:[#allocation195_spill] sm:$0xff]  ;;  %v14055_v56 = vld [vmem:[#allocation196_spill] sm:$0xff]  ;;  %p7945_p4 = pneg %p7944_p3 }
 0x454   : > { %v11948_v37 = vadd.f32 %v14045_v58, %v4513_v14  ;;  %v11951_v29 = vadd.f32 %v14047_v44, %v4717_v48  ;;  %v11954_v62 = vadd.f32 %v14049_v1, %v4921_v31  ;;  %v11959_v21 = vadd.f32 %v14051_v0, %v5125_v40  ;;  %v14057_v35 = vld [vmem:[#allocation197_spill] sm:$0xff] }
 0x455   : > { %14044 = vst [vmem:[#allocation128_spill] sm:$0xff] %v11945_v36  ;;  %v11962_v19 = vadd.f32 %v14053_v2, %v5329_v9  ;;  %v11965_v50 = vadd.f32 %v14055_v56, %v5533_v5  ;;  %v11968_v7 = vadd.f32 %v14057_v35, %v5737_v3  ;;  %v4301_v8 = vmul.f32 %v11158_v52, %v3702_v26  ;;  %v14060_v5 = vld [vmem:[#allocation118_spill] sm:$0xff]  ;;  %v14061_v32 = vld [vmem:[#allocation29_spill] sm:$0xff]  ;;  %v14069_v2 = vld [vmem:[#allocation200_spill] sm:$0xff] }
 0x456   : > { %14046 = vst [vmem:[#allocation40_spill] sm:$0xff] %v11948_v37  ;;  %14048 = vst [vmem:[#allocation129_spill] sm:$0xff] %v11951_v29  ;;  %v4504_v14 = vmul.f32 %v11168_v24, %v3702_v26  ;;  %v4708_v48 = vmul.f32 %v11177_v59, %v3702_v26  ;;  %v4912_v43 = vmul.f32 %v11209_v41, %v3702_v26  ;;  %v14059_v59 = vld [vmem:[#allocation28_spill] sm:$0xff]  ;;  %v14071_v35 = vld [vmem:[#allocation201_spill] sm:$0xff] }
 0x457   : > { %14050 = vst [vmem:[#allocation41_spill] sm:$0xff] %v11954_v62  ;;  %14052 = vst [vmem:[#allocation130_spill] sm:$0xff] %v11959_v21  ;;  %v5116_v31 = vmul.f32 %v11215_v51, %v3702_v26  ;;  %v5320_v40 = vmul.f32 %v11223_v25, %v3702_v26  ;;  %v5524_v33 = vmul.f32 %v11228_v23, %v3702_v26  ;;  %v14062_v51 = vld [vmem:[#allocation119_spill] sm:$0xff]  ;;  %v14063_v25 = vld [vmem:[#allocation30_spill] sm:$0xff] }
 0x458   : > { %14054 = vst [vmem:[#allocation42_spill] sm:$0xff] %v11962_v19  ;;  %14056 = vst [vmem:[#allocation131_spill] sm:$0xff] %v11965_v50  ;;  %v5728_v9 = vmul.f32 %v11233_v6, %v3702_v26  ;;  %v4309_v52 = vadd.f32 %v4301_v8, %v11680_v28  ;;  %v4512_v24 = vadd.f32 %v4504_v14, %v11713_v60  ;;  %v14064_v23 = vld [vmem:[#allocation31_spill] sm:$0xff]  ;;  %v14065_v26 = vld [vmem:[#allocation198_spill] sm:$0xff] }
 0x459   : > { %14058 = vst [vmem:[#allocation43_spill] sm:$0xff] %v11968_v7  ;;  %v4716_v41 = vadd.f32 %v4708_v48, %v14059_v59  ;;  %v4920_v3 = vadd.f32 %v4912_v43, %v14060_v5  ;;  %v5124_v58 = vadd.f32 %v5116_v31, %v14061_v32  ;;  %v5328_v44 = vadd.f32 %v5320_v40, %v14062_v51  ;;  %v14067_v28 = vld [vmem:[#allocation199_spill] sm:$0xff]  ;;  %v14073_v14 = vld [vmem:[#allocation202_spill] sm:$0xff]  ;;  %v14077_v40 = vld [vmem:[#allocation204_spill] sm:$0xff]  ;;  %v4079_v7 = vpop.f32.mrf.mxu0 }
 0x45a   : > { %v5532_v1 = vadd.f32 %v5524_v33, %v14063_v25  ;;  %v5736_v6 = vadd.f32 %v5728_v9, %v14064_v23  ;;  %v11994_v0 = vadd.f32 %v14065_v26, %v4309_v52  ;;  %v11997_v60 = vadd.f32 %v14067_v28, %v4512_v24  ;;  %v14075_v43 = vld [vmem:[#allocation203_spill] sm:$0xff]  ;;  %v14079_v9 = vld [vmem:[#allocation205_spill] sm:$0xff]  ;;  %v14095_v50 = vld [vmem:[#allocation16_spill] sm:$0xff] }
 0x45b   : > { %v12000_v56 = vadd.f32 %v14069_v2, %v4716_v41  ;;  %v12003_v8 = vadd.f32 %v14071_v35, %v4920_v3  ;;  %v12006_v48 = vadd.f32 %v14073_v14, %v5124_v58  ;;  %v12009_v31 = vadd.f32 %v14075_v43, %v5328_v44  ;;  %v14081_v41 = vld [vmem:[#allocation249_spill] sm:$0xff]  ;;  %v14082_v3 = vld [vmem:[#allocation250_spill] sm:$0xff]  ;;  %v14084_v58 = vld [vmem:[#allocation280_spill] sm:$0xff]  ;;  %v7562_v37 = vpop.f32.mrf.mxu0 }
 0x45c   : > { %14066 = vst [vmem:[#allocation132_spill] sm:$0xff] %v11994_v0  ;;  %14068 = vst [vmem:[#allocation44_spill] sm:$0xff] %v11997_v60  ;;  %v12012_v33 = vadd.f32 %v14077_v40, %v5532_v1  ;;  %v12015_v52 = vadd.f32 %v14079_v9, %v5736_v6  ;;  %v7754_v24 = vpop.eup %7753  ;;  %v12018_v59 = vstv %s11936_s10  ;;  %v4969_v5 = vadd.f32 %v14081_v41, %v4951_v13  ;;  %v14083_v51 = vld [vmem:[#allocation73_spill] sm:$0xff]  ;;  %v14085_v1 = vld [vmem:[#allocation163_spill] sm:$0xff]  ;;  %s7946_s10 = sshll.u32 %s8015_s26, 4  ;;  %s7947_s10 = int_to_ptr.vmem [resolvable:$false] %s7946_s10 }
 0x45d   : > { %14070 = vst [vmem:[#allocation133_spill] sm:$0xff] %v12000_v56  ;;  %14072 = vst [vmem:[#allocation45_spill] sm:$0xff] %v12003_v8  ;;  %v5173_v32 = vadd.f32 %v14082_v3, %v5155_v47  ;;  %v5359_v25 = vadd.f32 %v14084_v58, %v14083_v51  ;;  %v6465_v23 = vadd.f32 -1.0, %v7754_v24  ;;  %v12025_v44 = vstv %s11942_s12  ;;  %v14086_v28 = vld [vmem:[#allocation281_spill] sm:$0xff]  ;;  %v14087_v2 = vld [vmem:[#allocation251_spill] sm:$0xff]  ;;  %s7948_s12 = scalar_lea.vmem %s7947_s10, 16384  ;;  %p7949_p9 = scmp.lt.s32.totalorder %s13210_s17, %s7947_s10 }
 0x45e   : > { %14074 = vst [vmem:[#allocation134_spill] sm:$0xff] %v12006_v48  ;;  %14076 = vst [vmem:[#allocation46_spill] sm:$0xff] %v12009_v31  ;;  %v12028_v26 = vstv %s11956_s13  ;;  %v5563_v6 = vadd.f32 %v14086_v28, %v14085_v1  ;;  %v12034_v14 = vstv %s11970_s18  ;;  %v12037_v43 = vstv %s11977_s19  ;;  %v14088_v13 = vld [vmem:[#allocation74_spill] sm:$0xff]  ;;  %v14090_v9 = vld [vmem:[#allocation168_spill] sm:$0xff]  ;;  %p7950_p7 = scmp.lt.s32.totalorder %s7948_s12, %s7942_s25 }
 0x45f   : > { %14078 = vst [vmem:[#allocation135_spill] sm:$0xff] %v12012_v33  ;;  %14080 = vst [vmem:[#allocation47_spill] sm:$0xff] %v12015_v52  ;;  %v5377_v35 = vadd.f32 %v14087_v2, %v5359_v25  ;;  %v14089_v40 = vld [vmem:[#allocation282_spill] sm:$0xff]  ;;  %v14091_v41 = vld [vmem:[#allocation109_spill] sm:$0xff]  ;;  %v4179_v24 = vsel %vm4139_vm12, %v11797_v18, %v6465_v23  ;;  %v12050_v1 = vstv %s11983_s20 }
 0x460   : > { %v5767_v47 = vadd.f32 %v14089_v40, %v14088_v13  ;;  %v12043_v3 = vmul.f32 %v14091_v41, %v14090_v9  ;;  %v14093_v51 = vld [vmem:[#allocation252_spill] sm:$0xff]  ;;  %v4368_v25 = vmul.f32 %v11906_v39, %v4179_v24  ;;  %v4571_v28 = vmul.f32 %v11909_v16, %v4179_v24  ;;  %v14094_v31 = vld [vmem:[#allocation15_spill] sm:$0xff]  ;;  %v14096_v21 = vld [vmem:[#allocation297_spill] sm:$0xff]  ;;  %p7951_p5 = por %p7950_p7, %p7949_p9 }
 0x461   : > { %v5581_v58 = vadd.f32 %v14093_v51, %v5563_v6  ;;  %v4775_v2 = vmul.f32 %v12018_v59, %v4179_v24  ;;  %v4979_v13 = vmul.f32 %v12025_v44, %v4179_v24  ;;  %v5183_v40 = vmul.f32 %v12028_v26, %v4179_v24  ;;  %v14128_v36 = vld [vmem:[#allocation255_spill] sm:$0xff] }
 0x462   : > { %14092 = vst [vmem:[#allocation136_spill] sm:$0xff] %v12043_v3  ;;  %v5387_v52 = vmul.f32 %v12034_v14, %v4179_v24  ;;  %v5591_v33 = vmul.f32 %v12037_v43, %v4179_v24  ;;  %v5785_v18 = vadd.f32 %v14094_v31, %v5767_v47  ;;  %v4376_v23 = vadd.f32 %v4368_v25, %v11802_v34  ;;  %v14097_v31 = vld [vmem:[#allocation71_spill] sm:$0xff]  ;;  %v14117_v3 = vld [vmem:[#allocation254_spill] sm:$0xff]  ;;  %p7952_p6 = pnand %p7951_p5, %p7945_p4 }
 0x463   : > { %v4579_v6 = vadd.f32 %v4571_v28, %v11903_v12  ;;  %v4783_v51 = vadd.f32 %v4775_v2, %v11912_v11  ;;  %v4987_v48 = vadd.f32 %v4979_v13, %v4969_v5  ;;  %v5191_v8 = vadd.f32 %v5183_v40, %v5173_v32  ;;  %v14098_v34 = vld [vmem:[#allocation307_spill] sm:$0xff]  ;;  %v14099_v11 = vld [vmem:[#allocation110_spill] sm:$0xff]  ;;  %v14102_v32 = vld [vmem:[#allocation317_spill] sm:$0xff] }
 0x464   : > { %v5395_v56 = vadd.f32 %v5387_v52, %v5377_v35  ;;  %v5599_v60 = vadd.f32 %v5591_v33, %v5581_v58  ;;  %v5795_v0 = vmul.f32 %v12050_v1, %v4179_v24  ;;  %v12065_v19 = vadd.f32 %v14095_v50, %v4376_v23  ;;  %v14101_v33 = vld [vmem:[#allocation308_spill] sm:$0xff]  ;;  %v14103_v50 = vld [vmem:[#allocation318_spill] sm:$0xff]  ;;  %v14106_v28 = vld [vmem:[#allocation121_spill] sm:$0xff] }
 0x465   : > { %v12068_v62 = vadd.f32 %v14096_v21, %v4579_v6  ;;  %v12071_v47 = vadd.f32 %v14097_v31, %v4783_v51  ;;  %v12074_v12 = vadd.f32 %v14098_v34, %v4987_v48  ;;  %v12078_v5 = vmul.f32 %v14099_v11, %v14090_v9  ;;  %v14104_v21 = vld [vmem:[#allocation274_spill] sm:$0xff]  ;;  %v14108_v23 = vld [vmem:[#allocation283_spill] sm:$0xff] }
 0x466   : > { %v12081_v52 = vadd.f32 %v14101_v33, %v5191_v8  ;;  %v12084_v35 = vadd.f32 %v14102_v32, %v5395_v56  ;;  %v12087_v24 = vadd.f32 %v14103_v50, %v5599_v60  ;;  %v12091_v58 = vmul.f32 %v14104_v21, %v14090_v9  ;;  %v14107_v56 = vld [vmem:[#allocation169_spill] sm:$0xff]  ;;  %v14109_v34 = vld [vmem:[#allocation170_spill] sm:$0xff]  ;;  %v14110_v33 = vld [vmem:[#allocation284_spill] sm:$0xff] }
 0x467   : > { %14100 = vst [vmem:[#allocation48_spill] sm:$0xff] %v12078_v5  ;;  %v4410_v48 = vmin.f32 %v12065_v19, 0.0  ;;  %v4613_v25 = vmin.f32 %v12068_v62, 0.0  ;;  %v4120_v2 = vmul.f32 %v14106_v28, %v4079_v7  ;;  %v4817_v13 = vmin.f32 %v12071_v47, 0.0  ;;  %v14111_v50 = vld [vmem:[#allocation93_spill] sm:$0xff] }
 0x468   : > { %14105 = vst [vmem:[#allocation137_spill] sm:$0xff] %v12091_v58  ;;  %v5021_v8 = vmin.f32 %v12074_v12, 0.0  ;;  %v5803_v40 = vadd.f32 %v5795_v0, %v5785_v18  ;;  %v4339_v6 = vadd.f32 %v14108_v23, %v14107_v56  ;;  %v5225_v31 = vmin.f32 %v12081_v52, 0.0  ;;  %v14113_v0 = vld [vmem:[#allocation275_spill] sm:$0xff] }
 0x469   : > { %v4419_v60 = vmul.f32 1.442695, %v4410_v48  ;;  %v4622_v51 = vmul.f32 1.442695, %v4613_v25  ;;  %v4542_v32 = vadd.f32 %v14110_v33, %v14109_v34  ;;  %v12105_v58 = vmul.f32 %v14111_v50, %v14090_v9  ;;  %v14115_v23 = vld [vmem:[#allocation319_spill] sm:$0xff] }
 0x46a   : > { %v4826_v7 = vmul.f32 1.442695, %v4817_v13  ;;  %v5030_v5 = vmul.f32 1.442695, %v5021_v8  ;;  %v5429_v29 = vmin.f32 %v12084_v35, 0.0  ;;  %v12110_v18 = vmul.f32 %v14113_v0, %v14090_v9  ;;  %v14116_v8 = vld [vmem:[#allocation253_spill] sm:$0xff] }
 0x46b   : > { %14112 = vst [vmem:[#allocation49_spill] sm:$0xff] %v12105_v58  ;;  %7755 = vpow2.f32 %v4419_v60  ;;  %v5234_v48 = vmul.f32 1.442695, %v5225_v31  ;;  %v5633_v25 = vmin.f32 %v12087_v24, 0.0  ;;  %v12114_v34 = vadd.f32 %v14115_v23, %v5803_v40  ;;  %v14118_v60 = vld [vmem:[#allocation277_spill] sm:$0xff]  ;;  %v14123_v23 = vld [vmem:[#allocation286_spill] sm:$0xff] }
 0x46c   : > { %14114 = vst [vmem:[#allocation138_spill] sm:$0xff] %v12110_v18  ;;  %7757 = vpow2.f32 %v4622_v51  ;;  %v5438_v56 = vmul.f32 1.442695, %v5429_v29  ;;  %v12117_v33 = vadd.f32 %v11748_v4, %v4120_v2  ;;  %v12120_v58 = vadd.f32 %v14116_v8, %v4339_v6  ;;  %v14120_v51 = vld [vmem:[#allocation171_spill] sm:$0xff]  ;;  %v14124_v8 = vld [vmem:[#allocation21_spill] sm:$0xff] }
 0x46d   : > { %7759 = vpow2.f32 %v4826_v7  ;;  %v5642_v13 = vmul.f32 1.442695, %v5633_v25  ;;  %v12123_v0 = vadd.f32 %v14117_v3, %v4542_v32  ;;  %v12127_v31 = vmul.f32 %v14118_v60, %v14090_v9  ;;  %v14121_v7 = vld [vmem:[#allocation285_spill] sm:$0xff]  ;;  %v14122_v25 = vld [vmem:[#allocation172_spill] sm:$0xff] }
 0x46e   : > { %v12130_v29 = vadd.f32 -1.0, %v11817_v27  ;;  %7761 = vpow2.f32 %v5030_v5  ;;  %v5837_v40 = vmin.f32 %v12114_v34, 0.0  ;;  %v4146_v2 = vmin.f32 %v12117_v33, 0.0  ;;  %v14126_v27 = vld [vmem:[#allocation111_spill] sm:$0xff]  ;;  %v14127_v60 = vld [vmem:[#allocation288_spill] sm:$0xff] }
 0x46f   : > { %14119 = vst [vmem:[#allocation50_spill] sm:$0xff] %v12127_v31  ;;  %7763 = vpow2.f32 %v5234_v48  ;;  %v4746_v6 = vadd.f32 %v14121_v7, %v14120_v51  ;;  %v4950_v3 = vadd.f32 %v14123_v23, %v14122_v25  ;;  %v14125_v31 = vld [vmem:[#allocation287_spill] sm:$0xff]  ;;  %v5358_v5 = vadd.f32 %v14127_v60, %v14126_v27  ;;  %v14132_v25 = vld [vmem:[#allocation22_spill] sm:$0xff]  ;;  %v14133_v60 = vld [vmem:[#allocation289_spill] sm:$0xff] }
 0x470   : > { %7765 = vpow2.f32 %v5438_v56  ;;  %v5846_v32 = vmul.f32 1.442695, %v5837_v40  ;;  %v5154_v18 = vadd.f32 %v14125_v31, %v14124_v8  ;;  %v4154_v48 = vmul.f32 1.442695, %v4146_v2  ;;  %v14130_v56 = vld [vmem:[#allocation256_spill] sm:$0xff]  ;;  %v14131_v7 = vld [vmem:[#allocation19_spill] sm:$0xff] }
 0x471   : > { %7767 = vpow2.f32 %v5642_v13  ;;  %v12143_v61 = vadd.f32 %v14128_v36, %v4746_v6  ;;  %v12146_v51 = vadd.f32 %v14129_v30, %v4950_v3  ;;  %vm4402_vm13 = vcmp.gt.f32.partialorder %v12065_v19, 0.0  ;;  %v14134_v36 = vld [vmem:[#allocation112_spill] sm:$0xff]  ;;  %v14135_v30 = vld [vmem:[#allocation290_spill] sm:$0xff]  ;;  %v14137_v3 = vld [vmem:[#allocation291_spill] sm:$0xff] }
 0x472   : > { %7769 = vpow2.f32 %v5846_v32  ;;  %v12150_v40 = vadd.f32 %v14130_v56, %v5154_v18  ;;  %v12153_v31 = vadd.f32 %v14131_v7, %v5358_v5  ;;  %v5562_v23 = vadd.f32 %v14133_v60, %v14132_v25  ;;  %v14136_v6 = vld [vmem:[#allocation298_spill] sm:$0xff]  ;;  %v14138_v32 = vld [vmem:[#allocation257_spill] sm:$0xff]  ;;  %v14139_v27 = vld [vmem:[#allocation23_spill] sm:$0xff] }
 0x473   : > { %vm4605_vm14 = vcmp.gt.f32.partialorder %v12068_v62, 0.0  ;;  %7771 = vpow2.f32 %v4154_v48  ;;  %v5766_v13 = vadd.f32 %v14135_v30, %v14134_v36  ;;  %v4123_v2 = vmul.f32 %v7562_v37, %v14106_v28  ;;  %v14140_v5 = vld [vmem:[#allocation292_spill] sm:$0xff]  ;;  %v14141_v7 = vld [vmem:[#allocation113_spill] sm:$0xff]  ;;  %v14145_v37 = vld [vmem:[#allocation258_spill] sm:$0xff] }
 0x474   : > { %v4342_v18 = vadd.f32 %v14137_v3, %v14136_v6  ;;  %vm4809_vm15 = vcmp.gt.f32.partialorder %v12071_v47, 0.0  ;;  %v12166_v8 = vadd.f32 %v14138_v32, %v5562_v23  ;;  %v4545_v56 = vadd.f32 %v14140_v5, %v14139_v27  ;;  %v14142_v25 = vld [vmem:[#allocation293_spill] sm:$0xff]  ;;  %v14143_v48 = vld [vmem:[#allocation24_spill] sm:$0xff]  ;;  %v14146_v6 = vld [vmem:[#allocation259_spill] sm:$0xff]  ;;  %v4089_v5 = vpop.f32.mrf.mxu0 }
 0x475   : > { %v4749_v60 = vadd.f32 %v14142_v25, %v14141_v7  ;;  %v4953_v54 = vadd.f32 %v14144_v22, %v14143_v48  ;;  %vm5013_vm1 = vcmp.gt.f32.partialorder %v12074_v12, 0.0  ;;  %v12176_v36 = vadd.f32 %v14145_v37, %v5766_v13  ;;  %v14147_v3 = vld [vmem:[#allocation114_spill] sm:$0xff]  ;;  %v14148_v32 = vld [vmem:[#allocation101_spill] sm:$0xff]  ;;  %v14149_v7 = vld [vmem:[#allocation260_spill] sm:$0xff] }
 0x476   : > { %v12179_v30 = vadd.f32 %v11748_v4, %v4123_v2  ;;  %v12182_v23 = vadd.f32 %v14146_v6, %v4342_v18  ;;  %v5157_v27 = vadd.f32 %v14148_v32, %v14147_v3  ;;  %v12191_v22 = vadd.f32 %v14149_v7, %v4545_v56  ;;  %v14150_v25 = vld [vmem:[#allocation261_spill] sm:$0xff]  ;;  %v14151_v13 = vld [vmem:[#allocation262_spill] sm:$0xff]  ;;  %v14154_v6 = vld [vmem:[#allocation116_spill] sm:$0xff] }
 0x477   : > { %v12194_v48 = vadd.f32 %v14150_v25, %v4749_v60  ;;  %v12197_v37 = vadd.f32 %v14151_v13, %v4953_v54  ;;  %v14152_v2 = vld [vmem:[#allocation25_spill] sm:$0xff]  ;;  %vm3903_vm2 = vcmp.gt.f32.partialorder %v14154_v6, 0.0  ;;  %vm5217_vm3 = vcmp.gt.f32.partialorder %v12081_v52, 0.0  ;;  %v14155_v32 = vld [vmem:[#allocation271_spill] sm:$0xff]  ;;  %v14157_v7 = vld [vmem:[#allocation322_spill] sm:$0xff] }
 0x478   : > { %v5361_v18 = vadd.f32 %v14153_v15, %v14152_v2  ;;  %v4149_v3 = vmin.f32 %v12179_v30, 0.0  ;;  %v12205_v53 = vadd.f32 %v14155_v32, %v5157_v27  ;;  %v14156_v56 = vld [vmem:[#allocation115_spill] sm:$0xff]  ;;  %v7756_v60 = vpop.eup %7755  ;;  %v14158_v25 = vld [vmem:[#allocation272_spill] sm:$0xff]  ;;  %v14159_v54 = vld [vmem:[#allocation26_spill] sm:$0xff]  ;;  %v4122_v15 = vmul.f32 %v14106_v28, %v4089_v5 }
 0x479   : > { %v5565_v57 = vadd.f32 %v14157_v7, %v14156_v56  ;;  %v14160_v13 = vld [vmem:[#allocation333_spill] sm:$0xff]  ;;  %v14161_v2 = vld [vmem:[#allocation164_spill] sm:$0xff]  ;;  %v7758_v10 = vpop.eup %7757  ;;  %v6490_v63 = vadd.f32 -1.0, %v7756_v60  ;;  %vm5421_vm4 = vcmp.gt.f32.partialorder %v12084_v35, 0.0  ;;  %v14164_v7 = vld [vmem:[#allocation78_spill] sm:$0xff]  ;;  %vm5625_vm5 = vcmp.gt.f32.partialorder %v12087_v24, 0.0 }
 0x47a   : > { %v12210_v20 = vadd.f32 %v14158_v25, %v5361_v18  ;;  %v5769_v17 = vadd.f32 %v14160_v13, %v14159_v54  ;;  %v4341_v55 = vadd.f32 %v14161_v2, %v11773_v42  ;;  %v14162_v27 = vld [vmem:[#allocation273_spill] sm:$0xff]  ;;  %v14163_v56 = vld [vmem:[#allocation32_spill] sm:$0xff]  ;;  %v7760_v25 = vpop.eup %7759  ;;  %v6507_v46 = vadd.f32 -1.0, %v7758_v10 }
 0x47b   : > { %v12219_v32 = vadd.f32 %v14162_v27, %v5565_v57  ;;  %v4544_v18 = vadd.f32 %v14164_v7, %v14163_v56  ;;  %v12227_v5 = vadd.f32 %v11748_v4, %v4122_v15  ;;  %v14166_v42 = vld [vmem:[#allocation221_spill] sm:$0xff]  ;;  %v7762_v60 = vpop.eup %7761  ;;  %v4442_v57 = vsel %vm4402_vm13, %v12065_v19, %v6490_v63  ;;  %v14167_v27 = vld [vmem:[#allocation222_spill] sm:$0xff] }
 0x47c   : > { %v12224_v54 = vadd.f32 %v14165_v49, %v5769_v17  ;;  %v12230_v13 = vadd.f32 %v14166_v42, %v4341_v55  ;;  %v6532_v2 = vadd.f32 -1.0, %v7760_v25  ;;  %v7764_v10 = vpop.eup %7763  ;;  %4450 = vst.msk [vmem:[%s12240_s23 + $0x8] sm:$0xff] %vm515_vm0, %v4442_v57  ;;  %v4645_v49 = vsel %vm4605_vm14, %v12068_v62, %v6507_v46  ;;  %v14168_v7 = vld [vmem:[#allocation122_spill] sm:$0xff]  ;;  %v14170_v42 = vld [vmem:[#allocation13_spill] sm:$0xff] }
 0x47d   : > { %v12237_v56 = vadd.f32 %v14167_v27, %v4544_v18  ;;  %v6557_v55 = vadd.f32 -1.0, %v7762_v60  ;;  %vm5829_vm6 = vcmp.gt.f32.partialorder %v12114_v34, 0.0  ;;  %v4160_v63 = vmul.f32 1.442695, %v4149_v3  ;;  %v7766_v17 = vpop.eup %7765  ;;  %6515 = vst.msk [vmem:[%s12240_s23 + $0x48] sm:$0xff] %vm515_vm0, %v4645_v49  ;;  %v14169_v18 = vld [vmem:[#allocation82_spill] sm:$0xff] }
 0x47e   : > { %v4849_v19 = vsel %vm4809_vm15, %v12071_v47, %v6532_v2  ;;  %v6582_v15 = vadd.f32 -1.0, %v7764_v10  ;;  %v4748_v25 = vadd.f32 %v14169_v18, %v14168_v7  ;;  %v14171_v57 = vld [vmem:[#allocation85_spill] sm:$0xff]  ;;  %v7768_v62 = vpop.eup %7767  ;;  %v6607_v60 = vadd.f32 -1.0, %v7766_v17  ;;  %v14172_v47 = vld [vmem:[#allocation214_spill] sm:$0xff]  ;;  %v14173_v2 = vld [vmem:[#allocation87_spill] sm:$0xff] }
 0x47f   : > { %v4952_v46 = vadd.f32 %v14171_v57, %v14170_v42  ;;  %6540 = vst.msk [vmem:[%s12240_s23 + $0x88] sm:$0xff] %vm515_vm0, %v4849_v19  ;;  %v5053_v3 = vsel %vm5013_vm1, %v12074_v12, %v6557_v55  ;;  %v4148_v27 = vmin.f32 %v12227_v5, 0.0  ;;  %v5156_v10 = vadd.f32 %v14173_v2, %v14172_v47  ;;  %v7770_v49 = vpop.eup %7769  ;;  %v14174_v19 = vld [vmem:[#allocation223_spill] sm:$0xff]  ;;  %v14176_v47 = vld [vmem:[#allocation96_spill] sm:$0xff] }
 0x480   : > { %6565 = vst.msk [vmem:[%s12240_s23 + $0xc8] sm:$0xff] %vm515_vm0, %v5053_v3  ;;  %v5257_v7 = vsel %vm5217_vm3, %v12081_v52, %v6582_v15  ;;  %v6632_v18 = vadd.f32 -1.0, %v7768_v62  ;;  %v12271_v42 = vadd.f32 %v14174_v19, %v4748_v25  ;;  %v14175_v12 = vld [vmem:[#allocation95_spill] sm:$0xff]  ;;  %v7772_v17 = vpop.eup %7771  ;;  %v5461_v57 = vsel %vm5421_vm4, %v12084_v35, %v6607_v60  ;;  %v14180_v19 = vld [vmem:[#allocation70_spill] sm:$0xff] }
 0x481   : > { %v12274_v55 = vadd.f32 %v14175_v12, %v4952_v46  ;;  %6590 = vst.msk [vmem:[%s12240_s23 + $0x108] sm:$0xff] %vm515_vm0, %v5257_v7  ;;  %v6657_v3 = vadd.f32 -1.0, %v7770_v49  ;;  %7773 = vpow2.f32 %v4160_v63  ;;  %v12282_v52 = vadd.f32 %v14176_v47, %v5156_v10  ;;  %6615 = vst.msk [vmem:[%s12240_s23 + $0x148] sm:$0xff] %vm515_vm0, %v5461_v57  ;;  %v14177_v46 = vld [vmem:[#allocation215_spill] sm:$0xff]  ;;  %v14179_v7 = vld [vmem:[#allocation216_spill] sm:$0xff] }
 0x482   : > { %v5665_v15 = vsel %vm5625_vm5, %v12087_v24, %v6632_v18  ;;  %v6464_v25 = vadd.f32 -1.0, %v7772_v17  ;;  %v14178_v62 = vld [vmem:[#allocation91_spill] sm:$0xff]  ;;  %v5564_v12 = vadd.f32 %v14180_v19, %v14179_v7  ;;  %v14181_v35 = vld [vmem:[#allocation278_spill] sm:$0xff]  ;;  %v12301_v63 = vsel %vm3903_vm2, %v14154_v6, %v12130_v29  ;;  %v14183_v49 = vld [vmem:[#allocation97_spill] sm:$0xff] }
 0x483   : > { %v5360_v2 = vadd.f32 %v14178_v62, %v14177_v46  ;;  %v12295_v60 = vmul.f32 %v14181_v35, %v14090_v9  ;;  %6640 = vst.msk [vmem:[%s12240_s23 + $0x188] sm:$0xff] %vm515_vm0, %v5665_v15  ;;  %v5869_v24 = vsel %vm5829_vm6, %v12114_v34, %v6657_v3  ;;  %vm4138_vm7 = vcmp.gt.f32.partialorder %v12117_v33, 0.0  ;;  %v14184_v17 = vld [vmem:[#allocation98_spill] sm:$0xff] }
 0x484   : > { %6665 = vst.msk [vmem:[%s12240_s23 + $0x1c8] sm:$0xff] %vm515_vm0, %v5869_v24  ;;  %v4178_v10 = vsel %vm4138_vm7, %v12117_v33, %v6464_v25  ;;  %v4158_v9 = vmul.f32 1.442695, %v4148_v27  ;;  %v12316_v57 = vadd.f32 %v14184_v17, %v5564_v12  ;;  %vm4141_vm8 = vcmp.gt.f32.partialorder %v12179_v30, 0.0 }
 0x485   : > { %14182 = vst [vmem:[#allocation139_spill] sm:$0xff] %v12295_v60  ;;  %v12313_v18 = vadd.f32 %v14183_v49, %v5360_v2  ;;  %v4367_v29 = vmul.f32 %v11906_v39, %v4178_v10  ;;  %v4570_v6 = vmul.f32 %v11909_v16, %v4178_v10  ;;  %v4774_v47 = vmul.f32 %v12018_v59, %v4178_v10  ;;  %v14185_v49 = vld [vmem:[#allocation321_spill] sm:$0xff] }
 0x486   : > { %v4978_v34 = vmul.f32 %v12025_v44, %v4178_v10  ;;  %v5182_v3 = vmul.f32 %v12028_v26, %v4178_v10  ;;  %v5386_v15 = vmul.f32 %v12034_v14, %v4178_v10  ;;  %v5590_v33 = vmul.f32 %v12037_v43, %v4178_v10 }
 0x487   : > { %v5794_v27 = vmul.f32 %v12050_v1, %v4178_v10  ;;  %v4375_v25 = vadd.f32 %v4367_v29, %v12120_v58  ;;  %v4578_v46 = vadd.f32 %v4570_v6, %v12123_v0  ;;  %v4782_v62 = vadd.f32 %v4774_v47, %v12143_v61  ;;  %v14186_v10 = vld [vmem:[#allocation323_spill] sm:$0xff]  ;;  %v14187_v58 = vld [vmem:[#allocation324_spill] sm:$0xff]  ;;  %v14188_v61 = vld [vmem:[#allocation325_spill] sm:$0xff] }
 0x488   : > { %v4986_v2 = vadd.f32 %v4978_v34, %v12146_v51  ;;  %v5190_v7 = vadd.f32 %v5182_v3, %v12150_v40  ;;  %v5394_v19 = vadd.f32 %v5386_v15, %v12153_v31  ;;  %v5598_v12 = vadd.f32 %v5590_v33, %v12166_v8  ;;  %v14189_v51 = vld [vmem:[#allocation326_spill] sm:$0xff]  ;;  %v14190_v31 = vld [vmem:[#allocation327_spill] sm:$0xff]  ;;  %v14191_v8 = vld [vmem:[#allocation328_spill] sm:$0xff] }
 0x489   : > { %v5802_v24 = vadd.f32 %v5794_v27, %v12176_v36  ;;  %v12335_v17 = vadd.f32 %v14185_v49, %v4375_v25  ;;  %v12338_v60 = vadd.f32 %v14186_v10, %v4578_v46  ;;  %v12341_v0 = vadd.f32 %v14187_v58, %v4782_v62  ;;  %v14192_v47 = vld [vmem:[#allocation329_spill] sm:$0xff]  ;;  %v14193_v3 = vld [vmem:[#allocation108_spill] sm:$0xff] }
 0x48a   : > { %v12344_v29 = vadd.f32 %v14188_v61, %v4986_v2  ;;  %v12347_v40 = vadd.f32 %v14189_v51, %v5190_v7  ;;  %v12350_v6 = vadd.f32 %v14190_v31, %v5394_v19  ;;  %v12353_v36 = vadd.f32 %v14191_v8, %v5598_v12  ;;  %v14194_v58 = vld [vmem:[#allocation217_spill] sm:$0xff]  ;;  %v7565_v8 = vpop.f32.mrf.mxu0 }
 0x48b   : > { %v12356_v34 = vadd.f32 %v14192_v47, %v5802_v24  ;;  %v12360_v15 = vmul.f32 %v14193_v3, %v12301_v63  ;;  %v4409_v33 = vmin.f32 %v12335_v17, 0.0  ;;  %v4612_v27 = vmin.f32 %v12338_v60, 0.0 }
 0x48c   : > { %7775 = vpow2.f32 %v4158_v9  ;;  %v12366_v25 = vmul.f32 %v14091_v41, %v12301_v63  ;;  %v12370_v46 = vmul.f32 %v14099_v11, %v12301_v63  ;;  %v4816_v62 = vmin.f32 %v12341_v0, 0.0  ;;  %v14195_v11 = vld [vmem:[#allocation75_spill] sm:$0xff] }
 0x48d   : > { %v5020_v2 = vmin.f32 %v12344_v29, 0.0  ;;  %v12376_v7 = vmul.f32 %v14104_v21, %v12301_v63  ;;  %v4417_v19 = vmul.f32 1.442695, %v4409_v33  ;;  %v4620_v12 = vmul.f32 1.442695, %v4612_v27  ;;  %v14196_v21 = vld [vmem:[#allocation336_spill] sm:$0xff] }
 0x48e   : > { %v5224_v9 = vmin.f32 %v12347_v40, 0.0  ;;  %v7774_v24 = vpop.eup %7773  ;;  %v4824_v49 = vmul.f32 1.442695, %v4816_v62  ;;  %v5428_v10 = vmin.f32 %v12350_v6, 0.0  ;;  %v5768_v61 = vadd.f32 %v14195_v11, %v14194_v58  ;;  %v14199_v11 = vld [vmem:[#allocation224_spill] sm:$0xff] }
 0x48f   : > { %v5028_v41 = vmul.f32 1.442695, %v5020_v2  ;;  %7777 = vpow2.f32 %v4417_v19  ;;  %v5632_v31 = vmin.f32 %v12353_v36, 0.0  ;;  %v4344_v47 = vadd.f32 %v14196_v21, %v11832_v38 }
 0x490   : > { %v5232_v51 = vmul.f32 1.442695, %v5224_v9  ;;  %v12387_v3 = vmul.f32 %v14111_v50, %v12301_v63  ;;  %7779 = vpow2.f32 %v4620_v12  ;;  %v5436_v33 = vmul.f32 1.442695, %v5428_v10  ;;  %v14198_v9 = vld [vmem:[#allocation99_spill] sm:$0xff] }
 0x491   : > { %v5836_v27 = vmin.f32 %v12356_v34, 0.0  ;;  %7781 = vpow2.f32 %v4824_v49  ;;  %v5640_v62 = vmul.f32 1.442695, %v5632_v31  ;;  %v6467_v2 = vadd.f32 -1.0, %v7774_v24  ;;  %v14200_v10 = vld [vmem:[#allocation79_spill] sm:$0xff] }
 0x492   : > { %14197 = vst [vmem:[#allocation51_spill] sm:$0xff] %v12387_v3  ;;  %7783 = vpow2.f32 %v5028_v41  ;;  %v12392_v58 = vadd.f32 %v14198_v9, %v5768_v61  ;;  %v4125_v38 = vmul.f32 %v7565_v8, %v14106_v28  ;;  %v12397_v12 = vadd.f32 %v14199_v11, %v4344_v47  ;;  %v14201_v9 = vld [vmem:[#allocation330_spill] sm:$0xff] }
 0x493   : > { %v5844_v19 = vmul.f32 1.442695, %v5836_v27  ;;  %7785 = vpow2.f32 %v5232_v51  ;;  %v4181_v50 = vsel %vm4141_vm8, %v12179_v30, %v6467_v2  ;;  %v12401_v49 = vadd.f32 %v14200_v10, %v11835_v45  ;;  %v14207_v3 = vld [vmem:[#allocation338_spill] sm:$0xff] }
 0x494   : > { %7787 = vpow2.f32 %v5436_v33  ;;  %v4370_v24 = vmul.f32 %v11906_v39, %v4181_v50  ;;  %v4573_v41 = vmul.f32 %v11909_v16, %v4181_v50  ;;  %v4777_v61 = vmul.f32 %v12018_v59, %v4181_v50 }
 0x495   : > { %7789 = vpow2.f32 %v5640_v62  ;;  %v4981_v31 = vmul.f32 %v12025_v44, %v4181_v50  ;;  %v5185_v51 = vmul.f32 %v12028_v26, %v4181_v50  ;;  %v5389_v30 = vmul.f32 %v12034_v14, %v4181_v50 }
 0x496   : > { %vm4401_vm9 = vcmp.gt.f32.partialorder %v12335_v17, 0.0  ;;  %7791 = vpow2.f32 %v5844_v19  ;;  %v4378_v45 = vadd.f32 %v4370_v24, %v12182_v23  ;;  %v4581_v8 = vadd.f32 %v4573_v41, %v12191_v22  ;;  %v14202_v19 = vld [vmem:[#allocation331_spill] sm:$0xff]  ;;  %v14203_v22 = vld [vmem:[#allocation332_spill] sm:$0xff]  ;;  %v14206_v24 = vld [vmem:[#allocation337_spill] sm:$0xff] }
 0x497   : > { %v4785_v21 = vadd.f32 %v4777_v61, %v12194_v48  ;;  %v4989_v47 = vadd.f32 %v4981_v31, %v12197_v37  ;;  %v5193_v33 = vadd.f32 %v5185_v51, %v12205_v53  ;;  %v5397_v27 = vadd.f32 %v5389_v30, %v12210_v20  ;;  %v14204_v53 = vld [vmem:[#allocation334_spill] sm:$0xff]  ;;  %v14205_v48 = vld [vmem:[#allocation335_spill] sm:$0xff] }
 0x498   : > { %v5593_v62 = vmul.f32 %v12037_v43, %v4181_v50  ;;  %vm4604_vm10 = vcmp.gt.f32.partialorder %v12338_v60, 0.0  ;;  %v12419_v11 = vadd.f32 %v14201_v9, %v4378_v45  ;;  %v12422_v23 = vadd.f32 %v14202_v19, %v4581_v8 }
 0x499   : > { %v7776_v2 = vpop.eup %7775  ;;  %v12425_v10 = vadd.f32 %v14203_v22, %v4785_v21  ;;  %vm4140_vm11 = vcmp.gt.f32.partialorder %v12227_v5, 0.0  ;;  %vm4808_vm12 = vcmp.gt.f32.partialorder %v12341_v0, 0.0  ;;  %v12430_v20 = vadd.f32 %v14204_v53, %v4989_v47 }
 0x49a   : > { %v12433_v37 = vadd.f32 %v14205_v48, %v5193_v33  ;;  %v12436_v41 = vadd.f32 %v14206_v24, %v5397_v27  ;;  %vm5012_vm13 = vcmp.gt.f32.partialorder %v12344_v29, 0.0  ;;  %vm5216_vm14 = vcmp.gt.f32.partialorder %v12347_v40, 0.0 }
 0x49b   : > { %v4412_v61 = vmin.f32 %v12419_v11, 0.0  ;;  %v4615_v31 = vmin.f32 %v12422_v23, 0.0  ;;  %vm5420_vm15 = vcmp.gt.f32.partialorder %v12350_v6, 0.0  ;;  %v4819_v51 = vmin.f32 %v12425_v10, 0.0 }
 0x49c   : > { %v5023_v30 = vmin.f32 %v12430_v20, 0.0  ;;  %v5601_v45 = vadd.f32 %v5593_v62, %v12219_v32  ;;  %v6466_v8 = vadd.f32 -1.0, %v7776_v2  ;;  %v7778_v21 = vpop.eup %7777  ;;  %vm5624_vm1 = vcmp.gt.f32.partialorder %v12353_v36, 0.0 }
 0x49d   : > { %v4423_v47 = vmul.f32 1.442695, %v4412_v61  ;;  %v4626_v33 = vmul.f32 1.442695, %v4615_v31  ;;  %v5227_v27 = vmin.f32 %v12433_v37, 0.0  ;;  %v12449_v9 = vadd.f32 %v11748_v4, %v4125_v38  ;;  %v7780_v19 = vpop.eup %7779 }
 0x49e   : > { %v6489_v22 = vadd.f32 -1.0, %v7778_v21  ;;  %vm5828_vm2 = vcmp.gt.f32.partialorder %v12356_v34, 0.0  ;;  %v4830_v53 = vmul.f32 1.442695, %v4819_v51  ;;  %v5034_v48 = vmul.f32 1.442695, %v5023_v30  ;;  %v7782_v62 = vpop.eup %7781 }
 0x49f   : > { %v5797_v32 = vmul.f32 %v12050_v1, %v4181_v50  ;;  %v6506_v2 = vadd.f32 -1.0, %v7780_v19  ;;  %7793 = vpow2.f32 %v4423_v47  ;;  %v5238_v24 = vmul.f32 1.442695, %v5227_v27  ;;  %v7784_v31 = vpop.eup %7783 }
 0x4a0   : > { %v5431_v61 = vmin.f32 %v12436_v41, 0.0  ;;  %v4441_v38 = vsel %vm4401_vm9, %v12335_v17, %v6489_v22  ;;  %v6531_v21 = vadd.f32 -1.0, %v7782_v62  ;;  %7795 = vpow2.f32 %v4626_v33  ;;  %v7786_v30 = vpop.eup %7785 }
 0x4a1   : > { %v12458_v51 = vadd.f32 %v14207_v3, %v5601_v45  ;;  %4449 = vst.msk [vmem:[%s12240_s23] sm:$0xff] %vm515_vm0, %v4441_v38  ;;  %v4644_v50 = vsel %vm4604_vm10, %v12338_v60, %v6506_v2  ;;  %v6556_v47 = vadd.f32 -1.0, %v7784_v31  ;;  %7797 = vpow2.f32 %v4830_v53  ;;  %v7788_v19 = vpop.eup %7787 }
 0x4a2   : > { %v5442_v27 = vmul.f32 1.442695, %v5431_v61  ;;  %6514 = vst.msk [vmem:[%s12240_s23 + $0x40] sm:$0xff] %vm515_vm0, %v4644_v50  ;;  %v4848_v17 = vsel %vm4808_vm12, %v12341_v0, %v6531_v21  ;;  %v6581_v3 = vadd.f32 -1.0, %v7786_v30  ;;  %7799 = vpow2.f32 %v5034_v48  ;;  %v7790_v60 = vpop.eup %7789 }
 0x4a3   : > { %v12473_v45 = vsel %vm4140_vm11, %v12227_v5, %v6466_v8  ;;  %6539 = vst.msk [vmem:[%s12240_s23 + $0x80] sm:$0xff] %vm515_vm0, %v4848_v17  ;;  %v5052_v33 = vsel %vm5012_vm13, %v12344_v29, %v6556_v47  ;;  %v6606_v22 = vadd.f32 -1.0, %v7788_v19  ;;  %7801 = vpow2.f32 %v5238_v24  ;;  %v7792_v53 = vpop.eup %7791  ;;  %v14209_v47 = vld [vmem:[#allocation295_spill] sm:$0xff]  ;;  %v14210_v17 = vld [vmem:[#allocation102_spill] sm:$0xff] }
 0x4a4   : > { %v5635_v0 = vmin.f32 %v12458_v51, 0.0  ;;  %6564 = vst.msk [vmem:[%s12240_s23 + $0xc0] sm:$0xff] %vm515_vm0, %v5052_v33  ;;  %v5256_v5 = vsel %vm5216_vm14, %v12347_v40, %v6581_v3  ;;  %v6631_v8 = vadd.f32 -1.0, %v7790_v60  ;;  %7803 = vpow2.f32 %v5442_v27  ;;  %v14211_v60 = vld [vmem:[#allocation103_spill] sm:$0xff]  ;;  %v14212_v33 = vld [vmem:[#allocation104_spill] sm:$0xff] }
 0x4a5   : > { %v5805_v48 = vadd.f32 %v5797_v32, %v12224_v54  ;;  %6589 = vst.msk [vmem:[%s12240_s23 + $0x100] sm:$0xff] %vm515_vm0, %v5256_v5  ;;  %v5460_v29 = vsel %vm5420_vm15, %v12350_v6, %v6606_v22  ;;  %v6656_v62 = vadd.f32 -1.0, %v7792_v53  ;;  %v4369_v24 = vmul.f32 %v11906_v39, %v12473_v45  ;;  %v14208_v54 = vld [vmem:[#allocation339_spill] sm:$0xff] }
 0x4a6   : > { %v5646_v2 = vmul.f32 1.442695, %v5635_v0  ;;  %6614 = vst.msk [vmem:[%s12240_s23 + $0x140] sm:$0xff] %vm515_vm0, %v5460_v29  ;;  %v5664_v40 = vsel %vm5624_vm1, %v12353_v36, %v6631_v8  ;;  %vm4404_vm3 = vcmp.gt.f32.partialorder %v12419_v11, 0.0  ;;  %v4572_v61 = vmul.f32 %v11909_v16, %v12473_v45 }
 0x4a7   : > { %v12501_v32 = vadd.f32 %v14208_v54, %v5805_v48  ;;  %v4776_v6 = vmul.f32 %v12018_v59, %v12473_v45  ;;  %6639 = vst.msk [vmem:[%s12240_s23 + $0x180] sm:$0xff] %vm515_vm0, %v5664_v40  ;;  %v5868_v31 = vsel %vm5828_vm2, %v12356_v34, %v6656_v62  ;;  %v4377_v36 = vadd.f32 %v4369_v24, %v12230_v13 }
 0x4a8   : > { %7805 = vpow2.f32 %v5646_v2  ;;  %v4980_v38 = vmul.f32 %v12025_v44, %v12473_v45  ;;  %6664 = vst.msk [vmem:[%s12240_s23 + $0x1c0] sm:$0xff] %vm515_vm0, %v5868_v31  ;;  %vm4607_vm4 = vcmp.gt.f32.partialorder %v12422_v23, 0.0  ;;  %v4580_v30 = vadd.f32 %v4572_v61, %v12237_v56  ;;  %v14213_v61 = vld [vmem:[#allocation105_spill] sm:$0xff] }
 0x4a9   : > { %v5839_v21 = vmin.f32 %v12501_v32, 0.0  ;;  %v4784_v50 = vadd.f32 %v4776_v6, %v12271_v42  ;;  %vm4811_vm5 = vcmp.gt.f32.partialorder %v12425_v10, 0.0  ;;  %v12523_v34 = vadd.f32 %v14209_v47, %v4377_v36 }
 0x4aa   : > { %v4988_v13 = vadd.f32 %v4980_v38, %v12274_v55  ;;  %v5184_v27 = vmul.f32 %v12028_v26, %v12473_v45  ;;  %vm5015_vm6 = vcmp.gt.f32.partialorder %v12430_v20, 0.0  ;;  %v12530_v3 = vadd.f32 %v14210_v17, %v4580_v30 }
 0x4ab   : > { %v5850_v19 = vmul.f32 1.442695, %v5839_v21  ;;  %v12533_v56 = vadd.f32 %v14211_v60, %v4784_v50  ;;  %vm5219_vm7 = vcmp.gt.f32.partialorder %v12433_v37, 0.0  ;;  %v4411_v42 = vmin.f32 %v12523_v34, 0.0 }
 0x4ac   : > { %v12538_v22 = vadd.f32 %v14212_v33, %v4988_v13  ;;  %v5192_v55 = vadd.f32 %v5184_v27, %v12282_v52  ;;  %v7794_v0 = vpop.eup %7793  ;;  %vm5423_vm8 = vcmp.gt.f32.partialorder %v12436_v41, 0.0  ;;  %v4614_v53 = vmin.f32 %v12530_v3, 0.0 }
 0x4ad   : > { %7807 = vpow2.f32 %v5850_v19  ;;  %v5388_v5 = vmul.f32 %v12034_v14, %v12473_v45  ;;  %v7796_v8 = vpop.eup %7795  ;;  %v6492_v48 = vadd.f32 -1.0, %v7794_v0  ;;  %v4421_v29 = vmul.f32 1.442695, %v4411_v42 }
 0x4ae   : > { %v4818_v62 = vmin.f32 %v12533_v56, 0.0  ;;  %v5592_v2 = vmul.f32 %v12037_v43, %v12473_v45  ;;  %v7798_v24 = vpop.eup %7797  ;;  %v6509_v52 = vadd.f32 -1.0, %v7796_v8  ;;  %v4624_v40 = vmul.f32 1.442695, %v4614_v53 }
 0x4af   : > { %v5022_v54 = vmin.f32 %v12538_v22, 0.0  ;;  %v12550_v6 = vadd.f32 %v14213_v61, %v5192_v55  ;;  %v7800_v31 = vpop.eup %7799  ;;  %v4444_v36 = vsel %vm4404_vm3, %v12419_v11, %v6492_v48  ;;  %v6534_v38 = vadd.f32 -1.0, %v7798_v24  ;;  %v14218_v24 = vld [vmem:[#allocation63_spill] sm:$0xff]  ;;  %v14219_v61 = vld [vmem:[#allocation296_spill] sm:$0xff] }
 0x4b0   : > { %7809 = vpow2.f32 %v4421_v29  ;;  %v4828_v21 = vmul.f32 1.442695, %v4818_v62  ;;  %v7802_v30 = vpop.eup %7801  ;;  %4452 = vst.msk [vmem:[%s12240_s23 + $0x18] sm:$0xff] %vm515_vm0, %v4444_v36  ;;  %v4647_v50 = vsel %vm4607_vm4, %v12422_v23, %v6509_v52  ;;  %v6559_v47 = vadd.f32 -1.0, %v7800_v31  ;;  %v14220_v31 = vld [vmem:[#allocation226_spill] sm:$0xff] }
 0x4b1   : > { %7811 = vpow2.f32 %v4624_v40  ;;  %v5032_v13 = vmul.f32 1.442695, %v5022_v54  ;;  %v7804_v27 = vpop.eup %7803  ;;  %6517 = vst.msk [vmem:[%s12240_s23 + $0x58] sm:$0xff] %vm515_vm0, %v4647_v50  ;;  %v4851_v11 = vsel %vm4811_vm5, %v12425_v10, %v6534_v38  ;;  %v6584_v19 = vadd.f32 -1.0, %v7802_v30  ;;  %v14222_v30 = vld [vmem:[#allocation80_spill] sm:$0xff] }
 0x4b2   : > { %vm5627_vm9 = vcmp.gt.f32.partialorder %v12458_v51, 0.0  ;;  %7813 = vpow2.f32 %v4828_v21  ;;  %6542 = vst.msk [vmem:[%s12240_s23 + $0x98] sm:$0xff] %vm515_vm0, %v4851_v11  ;;  %v5055_v23 = vsel %vm5015_vm6, %v12430_v20, %v6559_v47  ;;  %v6609_v17 = vadd.f32 -1.0, %v7804_v27  ;;  %v14223_v47 = vld [vmem:[#allocation220_spill] sm:$0xff]  ;;  %v14225_v11 = vld [vmem:[#allocation33_spill] sm:$0xff] }
 0x4b3   : > { %7815 = vpow2.f32 %v5032_v13  ;;  %v5226_v60 = vmin.f32 %v12550_v6, 0.0  ;;  %6567 = vst.msk [vmem:[%s12240_s23 + $0xd8] sm:$0xff] %vm515_vm0, %v5055_v23  ;;  %v5259_v10 = vsel %vm5219_vm7, %v12433_v37, %v6584_v19  ;;  %v5396_v42 = vadd.f32 %v5388_v5, %v12313_v18  ;;  %v14224_v13 = vld [vmem:[#allocation62_spill] sm:$0xff]  ;;  %v14226_v19 = vld [vmem:[#allocation76_spill] sm:$0xff] }
 0x4b4   : > { %v5600_v33 = vadd.f32 %v5592_v2, %v12316_v57  ;;  %v5796_v55 = vmul.f32 %v12050_v1, %v12473_v45  ;;  %6592 = vst.msk [vmem:[%s12240_s23 + $0x118] sm:$0xff] %vm515_vm0, %v5259_v10  ;;  %v5463_v20 = vsel %vm5423_vm8, %v12436_v41, %v6609_v17  ;;  %vm5831_vm10 = vcmp.gt.f32.partialorder %v12501_v32, 0.0  ;;  %v14214_v57 = vld [vmem:[#allocation106_spill] sm:$0xff]  ;;  %v14215_v45 = vld [vmem:[#allocation107_spill] sm:$0xff]  ;;  %v14216_v41 = vld [vmem:[#allocation225_spill] sm:$0xff] }
 0x4b5   : > { %v7806_v0 = vpop.eup %7805  ;;  %v5236_v53 = vmul.f32 1.442695, %v5226_v60  ;;  %v4151_v37 = vmin.f32 %v12449_v9, 0.0  ;;  %6617 = vst.msk [vmem:[%s12240_s23 + $0x158] sm:$0xff] %vm515_vm0, %v5463_v20  ;;  %v12591_v5 = vadd.f32 %v14214_v57, %v5396_v42  ;;  %v12599_v62 = vadd.f32 %v14216_v41, %v12401_v49  ;;  %v14217_v2 = vld [vmem:[#allocation218_spill] sm:$0xff]  ;;  %v4099_v42 = vpop.f32.mrf.mxu0 }
 0x4b6   : > { %v6634_v18 = vadd.f32 -1.0, %v7806_v0  ;;  %v12594_v8 = vadd.f32 %v14215_v45, %v5600_v33  ;;  %v5804_v48 = vadd.f32 %v5796_v55, %v12392_v58  ;;  %v4751_v52 = vadd.f32 %v14218_v24, %v14217_v2  ;;  %v14227_v33 = vld [vmem:[#allocation227_spill] sm:$0xff]  ;;  %v14228_v0 = vld [vmem:[#allocation228_spill] sm:$0xff] }
 0x4b7   : > { %7817 = vpow2.f32 %v5236_v53  ;;  %v4164_v29 = vmul.f32 1.442695, %v4151_v37  ;;  %vm4403_vm11 = vcmp.gt.f32.partialorder %v12523_v34, 0.0  ;;  %vm4606_vm12 = vcmp.gt.f32.partialorder %v12530_v3, 0.0  ;;  %v14229_v53 = vld [vmem:[#allocation229_spill] sm:$0xff] }
 0x4b8   : > { %v5667_v40 = vsel %vm5627_vm9, %v12458_v51, %v6634_v18  ;;  %v5430_v54 = vmin.f32 %v12591_v5, 0.0  ;;  %v5634_v58 = vmin.f32 %v12594_v8, 0.0  ;;  %v12613_v49 = vadd.f32 %v14219_v61, %v5804_v48  ;;  %v14221_v51 = vld [vmem:[#allocation219_spill] sm:$0xff]  ;;  %v14234_v61 = vld [vmem:[#allocation124_spill] sm:$0xff] }
 0x4b9   : > { %6642 = vst.msk [vmem:[%s12240_s23 + $0x198] sm:$0xff] %vm515_vm0, %v5667_v40  ;;  %7819 = vpow2.f32 %v4164_v29  ;;  %v12616_v36 = vadd.f32 %v14220_v31, %v4751_v52  ;;  %v4955_v50 = vadd.f32 %v14222_v30, %v14221_v51  ;;  %v5159_v27 = vadd.f32 %v14224_v13, %v14223_v47  ;;  %v14230_v48 = vld [vmem:[#allocation123_spill] sm:$0xff]  ;;  %v14231_v29 = vld [vmem:[#allocation206_spill] sm:$0xff]  ;;  %v14235_v31 = vld [vmem:[#allocation209_spill] sm:$0xff] }
 0x4ba   : > { %v7808_v38 = vpop.eup %7807  ;;  %v5440_v21 = vmul.f32 1.442695, %v5430_v54  ;;  %v5363_v23 = vadd.f32 %v14226_v19, %v14225_v11  ;;  %vm4810_vm13 = vcmp.gt.f32.partialorder %v12533_v56, 0.0  ;;  %v5644_v60 = vmul.f32 1.442695, %v5634_v58  ;;  %v14232_v52 = vld [vmem:[#allocation34_spill] sm:$0xff] }
 0x4bb   : > { %v6659_v17 = vadd.f32 -1.0, %v7808_v38  ;;  %v5838_v10 = vmin.f32 %v12613_v49, 0.0  ;;  %v12627_v55 = vadd.f32 %v14227_v33, %v4955_v50  ;;  %v12630_v20 = vadd.f32 %v14228_v0, %v5159_v27  ;;  %v14233_v40 = vld [vmem:[#allocation207_spill] sm:$0xff]  ;;  %v14236_v51 = vld [vmem:[#allocation230_spill] sm:$0xff]  ;;  %v14238_v47 = vld [vmem:[#allocation84_spill] sm:$0xff] }
 0x4bc   : > { %7821 = vpow2.f32 %v5440_v21  ;;  %v12633_v37 = vadd.f32 %v14229_v53, %v5363_v23  ;;  %v5567_v41 = vadd.f32 %v14231_v29, %v14230_v48  ;;  %v5771_v54 = vadd.f32 %v14233_v40, %v14232_v52  ;;  %v14237_v50 = vld [vmem:[#allocation35_spill] sm:$0xff]  ;;  %v14240_v33 = vld [vmem:[#allocation100_spill] sm:$0xff]  ;;  %v14243_v48 = vld [vmem:[#allocation165_spill] sm:$0xff] }
 0x4bd   : > { %v7810_v18 = vpop.eup %7809  ;;  %v5871_v57 = vsel %vm5831_vm10, %v12501_v32, %v6659_v17  ;;  %7823 = vpow2.f32 %v5644_v60  ;;  %v5848_v45 = vmul.f32 1.442695, %v5838_v10  ;;  %v4124_v58 = vmul.f32 %v14106_v28, %v4099_v42  ;;  %v14239_v23 = vld [vmem:[#allocation231_spill] sm:$0xff]  ;;  %v14241_v53 = vld [vmem:[#allocation232_spill] sm:$0xff]  ;;  %v14246_v52 = vld [vmem:[#allocation126_spill] sm:$0xff] }
 0x4be   : > { %v7812_v2 = vpop.eup %7811  ;;  %6667 = vst.msk [vmem:[%s12240_s23 + $0x1d8] sm:$0xff] %vm515_vm0, %v5871_v57  ;;  %v6491_v24 = vadd.f32 -1.0, %v7810_v18  ;;  %v4343_v38 = vadd.f32 %v14235_v31, %v14234_v61  ;;  %v12648_v30 = vadd.f32 %v14236_v51, %v5567_v41  ;;  %v4546_v13 = vadd.f32 %v14238_v47, %v14237_v50  ;;  %v14244_v41 = vld [vmem:[#allocation36_spill] sm:$0xff]  ;;  %v14247_v40 = vld [vmem:[#allocation166_spill] sm:$0xff]  ;;  %v14249_v61 = vld [vmem:[#allocation89_spill] sm:$0xff] }
 0x4bf   : > { %v7814_v32 = vpop.eup %7813  ;;  %v6508_v21 = vadd.f32 -1.0, %v7812_v2  ;;  %7825 = vpow2.f32 %v5848_v45  ;;  %v12656_v17 = vadd.f32 %v14239_v23, %v5771_v54  ;;  %v12659_v60 = vadd.f32 %v11748_v4, %v4124_v58  ;;  %v14242_v45 = vld [vmem:[#allocation125_spill] sm:$0xff]  ;;  %v14245_v2 = vld [vmem:[#allocation88_spill] sm:$0xff]  ;;  %v14248_v58 = vld [vmem:[#allocation38_spill] sm:$0xff] }
 0x4c0   : > { %v7816_v27 = vpop.eup %7815  ;;  %v4443_v11 = vsel %vm4403_vm11, %v12523_v34, %v6491_v24  ;;  %v6533_v19 = vadd.f32 -1.0, %v7814_v32  ;;  %v12667_v0 = vadd.f32 %v14240_v33, %v4343_v38  ;;  %v12670_v34 = vadd.f32 %v14241_v53, %v4546_v13  ;;  %v14250_v32 = vld [vmem:[#allocation233_spill] sm:$0xff]  ;;  %v14251_v51 = vld [vmem:[#allocation127_spill] sm:$0xff]  ;;  %v14254_v13 = vld [vmem:[#allocation92_spill] sm:$0xff] }
 0x4c1   : > { %4451 = vst.msk [vmem:[%s12240_s23 + $0x10] sm:$0xff] %vm515_vm0, %v4443_v11  ;;  %v4646_v10 = vsel %vm4606_vm12, %v12530_v3, %v6508_v21  ;;  %v6558_v42 = vadd.f32 -1.0, %v7816_v27  ;;  %vm5014_vm14 = vcmp.gt.f32.partialorder %v12538_v22, 0.0  ;;  %v4150_v57 = vmin.f32 %v12659_v60, 0.0  ;;  %v14252_v50 = vld [vmem:[#allocation167_spill] sm:$0xff]  ;;  %v14257_v33 = vld [vmem:[#allocation236_spill] sm:$0xff] }
 0x4c2   : > { %6516 = vst.msk [vmem:[%s12240_s23 + $0x50] sm:$0xff] %vm515_vm0, %v4646_v10  ;;  %v4850_v18 = vsel %vm4810_vm13, %v12533_v56, %v6533_v19  ;;  %v4750_v3 = vadd.f32 %v14243_v48, %v14242_v45  ;;  %v4954_v24 = vadd.f32 %v14245_v2, %v14244_v41  ;;  %v5158_v54 = vadd.f32 %v14247_v40, %v14246_v52  ;;  %v14255_v19 = vld [vmem:[#allocation234_spill] sm:$0xff]  ;;  %v14256_v10 = vld [vmem:[#allocation235_spill] sm:$0xff]  ;;  %v14261_v52 = vld [vmem:[#allocation120_spill] sm:$0xff] }
 0x4c3   : > { %6541 = vst.msk [vmem:[%s12240_s23 + $0x90] sm:$0xff] %vm515_vm0, %v4850_v18  ;;  %v5054_v29 = vsel %vm5014_vm14, %v12538_v22, %v6558_v42  ;;  %v5362_v56 = vadd.f32 %v14249_v61, %v14248_v58  ;;  %v4162_v38 = vmul.f32 1.442695, %v4150_v57  ;;  %v5566_v47 = vadd.f32 %v14252_v50, %v14251_v51  ;;  %v14253_v22 = vld [vmem:[#allocation39_spill] sm:$0xff]  ;;  %v14258_v57 = vld [vmem:[#allocation237_spill] sm:$0xff]  ;;  %v14259_v48 = vld [vmem:[#allocation238_spill] sm:$0xff] }
 0x4c4   : > { %v7818_v31 = vpop.eup %7817  ;;  %6566 = vst.msk [vmem:[%s12240_s23 + $0xd0] sm:$0xff] %vm515_vm0, %v5054_v29  ;;  %v12693_v21 = vadd.f32 %v14250_v32, %v4750_v3  ;;  %v5770_v27 = vadd.f32 %v14254_v13, %v14253_v22  ;;  %v12700_v23 = vadd.f32 %v14255_v19, %v4954_v24  ;;  %v12703_v42 = vadd.f32 %v14256_v10, %v5158_v54  ;;  %v7568_v29 = vpop.f32.mrf.mxu0  ;;  %v14260_v24 = vld [vmem:[#allocation128_spill] sm:$0xff]  ;;  %v14265_v51 = vld [vmem:[#allocation239_spill] sm:$0xff] }
 0x4c5   : > { %v6583_v11 = vadd.f32 -1.0, %v7818_v31  ;;  %v12706_v53 = vadd.f32 %v14257_v33, %v5362_v56  ;;  %vm5218_vm15 = vcmp.gt.f32.partialorder %v12550_v6, 0.0  ;;  %7827 = vpow2.f32 %v4162_v38  ;;  %v14262_v54 = vld [vmem:[#allocation40_spill] sm:$0xff]  ;;  %v14264_v38 = vld [vmem:[#allocation37_spill] sm:$0xff] }
 0x4c6   : > { %v7820_v18 = vpop.eup %7819  ;;  %v12710_v45 = vadd.f32 %v14258_v57, %v5566_v47  ;;  %v12713_v3 = vadd.f32 %v14259_v48, %v5770_v27  ;;  %v4346_v40 = vadd.f32 %v14261_v52, %v14260_v24  ;;  %v14263_v58 = vld [vmem:[#allocation136_spill] sm:$0xff]  ;;  %vm5422_vm1 = vcmp.gt.f32.partialorder %v12591_v5, 0.0 }
 0x4c7   : > { %v5258_v41 = vsel %vm5218_vm15, %v12550_v6, %v6583_v11  ;;  %v6469_v2 = vadd.f32 -1.0, %v7820_v18  ;;  %v4549_v61 = vadd.f32 %v14263_v58, %v14262_v54  ;;  %vm5626_vm2 = vcmp.gt.f32.partialorder %v12594_v8, 0.0 }
 0x4c8   : > { %6591 = vst.msk [vmem:[%s12240_s23 + $0x110] sm:$0xff] %vm515_vm0, %v5258_v41  ;;  %vm5830_vm3 = vcmp.gt.f32.partialorder %v12613_v49, 0.0  ;;  %vm4143_vm4 = vcmp.gt.f32.partialorder %v12449_v9, 0.0  ;;  %v4127_v31 = vmul.f32 %v7568_v29, %v14106_v28  ;;  %v12729_v32 = vadd.f32 %v14264_v38, %v4346_v40 }
 0x4c9   : > { %v7822_v56 = vpop.eup %7821  ;;  %v4183_v6 = vsel %vm4143_vm4, %v12449_v9, %v6469_v2  ;;  %v12732_v50 = vadd.f32 %v14265_v51, %v4549_v61  ;;  %vm4142_vm5 = vcmp.gt.f32.partialorder %v12659_v60, 0.0 }
 0x4ca   : > { %v7824_v47 = vpop.eup %7823  ;;  %v6608_v22 = vadd.f32 -1.0, %v7822_v56  ;;  %v4372_v13 = vmul.f32 %v11906_v39, %v4183_v6  ;;  %v4575_v27 = vmul.f32 %v11909_v16, %v4183_v6  ;;  %v4779_v11 = vmul.f32 %v12018_v59, %v4183_v6 }
 0x4cb   : > { %v6633_v19 = vadd.f32 -1.0, %v7824_v47  ;;  %v4983_v9 = vmul.f32 %v12025_v44, %v4183_v6  ;;  %v5187_v10 = vmul.f32 %v12028_v26, %v4183_v6  ;;  %v5391_v33 = vmul.f32 %v12034_v14, %v4183_v6  ;;  %v14271_v47 = vld [vmem:[#allocation275_spill] sm:$0xff] }
 0x4cc   : > { %v7826_v18 = vpop.eup %7825  ;;  %v5462_v57 = vsel %vm5422_vm1, %v12591_v5, %v6608_v22  ;;  %v4380_v48 = vadd.f32 %v4372_v13, %v12397_v12  ;;  %v4583_v29 = vadd.f32 %v4575_v27, %v12599_v62  ;;  %v4787_v41 = vadd.f32 %v4779_v11, %v12616_v36  ;;  %v14266_v5 = vld [vmem:[#allocation299_spill] sm:$0xff]  ;;  %v14267_v62 = vld [vmem:[#allocation300_spill] sm:$0xff]  ;;  %v14268_v36 = vld [vmem:[#allocation301_spill] sm:$0xff] }
 0x4cd   : > { %6616 = vst.msk [vmem:[%s12240_s23 + $0x150] sm:$0xff] %vm515_vm0, %v5462_v57  ;;  %v5666_v2 = vsel %vm5626_vm2, %v12594_v8, %v6633_v19  ;;  %v6658_v24 = vadd.f32 -1.0, %v7826_v18  ;;  %v4991_v52 = vadd.f32 %v4983_v9, %v12627_v55  ;;  %v5195_v40 = vadd.f32 %v5187_v10, %v12630_v20  ;;  %v14269_v55 = vld [vmem:[#allocation302_spill] sm:$0xff]  ;;  %v14270_v20 = vld [vmem:[#allocation303_spill] sm:$0xff]  ;;  %v14272_v13 = vld [vmem:[#allocation277_spill] sm:$0xff] }
 0x4ce   : > { %6641 = vst.msk [vmem:[%s12240_s23 + $0x190] sm:$0xff] %vm515_vm0, %v5666_v2  ;;  %v12756_v12 = vadd.f32 %v14266_v5, %v4380_v48  ;;  %v12759_v54 = vadd.f32 %v14267_v62, %v4583_v29  ;;  %v12762_v58 = vadd.f32 %v14268_v36, %v4787_v41  ;;  %v5399_v61 = vadd.f32 %v5391_v33, %v12633_v37  ;;  %v14273_v2 = vld [vmem:[#allocation304_spill] sm:$0xff]  ;;  %v14274_v62 = vld [vmem:[#allocation305_spill] sm:$0xff] }
 0x4cf   : > { %v5870_v8 = vsel %vm5830_vm3, %v12613_v49, %v6658_v24  ;;  %v12769_v56 = vadd.f32 %v14269_v55, %v4991_v52  ;;  %v12772_v38 = vadd.f32 %v14270_v20, %v5195_v40  ;;  %v5595_v51 = vmul.f32 %v12037_v43, %v4183_v6  ;;  %v14277_v20 = vld [vmem:[#allocation41_spill] sm:$0xff] }
 0x4d0   : > { %v12777_v22 = vmul.f32 %v14271_v47, %v12301_v63  ;;  %v12781_v27 = vmul.f32 %v14272_v13, %v12301_v63  ;;  %6666 = vst.msk [vmem:[%s12240_s23 + $0x1d0] sm:$0xff] %vm515_vm0, %v5870_v8  ;;  %v4414_v49 = vmin.f32 %v12756_v12, 0.0  ;;  %v4617_v37 = vmin.f32 %v12759_v54, 0.0  ;;  %v14276_v8 = vld [vmem:[#allocation48_spill] sm:$0xff] }
 0x4d1   : > { %v12789_v11 = vmul.f32 %v14181_v35, %v12301_v63  ;;  %v4821_v19 = vmin.f32 %v12762_v58, 0.0  ;;  %v5025_v9 = vmin.f32 %v12769_v56, 0.0  ;;  %v5229_v18 = vmin.f32 %v12772_v38, 0.0 }
 0x4d2   : > { %v4427_v10 = vmul.f32 1.442695, %v4414_v49  ;;  %v4630_v33 = vmul.f32 1.442695, %v4617_v37  ;;  %v12796_v57 = vadd.f32 %v11748_v4, %v4127_v31  ;;  %v7828_v48 = vpop.eup %7827  ;;  %v12799_v24 = vadd.f32 %v14273_v2, %v5399_v61  ;;  %v14275_v31 = vld [vmem:[#allocation129_spill] sm:$0xff]  ;;  %v14279_v49 = vld [vmem:[#allocation130_spill] sm:$0xff] }
 0x4d3   : > { %v4834_v29 = vmul.f32 1.442695, %v4821_v19  ;;  %v5038_v41 = vmul.f32 1.442695, %v5025_v9  ;;  %v5603_v35 = vadd.f32 %v5595_v51, %v12648_v30  ;;  %v5242_v63 = vmul.f32 1.442695, %v5229_v18 }
 0x4d4   : > { %7829 = vpow2.f32 %v4427_v10  ;;  %v5799_v52 = vmul.f32 %v12050_v1, %v4183_v6  ;;  %v6468_v40 = vadd.f32 -1.0, %v7828_v48  ;;  %v5433_v5 = vmin.f32 %v12799_v24, 0.0  ;;  %v14278_v6 = vld [vmem:[#allocation137_spill] sm:$0xff]  ;;  %v14281_v9 = vld [vmem:[#allocation306_spill] sm:$0xff] }
 0x4d5   : > { %7831 = vpow2.f32 %v4630_v33  ;;  %v12805_v36 = vadd.f32 %v14274_v62, %v5603_v35  ;;  %v12809_v55 = vadd.f32 %v14276_v8, %v14275_v31  ;;  %v12817_v51 = vadd.f32 %v14278_v6, %v14277_v20  ;;  %v14280_v37 = vld [vmem:[#allocation49_spill] sm:$0xff]  ;;  %v14282_v35 = vld [vmem:[#allocation42_spill] sm:$0xff]  ;;  %v14286_v6 = vld [vmem:[#allocation311_spill] sm:$0xff] }
 0x4d6   : > { %7833 = vpow2.f32 %v4834_v29  ;;  %v5807_v61 = vadd.f32 %v5799_v52, %v12656_v17  ;;  %v4182_v30 = vsel %vm4142_vm5, %v12659_v60, %v6468_v40  ;;  %v5446_v47 = vmul.f32 1.442695, %v5433_v5  ;;  %v14284_v8 = vld [vmem:[#allocation309_spill] sm:$0xff] }
 0x4d7   : > { %7835 = vpow2.f32 %v5038_v41  ;;  %v5637_v13 = vmin.f32 %v12805_v36, 0.0  ;;  %v12822_v19 = vadd.f32 %v14280_v37, %v14279_v49  ;;  %v4371_v17 = vmul.f32 %v11906_v39, %v4182_v30 }
 0x4d8   : > { %7837 = vpow2.f32 %v5242_v63  ;;  %v12825_v10 = vadd.f32 %v14281_v9, %v5807_v61  ;;  %v4574_v60 = vmul.f32 %v11909_v16, %v4182_v30  ;;  %v4778_v18 = vmul.f32 %v12018_v59, %v4182_v30  ;;  %v14283_v63 = vld [vmem:[#allocation138_spill] sm:$0xff] }
 0x4d9   : > { %7839 = vpow2.f32 %v5446_v47  ;;  %v5650_v33 = vmul.f32 1.442695, %v5637_v13  ;;  %v4982_v48 = vmul.f32 %v12025_v44, %v4182_v30  ;;  %v4379_v41 = vadd.f32 %v4371_v17, %v12667_v0  ;;  %v14285_v0 = vld [vmem:[#allocation310_spill] sm:$0xff]  ;;  %v14287_v13 = vld [vmem:[#allocation312_spill] sm:$0xff] }
 0x4da   : > { %v5841_v29 = vmin.f32 %v12825_v10, 0.0  ;;  %v4582_v2 = vadd.f32 %v4574_v60, %v12670_v34  ;;  %v12836_v52 = vadd.f32 %v14283_v63, %v14282_v35  ;;  %vm4406_vm6 = vcmp.gt.f32.partialorder %v12756_v12, 0.0 }
 0x4db   : > { %7841 = vpow2.f32 %v5650_v33  ;;  %v4786_v40 = vadd.f32 %v4778_v18, %v12693_v21  ;;  %v4990_v5 = vadd.f32 %v4982_v48, %v12700_v23  ;;  %v5186_v62 = vmul.f32 %v12028_v26, %v4182_v30  ;;  %v14288_v33 = vld [vmem:[#allocation313_spill] sm:$0xff] }
 0x4dc   : > { %v5854_v31 = vmul.f32 1.442695, %v5841_v29  ;;  %v12843_v61 = vadd.f32 %v14284_v8, %v4379_v41  ;;  %v12846_v20 = vadd.f32 %v14285_v0, %v4582_v2  ;;  %v5390_v34 = vmul.f32 %v12034_v14, %v4182_v30  ;;  %v14289_v0 = vld [vmem:[#allocation314_spill] sm:$0xff] }
 0x4dd   : > { %v12850_v47 = vadd.f32 %v14286_v6, %v4786_v40  ;;  %v12853_v49 = vadd.f32 %v14287_v13, %v4990_v5  ;;  %v5194_v21 = vadd.f32 %v5186_v62, %v12703_v42  ;;  %v5594_v23 = vmul.f32 %v12037_v43, %v4182_v30 }
 0x4de   : > { %vm4609_vm7 = vcmp.gt.f32.partialorder %v12759_v54, 0.0  ;;  %vm4813_vm8 = vcmp.gt.f32.partialorder %v12762_v58, 0.0  ;;  %7843 = vpow2.f32 %v5854_v31  ;;  %v4413_v37 = vmin.f32 %v12843_v61, 0.0 }
 0x4df   : > { %vm5017_vm9 = vcmp.gt.f32.partialorder %v12769_v56, 0.0  ;;  %vm5221_vm10 = vcmp.gt.f32.partialorder %v12772_v38, 0.0  ;;  %v4616_v9 = vmin.f32 %v12846_v20, 0.0  ;;  %v4820_v17 = vmin.f32 %v12850_v47, 0.0 }
 0x4e0   : > { %v4425_v60 = vmul.f32 1.442695, %v4413_v37  ;;  %v5024_v42 = vmin.f32 %v12853_v49, 0.0  ;;  %v12866_v18 = vadd.f32 %v14288_v33, %v5194_v21  ;;  %v5398_v48 = vadd.f32 %v5390_v34, %v12706_v53  ;;  %v14290_v21 = vld [vmem:[#allocation315_spill] sm:$0xff] }
 0x4e1   : > { %v7830_v29 = vpop.eup %7829  ;;  %vm5425_vm11 = vcmp.gt.f32.partialorder %v12799_v24, 0.0  ;;  %v4628_v41 = vmul.f32 1.442695, %v4616_v9  ;;  %v4832_v2 = vmul.f32 1.442695, %v4820_v17  ;;  %v5602_v35 = vadd.f32 %v5594_v23, %v12710_v45 }
 0x4e2   : > { %v7832_v63 = vpop.eup %7831  ;;  %v6494_v40 = vadd.f32 -1.0, %v7830_v29  ;;  %7845 = vpow2.f32 %v4425_v60  ;;  %v5036_v5 = vmul.f32 1.442695, %v5024_v42  ;;  %v5798_v62 = vmul.f32 %v12050_v1, %v4182_v30 }
 0x4e3   : > { %v7834_v31 = vpop.eup %7833  ;;  %v6511_v8 = vadd.f32 -1.0, %v7832_v63  ;;  %7847 = vpow2.f32 %v4628_v41  ;;  %v5228_v53 = vmin.f32 %v12866_v18, 0.0  ;;  %v12874_v34 = vadd.f32 %v14289_v0, %v5398_v48 }
 0x4e4   : > { %v7836_v6 = vpop.eup %7835  ;;  %v4446_v45 = vsel %vm4406_vm6, %v12756_v12, %v6494_v40  ;;  %v6536_v13 = vadd.f32 -1.0, %v7834_v31  ;;  %7849 = vpow2.f32 %v4832_v2  ;;  %v12880_v23 = vadd.f32 %v14290_v21, %v5602_v35  ;;  %v14295_v21 = vld [vmem:[#allocation243_spill] sm:$0xff] }
 0x4e5   : > { %v7838_v30 = vpop.eup %7837  ;;  %4454 = vst.msk [vmem:[%s12240_s23 + $0x28] sm:$0xff] %vm515_vm0, %v4446_v45  ;;  %v4649_v37 = vsel %vm4609_vm7, %v12759_v54, %v6511_v8  ;;  %v6561_v9 = vadd.f32 -1.0, %v7836_v6  ;;  %7851 = vpow2.f32 %v5036_v5  ;;  %v5240_v17 = vmul.f32 1.442695, %v5228_v53  ;;  %v14291_v5 = vld [vmem:[#allocation240_spill] sm:$0xff]  ;;  %v14293_v8 = vld [vmem:[#allocation241_spill] sm:$0xff]  ;;  %v4109_v53 = vpop.f32.mrf.mxu0 }
 0x4e6   : > { %v7840_v60 = vpop.eup %7839  ;;  %6519 = vst.msk [vmem:[%s12240_s23 + $0x68] sm:$0xff] %vm515_vm0, %v4649_v37  ;;  %v4853_v12 = vsel %vm4813_vm8, %v12762_v58, %v6536_v13  ;;  %v6586_v42 = vadd.f32 -1.0, %v7838_v30  ;;  %vm5629_vm12 = vcmp.gt.f32.partialorder %v12805_v36, 0.0  ;;  %v5432_v33 = vmin.f32 %v12874_v34, 0.0 }
 0x4e7   : > { %6544 = vst.msk [vmem:[%s12240_s23 + $0xa8] sm:$0xff] %vm515_vm0, %v4853_v12  ;;  %v5057_v54 = vsel %vm5017_vm9, %v12769_v56, %v6561_v9  ;;  %v6611_v48 = vadd.f32 -1.0, %v7840_v60  ;;  %vm5833_vm13 = vcmp.gt.f32.partialorder %v12825_v10, 0.0  ;;  %7853 = vpow2.f32 %v5240_v17  ;;  %v14297_v9 = vld [vmem:[#allocation50_spill] sm:$0xff]  ;;  %v14298_v60 = vld [vmem:[#allocation43_spill] sm:$0xff] }
 0x4e8   : > { %v7842_v29 = vpop.eup %7841  ;;  %6569 = vst.msk [vmem:[%s12240_s23 + $0xe8] sm:$0xff] %vm515_vm0, %v5057_v54  ;;  %v5261_v58 = vsel %vm5221_vm10, %v12772_v38, %v6586_v42  ;;  %v5444_v41 = vmul.f32 1.442695, %v5432_v33  ;;  %v5636_v2 = vmin.f32 %v12880_v23, 0.0  ;;  %v5806_v35 = vadd.f32 %v5798_v62, %v12713_v3  ;;  %v14292_v62 = vld [vmem:[#allocation316_spill] sm:$0xff] }
 0x4e9   : > { %6594 = vst.msk [vmem:[%s12240_s23 + $0x128] sm:$0xff] %vm515_vm0, %v5261_v58  ;;  %v5465_v56 = vsel %vm5425_vm11, %v12799_v24, %v6611_v48  ;;  %v6636_v63 = vadd.f32 -1.0, %v7842_v29  ;;  %vm4405_vm14 = vcmp.gt.f32.partialorder %v12843_v61, 0.0  ;;  %v4153_v40 = vmin.f32 %v12796_v57, 0.0  ;;  %v14300_v54 = vld [vmem:[#allocation132_spill] sm:$0xff] }
 0x4ea   : > { %v12916_v38 = vadd.f32 %v14291_v5, %v12809_v55  ;;  %6619 = vst.msk [vmem:[%s12240_s23 + $0x168] sm:$0xff] %vm515_vm0, %v5465_v56  ;;  %7855 = vpow2.f32 %v5444_v41  ;;  %v5648_v3 = vmul.f32 1.442695, %v5636_v2  ;;  %v12921_v31 = vadd.f32 %v14292_v62, %v5806_v35  ;;  %v14294_v55 = vld [vmem:[#allocation242_spill] sm:$0xff]  ;;  %v14301_v29 = vld [vmem:[#allocation44_spill] sm:$0xff]  ;;  %v14303_v56 = vld [vmem:[#allocation245_spill] sm:$0xff] }
 0x4eb   : > { %v12925_v24 = vadd.f32 %v14293_v8, %v12817_v51  ;;  %v7844_v0 = vpop.eup %7843  ;;  %v5669_v6 = vsel %vm5629_vm12, %v12805_v36, %v6636_v63  ;;  %v4168_v45 = vmul.f32 1.442695, %v4153_v40  ;;  %v12932_v13 = vadd.f32 %v14294_v55, %v12822_v19  ;;  %v14296_v36 = vld [vmem:[#allocation131_spill] sm:$0xff]  ;;  %v14302_v2 = vld [vmem:[#allocation244_spill] sm:$0xff] }
 0x4ec   : > { %v12936_v30 = vadd.f32 %v14295_v21, %v12836_v52  ;;  %6644 = vst.msk [vmem:[%s12240_s23 + $0x1a8] sm:$0xff] %vm515_vm0, %v5669_v6  ;;  %v6661_v51 = vadd.f32 -1.0, %v7844_v0  ;;  %vm4608_vm15 = vcmp.gt.f32.partialorder %v12846_v20, 0.0  ;;  %7857 = vpow2.f32 %v5648_v3  ;;  %v14299_v19 = vld [vmem:[#allocation139_spill] sm:$0xff]  ;;  %v14306_v62 = vld [vmem:[#allocation264_spill] sm:$0xff]  ;;  %v14307_v6 = vld [vmem:[#allocation265_spill] sm:$0xff] }
 0x4ed   : > { %v5840_v37 = vmin.f32 %v12921_v31, 0.0  ;;  %7859 = vpow2.f32 %v4168_v45  ;;  %v5569_v17 = vadd.f32 %v14297_v9, %v14296_v36  ;;  %v5773_v12 = vadd.f32 %v14299_v19, %v14298_v60  ;;  %v14309_v36 = vld [vmem:[#allocation134_spill] sm:$0xff]  ;;  %v14310_v9 = vld [vmem:[#allocation51_spill] sm:$0xff] }
 0x4ee   : > { %v4126_v42 = vmul.f32 %v14106_v28, %v4109_v53  ;;  %v5873_v52 = vsel %vm5833_vm13, %v12825_v10, %v6661_v51  ;;  %v4345_v48 = vadd.f32 %v12360_v15, %v14300_v54  ;;  %v4548_v58 = vadd.f32 %v12366_v25, %v14301_v29  ;;  %v14304_v10 = vld [vmem:[#allocation133_spill] sm:$0xff]  ;;  %v14305_v25 = vld [vmem:[#allocation263_spill] sm:$0xff] }
 0x4ef   : > { %v5852_v33 = vmul.f32 1.442695, %v5840_v37  ;;  %v7846_v41 = vpop.eup %7845  ;;  %6669 = vst.msk [vmem:[%s12240_s23 + $0x1e8] sm:$0xff] %vm515_vm0, %v5873_v52  ;;  %v12957_v35 = vadd.f32 %v14302_v2, %v5569_v17  ;;  %v12960_v63 = vadd.f32 %v14303_v56, %v5773_v12  ;;  %v4752_v40 = vadd.f32 %v12370_v46, %v14304_v10  ;;  %v14308_v51 = vld [vmem:[#allocation45_spill] sm:$0xff]  ;;  %v14311_v12 = vld [vmem:[#allocation46_spill] sm:$0xff]  ;;  %v14313_v54 = vld [vmem:[#allocation267_spill] sm:$0xff] }
 0x4f0   : > { %v12963_v28 = vadd.f32 %v11748_v4, %v4126_v42  ;;  %v7848_v15 = vpop.eup %7847  ;;  %v6493_v5 = vadd.f32 -1.0, %v7846_v41  ;;  %v12968_v3 = vadd.f32 %v14305_v25, %v4345_v48  ;;  %v12971_v8 = vadd.f32 %v14306_v62, %v4548_v58  ;;  %v14312_v52 = vld [vmem:[#allocation266_spill] sm:$0xff]  ;;  %v14314_v29 = vld [vmem:[#allocation135_spill] sm:$0xff]  ;;  %v14315_v2 = vld [vmem:[#allocation268_spill] sm:$0xff] }
 0x4f1   : > { %7861 = vpow2.f32 %v5852_v33  ;;  %v7850_v53 = vpop.eup %7849  ;;  %v6510_v0 = vadd.f32 -1.0, %v7848_v15  ;;  %vm4812_vm1 = vcmp.gt.f32.partialorder %v12850_v47, 0.0  ;;  %v12976_v45 = vadd.f32 %v14307_v6, %v4752_v40  ;;  %v14317_v40 = vld [vmem:[#allocation47_spill] sm:$0xff]  ;;  %v14318_v25 = vld [vmem:[#allocation270_spill] sm:$0xff] }
 0x4f2   : > { %v4152_v4 = vmin.f32 %v12963_v28, 0.0  ;;  %v7852_v46 = vpop.eup %7851  ;;  %v4445_v55 = vsel %vm4405_vm14, %v12843_v61, %v6493_v5  ;;  %v6535_v21 = vadd.f32 -1.0, %v7850_v53  ;;  %v4956_v37 = vadd.f32 %v12376_v7, %v14308_v51 }
 0x4f3   : > { %v5160_v17 = vadd.f32 %v14310_v9, %v14309_v36  ;;  %4453 = vst.msk [vmem:[%s12240_s23 + $0x20] sm:$0xff] %vm515_vm0, %v4445_v55  ;;  %v4648_v60 = vsel %vm4608_vm15, %v12846_v20, %v6510_v0  ;;  %vm5016_vm2 = vcmp.gt.f32.partialorder %v12853_v49, 0.0  ;;  %v6560_v19 = vadd.f32 -1.0, %v7852_v46 }
 0x4f4   : > { %v5364_v61 = vadd.f32 %v12777_v22, %v14311_v12  ;;  %v7854_v42 = vpop.eup %7853  ;;  %6518 = vst.msk [vmem:[%s12240_s23 + $0x60] sm:$0xff] %vm515_vm0, %v4648_v60  ;;  %v4852_v7 = vsel %vm4812_vm1, %v12850_v47, %v6535_v21  ;;  %v12997_v33 = vadd.f32 %v14312_v52, %v4956_v37  ;;  %v5568_v20 = vadd.f32 %v12781_v27, %v14314_v29  ;;  %v14316_v47 = vld [vmem:[#allocation269_spill] sm:$0xff] }
 0x4f5   : > { %v13000_v48 = vadd.f32 %v14313_v54, %v5160_v17  ;;  %6543 = vst.msk [vmem:[%s12240_s23 + $0xa0] sm:$0xff] %vm515_vm0, %v4852_v7  ;;  %v5056_v58 = vsel %vm5016_vm2, %v12853_v49, %v6560_v19  ;;  %v6585_v22 = vadd.f32 -1.0, %v7854_v42  ;;  %v4166_v41 = vmul.f32 1.442695, %v4152_v4  ;;  %v14319_v54 = vld [vmem:[#allocation17_spill] sm:$0xff] }
 0x4f6   : > { %v13008_v56 = vadd.f32 %v14315_v2, %v5364_v61  ;;  %6568 = vst.msk [vmem:[%s12240_s23 + $0xe0] sm:$0xff] %vm515_vm0, %v5056_v58  ;;  %vm5220_vm3 = vcmp.gt.f32.partialorder %v12866_v18, 0.0  ;;  %v13014_v10 = vadd.f32 %v14316_v47, %v5568_v20  ;;  %v5772_v27 = vadd.f32 %v12789_v11, %v14317_v40 }
 0x4f7   : > { %v7856_v15 = vpop.eup %7855  ;;  %v5260_v5 = vsel %vm5220_vm3, %v12866_v18, %v6585_v22  ;;  %vm5424_vm4 = vcmp.gt.f32.partialorder %v12874_v34, 0.0  ;;  %7863 = vpow2.f32 %v4166_v41  ;;  %vm5628_vm5 = vcmp.gt.f32.partialorder %v12880_v23, 0.0  ;;  %v14323_v22 = vld [vmem:[#allocation72_spill] sm:$0xff] }
 0x4f8   : > { %6593 = vst.msk [vmem:[%s12240_s23 + $0x120] sm:$0xff] %vm515_vm0, %v5260_v5  ;;  %v6610_v49 = vadd.f32 -1.0, %v7856_v15  ;;  %v13022_v62 = vadd.f32 %v14318_v25, %v5772_v27  ;;  %vm4145_vm6 = vcmp.gt.f32.partialorder %v12796_v57, 0.0  ;;  %vm5832_vm7 = vcmp.gt.f32.partialorder %v12921_v31, 0.0 }
 0x4f9   : > { %v7858_v53 = vpop.eup %7857  ;;  %vm4144_vm8 = vcmp.gt.f32.partialorder %v12963_v28, 0.0 }
 0x4fa   : > { %v7860_v0 = vpop.eup %7859  ;;  %v5464_v4 = vsel %vm5424_vm4, %v12874_v34, %v6610_v49  ;;  %v6635_v6 = vadd.f32 -1.0, %v7858_v53 }
 0x4fb   : > { %6618 = vst.msk [vmem:[%s12240_s23 + $0x160] sm:$0xff] %vm515_vm0, %v5464_v4  ;;  %v6471_v11 = vadd.f32 -1.0, %v7860_v0 }
 0x4fc   : > { %v5668_v18 = vsel %vm5628_vm5, %v12880_v23, %v6635_v6 }
 0x4fd   : > { %6643 = vst.msk [vmem:[%s12240_s23 + $0x1a0] sm:$0xff] %vm515_vm0, %v5668_v18  ;;  %v4185_v55 = vsel %vm4145_vm6, %v12796_v57, %v6471_v11 }
 0x4fe   : > { %v7862_v46 = vpop.eup %7861  ;;  %v4374_v34 = vmul.f32 %v11906_v39, %v4185_v55  ;;  %v4577_v51 = vmul.f32 %v11909_v16, %v4185_v55  ;;  %v4781_v37 = vmul.f32 %v12018_v59, %v4185_v55  ;;  %v4985_v36 = vmul.f32 %v12025_v44, %v4185_v55 }
 0x4ff   : > { %v6660_v21 = vadd.f32 -1.0, %v7862_v46  ;;  %v5189_v23 = vmul.f32 %v12028_v26, %v4185_v55  ;;  %v5393_v9 = vmul.f32 %v12034_v14, %v4185_v55  ;;  %v5597_v17 = vmul.f32 %v12037_v43, %v4185_v55 }
 0x500   : > { %v4382_v19 = vadd.f32 %v4374_v34, %v12729_v32  ;;  %v4585_v57 = vadd.f32 %v4577_v51, %v12732_v50  ;;  %v4789_v12 = vadd.f32 %v4781_v37, %v12916_v38  ;;  %v4993_v61 = vadd.f32 %v4985_v36, %v12925_v24  ;;  %v14321_v32 = vld [vmem:[#allocation69_spill] sm:$0xff]  ;;  %v14322_v38 = vld [vmem:[#allocation154_spill] sm:$0xff] }
 0x501   : > { %v5872_v60 = vsel %vm5832_vm7, %v12921_v31, %v6660_v21  ;;  %v5197_v42 = vadd.f32 %v5189_v23, %v12932_v13  ;;  %v5401_v7 = vadd.f32 %v5393_v9, %v12936_v30  ;;  %v5605_v52 = vadd.f32 %v5597_v17, %v12957_v35  ;;  %v14320_v31 = vld [vmem:[#allocation153_spill] sm:$0xff]  ;;  %v14324_v13 = vld [vmem:[#allocation156_spill] sm:$0xff] }
 0x502   : > { %6668 = vst.msk [vmem:[%s12240_s23 + $0x1e0] sm:$0xff] %vm515_vm0, %v5872_v60  ;;  %v13053_v29 = vadd.f32 %v14319_v54, %v4382_v19  ;;  %v13056_v20 = vadd.f32 %v14320_v31, %v4585_v57  ;;  %v13059_v50 = vadd.f32 %v14321_v32, %v4789_v12  ;;  %v13062_v58 = vadd.f32 %v14322_v38, %v4993_v61  ;;  %v14325_v30 = vld [vmem:[#allocation340_spill] sm:$0xff]  ;;  %v14326_v51 = vld [vmem:[#allocation341_spill] sm:$0xff] }
 0x503   : > { %v13065_v24 = vadd.f32 %v14323_v22, %v5197_v42  ;;  %v13068_v41 = vadd.f32 %v14324_v13, %v5401_v7  ;;  %v13071_v35 = vadd.f32 %v14325_v30, %v5605_v52  ;;  %v5801_v15 = vmul.f32 %v12050_v1, %v4185_v55  ;;  %v14328_v7 = vld [vmem:[#allocation157_spill] sm:$0xff]  ;;  %v14331_v13 = vld [vmem:[#allocation83_spill] sm:$0xff] }
 0x504   : > { %v4416_v2 = vmin.f32 %v13053_v29, 0.0  ;;  %v4619_v47 = vmin.f32 %v13056_v20, 0.0  ;;  %v4823_v40 = vmin.f32 %v13059_v50, 0.0  ;;  %v5027_v27 = vmin.f32 %v13062_v58, 0.0  ;;  %v7864_v5 = vpop.eup %7863  ;;  %v14332_v30 = vld [vmem:[#allocation159_spill] sm:$0xff] }
 0x505   : > { %v5231_v53 = vmin.f32 %v13065_v24, 0.0  ;;  %v5435_v6 = vmin.f32 %v13068_v41, 0.0  ;;  %v5639_v18 = vmin.f32 %v13071_v35, 0.0  ;;  %v5809_v21 = vadd.f32 %v5801_v15, %v12960_v63 }
 0x506   : > { %v4431_v49 = vmul.f32 1.442695, %v4416_v2  ;;  %v4634_v25 = vmul.f32 1.442695, %v4619_v47  ;;  %v4838_v0 = vmul.f32 1.442695, %v4823_v40 }
 0x507   : > { %v5042_v4 = vmul.f32 1.442695, %v5027_v27  ;;  %v5246_v11 = vmul.f32 1.442695, %v5231_v53  ;;  %v5450_v46 = vmul.f32 1.442695, %v5435_v6  ;;  %v13084_v37 = vadd.f32 %v14326_v51, %v5809_v21 }
 0x508   : > { %7865 = vpow2.f32 %v4431_v49  ;;  %v6470_v34 = vadd.f32 -1.0, %v7864_v5  ;;  %v5654_v55 = vmul.f32 1.442695, %v5639_v18  ;;  %vm4408_vm9 = vcmp.gt.f32.partialorder %v13053_v29, 0.0 }
 0x509   : > { %7867 = vpow2.f32 %v4634_v25  ;;  %v5843_v63 = vmin.f32 %v13084_v37, 0.0  ;;  %vm4611_vm10 = vcmp.gt.f32.partialorder %v13056_v20, 0.0  ;;  %vm4815_vm11 = vcmp.gt.f32.partialorder %v13059_v50, 0.0 }
 0x50a   : > { %7869 = vpow2.f32 %v4838_v0  ;;  %v4184_v36 = vsel %vm4144_vm8, %v12963_v28, %v6470_v34  ;;  %vm5019_vm12 = vcmp.gt.f32.partialorder %v13062_v58, 0.0  ;;  %vm5223_vm13 = vcmp.gt.f32.partialorder %v13065_v24, 0.0 }
 0x50b   : > { %7871 = vpow2.f32 %v5042_v4  ;;  %v4373_v23 = vmul.f32 %v11906_v39, %v4184_v36  ;;  %v4576_v9 = vmul.f32 %v11909_v16, %v4184_v36  ;;  %v4780_v17 = vmul.f32 %v12018_v59, %v4184_v36  ;;  %v14327_v59 = vld [vmem:[#allocation77_spill] sm:$0xff] }
 0x50c   : > { %7873 = vpow2.f32 %v5246_v11  ;;  %v4984_v60 = vmul.f32 %v12025_v44, %v4184_v36  ;;  %v5858_v28 = vmul.f32 1.442695, %v5843_v63  ;;  %v5188_v39 = vmul.f32 %v12028_v26, %v4184_v36  ;;  %v14329_v44 = vld [vmem:[#allocation81_spill] sm:$0xff] }
 0x50d   : > { %7875 = vpow2.f32 %v5450_v46  ;;  %v4381_v19 = vadd.f32 %v4373_v23, %v12968_v3  ;;  %v4584_v57 = vadd.f32 %v4576_v9, %v12971_v8  ;;  %v4788_v12 = vadd.f32 %v4780_v17, %v12976_v45  ;;  %v14330_v3 = vld [vmem:[#allocation158_spill] sm:$0xff] }
 0x50e   : > { %7877 = vpow2.f32 %v5654_v55  ;;  %v4992_v61 = vadd.f32 %v4984_v60, %v12997_v33  ;;  %v5392_v16 = vmul.f32 %v12034_v14, %v4184_v36  ;;  %v5196_v45 = vadd.f32 %v5188_v39, %v13000_v48 }
 0x50f   : > { %v13099_v42 = vadd.f32 %v14327_v59, %v4381_v19  ;;  %v13102_v52 = vadd.f32 %v14328_v7, %v4584_v57  ;;  %v13105_v54 = vadd.f32 %v14329_v44, %v4788_v12  ;;  %7879 = vpow2.f32 %v5858_v28  ;;  %v14334_v57 = vld [vmem:[#allocation160_spill] sm:$0xff] }
 0x510   : > { %v13108_v8 = vadd.f32 %v14330_v3, %v4992_v61  ;;  %v5400_v33 = vadd.f32 %v5392_v16, %v13008_v56  ;;  %v5596_v31 = vmul.f32 %v12037_v43, %v4184_v36  ;;  %v13121_v56 = vadd.f32 %v14331_v13, %v5196_v45 }
 0x511   : > { %v4415_v26 = vmin.f32 %v13099_v42, 0.0  ;;  %v4618_v14 = vmin.f32 %v13102_v52, 0.0  ;;  %v4822_v32 = vmin.f32 %v13105_v54, 0.0  ;;  %v5800_v4 = vmul.f32 %v12050_v1, %v4184_v36  ;;  %v14333_v36 = vld [vmem:[#allocation86_spill] sm:$0xff] }
 0x512   : > { %v5026_v38 = vmin.f32 %v13108_v8, 0.0  ;;  %v13124_v2 = vadd.f32 %v14332_v30, %v5400_v33  ;;  %v5230_v5 = vmin.f32 %v13121_v56, 0.0  ;;  %v5604_v49 = vadd.f32 %v5596_v31, %v13014_v10 }
 0x513   : > { %v4429_v22 = vmul.f32 1.442695, %v4415_v26  ;;  %v4632_v48 = vmul.f32 1.442695, %v4618_v14  ;;  %v4836_v43 = vmul.f32 1.442695, %v4822_v32  ;;  %v5808_v63 = vadd.f32 %v5800_v4, %v13022_v62 }
 0x514   : > { %v5040_v40 = vmul.f32 1.442695, %v5026_v38  ;;  %v5434_v0 = vmin.f32 %v13124_v2, 0.0  ;;  %v5244_v46 = vmul.f32 1.442695, %v5230_v5  ;;  %v13146_v23 = vadd.f32 %v14333_v36, %v5604_v49 }
 0x515   : > { %v7866_v47 = vpop.eup %7865  ;;  %7881 = vpow2.f32 %v4429_v22  ;;  %vm5427_vm14 = vcmp.gt.f32.partialorder %v13068_v41, 0.0  ;;  %vm5631_vm15 = vcmp.gt.f32.partialorder %v13071_v35, 0.0  ;;  %v5826_v62 = vadd.f32 %v14334_v57, %v5808_v63 }
 0x516   : > { %v7868_v27 = vpop.eup %7867  ;;  %v6496_v15 = vadd.f32 -1.0, %v7866_v47  ;;  %7883 = vpow2.f32 %v4632_v48  ;;  %v5448_v1 = vmul.f32 1.442695, %v5434_v0  ;;  %v5638_v19 = vmin.f32 %v13146_v23, 0.0 }
 0x517   : > { %v7870_v25 = vpop.eup %7869  ;;  %v6513_v53 = vadd.f32 -1.0, %v7868_v27  ;;  %7885 = vpow2.f32 %v4836_v43  ;;  %v5842_v39 = vmin.f32 %v5826_v62, 0.0  ;;  %vm5835_vm1 = vcmp.gt.f32.partialorder %v13084_v37, 0.0 }
 0x518   : > { %v7872_v6 = vpop.eup %7871  ;;  %v4448_v11 = vsel %vm4408_vm9, %v13053_v29, %v6496_v15  ;;  %v6538_v18 = vadd.f32 -1.0, %v7870_v25  ;;  %7887 = vpow2.f32 %v5040_v40  ;;  %vm4407_vm2 = vcmp.gt.f32.partialorder %v13099_v42, 0.0 }
 0x519   : > { %v7874_v21 = vpop.eup %7873  ;;  %4456 = vst.msk [vmem:[%s12240_s23 + $0x38] sm:$0xff] %vm515_vm0, %v4448_v11  ;;  %v4651_v10 = vsel %vm4611_vm10, %v13056_v20, %v6513_v53  ;;  %v6563_v34 = vadd.f32 -1.0, %v7872_v6  ;;  %7889 = vpow2.f32 %v5244_v46  ;;  %v5856_v16 = vmul.f32 1.442695, %v5842_v39 }
 0x51a   : > { %v7876_v55 = vpop.eup %7875  ;;  %6521 = vst.msk [vmem:[%s12240_s23 + $0x78] sm:$0xff] %vm515_vm0, %v4651_v10  ;;  %v4855_v29 = vsel %vm4815_vm11, %v13059_v50, %v6538_v18  ;;  %v6588_v51 = vadd.f32 -1.0, %v7874_v21  ;;  %7891 = vpow2.f32 %v5448_v1  ;;  %vm4610_vm3 = vcmp.gt.f32.partialorder %v13102_v52, 0.0 }
 0x51b   : > { %v7878_v9 = vpop.eup %7877  ;;  %6546 = vst.msk [vmem:[%s12240_s23 + $0xb8] sm:$0xff] %vm515_vm0, %v4855_v29  ;;  %v5059_v20 = vsel %vm5019_vm12, %v13062_v58, %v6563_v34  ;;  %v6613_v17 = vadd.f32 -1.0, %v7876_v55  ;;  %vm4814_vm4 = vcmp.gt.f32.partialorder %v13105_v54, 0.0  ;;  %vm5018_vm5 = vcmp.gt.f32.partialorder %v13108_v8, 0.0 }
 0x51c   : > { %6571 = vst.msk [vmem:[%s12240_s23 + $0xf8] sm:$0xff] %vm515_vm0, %v5059_v20  ;;  %v5263_v50 = vsel %vm5223_vm13, %v13065_v24, %v6588_v51  ;;  %v6638_v60 = vadd.f32 -1.0, %v7878_v9  ;;  %v7880_v12 = vpop.eup %7879  ;;  %v5652_v24 = vmul.f32 1.442695, %v5638_v19  ;;  %vm5222_vm6 = vcmp.gt.f32.partialorder %v13121_v56, 0.0 }
 0x51d   : > { %6596 = vst.msk [vmem:[%s12240_s23 + $0x138] sm:$0xff] %vm515_vm0, %v5263_v50  ;;  %v5467_v58 = vsel %vm5427_vm14, %v13068_v41, %v6613_v17  ;;  %v6663_v61 = vadd.f32 -1.0, %v7880_v12  ;;  %vm5426_vm7 = vcmp.gt.f32.partialorder %v13124_v2, 0.0  ;;  %vm5630_vm8 = vcmp.gt.f32.partialorder %v13146_v23, 0.0 }
 0x51e   : > { %6621 = vst.msk [vmem:[%s12240_s23 + $0x178] sm:$0xff] %vm515_vm0, %v5467_v58  ;;  %v5671_v28 = vsel %vm5631_vm15, %v13071_v35, %v6638_v60  ;;  %7893 = vpow2.f32 %v5652_v24  ;;  %vm5834_vm9 = vcmp.gt.f32.partialorder %v5826_v62, 0.0 }
 0x51f   : > { %6646 = vst.msk [vmem:[%s12240_s23 + $0x1b8] sm:$0xff] %vm515_vm0, %v5671_v28  ;;  %v5875_v41 = vsel %vm5835_vm1, %v13084_v37, %v6663_v61  ;;  %7895 = vpow2.f32 %v5856_v16 }
 0x520   : > { %6671 = vst.msk [vmem:[%s12240_s23 + $0x1f8] sm:$0xff] %vm515_vm0, %v5875_v41 }
 0x522   : > { %v7882_v59 = vpop.eup %7881 }
 0x523   : > { %v7884_v7 = vpop.eup %7883  ;;  %v6495_v44 = vadd.f32 -1.0, %v7882_v59 }
 0x524   : > { %v7886_v35 = vpop.eup %7885  ;;  %v6512_v3 = vadd.f32 -1.0, %v7884_v7 }
 0x525   : > { %v7888_v45 = vpop.eup %7887  ;;  %v4447_v33 = vsel %vm4407_vm2, %v13099_v42, %v6495_v44  ;;  %v6537_v37 = vadd.f32 -1.0, %v7886_v35 }
 0x526   : > { %v7890_v26 = vpop.eup %7889  ;;  %4455 = vst.msk [vmem:[%s12240_s23 + $0x30] sm:$0xff] %vm515_vm0, %v4447_v33  ;;  %v4650_v14 = vsel %vm4610_vm3, %v13102_v52, %v6512_v3  ;;  %v6562_v31 = vadd.f32 -1.0, %v7888_v45 }
 0x527   : > { %v7892_v32 = vpop.eup %7891  ;;  %6520 = vst.msk [vmem:[%s12240_s23 + $0x70] sm:$0xff] %vm515_vm0, %v4650_v14  ;;  %v4854_v42 = vsel %vm4814_vm4, %v13105_v54, %v6537_v37  ;;  %v6587_v38 = vadd.f32 -1.0, %v7890_v26 }
 0x528   : > { %6545 = vst.msk [vmem:[%s12240_s23 + $0xb0] sm:$0xff] %vm515_vm0, %v4854_v42  ;;  %v5058_v22 = vsel %vm5018_vm5, %v13108_v8, %v6562_v31  ;;  %v6612_v52 = vadd.f32 -1.0, %v7892_v32 }
 0x529   : > { %6570 = vst.msk [vmem:[%s12240_s23 + $0xf0] sm:$0xff] %vm515_vm0, %v5058_v22  ;;  %v5262_v48 = vsel %vm5222_vm6, %v13121_v56, %v6587_v38 }
 0x52a   : > { %6595 = vst.msk [vmem:[%s12240_s23 + $0x130] sm:$0xff] %vm515_vm0, %v5262_v48  ;;  %v5466_v54 = vsel %vm5426_vm7, %v13124_v2, %v6612_v52 }
 0x52b   : > { %6620 = vst.msk [vmem:[%s12240_s23 + $0x170] sm:$0xff] %vm515_vm0, %v5466_v54  ;;  %v7894_v13 = vpop.eup %7893 }
 0x52c   : > { %v6637_v8 = vadd.f32 -1.0, %v7894_v13  ;;  %v7896_v30 = vpop.eup %7895 }
 0x52d   : > { %v6662_v47 = vadd.f32 -1.0, %v7896_v30 }
 0x52e   : > { %v5670_v56 = vsel %vm5630_vm8, %v13146_v23, %v6637_v8 }
 0x52f   : > { %6645 = vst.msk [vmem:[%s12240_s23 + $0x1b0] sm:$0xff] %vm515_vm0, %v5670_v56  ;;  %v5874_v2 = vsel %vm5834_vm9, %v5826_v62, %v6662_v47 }
 0x530   : > { %6670 = vst.msk [vmem:[%s12240_s23 + $0x1f0] sm:$0xff] %vm515_vm0, %v5874_v2 }
 0x531   : > { %7955 = shalt.err (!%p7952_p6)
}
 0x532   : > { %s7956_s13 = scalar_lea.hbm %s13208_s2, 8192  ;;  %s7960_s20 = scalar_lea.hbm %s13264_s8, 16384 }
 0x533   : > { %p7957_p10 = scmp.ne.s32.totalorder %s13208_s2, %s7956_s13  ;;  %p7961_p11 = scmp.lt.s32.totalorder %s13208_s2, %s13264_s8 }
 0x534   : > { %p7962_p13 = scmp.lt.s32.totalorder %s7960_s20, %s7956_s13 }
 0x535   : > { %p7958_p8 = pnand %p7957_p10, %p14335_p2 }
 0x536   : > { %p7963_p12 = por %p7962_p13, %p7961_p11 }
 0x537   : > { %p7959_p0 = pneg %p7958_p8 }
 0x539   : > { %p7964_p1 = pnand %p7963_p12, %p7959_p0 }
 0x53b   : > { %7967 = shalt.err (!%p7964_p1)
}
 0x53c   : > { %s8016_s23 = smov 128   ;;  %s8017_s0 = smov 8  }
 0x53d   : > { %7581 = dma.vmem_to_hbm [thread:$0]  (%p14335_p2), %s13210_s17, 8192, %s13208_s2, %s13216_s9, %s8016_s23, %s8016_s23, %s8017_s0  }
 0x53e PF: > { %p7603_p3 = scmp.ge.s32.totalorder %s8010_s30, 2  ;;  %s5914_s24 = sand.u32 1, %s7998_s27  }
 0x53f   : > { %p14336_p4 = scmp.ne.s32.totalorder %s13326_s16, 0  ;;  %s5915_s1 = scalar_lea.sflag [#allocation3], %s5914_s24 }
 0x541   : > { %p7594_p9 = pnand %p7603_p3, %p14336_p4 }
 0x543   : > { %p7595_p7 = pneg %p7594_p9 }
 0x545   : > { %7993 = dma.done.wait (%p7595_p7), %s5915_s1, 8192  }
 0x546   : > { %7995 = vsyncadd (%p7595_p7), %s5915_s1, 4294959104  ;;  %p20_p5 = scmp.ge.s32.totalorder %s8088_s11, 4   ;;  %s14337_s27 = smov %s8002_s28 }
 0x547   : > { %s14338_s28 = smov %s8006_s29  ;;  %s14339_s29 = smov %s8099_s14 }
 0x548   : > { %s14340_s30 = smov %s8088_s11  ;;  %22 = sbr.rel (!%p20_p5) target bundleno = 9 (0x9), region = 113 }
 0x54d   :  { %5920 = vsyncpa [#allocation3], 1 }
 0x54e   :  { %5922 = vsyncpa [#allocation3 + $0x1], 1 }
 0x54f   :  { %5923 = vsyncpa [#allocation4], 1 }
 0x550   :  { %5925 = vsyncpa [#allocation4 + $0x1], 1 }
 0x551   :  { %5926 = vsyncpa [#allocation6], 1 }

</bundles_post_ra>
